<compile_context>
chip_gen: v7x
topology: tpu7x:2x2x1
jax: 0.10.0
libtpu: 0.0.40
codegen_flags: <defaults>
</compile_context>

<pallas_src>
import functools

import jax
import jax.numpy as jnp
from jax.experimental import pallas as pl
from jax.experimental.pallas import tpu as pltpu


# ----------------------------- Pallas kernel -----------------------------
def inception_kernel(Wp, x_ref, mask_ref,
                     w1_ref, b1_ref, w5b_ref, b5b_ref,
                     w3b_ref, b3b_ref, w3c_ref, b3c_ref,
                     out_ref):
    S = x_ref.shape[-1]          # flattened padded spatial extent (mult. of 128)
    x = x_ref[0]                 # (Cin, S) f32, valid pixel (h,w) at (h+2)*Wp+(w+2)
    mask = mask_ref[...]         # (1, S): 1.0 on valid pixels, 0.0 elsewhere

    def conv(xin, w_ref, b_ref, K, p):
        """'same' KxK conv on the flattened padded grid.

        xin  : (Cin, S), zero everywhere outside the valid HxW block.
        w_ref: (K*K, Cout, Cin) per-tap weights.  b_ref: (Cout, 1).
        Returns (Cout, S); only valid pixel positions are meaningful.
        """
        C = xin.shape[0]
        Cout = w_ref.shape[1]
        # Wrap buffer so every tap shift is a single static lane-axis slice
        # (no dimension-remapping relayout, no out-of-bounds handling).
        xx = jnp.concatenate([xin, xin], axis=1)          # (C, 2S)
        acc = jnp.zeros((Cout, S), jnp.float32)
        for kh in range(K):
            for kw in range(K):
                off = ((kh - p) * Wp + (kw - p)) % S
                win = xx[:, off:off + S]                  # lane shift by tap offset
                acc = acc + jnp.dot(w_ref[kh * K + kw], win,
                                    preferred_element_type=jnp.float32)
        return acc + b_ref[...]

    # Fused stage 1: one 5x5 conv, Cin -> 80 = [pool(24) | 1x1(24) | 5a(16) | 3a(16)]
    s1 = conv(x, w1_ref, b1_ref, 5, 2)

    # branch_5x5: 5x5 (16 -> 24) on the (re-masked) 5x5_1 output.
    t5 = s1[48:64] * mask
    b5 = conv(t5, w5b_ref, b5b_ref, 5, 2)

    # branch_3x3: 3x3 (16 -> 24) -> 3x3 (24 -> 24) on the (re-masked) 3x3_1 output.
    t3 = s1[64:80] * mask
    t3 = conv(t3, w3b_ref, b3b_ref, 3, 1) * mask
    b3 = conv(t3, w3c_ref, b3c_ref, 3, 1)

    # torch.cat channel order: [pool, 1x1, 5x5, 3x3]; lane-dense (96, S) store.
    out_ref[0, 0:24, :] = s1[0:24]
    out_ref[0, 24:48, :] = s1[24:48]
    out_ref[0, 48:72, :] = b5
    out_ref[0, 72:96, :] = b3


# ----------------------------- wrapper -----------------------------
def _prep_weights(params, cin):
    """Fuse stage-1 weights and reshape all weights to per-tap (K*K, Cout, Cin)."""
    def taps(w):                        # (K, K, Ci, Co) -> (K*K, Co, Ci)
        K = w.shape[0]
        return jnp.transpose(w, (0, 1, 3, 2)).reshape(K * K, w.shape[3], w.shape[2])

    w_pool, b_pool = params['pool']
    w_1x1, b_1x1 = params['1x1']
    w_5a, b_5a = params['5a']
    w_5b, b_5b = params['5b']
    w_3a, b_3a = params['3a']
    w_3b, b_3b = params['3b']
    w_3c, b_3c = params['3c']

    # Stage-1 fusion into a single 5x5 kernel, Cin -> 80.
    w1 = jnp.zeros((5, 5, cin, 80), jnp.float32)
    # AvgPool(3x3, count_include_pad) + 1x1  ==  3x3 conv with weight w_pool/9.
    w1 = w1.at[1:4, 1:4, :, 0:24].set(
        jnp.broadcast_to(w_pool[0, 0] / 9.0, (3, 3, cin, 24)))
    # 1x1 conv == centre tap only.
    w1 = w1.at[2, 2, :, 24:48].set(w_1x1[0, 0])
    # 5x5_1 as-is.
    w1 = w1.at[:, :, :, 48:64].set(w_5a)
    # 3x3_1 == centre 3x3 of the 5x5.
    w1 = w1.at[1:4, 1:4, :, 64:80].set(w_3a)
    b1 = jnp.concatenate([b_pool.reshape(-1), b_1x1.reshape(-1),
                          b_5a.reshape(-1), b_3a.reshape(-1)]).reshape(80, 1)

    return (taps(w1), b1,
            taps(w_5b), b_5b.reshape(-1, 1),
            taps(w_3b), b_3b.reshape(-1, 1),
            taps(w_3c), b_3c.reshape(-1, 1))


@jax.jit
def inception_forward(x_nchw, params):
    N, Cin, H, W = x_nchw.shape
    Hp, Wp = H + 4, W + 4                         # pad 2 (max halo) on each side
    S = Hp * Wp
    S_buf = ((S + 127) // 128) * 128              # lane-aligned flattened length

    xp = jnp.pad(x_nchw.astype(jnp.float32),
                 ((0, 0), (0, 0), (2, 2), (2, 2))).reshape(N, Cin, S)
    x_flat = jnp.pad(xp, ((0, 0), (0, 0), (0, S_buf - S)))          # (N, Cin, S_buf)

    pos = jnp.arange(S_buf, dtype=jnp.int32)
    hh, ww = pos // Wp, pos % Wp
    mask = (((hh >= 2) & (hh < 2 + H) & (ww >= 2) & (ww < 2 + W))
            .astype(jnp.float32).reshape(1, S_buf))

    w1, b1, w5b, b5b, w3b, b3b, w3c, b3c = _prep_weights(params, Cin)

    def whole(a):   # operand kept fully VMEM-resident across grid steps
        nd = a.ndim
        return pl.BlockSpec(a.shape, lambda n: (0,) * nd)

    # Grid over the batch dim (independent images -> "parallel" / megacore).
    # TODO(synk): for production spatial sizes, additionally tile H into
    # halo'd row blocks so per-step VMEM fits v7x's 64 MiB and the pipeline
    # double-buffers HBM<->VMEM.
    out = pl.pallas_call(
        functools.partial(inception_kernel, Wp),
        out_shape=jax.ShapeDtypeStruct((N, 96, S_buf), jnp.float32),
        grid=(N,),
        in_specs=[pl.BlockSpec((1, Cin, S_buf), lambda n: (n, 0, 0)),
                  whole(mask),
                  whole(w1), whole(b1), whole(w5b), whole(b5b),
                  whole(w3b), whole(b3b), whole(w3c), whole(b3c)],
        out_specs=pl.BlockSpec((1, 96, S_buf), lambda n: (n, 0, 0)),
        compiler_params=pltpu.CompilerParams(
            dimension_semantics=("parallel",)),
    )(x_flat, mask, w1, b1, w5b, b5b, w3b, b3b, w3c, b3c)

    # (N, 96, S_buf) -> (N, 96, Hp, Wp) -> slice halo -> NCHW (N, 96, H, W).
    out = out[:, :, :S].reshape(N, 96, Hp, Wp)[:, :, 2:2 + H, 2:2 + W]
    return out


# ----------------------------- reference (plain JAX) -----------------------------
def _conv_ref(x, w, b, pad):
    y = jax.lax.conv_general_dilated(
        x, w, window_strides=(1, 1), padding=[(pad, pad), (pad, pad)],
        dimension_numbers=('NHWC', 'HWIO', 'NHWC'),
        precision=jax.lax.Precision.HIGHEST)
    return y + b.reshape(1, 1, 1, -1)


def inception_ref(x_nchw, params):
    x = jnp.transpose(x_nchw, (0, 2, 3, 1)).astype(jnp.float32)
    pool = jax.lax.reduce_window(
        x, 0.0, jax.lax.add, (1, 3, 3, 1), (1, 1, 1, 1),
        [(0, 0), (1, 1), (1, 1), (0, 0)]) / 9.0
    bp = _conv_ref(pool, *params['pool'], 0)
    b1 = _conv_ref(x, *params['1x1'], 0)
    b5 = _conv_ref(_conv_ref(x, *params['5a'], 2), *params['5b'], 2)
    b3 = _conv_ref(_conv_ref(_conv_ref(x, *params['3a'], 1),
                             *params['3b'], 1), *params['3c'], 1)
    y = jnp.concatenate([bp, b1, b5, b3], axis=-1)
    return jnp.transpose(y, (0, 3, 1, 2))


def init_params(key, cin):
    def conv_p(k, ksize, ci, co):
        kw, kb = jax.random.split(k)
        w = jax.random.normal(kw, (ksize, ksize, ci, co), jnp.float32) * 0.1
        b = jax.random.normal(kb, (1, co), jnp.float32) * 0.1
        return w, b

    keys = jax.random.split(key, 7)
    return {
        'pool': conv_p(keys[0], 1, cin, 24),   # branch_pool_2
        '1x1':  conv_p(keys[1], 1, cin, 24),   # branch_1x1
        '5a':   conv_p(keys[2], 5, cin, 16),   # branch_5x5_1
        '5b':   conv_p(keys[3], 5, 16, 24),    # branch_5x5_2
        '3a':   conv_p(keys[4], 3, cin, 16),   # branch_3x3_1
        '3b':   conv_p(keys[5], 3, 16, 24),    # branch_3x3_2
        '3c':   conv_p(keys[6], 3, 24, 24),    # branch_3x3_3
    }


if __name__ == "__main__":
    key = jax.random.PRNGKey(0)
    kx, kp = jax.random.split(key)

    N, Cin, H, W = 2, 4, 16, 16
    x = jax.random.normal(kx, (N, Cin, H, W), jnp.float32)
    params = init_params(kp, Cin)

    out = inception_forward(x, params)
    out = jax.block_until_ready(out)
    assert out.shape == (N, 96, H, W), out.shape

    ref = inception_ref(x, params)
    err = float(jnp.max(jnp.abs(out - ref)))
    # DEFAULT-precision MXU matmuls (bf16 multiplies, f32 accumulation) vs. an
    # f32-HIGHEST reference: allow a few 1e-2 absolute on O(1) activations.
    assert err < 5e-2, f"max abs error too large: {err}"
    print("KERNEL_OK")
</pallas_src>

<mosaic_0001>
module attributes {stable_mosaic.version = 11 : i64} {
  func.func @inception_kernel(%arg0: i32, %arg1: memref<1x4x512xf32, #tpu.memory_space<vmem>>, %arg2: memref<1x512xf32, #tpu.memory_space<vmem>>, %arg3: memref<25x80x4xf32, #tpu.memory_space<vmem>>, %arg4: memref<80x1xf32, #tpu.memory_space<vmem>>, %arg5: memref<25x24x16xf32, #tpu.memory_space<vmem>>, %arg6: memref<24x1xf32, #tpu.memory_space<vmem>>, %arg7: memref<9x24x16xf32, #tpu.memory_space<vmem>>, %arg8: memref<24x1xf32, #tpu.memory_space<vmem>>, %arg9: memref<9x24x24xf32, #tpu.memory_space<vmem>>, %arg10: memref<24x1xf32, #tpu.memory_space<vmem>>, %arg11: memref<1x96x512xf32, #tpu.memory_space<vmem>>) attributes {dimension_semantics = [#tpu.dimension_semantics<parallel>], iteration_bounds = array<i64: 2>, scalar_prefetch = 0 : i64, scratch_operands = 0 : i64, tpu.core_type = #tpu.core_type<tc>, window_params = [{transform_indices = @transform_0, window_bounds = array<i64: 1, 4, 512>}, {pipeline_mode = #tpu.pipeline_mode<synchronous>, transform_indices = @transform_1, window_bounds = array<i64: 1, 512>}, {pipeline_mode = #tpu.pipeline_mode<synchronous>, transform_indices = @transform_2, window_bounds = array<i64: 25, 80, 4>}, {pipeline_mode = #tpu.pipeline_mode<synchronous>, transform_indices = @transform_3, window_bounds = array<i64: 80, 1>}, {pipeline_mode = #tpu.pipeline_mode<synchronous>, transform_indices = @transform_4, window_bounds = array<i64: 25, 24, 16>}, {pipeline_mode = #tpu.pipeline_mode<synchronous>, transform_indices = @transform_5, window_bounds = array<i64: 24, 1>}, {pipeline_mode = #tpu.pipeline_mode<synchronous>, transform_indices = @transform_6, window_bounds = array<i64: 9, 24, 16>}, {pipeline_mode = #tpu.pipeline_mode<synchronous>, transform_indices = @transform_7, window_bounds = array<i64: 24, 1>}, {pipeline_mode = #tpu.pipeline_mode<synchronous>, transform_indices = @transform_8, window_bounds = array<i64: 9, 24, 24>}, {pipeline_mode = #tpu.pipeline_mode<synchronous>, transform_indices = @transform_9, window_bounds = array<i64: 24, 1>}, {transform_indices = @transform_10, window_bounds = array<i64: 1, 96, 512>}]} {
    %c0 = arith.constant 0 : index
    %c0_0 = arith.constant 0 : index
    %c0_1 = arith.constant 0 : index
    %0 = vector.load %arg1[%c0, %c0_0, %c0_1] : memref<1x4x512xf32, #tpu.memory_space<vmem>>, vector<1x4x512xf32>
    %1 = vector.shape_cast %0 : vector<1x4x512xf32> to vector<4x512xf32>
    %c0_2 = arith.constant 0 : index
    %c0_3 = arith.constant 0 : index
    %2 = vector.load %arg2[%c0_2, %c0_3] : memref<1x512xf32, #tpu.memory_space<vmem>>, vector<1x512xf32>
    %3 = tpu.concatenate %1, %1 in 1 : vector<4x512xf32>, vector<4x512xf32> -> vector<4x1024xf32>
    %cst = arith.constant 0.000000e+00 : f32
    %4 = vector.broadcast %cst : f32 to vector<80x512xf32>
    %5 = vector.extract_strided_slice %3 {offsets = [0, 470], sizes = [4, 512], strides = [1, 1]} : vector<4x1024xf32> to vector<4x512xf32>
    %c0_4 = arith.constant 0 : index
    %c0_5 = arith.constant 0 : index
    %c0_6 = arith.constant 0 : index
    %6 = vector.load %arg3[%c0_4, %c0_5, %c0_6] : memref<25x80x4xf32, #tpu.memory_space<vmem>>, vector<1x80x4xf32>
    %7 = vector.shape_cast %6 : vector<1x80x4xf32> to vector<80x4xf32>
    %cst_7 = arith.constant dense<0.000000e+00> : vector<80x512xf32>
    %8 = tpu.matmul %7, %5, %cst_7 {dimension_numbers = #tpu.dot_dimension_numbers<[1], [0], [0], [1], [0, 0, 1, 1], [], []>} : vector<80x4xf32>, vector<4x512xf32>, vector<80x512xf32> -> vector<80x512xf32>
    %9 = arith.addf %4, %8 : vector<80x512xf32>
    %10 = vector.extract_strided_slice %3 {offsets = [0, 471], sizes = [4, 512], strides = [1, 1]} : vector<4x1024xf32> to vector<4x512xf32>
    %c1 = arith.constant 1 : index
    %c0_8 = arith.constant 0 : index
    %c0_9 = arith.constant 0 : index
    %11 = vector.load %arg3[%c1, %c0_8, %c0_9] : memref<25x80x4xf32, #tpu.memory_space<vmem>>, vector<1x80x4xf32>
    %12 = vector.shape_cast %11 : vector<1x80x4xf32> to vector<80x4xf32>
    %cst_10 = arith.constant dense<0.000000e+00> : vector<80x512xf32>
    %13 = tpu.matmul %12, %10, %cst_10 {dimension_numbers = #tpu.dot_dimension_numbers<[1], [0], [0], [1], [0, 0, 1, 1], [], []>} : vector<80x4xf32>, vector<4x512xf32>, vector<80x512xf32> -> vector<80x512xf32>
    %14 = arith.addf %9, %13 : vector<80x512xf32>
    %15 = vector.extract_strided_slice %3 {offsets = [0, 472], sizes = [4, 512], strides = [1, 1]} : vector<4x1024xf32> to vector<4x512xf32>
    %c2 = arith.constant 2 : index
    %c0_11 = arith.constant 0 : index
    %c0_12 = arith.constant 0 : index
    %16 = vector.load %arg3[%c2, %c0_11, %c0_12] : memref<25x80x4xf32, #tpu.memory_space<vmem>>, vector<1x80x4xf32>
    %17 = vector.shape_cast %16 : vector<1x80x4xf32> to vector<80x4xf32>
    %cst_13 = arith.constant dense<0.000000e+00> : vector<80x512xf32>
    %18 = tpu.matmul %17, %15, %cst_13 {dimension_numbers = #tpu.dot_dimension_numbers<[1], [0], [0], [1], [0, 0, 1, 1], [], []>} : vector<80x4xf32>, vector<4x512xf32>, vector<80x512xf32> -> vector<80x512xf32>
    %19 = arith.addf %14, %18 : vector<80x512xf32>
    %20 = vector.extract_strided_slice %3 {offsets = [0, 473], sizes = [4, 512], strides = [1, 1]} : vector<4x1024xf32> to vector<4x512xf32>
    %c3 = arith.constant 3 : index
    %c0_14 = arith.constant 0 : index
    %c0_15 = arith.constant 0 : index
    %21 = vector.load %arg3[%c3, %c0_14, %c0_15] : memref<25x80x4xf32, #tpu.memory_space<vmem>>, vector<1x80x4xf32>
    %22 = vector.shape_cast %21 : vector<1x80x4xf32> to vector<80x4xf32>
    %cst_16 = arith.constant dense<0.000000e+00> : vector<80x512xf32>
    %23 = tpu.matmul %22, %20, %cst_16 {dimension_numbers = #tpu.dot_dimension_numbers<[1], [0], [0], [1], [0, 0, 1, 1], [], []>} : vector<80x4xf32>, vector<4x512xf32>, vector<80x512xf32> -> vector<80x512xf32>
    %24 = arith.addf %19, %23 : vector<80x512xf32>
    %25 = vector.extract_strided_slice %3 {offsets = [0, 474], sizes = [4, 512], strides = [1, 1]} : vector<4x1024xf32> to vector<4x512xf32>
    %c4 = arith.constant 4 : index
    %c0_17 = arith.constant 0 : index
    %c0_18 = arith.constant 0 : index
    %26 = vector.load %arg3[%c4, %c0_17, %c0_18] : memref<25x80x4xf32, #tpu.memory_space<vmem>>, vector<1x80x4xf32>
    %27 = vector.shape_cast %26 : vector<1x80x4xf32> to vector<80x4xf32>
    %cst_19 = arith.constant dense<0.000000e+00> : vector<80x512xf32>
    %28 = tpu.matmul %27, %25, %cst_19 {dimension_numbers = #tpu.dot_dimension_numbers<[1], [0], [0], [1], [0, 0, 1, 1], [], []>} : vector<80x4xf32>, vector<4x512xf32>, vector<80x512xf32> -> vector<80x512xf32>
    %29 = arith.addf %24, %28 : vector<80x512xf32>
    %30 = vector.extract_strided_slice %3 {offsets = [0, 490], sizes = [4, 512], strides = [1, 1]} : vector<4x1024xf32> to vector<4x512xf32>
    %c5 = arith.constant 5 : index
    %c0_20 = arith.constant 0 : index
    %c0_21 = arith.constant 0 : index
    %31 = vector.load %arg3[%c5, %c0_20, %c0_21] : memref<25x80x4xf32, #tpu.memory_space<vmem>>, vector<1x80x4xf32>
    %32 = vector.shape_cast %31 : vector<1x80x4xf32> to vector<80x4xf32>
    %cst_22 = arith.constant dense<0.000000e+00> : vector<80x512xf32>
    %33 = tpu.matmul %32, %30, %cst_22 {dimension_numbers = #tpu.dot_dimension_numbers<[1], [0], [0], [1], [0, 0, 1, 1], [], []>} : vector<80x4xf32>, vector<4x512xf32>, vector<80x512xf32> -> vector<80x512xf32>
    %34 = arith.addf %29, %33 : vector<80x512xf32>
    %35 = vector.extract_strided_slice %3 {offsets = [0, 491], sizes = [4, 512], strides = [1, 1]} : vector<4x1024xf32> to vector<4x512xf32>
    %c6 = arith.constant 6 : index
    %c0_23 = arith.constant 0 : index
    %c0_24 = arith.constant 0 : index
    %36 = vector.load %arg3[%c6, %c0_23, %c0_24] : memref<25x80x4xf32, #tpu.memory_space<vmem>>, vector<1x80x4xf32>
    %37 = vector.shape_cast %36 : vector<1x80x4xf32> to vector<80x4xf32>
    %cst_25 = arith.constant dense<0.000000e+00> : vector<80x512xf32>
    %38 = tpu.matmul %37, %35, %cst_25 {dimension_numbers = #tpu.dot_dimension_numbers<[1], [0], [0], [1], [0, 0, 1, 1], [], []>} : vector<80x4xf32>, vector<4x512xf32>, vector<80x512xf32> -> vector<80x512xf32>
    %39 = arith.addf %34, %38 : vector<80x512xf32>
    %40 = vector.extract_strided_slice %3 {offsets = [0, 492], sizes = [4, 512], strides = [1, 1]} : vector<4x1024xf32> to vector<4x512xf32>
    %c7 = arith.constant 7 : index
    %c0_26 = arith.constant 0 : index
    %c0_27 = arith.constant 0 : index
    %41 = vector.load %arg3[%c7, %c0_26, %c0_27] : memref<25x80x4xf32, #tpu.memory_space<vmem>>, vector<1x80x4xf32>
    %42 = vector.shape_cast %41 : vector<1x80x4xf32> to vector<80x4xf32>
    %cst_28 = arith.constant dense<0.000000e+00> : vector<80x512xf32>
    %43 = tpu.matmul %42, %40, %cst_28 {dimension_numbers = #tpu.dot_dimension_numbers<[1], [0], [0], [1], [0, 0, 1, 1], [], []>} : vector<80x4xf32>, vector<4x512xf32>, vector<80x512xf32> -> vector<80x512xf32>
    %44 = arith.addf %39, %43 : vector<80x512xf32>
    %45 = vector.extract_strided_slice %3 {offsets = [0, 493], sizes = [4, 512], strides = [1, 1]} : vector<4x1024xf32> to vector<4x512xf32>
    %c8 = arith.constant 8 : index
    %c0_29 = arith.constant 0 : index
    %c0_30 = arith.constant 0 : index
    %46 = vector.load %arg3[%c8, %c0_29, %c0_30] : memref<25x80x4xf32, #tpu.memory_space<vmem>>, vector<1x80x4xf32>
    %47 = vector.shape_cast %46 : vector<1x80x4xf32> to vector<80x4xf32>
    %cst_31 = arith.constant dense<0.000000e+00> : vector<80x512xf32>
    %48 = tpu.matmul %47, %45, %cst_31 {dimension_numbers = #tpu.dot_dimension_numbers<[1], [0], [0], [1], [0, 0, 1, 1], [], []>} : vector<80x4xf32>, vector<4x512xf32>, vector<80x512xf32> -> vector<80x512xf32>
    %49 = arith.addf %44, %48 : vector<80x512xf32>
    %50 = vector.extract_strided_slice %3 {offsets = [0, 494], sizes = [4, 512], strides = [1, 1]} : vector<4x1024xf32> to vector<4x512xf32>
    %c9 = arith.constant 9 : index
    %c0_32 = arith.constant 0 : index
    %c0_33 = arith.constant 0 : index
    %51 = vector.load %arg3[%c9, %c0_32, %c0_33] : memref<25x80x4xf32, #tpu.memory_space<vmem>>, vector<1x80x4xf32>
    %52 = vector.shape_cast %51 : vector<1x80x4xf32> to vector<80x4xf32>
    %cst_34 = arith.constant dense<0.000000e+00> : vector<80x512xf32>
    %53 = tpu.matmul %52, %50, %cst_34 {dimension_numbers = #tpu.dot_dimension_numbers<[1], [0], [0], [1], [0, 0, 1, 1], [], []>} : vector<80x4xf32>, vector<4x512xf32>, vector<80x512xf32> -> vector<80x512xf32>
    %54 = arith.addf %49, %53 : vector<80x512xf32>
    %55 = vector.extract_strided_slice %3 {offsets = [0, 510], sizes = [4, 512], strides = [1, 1]} : vector<4x1024xf32> to vector<4x512xf32>
    %c10 = arith.constant 10 : index
    %c0_35 = arith.constant 0 : index
    %c0_36 = arith.constant 0 : index
    %56 = vector.load %arg3[%c10, %c0_35, %c0_36] : memref<25x80x4xf32, #tpu.memory_space<vmem>>, vector<1x80x4xf32>
    %57 = vector.shape_cast %56 : vector<1x80x4xf32> to vector<80x4xf32>
    %cst_37 = arith.constant dense<0.000000e+00> : vector<80x512xf32>
    %58 = tpu.matmul %57, %55, %cst_37 {dimension_numbers = #tpu.dot_dimension_numbers<[1], [0], [0], [1], [0, 0, 1, 1], [], []>} : vector<80x4xf32>, vector<4x512xf32>, vector<80x512xf32> -> vector<80x512xf32>
    %59 = arith.addf %54, %58 : vector<80x512xf32>
    %60 = vector.extract_strided_slice %3 {offsets = [0, 511], sizes = [4, 512], strides = [1, 1]} : vector<4x1024xf32> to vector<4x512xf32>
    %c11 = arith.constant 11 : index
    %c0_38 = arith.constant 0 : index
    %c0_39 = arith.constant 0 : index
    %61 = vector.load %arg3[%c11, %c0_38, %c0_39] : memref<25x80x4xf32, #tpu.memory_space<vmem>>, vector<1x80x4xf32>
    %62 = vector.shape_cast %61 : vector<1x80x4xf32> to vector<80x4xf32>
    %cst_40 = arith.constant dense<0.000000e+00> : vector<80x512xf32>
    %63 = tpu.matmul %62, %60, %cst_40 {dimension_numbers = #tpu.dot_dimension_numbers<[1], [0], [0], [1], [0, 0, 1, 1], [], []>} : vector<80x4xf32>, vector<4x512xf32>, vector<80x512xf32> -> vector<80x512xf32>
    %64 = arith.addf %59, %63 : vector<80x512xf32>
    %65 = vector.extract_strided_slice %3 {offsets = [0, 0], sizes = [4, 512], strides = [1, 1]} : vector<4x1024xf32> to vector<4x512xf32>
    %c12 = arith.constant 12 : index
    %c0_41 = arith.constant 0 : index
    %c0_42 = arith.constant 0 : index
    %66 = vector.load %arg3[%c12, %c0_41, %c0_42] : memref<25x80x4xf32, #tpu.memory_space<vmem>>, vector<1x80x4xf32>
    %67 = vector.shape_cast %66 : vector<1x80x4xf32> to vector<80x4xf32>
    %cst_43 = arith.constant dense<0.000000e+00> : vector<80x512xf32>
    %68 = tpu.matmul %67, %65, %cst_43 {dimension_numbers = #tpu.dot_dimension_numbers<[1], [0], [0], [1], [0, 0, 1, 1], [], []>} : vector<80x4xf32>, vector<4x512xf32>, vector<80x512xf32> -> vector<80x512xf32>
    %69 = arith.addf %64, %68 : vector<80x512xf32>
    %70 = vector.extract_strided_slice %3 {offsets = [0, 1], sizes = [4, 512], strides = [1, 1]} : vector<4x1024xf32> to vector<4x512xf32>
    %c13 = arith.constant 13 : index
    %c0_44 = arith.constant 0 : index
    %c0_45 = arith.constant 0 : index
    %71 = vector.load %arg3[%c13, %c0_44, %c0_45] : memref<25x80x4xf32, #tpu.memory_space<vmem>>, vector<1x80x4xf32>
    %72 = vector.shape_cast %71 : vector<1x80x4xf32> to vector<80x4xf32>
    %cst_46 = arith.constant dense<0.000000e+00> : vector<80x512xf32>
    %73 = tpu.matmul %72, %70, %cst_46 {dimension_numbers = #tpu.dot_dimension_numbers<[1], [0], [0], [1], [0, 0, 1, 1], [], []>} : vector<80x4xf32>, vector<4x512xf32>, vector<80x512xf32> -> vector<80x512xf32>
    %74 = arith.addf %69, %73 : vector<80x512xf32>
    %75 = vector.extract_strided_slice %3 {offsets = [0, 2], sizes = [4, 512], strides = [1, 1]} : vector<4x1024xf32> to vector<4x512xf32>
    %c14 = arith.constant 14 : index
    %c0_47 = arith.constant 0 : index
    %c0_48 = arith.constant 0 : index
    %76 = vector.load %arg3[%c14, %c0_47, %c0_48] : memref<25x80x4xf32, #tpu.memory_space<vmem>>, vector<1x80x4xf32>
    %77 = vector.shape_cast %76 : vector<1x80x4xf32> to vector<80x4xf32>
    %cst_49 = arith.constant dense<0.000000e+00> : vector<80x512xf32>
    %78 = tpu.matmul %77, %75, %cst_49 {dimension_numbers = #tpu.dot_dimension_numbers<[1], [0], [0], [1], [0, 0, 1, 1], [], []>} : vector<80x4xf32>, vector<4x512xf32>, vector<80x512xf32> -> vector<80x512xf32>
    %79 = arith.addf %74, %78 : vector<80x512xf32>
    %80 = vector.extract_strided_slice %3 {offsets = [0, 18], sizes = [4, 512], strides = [1, 1]} : vector<4x1024xf32> to vector<4x512xf32>
    %c15 = arith.constant 15 : index
    %c0_50 = arith.constant 0 : index
    %c0_51 = arith.constant 0 : index
    %81 = vector.load %arg3[%c15, %c0_50, %c0_51] : memref<25x80x4xf32, #tpu.memory_space<vmem>>, vector<1x80x4xf32>
    %82 = vector.shape_cast %81 : vector<1x80x4xf32> to vector<80x4xf32>
    %cst_52 = arith.constant dense<0.000000e+00> : vector<80x512xf32>
    %83 = tpu.matmul %82, %80, %cst_52 {dimension_numbers = #tpu.dot_dimension_numbers<[1], [0], [0], [1], [0, 0, 1, 1], [], []>} : vector<80x4xf32>, vector<4x512xf32>, vector<80x512xf32> -> vector<80x512xf32>
    %84 = arith.addf %79, %83 : vector<80x512xf32>
    %85 = vector.extract_strided_slice %3 {offsets = [0, 19], sizes = [4, 512], strides = [1, 1]} : vector<4x1024xf32> to vector<4x512xf32>
    %c16 = arith.constant 16 : index
    %c0_53 = arith.constant 0 : index
    %c0_54 = arith.constant 0 : index
    %86 = vector.load %arg3[%c16, %c0_53, %c0_54] : memref<25x80x4xf32, #tpu.memory_space<vmem>>, vector<1x80x4xf32>
    %87 = vector.shape_cast %86 : vector<1x80x4xf32> to vector<80x4xf32>
    %cst_55 = arith.constant dense<0.000000e+00> : vector<80x512xf32>
    %88 = tpu.matmul %87, %85, %cst_55 {dimension_numbers = #tpu.dot_dimension_numbers<[1], [0], [0], [1], [0, 0, 1, 1], [], []>} : vector<80x4xf32>, vector<4x512xf32>, vector<80x512xf32> -> vector<80x512xf32>
    %89 = arith.addf %84, %88 : vector<80x512xf32>
    %90 = vector.extract_strided_slice %3 {offsets = [0, 20], sizes = [4, 512], strides = [1, 1]} : vector<4x1024xf32> to vector<4x512xf32>
    %c17 = arith.constant 17 : index
    %c0_56 = arith.constant 0 : index
    %c0_57 = arith.constant 0 : index
    %91 = vector.load %arg3[%c17, %c0_56, %c0_57] : memref<25x80x4xf32, #tpu.memory_space<vmem>>, vector<1x80x4xf32>
    %92 = vector.shape_cast %91 : vector<1x80x4xf32> to vector<80x4xf32>
    %cst_58 = arith.constant dense<0.000000e+00> : vector<80x512xf32>
    %93 = tpu.matmul %92, %90, %cst_58 {dimension_numbers = #tpu.dot_dimension_numbers<[1], [0], [0], [1], [0, 0, 1, 1], [], []>} : vector<80x4xf32>, vector<4x512xf32>, vector<80x512xf32> -> vector<80x512xf32>
    %94 = arith.addf %89, %93 : vector<80x512xf32>
    %95 = vector.extract_strided_slice %3 {offsets = [0, 21], sizes = [4, 512], strides = [1, 1]} : vector<4x1024xf32> to vector<4x512xf32>
    %c18 = arith.constant 18 : index
    %c0_59 = arith.constant 0 : index
    %c0_60 = arith.constant 0 : index
    %96 = vector.load %arg3[%c18, %c0_59, %c0_60] : memref<25x80x4xf32, #tpu.memory_space<vmem>>, vector<1x80x4xf32>
    %97 = vector.shape_cast %96 : vector<1x80x4xf32> to vector<80x4xf32>
    %cst_61 = arith.constant dense<0.000000e+00> : vector<80x512xf32>
    %98 = tpu.matmul %97, %95, %cst_61 {dimension_numbers = #tpu.dot_dimension_numbers<[1], [0], [0], [1], [0, 0, 1, 1], [], []>} : vector<80x4xf32>, vector<4x512xf32>, vector<80x512xf32> -> vector<80x512xf32>
    %99 = arith.addf %94, %98 : vector<80x512xf32>
    %100 = vector.extract_strided_slice %3 {offsets = [0, 22], sizes = [4, 512], strides = [1, 1]} : vector<4x1024xf32> to vector<4x512xf32>
    %c19 = arith.constant 19 : index
    %c0_62 = arith.constant 0 : index
    %c0_63 = arith.constant 0 : index
    %101 = vector.load %arg3[%c19, %c0_62, %c0_63] : memref<25x80x4xf32, #tpu.memory_space<vmem>>, vector<1x80x4xf32>
    %102 = vector.shape_cast %101 : vector<1x80x4xf32> to vector<80x4xf32>
    %cst_64 = arith.constant dense<0.000000e+00> : vector<80x512xf32>
    %103 = tpu.matmul %102, %100, %cst_64 {dimension_numbers = #tpu.dot_dimension_numbers<[1], [0], [0], [1], [0, 0, 1, 1], [], []>} : vector<80x4xf32>, vector<4x512xf32>, vector<80x512xf32> -> vector<80x512xf32>
    %104 = arith.addf %99, %103 : vector<80x512xf32>
    %105 = vector.extract_strided_slice %3 {offsets = [0, 38], sizes = [4, 512], strides = [1, 1]} : vector<4x1024xf32> to vector<4x512xf32>
    %c20 = arith.constant 20 : index
    %c0_65 = arith.constant 0 : index
    %c0_66 = arith.constant 0 : index
    %106 = vector.load %arg3[%c20, %c0_65, %c0_66] : memref<25x80x4xf32, #tpu.memory_space<vmem>>, vector<1x80x4xf32>
    %107 = vector.shape_cast %106 : vector<1x80x4xf32> to vector<80x4xf32>
    %cst_67 = arith.constant dense<0.000000e+00> : vector<80x512xf32>
    %108 = tpu.matmul %107, %105, %cst_67 {dimension_numbers = #tpu.dot_dimension_numbers<[1], [0], [0], [1], [0, 0, 1, 1], [], []>} : vector<80x4xf32>, vector<4x512xf32>, vector<80x512xf32> -> vector<80x512xf32>
    %109 = arith.addf %104, %108 : vector<80x512xf32>
    %110 = vector.extract_strided_slice %3 {offsets = [0, 39], sizes = [4, 512], strides = [1, 1]} : vector<4x1024xf32> to vector<4x512xf32>
    %c21 = arith.constant 21 : index
    %c0_68 = arith.constant 0 : index
    %c0_69 = arith.constant 0 : index
    %111 = vector.load %arg3[%c21, %c0_68, %c0_69] : memref<25x80x4xf32, #tpu.memory_space<vmem>>, vector<1x80x4xf32>
    %112 = vector.shape_cast %111 : vector<1x80x4xf32> to vector<80x4xf32>
    %cst_70 = arith.constant dense<0.000000e+00> : vector<80x512xf32>
    %113 = tpu.matmul %112, %110, %cst_70 {dimension_numbers = #tpu.dot_dimension_numbers<[1], [0], [0], [1], [0, 0, 1, 1], [], []>} : vector<80x4xf32>, vector<4x512xf32>, vector<80x512xf32> -> vector<80x512xf32>
    %114 = arith.addf %109, %113 : vector<80x512xf32>
    %115 = vector.extract_strided_slice %3 {offsets = [0, 40], sizes = [4, 512], strides = [1, 1]} : vector<4x1024xf32> to vector<4x512xf32>
    %c22 = arith.constant 22 : index
    %c0_71 = arith.constant 0 : index
    %c0_72 = arith.constant 0 : index
    %116 = vector.load %arg3[%c22, %c0_71, %c0_72] : memref<25x80x4xf32, #tpu.memory_space<vmem>>, vector<1x80x4xf32>
    %117 = vector.shape_cast %116 : vector<1x80x4xf32> to vector<80x4xf32>
    %cst_73 = arith.constant dense<0.000000e+00> : vector<80x512xf32>
    %118 = tpu.matmul %117, %115, %cst_73 {dimension_numbers = #tpu.dot_dimension_numbers<[1], [0], [0], [1], [0, 0, 1, 1], [], []>} : vector<80x4xf32>, vector<4x512xf32>, vector<80x512xf32> -> vector<80x512xf32>
    %119 = arith.addf %114, %118 : vector<80x512xf32>
    %120 = vector.extract_strided_slice %3 {offsets = [0, 41], sizes = [4, 512], strides = [1, 1]} : vector<4x1024xf32> to vector<4x512xf32>
    %c23 = arith.constant 23 : index
    %c0_74 = arith.constant 0 : index
    %c0_75 = arith.constant 0 : index
    %121 = vector.load %arg3[%c23, %c0_74, %c0_75] : memref<25x80x4xf32, #tpu.memory_space<vmem>>, vector<1x80x4xf32>
    %122 = vector.shape_cast %121 : vector<1x80x4xf32> to vector<80x4xf32>
    %cst_76 = arith.constant dense<0.000000e+00> : vector<80x512xf32>
    %123 = tpu.matmul %122, %120, %cst_76 {dimension_numbers = #tpu.dot_dimension_numbers<[1], [0], [0], [1], [0, 0, 1, 1], [], []>} : vector<80x4xf32>, vector<4x512xf32>, vector<80x512xf32> -> vector<80x512xf32>
    %124 = arith.addf %119, %123 : vector<80x512xf32>
    %125 = vector.extract_strided_slice %3 {offsets = [0, 42], sizes = [4, 512], strides = [1, 1]} : vector<4x1024xf32> to vector<4x512xf32>
    %c24 = arith.constant 24 : index
    %c0_77 = arith.constant 0 : index
    %c0_78 = arith.constant 0 : index
    %126 = vector.load %arg3[%c24, %c0_77, %c0_78] : memref<25x80x4xf32, #tpu.memory_space<vmem>>, vector<1x80x4xf32>
    %127 = vector.shape_cast %126 : vector<1x80x4xf32> to vector<80x4xf32>
    %cst_79 = arith.constant dense<0.000000e+00> : vector<80x512xf32>
    %128 = tpu.matmul %127, %125, %cst_79 {dimension_numbers = #tpu.dot_dimension_numbers<[1], [0], [0], [1], [0, 0, 1, 1], [], []>} : vector<80x4xf32>, vector<4x512xf32>, vector<80x512xf32> -> vector<80x512xf32>
    %129 = arith.addf %124, %128 : vector<80x512xf32>
    %c0_80 = arith.constant 0 : index
    %c0_81 = arith.constant 0 : index
    %130 = vector.load %arg4[%c0_80, %c0_81] : memref<80x1xf32, #tpu.memory_space<vmem>>, vector<80x1xf32>
    %131 = vector.broadcast %130 : vector<80x1xf32> to vector<80x512xf32>
    %132 = arith.addf %129, %131 : vector<80x512xf32>
    %133 = vector.extract_strided_slice %132 {offsets = [48, 0], sizes = [16, 512], strides = [1, 1]} : vector<80x512xf32> to vector<16x512xf32>
    %134 = vector.broadcast %2 : vector<1x512xf32> to vector<16x512xf32>
    %135 = arith.mulf %133, %134 : vector<16x512xf32>
    %136 = tpu.concatenate %135, %135 in 1 : vector<16x512xf32>, vector<16x512xf32> -> vector<16x1024xf32>
    %cst_82 = arith.constant 0.000000e+00 : f32
    %137 = vector.broadcast %cst_82 : f32 to vector<24x512xf32>
    %138 = vector.extract_strided_slice %136 {offsets = [0, 470], sizes = [16, 512], strides = [1, 1]} : vector<16x1024xf32> to vector<16x512xf32>
    %c0_83 = arith.constant 0 : index
    %c0_84 = arith.constant 0 : index
    %c0_85 = arith.constant 0 : index
    %139 = vector.load %arg5[%c0_83, %c0_84, %c0_85] : memref<25x24x16xf32, #tpu.memory_space<vmem>>, vector<1x24x16xf32>
    %140 = vector.shape_cast %139 : vector<1x24x16xf32> to vector<24x16xf32>
    %cst_86 = arith.constant dense<0.000000e+00> : vector<24x512xf32>
    %141 = tpu.matmul %140, %138, %cst_86 {dimension_numbers = #tpu.dot_dimension_numbers<[1], [0], [0], [1], [0, 0, 1, 1], [], []>} : vector<24x16xf32>, vector<16x512xf32>, vector<24x512xf32> -> vector<24x512xf32>
    %142 = arith.addf %137, %141 : vector<24x512xf32>
    %143 = vector.extract_strided_slice %136 {offsets = [0, 471], sizes = [16, 512], strides = [1, 1]} : vector<16x1024xf32> to vector<16x512xf32>
    %c1_87 = arith.constant 1 : index
    %c0_88 = arith.constant 0 : index
    %c0_89 = arith.constant 0 : index
    %144 = vector.load %arg5[%c1_87, %c0_88, %c0_89] : memref<25x24x16xf32, #tpu.memory_space<vmem>>, vector<1x24x16xf32>
    %145 = vector.shape_cast %144 : vector<1x24x16xf32> to vector<24x16xf32>
    %cst_90 = arith.constant dense<0.000000e+00> : vector<24x512xf32>
    %146 = tpu.matmul %145, %143, %cst_90 {dimension_numbers = #tpu.dot_dimension_numbers<[1], [0], [0], [1], [0, 0, 1, 1], [], []>} : vector<24x16xf32>, vector<16x512xf32>, vector<24x512xf32> -> vector<24x512xf32>
    %147 = arith.addf %142, %146 : vector<24x512xf32>
    %148 = vector.extract_strided_slice %136 {offsets = [0, 472], sizes = [16, 512], strides = [1, 1]} : vector<16x1024xf32> to vector<16x512xf32>
    %c2_91 = arith.constant 2 : index
    %c0_92 = arith.constant 0 : index
    %c0_93 = arith.constant 0 : index
    %149 = vector.load %arg5[%c2_91, %c0_92, %c0_93] : memref<25x24x16xf32, #tpu.memory_space<vmem>>, vector<1x24x16xf32>
    %150 = vector.shape_cast %149 : vector<1x24x16xf32> to vector<24x16xf32>
    %cst_94 = arith.constant dense<0.000000e+00> : vector<24x512xf32>
    %151 = tpu.matmul %150, %148, %cst_94 {dimension_numbers = #tpu.dot_dimension_numbers<[1], [0], [0], [1], [0, 0, 1, 1], [], []>} : vector<24x16xf32>, vector<16x512xf32>, vector<24x512xf32> -> vector<24x512xf32>
    %152 = arith.addf %147, %151 : vector<24x512xf32>
    %153 = vector.extract_strided_slice %136 {offsets = [0, 473], sizes = [16, 512], strides = [1, 1]} : vector<16x1024xf32> to vector<16x512xf32>
    %c3_95 = arith.constant 3 : index
    %c0_96 = arith.constant 0 : index
    %c0_97 = arith.constant 0 : index
    %154 = vector.load %arg5[%c3_95, %c0_96, %c0_97] : memref<25x24x16xf32, #tpu.memory_space<vmem>>, vector<1x24x16xf32>
    %155 = vector.shape_cast %154 : vector<1x24x16xf32> to vector<24x16xf32>
    %cst_98 = arith.constant dense<0.000000e+00> : vector<24x512xf32>
    %156 = tpu.matmul %155, %153, %cst_98 {dimension_numbers = #tpu.dot_dimension_numbers<[1], [0], [0], [1], [0, 0, 1, 1], [], []>} : vector<24x16xf32>, vector<16x512xf32>, vector<24x512xf32> -> vector<24x512xf32>
    %157 = arith.addf %152, %156 : vector<24x512xf32>
    %158 = vector.extract_strided_slice %136 {offsets = [0, 474], sizes = [16, 512], strides = [1, 1]} : vector<16x1024xf32> to vector<16x512xf32>
    %c4_99 = arith.constant 4 : index
    %c0_100 = arith.constant 0 : index
    %c0_101 = arith.constant 0 : index
    %159 = vector.load %arg5[%c4_99, %c0_100, %c0_101] : memref<25x24x16xf32, #tpu.memory_space<vmem>>, vector<1x24x16xf32>
    %160 = vector.shape_cast %159 : vector<1x24x16xf32> to vector<24x16xf32>
    %cst_102 = arith.constant dense<0.000000e+00> : vector<24x512xf32>
    %161 = tpu.matmul %160, %158, %cst_102 {dimension_numbers = #tpu.dot_dimension_numbers<[1], [0], [0], [1], [0, 0, 1, 1], [], []>} : vector<24x16xf32>, vector<16x512xf32>, vector<24x512xf32> -> vector<24x512xf32>
    %162 = arith.addf %157, %161 : vector<24x512xf32>
    %163 = vector.extract_strided_slice %136 {offsets = [0, 490], sizes = [16, 512], strides = [1, 1]} : vector<16x1024xf32> to vector<16x512xf32>
    %c5_103 = arith.constant 5 : index
    %c0_104 = arith.constant 0 : index
    %c0_105 = arith.constant 0 : index
    %164 = vector.load %arg5[%c5_103, %c0_104, %c0_105] : memref<25x24x16xf32, #tpu.memory_space<vmem>>, vector<1x24x16xf32>
    %165 = vector.shape_cast %164 : vector<1x24x16xf32> to vector<24x16xf32>
    %cst_106 = arith.constant dense<0.000000e+00> : vector<24x512xf32>
    %166 = tpu.matmul %165, %163, %cst_106 {dimension_numbers = #tpu.dot_dimension_numbers<[1], [0], [0], [1], [0, 0, 1, 1], [], []>} : vector<24x16xf32>, vector<16x512xf32>, vector<24x512xf32> -> vector<24x512xf32>
    %167 = arith.addf %162, %166 : vector<24x512xf32>
    %168 = vector.extract_strided_slice %136 {offsets = [0, 491], sizes = [16, 512], strides = [1, 1]} : vector<16x1024xf32> to vector<16x512xf32>
    %c6_107 = arith.constant 6 : index
    %c0_108 = arith.constant 0 : index
    %c0_109 = arith.constant 0 : index
    %169 = vector.load %arg5[%c6_107, %c0_108, %c0_109] : memref<25x24x16xf32, #tpu.memory_space<vmem>>, vector<1x24x16xf32>
    %170 = vector.shape_cast %169 : vector<1x24x16xf32> to vector<24x16xf32>
    %cst_110 = arith.constant dense<0.000000e+00> : vector<24x512xf32>
    %171 = tpu.matmul %170, %168, %cst_110 {dimension_numbers = #tpu.dot_dimension_numbers<[1], [0], [0], [1], [0, 0, 1, 1], [], []>} : vector<24x16xf32>, vector<16x512xf32>, vector<24x512xf32> -> vector<24x512xf32>
    %172 = arith.addf %167, %171 : vector<24x512xf32>
    %173 = vector.extract_strided_slice %136 {offsets = [0, 492], sizes = [16, 512], strides = [1, 1]} : vector<16x1024xf32> to vector<16x512xf32>
    %c7_111 = arith.constant 7 : index
    %c0_112 = arith.constant 0 : index
    %c0_113 = arith.constant 0 : index
    %174 = vector.load %arg5[%c7_111, %c0_112, %c0_113] : memref<25x24x16xf32, #tpu.memory_space<vmem>>, vector<1x24x16xf32>
    %175 = vector.shape_cast %174 : vector<1x24x16xf32> to vector<24x16xf32>
    %cst_114 = arith.constant dense<0.000000e+00> : vector<24x512xf32>
    %176 = tpu.matmul %175, %173, %cst_114 {dimension_numbers = #tpu.dot_dimension_numbers<[1], [0], [0], [1], [0, 0, 1, 1], [], []>} : vector<24x16xf32>, vector<16x512xf32>, vector<24x512xf32> -> vector<24x512xf32>
    %177 = arith.addf %172, %176 : vector<24x512xf32>
    %178 = vector.extract_strided_slice %136 {offsets = [0, 493], sizes = [16, 512], strides = [1, 1]} : vector<16x1024xf32> to vector<16x512xf32>
    %c8_115 = arith.constant 8 : index
    %c0_116 = arith.constant 0 : index
    %c0_117 = arith.constant 0 : index
    %179 = vector.load %arg5[%c8_115, %c0_116, %c0_117] : memref<25x24x16xf32, #tpu.memory_space<vmem>>, vector<1x24x16xf32>
    %180 = vector.shape_cast %179 : vector<1x24x16xf32> to vector<24x16xf32>
    %cst_118 = arith.constant dense<0.000000e+00> : vector<24x512xf32>
    %181 = tpu.matmul %180, %178, %cst_118 {dimension_numbers = #tpu.dot_dimension_numbers<[1], [0], [0], [1], [0, 0, 1, 1], [], []>} : vector<24x16xf32>, vector<16x512xf32>, vector<24x512xf32> -> vector<24x512xf32>
    %182 = arith.addf %177, %181 : vector<24x512xf32>
    %183 = vector.extract_strided_slice %136 {offsets = [0, 494], sizes = [16, 512], strides = [1, 1]} : vector<16x1024xf32> to vector<16x512xf32>
    %c9_119 = arith.constant 9 : index
    %c0_120 = arith.constant 0 : index
    %c0_121 = arith.constant 0 : index
    %184 = vector.load %arg5[%c9_119, %c0_120, %c0_121] : memref<25x24x16xf32, #tpu.memory_space<vmem>>, vector<1x24x16xf32>
    %185 = vector.shape_cast %184 : vector<1x24x16xf32> to vector<24x16xf32>
    %cst_122 = arith.constant dense<0.000000e+00> : vector<24x512xf32>
    %186 = tpu.matmul %185, %183, %cst_122 {dimension_numbers = #tpu.dot_dimension_numbers<[1], [0], [0], [1], [0, 0, 1, 1], [], []>} : vector<24x16xf32>, vector<16x512xf32>, vector<24x512xf32> -> vector<24x512xf32>
    %187 = arith.addf %182, %186 : vector<24x512xf32>
    %188 = vector.extract_strided_slice %136 {offsets = [0, 510], sizes = [16, 512], strides = [1, 1]} : vector<16x1024xf32> to vector<16x512xf32>
    %c10_123 = arith.constant 10 : index
    %c0_124 = arith.constant 0 : index
    %c0_125 = arith.constant 0 : index
    %189 = vector.load %arg5[%c10_123, %c0_124, %c0_125] : memref<25x24x16xf32, #tpu.memory_space<vmem>>, vector<1x24x16xf32>
    %190 = vector.shape_cast %189 : vector<1x24x16xf32> to vector<24x16xf32>
    %cst_126 = arith.constant dense<0.000000e+00> : vector<24x512xf32>
    %191 = tpu.matmul %190, %188, %cst_126 {dimension_numbers = #tpu.dot_dimension_numbers<[1], [0], [0], [1], [0, 0, 1, 1], [], []>} : vector<24x16xf32>, vector<16x512xf32>, vector<24x512xf32> -> vector<24x512xf32>
    %192 = arith.addf %187, %191 : vector<24x512xf32>
    %193 = vector.extract_strided_slice %136 {offsets = [0, 511], sizes = [16, 512], strides = [1, 1]} : vector<16x1024xf32> to vector<16x512xf32>
    %c11_127 = arith.constant 11 : index
    %c0_128 = arith.constant 0 : index
    %c0_129 = arith.constant 0 : index
    %194 = vector.load %arg5[%c11_127, %c0_128, %c0_129] : memref<25x24x16xf32, #tpu.memory_space<vmem>>, vector<1x24x16xf32>
    %195 = vector.shape_cast %194 : vector<1x24x16xf32> to vector<24x16xf32>
    %cst_130 = arith.constant dense<0.000000e+00> : vector<24x512xf32>
    %196 = tpu.matmul %195, %193, %cst_130 {dimension_numbers = #tpu.dot_dimension_numbers<[1], [0], [0], [1], [0, 0, 1, 1], [], []>} : vector<24x16xf32>, vector<16x512xf32>, vector<24x512xf32> -> vector<24x512xf32>
    %197 = arith.addf %192, %196 : vector<24x512xf32>
    %198 = vector.extract_strided_slice %136 {offsets = [0, 0], sizes = [16, 512], strides = [1, 1]} : vector<16x1024xf32> to vector<16x512xf32>
    %c12_131 = arith.constant 12 : index
    %c0_132 = arith.constant 0 : index
    %c0_133 = arith.constant 0 : index
    %199 = vector.load %arg5[%c12_131, %c0_132, %c0_133] : memref<25x24x16xf32, #tpu.memory_space<vmem>>, vector<1x24x16xf32>
    %200 = vector.shape_cast %199 : vector<1x24x16xf32> to vector<24x16xf32>
    %cst_134 = arith.constant dense<0.000000e+00> : vector<24x512xf32>
    %201 = tpu.matmul %200, %198, %cst_134 {dimension_numbers = #tpu.dot_dimension_numbers<[1], [0], [0], [1], [0, 0, 1, 1], [], []>} : vector<24x16xf32>, vector<16x512xf32>, vector<24x512xf32> -> vector<24x512xf32>
    %202 = arith.addf %197, %201 : vector<24x512xf32>
    %203 = vector.extract_strided_slice %136 {offsets = [0, 1], sizes = [16, 512], strides = [1, 1]} : vector<16x1024xf32> to vector<16x512xf32>
    %c13_135 = arith.constant 13 : index
    %c0_136 = arith.constant 0 : index
    %c0_137 = arith.constant 0 : index
    %204 = vector.load %arg5[%c13_135, %c0_136, %c0_137] : memref<25x24x16xf32, #tpu.memory_space<vmem>>, vector<1x24x16xf32>
    %205 = vector.shape_cast %204 : vector<1x24x16xf32> to vector<24x16xf32>
    %cst_138 = arith.constant dense<0.000000e+00> : vector<24x512xf32>
    %206 = tpu.matmul %205, %203, %cst_138 {dimension_numbers = #tpu.dot_dimension_numbers<[1], [0], [0], [1], [0, 0, 1, 1], [], []>} : vector<24x16xf32>, vector<16x512xf32>, vector<24x512xf32> -> vector<24x512xf32>
    %207 = arith.addf %202, %206 : vector<24x512xf32>
    %208 = vector.extract_strided_slice %136 {offsets = [0, 2], sizes = [16, 512], strides = [1, 1]} : vector<16x1024xf32> to vector<16x512xf32>
    %c14_139 = arith.constant 14 : index
    %c0_140 = arith.constant 0 : index
    %c0_141 = arith.constant 0 : index
    %209 = vector.load %arg5[%c14_139, %c0_140, %c0_141] : memref<25x24x16xf32, #tpu.memory_space<vmem>>, vector<1x24x16xf32>
    %210 = vector.shape_cast %209 : vector<1x24x16xf32> to vector<24x16xf32>
    %cst_142 = arith.constant dense<0.000000e+00> : vector<24x512xf32>
    %211 = tpu.matmul %210, %208, %cst_142 {dimension_numbers = #tpu.dot_dimension_numbers<[1], [0], [0], [1], [0, 0, 1, 1], [], []>} : vector<24x16xf32>, vector<16x512xf32>, vector<24x512xf32> -> vector<24x512xf32>
    %212 = arith.addf %207, %211 : vector<24x512xf32>
    %213 = vector.extract_strided_slice %136 {offsets = [0, 18], sizes = [16, 512], strides = [1, 1]} : vector<16x1024xf32> to vector<16x512xf32>
    %c15_143 = arith.constant 15 : index
    %c0_144 = arith.constant 0 : index
    %c0_145 = arith.constant 0 : index
    %214 = vector.load %arg5[%c15_143, %c0_144, %c0_145] : memref<25x24x16xf32, #tpu.memory_space<vmem>>, vector<1x24x16xf32>
    %215 = vector.shape_cast %214 : vector<1x24x16xf32> to vector<24x16xf32>
    %cst_146 = arith.constant dense<0.000000e+00> : vector<24x512xf32>
    %216 = tpu.matmul %215, %213, %cst_146 {dimension_numbers = #tpu.dot_dimension_numbers<[1], [0], [0], [1], [0, 0, 1, 1], [], []>} : vector<24x16xf32>, vector<16x512xf32>, vector<24x512xf32> -> vector<24x512xf32>
    %217 = arith.addf %212, %216 : vector<24x512xf32>
    %218 = vector.extract_strided_slice %136 {offsets = [0, 19], sizes = [16, 512], strides = [1, 1]} : vector<16x1024xf32> to vector<16x512xf32>
    %c16_147 = arith.constant 16 : index
    %c0_148 = arith.constant 0 : index
    %c0_149 = arith.constant 0 : index
    %219 = vector.load %arg5[%c16_147, %c0_148, %c0_149] : memref<25x24x16xf32, #tpu.memory_space<vmem>>, vector<1x24x16xf32>
    %220 = vector.shape_cast %219 : vector<1x24x16xf32> to vector<24x16xf32>
    %cst_150 = arith.constant dense<0.000000e+00> : vector<24x512xf32>
    %221 = tpu.matmul %220, %218, %cst_150 {dimension_numbers = #tpu.dot_dimension_numbers<[1], [0], [0], [1], [0, 0, 1, 1], [], []>} : vector<24x16xf32>, vector<16x512xf32>, vector<24x512xf32> -> vector<24x512xf32>
    %222 = arith.addf %217, %221 : vector<24x512xf32>
    %223 = vector.extract_strided_slice %136 {offsets = [0, 20], sizes = [16, 512], strides = [1, 1]} : vector<16x1024xf32> to vector<16x512xf32>
    %c17_151 = arith.constant 17 : index
    %c0_152 = arith.constant 0 : index
    %c0_153 = arith.constant 0 : index
    %224 = vector.load %arg5[%c17_151, %c0_152, %c0_153] : memref<25x24x16xf32, #tpu.memory_space<vmem>>, vector<1x24x16xf32>
    %225 = vector.shape_cast %224 : vector<1x24x16xf32> to vector<24x16xf32>
    %cst_154 = arith.constant dense<0.000000e+00> : vector<24x512xf32>
    %226 = tpu.matmul %225, %223, %cst_154 {dimension_numbers = #tpu.dot_dimension_numbers<[1], [0], [0], [1], [0, 0, 1, 1], [], []>} : vector<24x16xf32>, vector<16x512xf32>, vector<24x512xf32> -> vector<24x512xf32>
    %227 = arith.addf %222, %226 : vector<24x512xf32>
    %228 = vector.extract_strided_slice %136 {offsets = [0, 21], sizes = [16, 512], strides = [1, 1]} : vector<16x1024xf32> to vector<16x512xf32>
    %c18_155 = arith.constant 18 : index
    %c0_156 = arith.constant 0 : index
    %c0_157 = arith.constant 0 : index
    %229 = vector.load %arg5[%c18_155, %c0_156, %c0_157] : memref<25x24x16xf32, #tpu.memory_space<vmem>>, vector<1x24x16xf32>
    %230 = vector.shape_cast %229 : vector<1x24x16xf32> to vector<24x16xf32>
    %cst_158 = arith.constant dense<0.000000e+00> : vector<24x512xf32>
    %231 = tpu.matmul %230, %228, %cst_158 {dimension_numbers = #tpu.dot_dimension_numbers<[1], [0], [0], [1], [0, 0, 1, 1], [], []>} : vector<24x16xf32>, vector<16x512xf32>, vector<24x512xf32> -> vector<24x512xf32>
    %232 = arith.addf %227, %231 : vector<24x512xf32>
    %233 = vector.extract_strided_slice %136 {offsets = [0, 22], sizes = [16, 512], strides = [1, 1]} : vector<16x1024xf32> to vector<16x512xf32>
    %c19_159 = arith.constant 19 : index
    %c0_160 = arith.constant 0 : index
    %c0_161 = arith.constant 0 : index
    %234 = vector.load %arg5[%c19_159, %c0_160, %c0_161] : memref<25x24x16xf32, #tpu.memory_space<vmem>>, vector<1x24x16xf32>
    %235 = vector.shape_cast %234 : vector<1x24x16xf32> to vector<24x16xf32>
    %cst_162 = arith.constant dense<0.000000e+00> : vector<24x512xf32>
    %236 = tpu.matmul %235, %233, %cst_162 {dimension_numbers = #tpu.dot_dimension_numbers<[1], [0], [0], [1], [0, 0, 1, 1], [], []>} : vector<24x16xf32>, vector<16x512xf32>, vector<24x512xf32> -> vector<24x512xf32>
    %237 = arith.addf %232, %236 : vector<24x512xf32>
    %238 = vector.extract_strided_slice %136 {offsets = [0, 38], sizes = [16, 512], strides = [1, 1]} : vector<16x1024xf32> to vector<16x512xf32>
    %c20_163 = arith.constant 20 : index
    %c0_164 = arith.constant 0 : index
    %c0_165 = arith.constant 0 : index
    %239 = vector.load %arg5[%c20_163, %c0_164, %c0_165] : memref<25x24x16xf32, #tpu.memory_space<vmem>>, vector<1x24x16xf32>
    %240 = vector.shape_cast %239 : vector<1x24x16xf32> to vector<24x16xf32>
    %cst_166 = arith.constant dense<0.000000e+00> : vector<24x512xf32>
    %241 = tpu.matmul %240, %238, %cst_166 {dimension_numbers = #tpu.dot_dimension_numbers<[1], [0], [0], [1], [0, 0, 1, 1], [], []>} : vector<24x16xf32>, vector<16x512xf32>, vector<24x512xf32> -> vector<24x512xf32>
    %242 = arith.addf %237, %241 : vector<24x512xf32>
    %243 = vector.extract_strided_slice %136 {offsets = [0, 39], sizes = [16, 512], strides = [1, 1]} : vector<16x1024xf32> to vector<16x512xf32>
    %c21_167 = arith.constant 21 : index
    %c0_168 = arith.constant 0 : index
    %c0_169 = arith.constant 0 : index
    %244 = vector.load %arg5[%c21_167, %c0_168, %c0_169] : memref<25x24x16xf32, #tpu.memory_space<vmem>>, vector<1x24x16xf32>
    %245 = vector.shape_cast %244 : vector<1x24x16xf32> to vector<24x16xf32>
    %cst_170 = arith.constant dense<0.000000e+00> : vector<24x512xf32>
    %246 = tpu.matmul %245, %243, %cst_170 {dimension_numbers = #tpu.dot_dimension_numbers<[1], [0], [0], [1], [0, 0, 1, 1], [], []>} : vector<24x16xf32>, vector<16x512xf32>, vector<24x512xf32> -> vector<24x512xf32>
    %247 = arith.addf %242, %246 : vector<24x512xf32>
    %248 = vector.extract_strided_slice %136 {offsets = [0, 40], sizes = [16, 512], strides = [1, 1]} : vector<16x1024xf32> to vector<16x512xf32>
    %c22_171 = arith.constant 22 : index
    %c0_172 = arith.constant 0 : index
    %c0_173 = arith.constant 0 : index
    %249 = vector.load %arg5[%c22_171, %c0_172, %c0_173] : memref<25x24x16xf32, #tpu.memory_space<vmem>>, vector<1x24x16xf32>
    %250 = vector.shape_cast %249 : vector<1x24x16xf32> to vector<24x16xf32>
    %cst_174 = arith.constant dense<0.000000e+00> : vector<24x512xf32>
    %251 = tpu.matmul %250, %248, %cst_174 {dimension_numbers = #tpu.dot_dimension_numbers<[1], [0], [0], [1], [0, 0, 1, 1], [], []>} : vector<24x16xf32>, vector<16x512xf32>, vector<24x512xf32> -> vector<24x512xf32>
    %252 = arith.addf %247, %251 : vector<24x512xf32>
    %253 = vector.extract_strided_slice %136 {offsets = [0, 41], sizes = [16, 512], strides = [1, 1]} : vector<16x1024xf32> to vector<16x512xf32>
    %c23_175 = arith.constant 23 : index
    %c0_176 = arith.constant 0 : index
    %c0_177 = arith.constant 0 : index
    %254 = vector.load %arg5[%c23_175, %c0_176, %c0_177] : memref<25x24x16xf32, #tpu.memory_space<vmem>>, vector<1x24x16xf32>
    %255 = vector.shape_cast %254 : vector<1x24x16xf32> to vector<24x16xf32>
    %cst_178 = arith.constant dense<0.000000e+00> : vector<24x512xf32>
    %256 = tpu.matmul %255, %253, %cst_178 {dimension_numbers = #tpu.dot_dimension_numbers<[1], [0], [0], [1], [0, 0, 1, 1], [], []>} : vector<24x16xf32>, vector<16x512xf32>, vector<24x512xf32> -> vector<24x512xf32>
    %257 = arith.addf %252, %256 : vector<24x512xf32>
    %258 = vector.extract_strided_slice %136 {offsets = [0, 42], sizes = [16, 512], strides = [1, 1]} : vector<16x1024xf32> to vector<16x512xf32>
    %c24_179 = arith.constant 24 : index
    %c0_180 = arith.constant 0 : index
    %c0_181 = arith.constant 0 : index
    %259 = vector.load %arg5[%c24_179, %c0_180, %c0_181] : memref<25x24x16xf32, #tpu.memory_space<vmem>>, vector<1x24x16xf32>
    %260 = vector.shape_cast %259 : vector<1x24x16xf32> to vector<24x16xf32>
    %cst_182 = arith.constant dense<0.000000e+00> : vector<24x512xf32>
    %261 = tpu.matmul %260, %258, %cst_182 {dimension_numbers = #tpu.dot_dimension_numbers<[1], [0], [0], [1], [0, 0, 1, 1], [], []>} : vector<24x16xf32>, vector<16x512xf32>, vector<24x512xf32> -> vector<24x512xf32>
    %262 = arith.addf %257, %261 : vector<24x512xf32>
    %c0_183 = arith.constant 0 : index
    %c0_184 = arith.constant 0 : index
    %263 = vector.load %arg6[%c0_183, %c0_184] : memref<24x1xf32, #tpu.memory_space<vmem>>, vector<24x1xf32>
    %264 = vector.broadcast %263 : vector<24x1xf32> to vector<24x512xf32>
    %265 = arith.addf %262, %264 : vector<24x512xf32>
    %266 = vector.extract_strided_slice %132 {offsets = [64, 0], sizes = [16, 512], strides = [1, 1]} : vector<80x512xf32> to vector<16x512xf32>
    %267 = vector.broadcast %2 : vector<1x512xf32> to vector<16x512xf32>
    %268 = arith.mulf %266, %267 : vector<16x512xf32>
    %269 = tpu.concatenate %268, %268 in 1 : vector<16x512xf32>, vector<16x512xf32> -> vector<16x1024xf32>
    %cst_185 = arith.constant 0.000000e+00 : f32
    %270 = vector.broadcast %cst_185 : f32 to vector<24x512xf32>
    %271 = vector.extract_strided_slice %269 {offsets = [0, 491], sizes = [16, 512], strides = [1, 1]} : vector<16x1024xf32> to vector<16x512xf32>
    %c0_186 = arith.constant 0 : index
    %c0_187 = arith.constant 0 : index
    %c0_188 = arith.constant 0 : index
    %272 = vector.load %arg7[%c0_186, %c0_187, %c0_188] : memref<9x24x16xf32, #tpu.memory_space<vmem>>, vector<1x24x16xf32>
    %273 = vector.shape_cast %272 : vector<1x24x16xf32> to vector<24x16xf32>
    %cst_189 = arith.constant dense<0.000000e+00> : vector<24x512xf32>
    %274 = tpu.matmul %273, %271, %cst_189 {dimension_numbers = #tpu.dot_dimension_numbers<[1], [0], [0], [1], [0, 0, 1, 1], [], []>} : vector<24x16xf32>, vector<16x512xf32>, vector<24x512xf32> -> vector<24x512xf32>
    %275 = arith.addf %270, %274 : vector<24x512xf32>
    %276 = vector.extract_strided_slice %269 {offsets = [0, 492], sizes = [16, 512], strides = [1, 1]} : vector<16x1024xf32> to vector<16x512xf32>
    %c1_190 = arith.constant 1 : index
    %c0_191 = arith.constant 0 : index
    %c0_192 = arith.constant 0 : index
    %277 = vector.load %arg7[%c1_190, %c0_191, %c0_192] : memref<9x24x16xf32, #tpu.memory_space<vmem>>, vector<1x24x16xf32>
    %278 = vector.shape_cast %277 : vector<1x24x16xf32> to vector<24x16xf32>
    %cst_193 = arith.constant dense<0.000000e+00> : vector<24x512xf32>
    %279 = tpu.matmul %278, %276, %cst_193 {dimension_numbers = #tpu.dot_dimension_numbers<[1], [0], [0], [1], [0, 0, 1, 1], [], []>} : vector<24x16xf32>, vector<16x512xf32>, vector<24x512xf32> -> vector<24x512xf32>
    %280 = arith.addf %275, %279 : vector<24x512xf32>
    %281 = vector.extract_strided_slice %269 {offsets = [0, 493], sizes = [16, 512], strides = [1, 1]} : vector<16x1024xf32> to vector<16x512xf32>
    %c2_194 = arith.constant 2 : index
    %c0_195 = arith.constant 0 : index
    %c0_196 = arith.constant 0 : index
    %282 = vector.load %arg7[%c2_194, %c0_195, %c0_196] : memref<9x24x16xf32, #tpu.memory_space<vmem>>, vector<1x24x16xf32>
    %283 = vector.shape_cast %282 : vector<1x24x16xf32> to vector<24x16xf32>
    %cst_197 = arith.constant dense<0.000000e+00> : vector<24x512xf32>
    %284 = tpu.matmul %283, %281, %cst_197 {dimension_numbers = #tpu.dot_dimension_numbers<[1], [0], [0], [1], [0, 0, 1, 1], [], []>} : vector<24x16xf32>, vector<16x512xf32>, vector<24x512xf32> -> vector<24x512xf32>
    %285 = arith.addf %280, %284 : vector<24x512xf32>
    %286 = vector.extract_strided_slice %269 {offsets = [0, 511], sizes = [16, 512], strides = [1, 1]} : vector<16x1024xf32> to vector<16x512xf32>
    %c3_198 = arith.constant 3 : index
    %c0_199 = arith.constant 0 : index
    %c0_200 = arith.constant 0 : index
    %287 = vector.load %arg7[%c3_198, %c0_199, %c0_200] : memref<9x24x16xf32, #tpu.memory_space<vmem>>, vector<1x24x16xf32>
    %288 = vector.shape_cast %287 : vector<1x24x16xf32> to vector<24x16xf32>
    %cst_201 = arith.constant dense<0.000000e+00> : vector<24x512xf32>
    %289 = tpu.matmul %288, %286, %cst_201 {dimension_numbers = #tpu.dot_dimension_numbers<[1], [0], [0], [1], [0, 0, 1, 1], [], []>} : vector<24x16xf32>, vector<16x512xf32>, vector<24x512xf32> -> vector<24x512xf32>
    %290 = arith.addf %285, %289 : vector<24x512xf32>
    %291 = vector.extract_strided_slice %269 {offsets = [0, 0], sizes = [16, 512], strides = [1, 1]} : vector<16x1024xf32> to vector<16x512xf32>
    %c4_202 = arith.constant 4 : index
    %c0_203 = arith.constant 0 : index
    %c0_204 = arith.constant 0 : index
    %292 = vector.load %arg7[%c4_202, %c0_203, %c0_204] : memref<9x24x16xf32, #tpu.memory_space<vmem>>, vector<1x24x16xf32>
    %293 = vector.shape_cast %292 : vector<1x24x16xf32> to vector<24x16xf32>
    %cst_205 = arith.constant dense<0.000000e+00> : vector<24x512xf32>
    %294 = tpu.matmul %293, %291, %cst_205 {dimension_numbers = #tpu.dot_dimension_numbers<[1], [0], [0], [1], [0, 0, 1, 1], [], []>} : vector<24x16xf32>, vector<16x512xf32>, vector<24x512xf32> -> vector<24x512xf32>
    %295 = arith.addf %290, %294 : vector<24x512xf32>
    %296 = vector.extract_strided_slice %269 {offsets = [0, 1], sizes = [16, 512], strides = [1, 1]} : vector<16x1024xf32> to vector<16x512xf32>
    %c5_206 = arith.constant 5 : index
    %c0_207 = arith.constant 0 : index
    %c0_208 = arith.constant 0 : index
    %297 = vector.load %arg7[%c5_206, %c0_207, %c0_208] : memref<9x24x16xf32, #tpu.memory_space<vmem>>, vector<1x24x16xf32>
    %298 = vector.shape_cast %297 : vector<1x24x16xf32> to vector<24x16xf32>
    %cst_209 = arith.constant dense<0.000000e+00> : vector<24x512xf32>
    %299 = tpu.matmul %298, %296, %cst_209 {dimension_numbers = #tpu.dot_dimension_numbers<[1], [0], [0], [1], [0, 0, 1, 1], [], []>} : vector<24x16xf32>, vector<16x512xf32>, vector<24x512xf32> -> vector<24x512xf32>
    %300 = arith.addf %295, %299 : vector<24x512xf32>
    %301 = vector.extract_strided_slice %269 {offsets = [0, 19], sizes = [16, 512], strides = [1, 1]} : vector<16x1024xf32> to vector<16x512xf32>
    %c6_210 = arith.constant 6 : index
    %c0_211 = arith.constant 0 : index
    %c0_212 = arith.constant 0 : index
    %302 = vector.load %arg7[%c6_210, %c0_211, %c0_212] : memref<9x24x16xf32, #tpu.memory_space<vmem>>, vector<1x24x16xf32>
    %303 = vector.shape_cast %302 : vector<1x24x16xf32> to vector<24x16xf32>
    %cst_213 = arith.constant dense<0.000000e+00> : vector<24x512xf32>
    %304 = tpu.matmul %303, %301, %cst_213 {dimension_numbers = #tpu.dot_dimension_numbers<[1], [0], [0], [1], [0, 0, 1, 1], [], []>} : vector<24x16xf32>, vector<16x512xf32>, vector<24x512xf32> -> vector<24x512xf32>
    %305 = arith.addf %300, %304 : vector<24x512xf32>
    %306 = vector.extract_strided_slice %269 {offsets = [0, 20], sizes = [16, 512], strides = [1, 1]} : vector<16x1024xf32> to vector<16x512xf32>
    %c7_214 = arith.constant 7 : index
    %c0_215 = arith.constant 0 : index
    %c0_216 = arith.constant 0 : index
    %307 = vector.load %arg7[%c7_214, %c0_215, %c0_216] : memref<9x24x16xf32, #tpu.memory_space<vmem>>, vector<1x24x16xf32>
    %308 = vector.shape_cast %307 : vector<1x24x16xf32> to vector<24x16xf32>
    %cst_217 = arith.constant dense<0.000000e+00> : vector<24x512xf32>
    %309 = tpu.matmul %308, %306, %cst_217 {dimension_numbers = #tpu.dot_dimension_numbers<[1], [0], [0], [1], [0, 0, 1, 1], [], []>} : vector<24x16xf32>, vector<16x512xf32>, vector<24x512xf32> -> vector<24x512xf32>
    %310 = arith.addf %305, %309 : vector<24x512xf32>
    %311 = vector.extract_strided_slice %269 {offsets = [0, 21], sizes = [16, 512], strides = [1, 1]} : vector<16x1024xf32> to vector<16x512xf32>
    %c8_218 = arith.constant 8 : index
    %c0_219 = arith.constant 0 : index
    %c0_220 = arith.constant 0 : index
    %312 = vector.load %arg7[%c8_218, %c0_219, %c0_220] : memref<9x24x16xf32, #tpu.memory_space<vmem>>, vector<1x24x16xf32>
    %313 = vector.shape_cast %312 : vector<1x24x16xf32> to vector<24x16xf32>
    %cst_221 = arith.constant dense<0.000000e+00> : vector<24x512xf32>
    %314 = tpu.matmul %313, %311, %cst_221 {dimension_numbers = #tpu.dot_dimension_numbers<[1], [0], [0], [1], [0, 0, 1, 1], [], []>} : vector<24x16xf32>, vector<16x512xf32>, vector<24x512xf32> -> vector<24x512xf32>
    %315 = arith.addf %310, %314 : vector<24x512xf32>
    %c0_222 = arith.constant 0 : index
    %c0_223 = arith.constant 0 : index
    %316 = vector.load %arg8[%c0_222, %c0_223] : memref<24x1xf32, #tpu.memory_space<vmem>>, vector<24x1xf32>
    %317 = vector.broadcast %316 : vector<24x1xf32> to vector<24x512xf32>
    %318 = arith.addf %315, %317 : vector<24x512xf32>
    %319 = vector.broadcast %2 : vector<1x512xf32> to vector<24x512xf32>
    %320 = arith.mulf %318, %319 : vector<24x512xf32>
    %321 = tpu.concatenate %320, %320 in 1 : vector<24x512xf32>, vector<24x512xf32> -> vector<24x1024xf32>
    %cst_224 = arith.constant 0.000000e+00 : f32
    %322 = vector.broadcast %cst_224 : f32 to vector<24x512xf32>
    %323 = vector.extract_strided_slice %321 {offsets = [0, 491], sizes = [24, 512], strides = [1, 1]} : vector<24x1024xf32> to vector<24x512xf32>
    %c0_225 = arith.constant 0 : index
    %c0_226 = arith.constant 0 : index
    %c0_227 = arith.constant 0 : index
    %324 = vector.load %arg9[%c0_225, %c0_226, %c0_227] : memref<9x24x24xf32, #tpu.memory_space<vmem>>, vector<1x24x24xf32>
    %325 = vector.shape_cast %324 : vector<1x24x24xf32> to vector<24x24xf32>
    %cst_228 = arith.constant dense<0.000000e+00> : vector<24x512xf32>
    %326 = tpu.matmul %325, %323, %cst_228 {dimension_numbers = #tpu.dot_dimension_numbers<[1], [0], [0], [1], [0, 0, 1, 1], [], []>} : vector<24x24xf32>, vector<24x512xf32>, vector<24x512xf32> -> vector<24x512xf32>
    %327 = arith.addf %322, %326 : vector<24x512xf32>
    %328 = vector.extract_strided_slice %321 {offsets = [0, 492], sizes = [24, 512], strides = [1, 1]} : vector<24x1024xf32> to vector<24x512xf32>
    %c1_229 = arith.constant 1 : index
    %c0_230 = arith.constant 0 : index
    %c0_231 = arith.constant 0 : index
    %329 = vector.load %arg9[%c1_229, %c0_230, %c0_231] : memref<9x24x24xf32, #tpu.memory_space<vmem>>, vector<1x24x24xf32>
    %330 = vector.shape_cast %329 : vector<1x24x24xf32> to vector<24x24xf32>
    %cst_232 = arith.constant dense<0.000000e+00> : vector<24x512xf32>
    %331 = tpu.matmul %330, %328, %cst_232 {dimension_numbers = #tpu.dot_dimension_numbers<[1], [0], [0], [1], [0, 0, 1, 1], [], []>} : vector<24x24xf32>, vector<24x512xf32>, vector<24x512xf32> -> vector<24x512xf32>
    %332 = arith.addf %327, %331 : vector<24x512xf32>
    %333 = vector.extract_strided_slice %321 {offsets = [0, 493], sizes = [24, 512], strides = [1, 1]} : vector<24x1024xf32> to vector<24x512xf32>
    %c2_233 = arith.constant 2 : index
    %c0_234 = arith.constant 0 : index
    %c0_235 = arith.constant 0 : index
    %334 = vector.load %arg9[%c2_233, %c0_234, %c0_235] : memref<9x24x24xf32, #tpu.memory_space<vmem>>, vector<1x24x24xf32>
    %335 = vector.shape_cast %334 : vector<1x24x24xf32> to vector<24x24xf32>
    %cst_236 = arith.constant dense<0.000000e+00> : vector<24x512xf32>
    %336 = tpu.matmul %335, %333, %cst_236 {dimension_numbers = #tpu.dot_dimension_numbers<[1], [0], [0], [1], [0, 0, 1, 1], [], []>} : vector<24x24xf32>, vector<24x512xf32>, vector<24x512xf32> -> vector<24x512xf32>
    %337 = arith.addf %332, %336 : vector<24x512xf32>
    %338 = vector.extract_strided_slice %321 {offsets = [0, 511], sizes = [24, 512], strides = [1, 1]} : vector<24x1024xf32> to vector<24x512xf32>
    %c3_237 = arith.constant 3 : index
    %c0_238 = arith.constant 0 : index
    %c0_239 = arith.constant 0 : index
    %339 = vector.load %arg9[%c3_237, %c0_238, %c0_239] : memref<9x24x24xf32, #tpu.memory_space<vmem>>, vector<1x24x24xf32>
    %340 = vector.shape_cast %339 : vector<1x24x24xf32> to vector<24x24xf32>
    %cst_240 = arith.constant dense<0.000000e+00> : vector<24x512xf32>
    %341 = tpu.matmul %340, %338, %cst_240 {dimension_numbers = #tpu.dot_dimension_numbers<[1], [0], [0], [1], [0, 0, 1, 1], [], []>} : vector<24x24xf32>, vector<24x512xf32>, vector<24x512xf32> -> vector<24x512xf32>
    %342 = arith.addf %337, %341 : vector<24x512xf32>
    %343 = vector.extract_strided_slice %321 {offsets = [0, 0], sizes = [24, 512], strides = [1, 1]} : vector<24x1024xf32> to vector<24x512xf32>
    %c4_241 = arith.constant 4 : index
    %c0_242 = arith.constant 0 : index
    %c0_243 = arith.constant 0 : index
    %344 = vector.load %arg9[%c4_241, %c0_242, %c0_243] : memref<9x24x24xf32, #tpu.memory_space<vmem>>, vector<1x24x24xf32>
    %345 = vector.shape_cast %344 : vector<1x24x24xf32> to vector<24x24xf32>
    %cst_244 = arith.constant dense<0.000000e+00> : vector<24x512xf32>
    %346 = tpu.matmul %345, %343, %cst_244 {dimension_numbers = #tpu.dot_dimension_numbers<[1], [0], [0], [1], [0, 0, 1, 1], [], []>} : vector<24x24xf32>, vector<24x512xf32>, vector<24x512xf32> -> vector<24x512xf32>
    %347 = arith.addf %342, %346 : vector<24x512xf32>
    %348 = vector.extract_strided_slice %321 {offsets = [0, 1], sizes = [24, 512], strides = [1, 1]} : vector<24x1024xf32> to vector<24x512xf32>
    %c5_245 = arith.constant 5 : index
    %c0_246 = arith.constant 0 : index
    %c0_247 = arith.constant 0 : index
    %349 = vector.load %arg9[%c5_245, %c0_246, %c0_247] : memref<9x24x24xf32, #tpu.memory_space<vmem>>, vector<1x24x24xf32>
    %350 = vector.shape_cast %349 : vector<1x24x24xf32> to vector<24x24xf32>
    %cst_248 = arith.constant dense<0.000000e+00> : vector<24x512xf32>
    %351 = tpu.matmul %350, %348, %cst_248 {dimension_numbers = #tpu.dot_dimension_numbers<[1], [0], [0], [1], [0, 0, 1, 1], [], []>} : vector<24x24xf32>, vector<24x512xf32>, vector<24x512xf32> -> vector<24x512xf32>
    %352 = arith.addf %347, %351 : vector<24x512xf32>
    %353 = vector.extract_strided_slice %321 {offsets = [0, 19], sizes = [24, 512], strides = [1, 1]} : vector<24x1024xf32> to vector<24x512xf32>
    %c6_249 = arith.constant 6 : index
    %c0_250 = arith.constant 0 : index
    %c0_251 = arith.constant 0 : index
    %354 = vector.load %arg9[%c6_249, %c0_250, %c0_251] : memref<9x24x24xf32, #tpu.memory_space<vmem>>, vector<1x24x24xf32>
    %355 = vector.shape_cast %354 : vector<1x24x24xf32> to vector<24x24xf32>
    %cst_252 = arith.constant dense<0.000000e+00> : vector<24x512xf32>
    %356 = tpu.matmul %355, %353, %cst_252 {dimension_numbers = #tpu.dot_dimension_numbers<[1], [0], [0], [1], [0, 0, 1, 1], [], []>} : vector<24x24xf32>, vector<24x512xf32>, vector<24x512xf32> -> vector<24x512xf32>
    %357 = arith.addf %352, %356 : vector<24x512xf32>
    %358 = vector.extract_strided_slice %321 {offsets = [0, 20], sizes = [24, 512], strides = [1, 1]} : vector<24x1024xf32> to vector<24x512xf32>
    %c7_253 = arith.constant 7 : index
    %c0_254 = arith.constant 0 : index
    %c0_255 = arith.constant 0 : index
    %359 = vector.load %arg9[%c7_253, %c0_254, %c0_255] : memref<9x24x24xf32, #tpu.memory_space<vmem>>, vector<1x24x24xf32>
    %360 = vector.shape_cast %359 : vector<1x24x24xf32> to vector<24x24xf32>
    %cst_256 = arith.constant dense<0.000000e+00> : vector<24x512xf32>
    %361 = tpu.matmul %360, %358, %cst_256 {dimension_numbers = #tpu.dot_dimension_numbers<[1], [0], [0], [1], [0, 0, 1, 1], [], []>} : vector<24x24xf32>, vector<24x512xf32>, vector<24x512xf32> -> vector<24x512xf32>
    %362 = arith.addf %357, %361 : vector<24x512xf32>
    %363 = vector.extract_strided_slice %321 {offsets = [0, 21], sizes = [24, 512], strides = [1, 1]} : vector<24x1024xf32> to vector<24x512xf32>
    %c8_257 = arith.constant 8 : index
    %c0_258 = arith.constant 0 : index
    %c0_259 = arith.constant 0 : index
    %364 = vector.load %arg9[%c8_257, %c0_258, %c0_259] : memref<9x24x24xf32, #tpu.memory_space<vmem>>, vector<1x24x24xf32>
    %365 = vector.shape_cast %364 : vector<1x24x24xf32> to vector<24x24xf32>
    %cst_260 = arith.constant dense<0.000000e+00> : vector<24x512xf32>
    %366 = tpu.matmul %365, %363, %cst_260 {dimension_numbers = #tpu.dot_dimension_numbers<[1], [0], [0], [1], [0, 0, 1, 1], [], []>} : vector<24x24xf32>, vector<24x512xf32>, vector<24x512xf32> -> vector<24x512xf32>
    %367 = arith.addf %362, %366 : vector<24x512xf32>
    %c0_261 = arith.constant 0 : index
    %c0_262 = arith.constant 0 : index
    %368 = vector.load %arg10[%c0_261, %c0_262] : memref<24x1xf32, #tpu.memory_space<vmem>>, vector<24x1xf32>
    %369 = vector.broadcast %368 : vector<24x1xf32> to vector<24x512xf32>
    %370 = arith.addf %367, %369 : vector<24x512xf32>
    %371 = vector.extract_strided_slice %132 {offsets = [0, 0], sizes = [24, 512], strides = [1, 1]} : vector<80x512xf32> to vector<24x512xf32>
    %c0_263 = arith.constant 0 : index
    %c0_264 = arith.constant 0 : index
    %c0_265 = arith.constant 0 : index
    %372 = vector.load %arg11[%c0_263, %c0_264, %c0_265] : memref<1x96x512xf32, #tpu.memory_space<vmem>>, vector<1x24x512xf32>
    %373 = vector.shape_cast %372 : vector<1x24x512xf32> to vector<24x512xf32>
    %374 = vector.shape_cast %371 : vector<24x512xf32> to vector<1x24x512xf32>
    tpu.vector_store %arg11[%c0_263, %c0_264, %c0_265], %374 {strides = array<i32>} : memref<1x96x512xf32, #tpu.memory_space<vmem>>, vector<1x24x512xf32>,
    %375 = vector.extract_strided_slice %132 {offsets = [24, 0], sizes = [24, 512], strides = [1, 1]} : vector<80x512xf32> to vector<24x512xf32>
    %c0_266 = arith.constant 0 : index
    %c24_267 = arith.constant 24 : index
    %c0_268 = arith.constant 0 : index
    %376 = vector.load %arg11[%c0_266, %c24_267, %c0_268] : memref<1x96x512xf32, #tpu.memory_space<vmem>>, vector<1x24x512xf32>
    %377 = vector.shape_cast %376 : vector<1x24x512xf32> to vector<24x512xf32>
    %378 = vector.shape_cast %375 : vector<24x512xf32> to vector<1x24x512xf32>
    tpu.vector_store %arg11[%c0_266, %c24_267, %c0_268], %378 {strides = array<i32>} : memref<1x96x512xf32, #tpu.memory_space<vmem>>, vector<1x24x512xf32>,
    %c0_269 = arith.constant 0 : index
    %c48 = arith.constant 48 : index
    %c0_270 = arith.constant 0 : index
    %379 = vector.load %arg11[%c0_269, %c48, %c0_270] : memref<1x96x512xf32, #tpu.memory_space<vmem>>, vector<1x24x512xf32>
    %380 = vector.shape_cast %379 : vector<1x24x512xf32> to vector<24x512xf32>
    %381 = vector.shape_cast %265 : vector<24x512xf32> to vector<1x24x512xf32>
    tpu.vector_store %arg11[%c0_269, %c48, %c0_270], %381 {strides = array<i32>} : memref<1x96x512xf32, #tpu.memory_space<vmem>>, vector<1x24x512xf32>,
    %c0_271 = arith.constant 0 : index
    %c72 = arith.constant 72 : index
    %c0_272 = arith.constant 0 : index
    %382 = vector.load %arg11[%c0_271, %c72, %c0_272] : memref<1x96x512xf32, #tpu.memory_space<vmem>>, vector<1x24x512xf32>
    %383 = vector.shape_cast %382 : vector<1x24x512xf32> to vector<24x512xf32>
    %384 = vector.shape_cast %370 : vector<24x512xf32> to vector<1x24x512xf32>
    tpu.vector_store %arg11[%c0_271, %c72, %c0_272], %384 {strides = array<i32>} : memref<1x96x512xf32, #tpu.memory_space<vmem>>, vector<1x24x512xf32>,
    return
  }
  func.func @transform_0(%arg0: i32) -> (i32, i32, i32) {
    %c0_i32 = arith.constant 0 : i32
    %c0_i32_0 = arith.constant 0 : i32
    %c0_i32_1 = arith.constant 0 : i32
    return %arg0, %c0_i32, %c0_i32_0 : i32, i32, i32
  }
  func.func @transform_1(%arg0: i32) -> (i32, i32) {
    %c0_i32 = arith.constant 0 : i32
    %c0_i32_0 = arith.constant 0 : i32
    %c0_i32_1 = arith.constant 0 : i32
    return %c0_i32, %c0_i32_0 : i32, i32
  }
  func.func @transform_2(%arg0: i32) -> (i32, i32, i32) {
    %c0_i32 = arith.constant 0 : i32
    %c0_i32_0 = arith.constant 0 : i32
    %c0_i32_1 = arith.constant 0 : i32
    %c0_i32_2 = arith.constant 0 : i32
    return %c0_i32, %c0_i32_0, %c0_i32_1 : i32, i32, i32
  }
  func.func @transform_3(%arg0: i32) -> (i32, i32) {
    %c0_i32 = arith.constant 0 : i32
    %c0_i32_0 = arith.constant 0 : i32
    %c0_i32_1 = arith.constant 0 : i32
    return %c0_i32, %c0_i32_0 : i32, i32
  }
  func.func @transform_4(%arg0: i32) -> (i32, i32, i32) {
    %c0_i32 = arith.constant 0 : i32
    %c0_i32_0 = arith.constant 0 : i32
    %c0_i32_1 = arith.constant 0 : i32
    %c0_i32_2 = arith.constant 0 : i32
    return %c0_i32, %c0_i32_0, %c0_i32_1 : i32, i32, i32
  }
  func.func @transform_5(%arg0: i32) -> (i32, i32) {
    %c0_i32 = arith.constant 0 : i32
    %c0_i32_0 = arith.constant 0 : i32
    %c0_i32_1 = arith.constant 0 : i32
    return %c0_i32, %c0_i32_0 : i32, i32
  }
  func.func @transform_6(%arg0: i32) -> (i32, i32, i32) {
    %c0_i32 = arith.constant 0 : i32
    %c0_i32_0 = arith.constant 0 : i32
    %c0_i32_1 = arith.constant 0 : i32
    %c0_i32_2 = arith.constant 0 : i32
    return %c0_i32, %c0_i32_0, %c0_i32_1 : i32, i32, i32
  }
  func.func @transform_7(%arg0: i32) -> (i32, i32) {
    %c0_i32 = arith.constant 0 : i32
    %c0_i32_0 = arith.constant 0 : i32
    %c0_i32_1 = arith.constant 0 : i32
    return %c0_i32, %c0_i32_0 : i32, i32
  }
  func.func @transform_8(%arg0: i32) -> (i32, i32, i32) {
    %c0_i32 = arith.constant 0 : i32
    %c0_i32_0 = arith.constant 0 : i32
    %c0_i32_1 = arith.constant 0 : i32
    %c0_i32_2 = arith.constant 0 : i32
    return %c0_i32, %c0_i32_0, %c0_i32_1 : i32, i32, i32
  }
  func.func @transform_9(%arg0: i32) -> (i32, i32) {
    %c0_i32 = arith.constant 0 : i32
    %c0_i32_0 = arith.constant 0 : i32
    %c0_i32_1 = arith.constant 0 : i32
    return %c0_i32, %c0_i32_0 : i32, i32
  }
  func.func @transform_10(%arg0: i32) -> (i32, i32, i32) {
    %c0_i32 = arith.constant 0 : i32
    %c0_i32_0 = arith.constant 0 : i32
    %c0_i32_1 = arith.constant 0 : i32
    return %arg0, %c0_i32, %c0_i32_0 : i32, i32, i32
  }
}

</mosaic_0001>

<bundles_post_ra>
// kernel: inception_forward.1
= control target key start
LH: loop header
LB: loop body
LE: loop exit
PB: predicated region body
PF: predicated region fallthrough
CT: control target
= control target key end

     0   :  { %s22938_s13 = smov 0   ;;  %s28183_s0 = inlined_call_operand.vmem [shape: f32[2,4,512], index: 0, kind: input, shape index: {}]   ;;  %s28184_s1 = inlined_call_operand.vmem [shape: f32[1,512], index: 1, kind: input, shape index: {}]   ;;  %s28185_s2 = inlined_call_operand.vmem [shape: f32[25,80,4], index: 2, kind: input, shape index: {}]   ;;  %s28186_s3 = inlined_call_operand.vmem [shape: f32[80,1], index: 3, kind: input, shape index: {}]   ;;  %s28187_s4 = inlined_call_operand.vmem [shape: f32[25,24,16], index: 4, kind: input, shape index: {}]   ;;  %s28188_s5 = inlined_call_operand.vmem [shape: f32[24,1], index: 5, kind: input, shape index: {}]   ;;  %s28189_s6 = inlined_call_operand.vmem [shape: f32[9,24,16], index: 6, kind: input, shape index: {}]   ;;  %s28190_s7 = inlined_call_operand.vmem [shape: f32[24,1], index: 7, kind: input, shape index: {}]   ;;  %s28191_s8 = inlined_call_operand.vmem [shape: f32[9,24,24], index: 8, kind: input, shape index: {}]   ;;  %s28192_s9 = inlined_call_operand.vmem [shape: f32[24,1], index: 9, kind: input, shape index: {}]   ;;  %s28193_s10 = inlined_call_operand.vmem [shape: f32[2,96,512], index: 10, kind: output, shape index: {}]  }
   0x1 LB: > { %s18993_s14 = sadd.s32 4294967295, %s22855_s13   ;;  %p18997_p0 = scmp.ge.s32.totalorder %s22855_s13, 1  ;;  %s22855_s13 = sphi %s22938_s13, %s20_s13  }
   0x2   : > { %p312_p1 = scmp.lt.s32.totalorder %s22855_s13, 3 }
   0x4   : > { %p313_p2 = pnand %p18997_p0, %p312_p1 }
   0x6   : > { %316 = sbr.rel (%p313_p2) target bundleno = 2568 (0xa08), region = 60 }
   0xd   : > { %p350_p3 = scmp.lt.s32.totalorder %s18993_s14, 1  ;;  %v28232_v0 = vmov 0.0   ;;  %s22858_s19 = smov 41   ;;  %vm396_vm0 = vcmask 334848   ;;  %vm432_vm1 = vcmask 1043456   ;;  %vm401_vm2 = vcmask 31744  }
   0xe   : > { %505 = vmatprep.mubr.f32.mxu0 %v28232_v0  ;;  %630 = vmatprep.mubr.f32.mxu1 %v28232_v0  ;;  %s22859_s20 = smov 42   ;;  %s22860_s21 = smov 40   ;;  %v19001_v13 = vld [vmem:[%s28185_s2 + $0x50] sm:$0xff]  ;;  %v19002_v16 = vld [vmem:[%s28185_s2 + $0x58] sm:$0xff]  ;;  %vm699_vm3 = vcmask 343040   ;;  %v19003_v20 = vld [vmem:[%s28185_s2 + $0x60] sm:$0xff] }
   0xf   : > { %s28489_s14 = smov (!%p350_p3, %s18993_s14), 1  ;;  %s22861_s22 = smov 39   ;;  %v19004_v26 = vld [vmem:[%s28185_s2 + $0x68] sm:$0xff]  ;;  %vm1011_vm4 = vcmask 326656   ;;  %v19005_v29 = vld [vmem:[%s28185_s2 + $0x70] sm:$0xff]  ;;  %v19006_v32 = vld [vmem:[%s28185_s2 + $0x78] sm:$0xff] }
  0x10   : > { %s20221_s15 = sshll.u32 %s28489_s14, 4  ;;  %s22862_s23 = smov 38   ;;  %v19007_v33 = vld [vmem:[%s28185_s2 + $0x80] sm:$0xff]  ;;  %v19008_v34 = vld [vmem:[%s28185_s2 + $0x88] sm:$0xff]  ;;  %v19009_v35 = vld [vmem:[%s28185_s2 + $0x90] sm:$0xff]  ;;  %vm1363_vm5 = vcmask 318464  }
  0x11   : > { %s22954_s18 = scalar_lea.vmem %s28183_s0, %s20221_s15  ;;  %s22863_s24 = smov 22   ;;  %v19010_v38 = vld [vmem:[%s28185_s2 + $0x98] sm:$0xff]  ;;  %v367_v39 = vld [vmem:[%s28185_s2] sm:$0xff]  ;;  %v368_v46 = vld [vmem:[%s28185_s2 + $0x8] sm:$0xff]  ;;  %vm1715_vm6 = vcmask 310272   ;;  %vm2067_vm7 = vcmask 179200  }
  0x12   : > { %v22957_v1 = vld [vmem:[%s22954_s18 + $0x8] sm:$0xff]  ;;  %v22960_v2 = vld [vmem:[%s22954_s18] sm:$0xff]  ;;  %s22864_s25 = smov 21   ;;  %s22865_s30 = smov 20   ;;  %v369_v47 = vld [vmem:[%s28185_s2 + $0x10] sm:$0xff]  ;;  %vm2419_vm8 = vcmask 171008  }
  0x13   : > { %v22964_v3 = vcombine.high %v22957_v1, %v22957_v1  ;;  %v22968_v4 = vcombine.high %v22960_v2, %v22960_v2  ;;  %v370_v48 = vld [vmem:[%s28185_s2 + $0x18] sm:$0xff]  ;;  %v371_v49 = vld [vmem:[%s28185_s2 + $0x20] sm:$0xff]  ;;  %v372_v50 = vld [vmem:[%s28185_s2 + $0x28] sm:$0xff]  ;;  %s22866_s15 = smov 19   ;;  %s22867_s28 = smov 18   ;;  %vm2771_vm9 = vcmask 162816  }
  0x14   : > { %v373_v51 = vld [vmem:[%s28185_s2 + $0x30] sm:$0xff]  ;;  %v374_v52 = vld [vmem:[%s28185_s2 + $0x38] sm:$0xff]  ;;  %v375_v53 = vld [vmem:[%s28185_s2 + $0x40] sm:$0xff]  ;;  %s28229_s27 = smov 2   ;;  %s28227_s12 = smov 1   ;;  %vm3123_vm10 = vcmask 154624  }
  0x15   : > { %388 = vrot.lane.b32.xlu0 %v22964_v3, %s22858_s19  ;;  %392 = vrot.lane.b32.xlu1 %v22968_v4, %s22858_s19  ;;  %v376_v56 = vld [vmem:[%s28185_s2 + $0x48] sm:$0xff]  ;;  %v19059_v57 = vld [vmem:[%s28185_s2 + $0xa0] sm:$0xff]  ;;  %s28194_s16 = smov 127   ;;  %vm3475_vm11 = vcmask 146432   ;;  %vm3827_vm12 = vcmask 15360   ;;  %vm4179_vm13 = vcmask 7168  }
  0x16   : > { %vm28206_vm14 = vcmask 1039360   ;;  %vm28209_vm15 = vcmask 1031168   ;;  %s28217_s17 = smov 87   ;;  %s28270_s29 = smov 107  }
  0x17   : > { %s28282_s11 = smov 89  }
  0x19   : > { %390 = vrot.lane.b32.xlu0 %v22960_v2, %s22858_s19  ;;  %394 = vrot.lane.b32.xlu1 %v22957_v1, %s22858_s19 }
  0x1d   : > { %691 = vrot.lane.b32.xlu0 %v22964_v3, %s22859_s20  ;;  %693 = vrot.lane.b32.xlu1 %v22960_v2, %s22859_s20 }
  0x21   : > { %695 = vrot.lane.b32.xlu0 %v22968_v4, %s22859_s20  ;;  %697 = vrot.lane.b32.xlu1 %v22957_v1, %s22859_s20 }
  0x25   : > { %1003 = vrot.lane.b32.xlu0 %v22964_v3, %s22860_s21  ;;  %1005 = vrot.lane.b32.xlu1 %v22960_v2, %s22860_s21 }
  0x29   : > { %1007 = vrot.lane.b32.xlu0 %v22968_v4, %s22860_s21  ;;  %1009 = vrot.lane.b32.xlu1 %v22957_v1, %s22860_s21 }
  0x2d   : > { %1355 = vrot.lane.b32.xlu0 %v22964_v3, %s22861_s22  ;;  %1357 = vrot.lane.b32.xlu1 %v22960_v2, %s22861_s22 }
  0x31   : > { %1359 = vrot.lane.b32.xlu0 %v22968_v4, %s22861_s22  ;;  %1361 = vrot.lane.b32.xlu1 %v22957_v1, %s22861_s22 }
  0x35   : > { %1707 = vrot.lane.b32.xlu0 %v22964_v3, %s22862_s23  ;;  %1709 = vrot.lane.b32.xlu1 %v22960_v2, %s22862_s23 }
  0x39   : > { %1711 = vrot.lane.b32.xlu0 %v22968_v4, %s22862_s23  ;;  %1713 = vrot.lane.b32.xlu1 %v22957_v1, %s22862_s23 }
  0x3d   : > { %2059 = vrot.lane.b32.xlu0 %v22964_v3, %s22863_s24  ;;  %2061 = vrot.lane.b32.xlu1 %v22960_v2, %s22863_s24 }
  0x41   : > { %2063 = vrot.lane.b32.xlu0 %v22968_v4, %s22863_s24  ;;  %2065 = vrot.lane.b32.xlu1 %v22957_v1, %s22863_s24 }
  0x45   : > { %2411 = vrot.lane.b32.xlu0 %v22964_v3, %s22864_s25  ;;  %2413 = vrot.lane.b32.xlu1 %v22960_v2, %s22864_s25 }
  0x49   : > { %2415 = vrot.lane.b32.xlu0 %v22968_v4, %s22864_s25  ;;  %2417 = vrot.lane.b32.xlu1 %v22957_v1, %s22864_s25 }
  0x4d   : > { %2763 = vrot.lane.b32.xlu0 %v22964_v3, %s22865_s30  ;;  %2765 = vrot.lane.b32.xlu1 %v22960_v2, %s22865_s30 }
  0x51   : > { %2767 = vrot.lane.b32.xlu0 %v22968_v4, %s22865_s30  ;;  %2769 = vrot.lane.b32.xlu1 %v22957_v1, %s22865_s30 }
  0x55   : > { %3115 = vrot.lane.b32.xlu0 %v22964_v3, %s22866_s15  ;;  %3117 = vrot.lane.b32.xlu1 %v22960_v2, %s22866_s15 }
  0x59   : > { %3119 = vrot.lane.b32.xlu0 %v22968_v4, %s22866_s15  ;;  %3121 = vrot.lane.b32.xlu1 %v22957_v1, %s22866_s15 }
  0x5d   : > { %3467 = vrot.lane.b32.xlu0 %v22964_v3, %s22867_s28  ;;  %3469 = vrot.lane.b32.xlu1 %v22960_v2, %s22867_s28 }
  0x61   : > { %3471 = vrot.lane.b32.xlu0 %v22968_v4, %s22867_s28  ;;  %3473 = vrot.lane.b32.xlu1 %v22957_v1, %s22867_s28 }
  0x65   : > { %3819 = vrot.lane.b32.xlu0 %v22964_v3, %s28229_s27  ;;  %3821 = vrot.lane.b32.xlu1 %v22960_v2, %s28229_s27 }
  0x69   : > { %3823 = vrot.lane.b32.xlu0 %v22968_v4, %s28229_s27  ;;  %3825 = vrot.lane.b32.xlu1 %v22957_v1, %s28229_s27  ;;  %s28268_s27 = smov 108  }
  0x6d   : > { %4171 = vrot.lane.b32.xlu0 %v22964_v3, %s28227_s12  ;;  %4173 = vrot.lane.b32.xlu1 %v22960_v2, %s28227_s12 }
  0x71   : > { %4175 = vrot.lane.b32.xlu0 %v22968_v4, %s28227_s12  ;;  %4177 = vrot.lane.b32.xlu1 %v22957_v1, %s28227_s12  ;;  %v19136_v1 = vld [vmem:[%s28185_s2 + $0x188] sm:$0xff] }
  0x75   : > { %4862 = vrot.lane.b32.xlu0 %v22960_v2, %s28194_s16  ;;  %4864 = vrot.lane.b32.xlu1 %v22968_v4, %s28194_s16  ;;  %v19203_v2 = vld [vmem:[%s28185_s2 + $0x220] sm:$0xff] }
  0x79   : > { %4868 = vrot.lane.b32.xlu1 %v22964_v3, %s28194_s16 }
  0x87   : > { %v389_v5 = vpop.permute.xlu0 %388  ;;  %v393_v6 = vpop.permute.xlu1 %392 }
  0x8b   : > { %v391_v7 = vpop.permute.xlu0 %390  ;;  %v395_v8 = vpop.permute.xlu1 %394 }
  0x8c   : > { %v398_v9 = vsel %vm396_vm0, %v391_v7, %v393_v6  ;;  %v400_v10 = vsel %vm396_vm0, %v395_v8, %v389_v5  ;;  %v397_v11 = vsel %vm396_vm0, %v389_v5, %v391_v7  ;;  %v399_v12 = vsel %vm396_vm0, %v393_v6, %v395_v8  ;;  %v19060_v5 = vld [vmem:[%s28185_s2 + $0xa8] sm:$0xff]  ;;  %v19061_v6 = vld [vmem:[%s28185_s2 + $0xb0] sm:$0xff]  ;;  %v19062_v7 = vld [vmem:[%s28185_s2 + $0xb8] sm:$0xff] }
  0x8d   : > { %19011 = vmatprep.subr.msk.mxu0 %vm432_vm1, %v398_v9  ;;  %19023 = vmatprep.subr.msk.mxu1 %vm432_vm1, %v400_v10  ;;  %v19063_v8 = vld [vmem:[%s28185_s2 + $0xc0] sm:$0xff]  ;;  %v19064_v9 = vld [vmem:[%s28185_s2 + $0xc8] sm:$0xff]  ;;  %v19065_v10 = vld [vmem:[%s28185_s2 + $0xd0] sm:$0xff] }
  0x8e   : > { %19012 = vmatpush1.msk.msra.mxu0 %vm432_vm1, %v397_v11  ;;  %19024 = vmatpush1.msk.msra.mxu1 %vm432_vm1, %v399_v12  ;;  %v19066_v11 = vld [vmem:[%s28185_s2 + $0xd8] sm:$0xff]  ;;  %v19067_v12 = vld [vmem:[%s28185_s2 + $0xe0] sm:$0xff] }
  0x8f   : > { %19013 = vmatmul.mubr.msk.f32.vlgmr.msra.gmra.mrb[0].mxu0 %vm401_vm2, %v19001_v13  ;;  %19025 = vmatmul.mubr.msk.f32.vlgmr.msra.gmra.mrb[0].mxu1 %vm401_vm2, %v19001_v13  ;;  %v692_v14 = vpop.permute.xlu0 %691  ;;  %v694_v15 = vpop.permute.xlu1 %693 }
  0x90   : > { %511 = vmatprep.mubr.f32.mxu0 %v28232_v0  ;;  %636 = vmatprep.mubr.f32.mxu1 %v28232_v0  ;;  %v700_v17 = vsel %vm699_vm3, %v692_v14, %v694_v15 }
  0x93   : > { %19014 = vmatmul.mubr.msk.f32.gmra.mrb[2].mxu0 %vm401_vm2, %v19002_v16  ;;  %19026 = vmatmul.mubr.msk.f32.gmra.mrb[2].mxu1 %vm401_vm2, %v19002_v16  ;;  %v696_v18 = vpop.permute.xlu0 %695  ;;  %v698_v19 = vpop.permute.xlu1 %697  ;;  %v19093_v16 = vld [vmem:[%s28185_s2 + $0xf0] sm:$0xff] }
  0x94   : > { %517 = vmatprep.mubr.f32.mxu0 %v28232_v0  ;;  %642 = vmatprep.mubr.f32.mxu1 %v28232_v0  ;;  %v702_v21 = vsel %vm699_vm3, %v696_v18, %v698_v19  ;;  %v701_v22 = vsel %vm699_vm3, %v694_v15, %v696_v18  ;;  %v703_v23 = vsel %vm699_vm3, %v698_v19, %v692_v14  ;;  %v19068_v15 = vld [vmem:[%s28185_s2 + $0xe8] sm:$0xff] }
  0x95   : > { %19035 = vmatprep.subr.msk.mxu0 %vm432_vm1, %v701_v22  ;;  %19047 = vmatprep.subr.msk.mxu1 %vm432_vm1, %v703_v23  ;;  %v19094_v23 = vld [vmem:[%s28185_s2 + $0xf8] sm:$0xff] }
  0x96   : > { %19036 = vmatpush1.msk.msra.mxu0 %vm432_vm1, %v700_v17  ;;  %19048 = vmatpush1.msk.msra.mxu1 %vm432_vm1, %v702_v21 }
  0x97   : > { %19015 = vmatmul.mubr.msk.f32.gmra.mrb[4].mxu0 %vm401_vm2, %v19003_v20  ;;  %19027 = vmatmul.mubr.msk.f32.gmra.mrb[4].mxu1 %vm401_vm2, %v19003_v20  ;;  %v1004_v24 = vpop.permute.xlu0 %1003  ;;  %v1006_v25 = vpop.permute.xlu1 %1005 }
  0x98   : > { %523 = vmatprep.mubr.f32.mxu0 %v28232_v0  ;;  %648 = vmatprep.mubr.f32.mxu1 %v28232_v0  ;;  %v1012_v42 = vsel %vm1011_vm4, %v1004_v24, %v1006_v25 }
  0x9b   : > { %19016 = vmatmul.mubr.msk.f32.gmra.mrb[6].mxu0 %vm401_vm2, %v19004_v26  ;;  %19028 = vmatmul.mubr.msk.f32.gmra.mrb[6].mxu1 %vm401_vm2, %v19004_v26  ;;  %v1008_v27 = vpop.permute.xlu0 %1007  ;;  %v1010_v28 = vpop.permute.xlu1 %1009  ;;  %v19097_v26 = vld [vmem:[%s28185_s2 + $0x110] sm:$0xff] }
  0x9c   : > { %529 = vmatprep.mubr.f32.mxu0 %v28232_v0  ;;  %654 = vmatprep.mubr.f32.mxu1 %v28232_v0  ;;  %v1013_v30 = vsel %vm1011_vm4, %v1006_v25, %v1008_v27  ;;  %v1015_v31 = vsel %vm1011_vm4, %v1010_v28, %v1004_v24  ;;  %v1014_v43 = vsel %vm1011_vm4, %v1008_v27, %v1010_v28  ;;  %v19095_v24 = vld [vmem:[%s28185_s2 + $0x100] sm:$0xff]  ;;  %v19096_v25 = vld [vmem:[%s28185_s2 + $0x108] sm:$0xff]  ;;  %v19098_v27 = vld [vmem:[%s28185_s2 + $0x118] sm:$0xff] }
  0x9d   : > { %19069 = vmatprep.subr.msk.mxu0 %vm432_vm1, %v1013_v30  ;;  %19081 = vmatprep.subr.msk.mxu1 %vm432_vm1, %v1015_v31  ;;  %v19099_v28 = vld [vmem:[%s28185_s2 + $0x120] sm:$0xff]  ;;  %v19101_v30 = vld [vmem:[%s28185_s2 + $0x130] sm:$0xff] }
  0x9f   : > { %19017 = vmatmul.mubr.msk.f32.gmra.mrb[8].mxu0 %vm401_vm2, %v19005_v29  ;;  %19029 = vmatmul.mubr.msk.f32.gmra.mrb[8].mxu1 %vm401_vm2, %v19005_v29  ;;  %v23113_v36 = vpop.permute.xlu0 %1355  ;;  %v23115_v37 = vpop.permute.xlu1 %1357  ;;  %v19100_v29 = vld [vmem:[%s28185_s2 + $0x128] sm:$0xff] }
  0xa0   : > { %535 = vmatprep.mubr.f32.mxu0 %v28232_v0  ;;  %660 = vmatprep.mubr.f32.mxu1 %v28232_v0  ;;  %v1364_v60 = vsel %vm1363_vm5, %v23113_v36, %v23115_v37 }
  0xa3   : > { %19018 = vmatmul.mubr.msk.f32.gmra.mrb[10].mxu0 %vm401_vm2, %v19006_v32  ;;  %19030 = vmatmul.mubr.msk.f32.gmra.mrb[10].mxu1 %vm401_vm2, %v19006_v32  ;;  %v23131_v40 = vpop.permute.xlu0 %1359  ;;  %v23133_v41 = vpop.permute.xlu1 %1361 }
  0xa4   : > { %541 = vmatprep.mubr.f32.mxu0 %v28232_v0  ;;  %666 = vmatprep.mubr.f32.mxu1 %v28232_v0  ;;  %v1365_v44 = vsel %vm1363_vm5, %v23115_v37, %v23131_v40  ;;  %v1367_v45 = vsel %vm1363_vm5, %v23133_v41, %v23113_v36  ;;  %v1366_v61 = vsel %vm1363_vm5, %v23131_v40, %v23133_v41  ;;  %v19128_v41 = vld [vmem:[%s28185_s2 + $0x148] sm:$0xff] }
  0xa7   : > { %19019 = vmatmul.mubr.msk.f32.gmra.mrb[12].mxu0 %vm401_vm2, %v19007_v33  ;;  %19031 = vmatmul.mubr.msk.f32.gmra.mrb[12].mxu1 %vm401_vm2, %v19007_v33  ;;  %v23211_v54 = vpop.permute.xlu0 %1707  ;;  %v23213_v55 = vpop.permute.xlu1 %1709  ;;  %v19102_v33 = vld [vmem:[%s28185_s2 + $0x138] sm:$0xff] }
  0xa8   : > { %547 = vmatprep.mubr.f32.mxu0 %v28232_v0  ;;  %672 = vmatprep.mubr.f32.mxu1 %v28232_v0  ;;  %v1716_v19 = vsel %vm1715_vm6, %v23211_v54, %v23213_v55 }
  0xab   : > { %19020 = vmatmul.mubr.msk.f32.gmra.mrb[14].mxu0 %vm401_vm2, %v19008_v34  ;;  %19032 = vmatmul.mubr.msk.f32.gmra.mrb[14].mxu1 %vm401_vm2, %v19008_v34  ;;  %v23229_v58 = vpop.permute.xlu0 %1711  ;;  %v23231_v59 = vpop.permute.xlu1 %1713  ;;  %v19127_v34 = vld [vmem:[%s28185_s2 + $0x140] sm:$0xff] }
  0xac   : > { %553 = vmatprep.mubr.f32.mxu0 %v28232_v0  ;;  %678 = vmatprep.mubr.f32.mxu1 %v28232_v0  ;;  %v1717_v62 = vsel %vm1715_vm6, %v23213_v55, %v23229_v58  ;;  %v1719_v63 = vsel %vm1715_vm6, %v23231_v59, %v23211_v54  ;;  %v1718_v20 = vsel %vm1715_vm6, %v23229_v58, %v23231_v59  ;;  %v19162_v58 = vld [vmem:[%s28185_s2 + $0x198] sm:$0xff]  ;;  %v19163_v59 = vld [vmem:[%s28185_s2 + $0x1a0] sm:$0xff] }
  0xaf   : > { %19021 = vmatmul.mubr.msk.f32.gmra.mrb[16].mxu0 %vm401_vm2, %v19009_v35  ;;  %19033 = vmatmul.mubr.msk.f32.gmra.mrb[16].mxu1 %vm401_vm2, %v19009_v35  ;;  %v23313_v13 = vpop.permute.xlu0 %2059  ;;  %v23315_v14 = vpop.permute.xlu1 %2061 }
  0xb0   : > { %559 = vmatprep.mubr.f32.mxu0 %v28232_v0  ;;  %684 = vmatprep.mubr.f32.mxu1 %v28232_v0  ;;  %v2068_v37 = vsel %vm2067_vm7, %v23313_v13, %v23315_v14 }
  0xb3   : > { %19022 = vmatmul.mubr.msk.f32.gmra.mrb[18].mxu0 %vm401_vm2, %v19010_v38  ;;  %19034 = vmatmul.mubr.msk.f32.gmra.mrb[18].mxu1 %vm401_vm2, %v19010_v38  ;;  %v23331_v17 = vpop.permute.xlu0 %2063  ;;  %v23333_v18 = vpop.permute.xlu1 %2065 }
  0xb4   : > { %806 = vmatprep.mubr.f32.mxu0 %v28232_v0  ;;  %931 = vmatprep.mubr.f32.mxu1 %v28232_v0  ;;  %v2069_v21 = vsel %vm2067_vm7, %v23315_v14, %v23331_v17  ;;  %v2071_v22 = vsel %vm2067_vm7, %v23333_v18, %v23313_v13  ;;  %v2070_v38 = vsel %vm2067_vm7, %v23331_v17, %v23333_v18  ;;  %v19196_v17 = vld [vmem:[%s28185_s2 + $0x1e8] sm:$0xff]  ;;  %v19197_v18 = vld [vmem:[%s28185_s2 + $0x1f0] sm:$0xff] }
  0xb7   : > { %19037 = vmatmul.mubr.msk.f32.vlgmr.msra.gmra.mrb[0].mxu0 %vm401_vm2, %v367_v39  ;;  %19049 = vmatmul.mubr.msk.f32.vlgmr.msra.gmra.mrb[0].mxu1 %vm401_vm2, %v367_v39  ;;  %v23415_v31 = vpop.permute.xlu0 %2411  ;;  %v23417_v32 = vpop.permute.xlu1 %2413 }
  0xb8   : > { %812 = vmatprep.mubr.f32.mxu0 %v28232_v0  ;;  %937 = vmatprep.mubr.f32.mxu1 %v28232_v0  ;;  %v2420_v54 = vsel %vm2419_vm8, %v23415_v31, %v23417_v32 }
  0xb9   : > { %19070 = vmatpush1.msk.msra.mxu0 %vm432_vm1, %v1012_v42  ;;  %19082 = vmatpush1.msk.msra.mxu1 %vm432_vm1, %v1014_v43  ;;  %v19129_v42 = vld [vmem:[%s28185_s2 + $0x150] sm:$0xff]  ;;  %v19130_v43 = vld [vmem:[%s28185_s2 + $0x158] sm:$0xff] }
  0xba   : > { %19103 = vmatprep.subr.msk.mxu0 %vm432_vm1, %v1365_v44  ;;  %19115 = vmatprep.subr.msk.mxu1 %vm432_vm1, %v1367_v45  ;;  %v19131_v44 = vld [vmem:[%s28185_s2 + $0x160] sm:$0xff]  ;;  %v19132_v45 = vld [vmem:[%s28185_s2 + $0x168] sm:$0xff] }
  0xbb   : > { %19038 = vmatmul.mubr.msk.f32.gmra.mrb[2].mxu0 %vm401_vm2, %v368_v46  ;;  %19050 = vmatmul.mubr.msk.f32.gmra.mrb[2].mxu1 %vm401_vm2, %v368_v46  ;;  %v23433_v35 = vpop.permute.xlu0 %2415  ;;  %v23435_v36 = vpop.permute.xlu1 %2417  ;;  %v19133_v46 = vld [vmem:[%s28185_s2 + $0x170] sm:$0xff] }
  0xbc   : > { %818 = vmatprep.mubr.f32.mxu0 %v28232_v0  ;;  %943 = vmatprep.mubr.f32.mxu1 %v28232_v0  ;;  %v2421_v39 = vsel %vm2419_vm8, %v23417_v32, %v23433_v35  ;;  %v2423_v40 = vsel %vm2419_vm8, %v23435_v36, %v23415_v31  ;;  %v2422_v55 = vsel %vm2419_vm8, %v23433_v35, %v23435_v36  ;;  %v19230_v35 = vld [vmem:[%s28185_s2 + $0x238] sm:$0xff]  ;;  %v19231_v36 = vld [vmem:[%s28185_s2 + $0x240] sm:$0xff] }
  0xbf   : > { %19039 = vmatmul.mubr.msk.f32.gmra.mrb[4].mxu0 %vm401_vm2, %v369_v47  ;;  %19051 = vmatmul.mubr.msk.f32.gmra.mrb[4].mxu1 %vm401_vm2, %v369_v47  ;;  %v19134_v47 = vld [vmem:[%s28185_s2 + $0x178] sm:$0xff] }
  0xc0   : > { %824 = vmatprep.mubr.f32.mxu0 %v28232_v0  ;;  %949 = vmatprep.mubr.f32.mxu1 %v28232_v0 }
  0xc3   : > { %19040 = vmatmul.mubr.msk.f32.gmra.mrb[6].mxu0 %vm401_vm2, %v370_v48  ;;  %19052 = vmatmul.mubr.msk.f32.gmra.mrb[6].mxu1 %vm401_vm2, %v370_v48  ;;  %v19135_v48 = vld [vmem:[%s28185_s2 + $0x180] sm:$0xff] }
  0xc4   : > { %830 = vmatprep.mubr.f32.mxu0 %v28232_v0  ;;  %955 = vmatprep.mubr.f32.mxu1 %v28232_v0 }
  0xc7   : > { %19041 = vmatmul.mubr.msk.f32.gmra.mrb[8].mxu0 %vm401_vm2, %v371_v49  ;;  %19053 = vmatmul.mubr.msk.f32.gmra.mrb[8].mxu1 %vm401_vm2, %v371_v49  ;;  %v23517_v49 = vpop.permute.xlu0 %2763 }
  0xc8   : > { %836 = vmatprep.mubr.f32.mxu0 %v28232_v0  ;;  %961 = vmatprep.mubr.f32.mxu1 %v28232_v0 }
  0xcb   : > { %19042 = vmatmul.mubr.msk.f32.gmra.mrb[10].mxu0 %vm401_vm2, %v372_v50  ;;  %19054 = vmatmul.mubr.msk.f32.gmra.mrb[10].mxu1 %vm401_vm2, %v372_v50  ;;  %v23519_v50 = vpop.permute.xlu1 %2765 }
  0xcc   : > { %842 = vmatprep.mubr.f32.mxu0 %v28232_v0  ;;  %967 = vmatprep.mubr.f32.mxu1 %v28232_v0  ;;  %v2772_v13 = vsel %vm2771_vm9, %v23517_v49, %v23519_v50 }
  0xcf   : > { %19043 = vmatmul.mubr.msk.f32.gmra.mrb[12].mxu0 %vm401_vm2, %v373_v51  ;;  %19055 = vmatmul.mubr.msk.f32.gmra.mrb[12].mxu1 %vm401_vm2, %v373_v51  ;;  %v19161_v51 = vld [vmem:[%s28185_s2 + $0x190] sm:$0xff] }
  0xd0   : > { %848 = vmatprep.mubr.f32.mxu0 %v28232_v0  ;;  %973 = vmatprep.mubr.f32.mxu1 %v28232_v0 }
  0xd3   : > { %19044 = vmatmul.mubr.msk.f32.gmra.mrb[14].mxu0 %vm401_vm2, %v374_v52  ;;  %19056 = vmatmul.mubr.msk.f32.gmra.mrb[14].mxu1 %vm401_vm2, %v374_v52  ;;  %v23535_v52 = vpop.permute.xlu0 %2767 }
  0xd4   : > { %854 = vmatprep.mubr.f32.mxu0 %v28232_v0  ;;  %979 = vmatprep.mubr.f32.mxu1 %v28232_v0 }
  0xd7   : > { %19045 = vmatmul.mubr.msk.f32.gmra.mrb[16].mxu0 %vm401_vm2, %v375_v53  ;;  %19057 = vmatmul.mubr.msk.f32.gmra.mrb[16].mxu1 %vm401_vm2, %v375_v53  ;;  %v23537_v53 = vpop.permute.xlu1 %2769 }
  0xd8   : > { %860 = vmatprep.mubr.f32.mxu0 %v28232_v0  ;;  %985 = vmatprep.mubr.f32.mxu1 %v28232_v0  ;;  %v2774_v14 = vsel %vm2771_vm9, %v23535_v52, %v23537_v53 }
  0xdb   : > { %19046 = vmatmul.mubr.msk.f32.gmra.mrb[18].mxu0 %vm401_vm2, %v376_v56  ;;  %19058 = vmatmul.mubr.msk.f32.gmra.mrb[18].mxu1 %vm401_vm2, %v376_v56  ;;  %v2773_v56 = vsel %vm2771_vm9, %v23519_v50, %v23535_v52 }
  0xdc   : > { %1118 = vmatprep.mubr.f32.mxu0 %v28232_v0  ;;  %1243 = vmatprep.mubr.f32.mxu1 %v28232_v0 }
  0xdf   : > { %19071 = vmatmul.mubr.msk.f32.vlgmr.msra.gmra.mrb[0].mxu0 %vm401_vm2, %v19059_v57  ;;  %19083 = vmatmul.mubr.msk.f32.vlgmr.msra.gmra.mrb[0].mxu1 %vm401_vm2, %v19059_v57  ;;  %v2775_v57 = vsel %vm2771_vm9, %v23537_v53, %v23517_v49  ;;  %v19264_v53 = vld [vmem:[%s28185_s2 + $0x288] sm:$0xff] }
  0xe0   : > { %1124 = vmatprep.mubr.f32.mxu0 %v28232_v0  ;;  %1249 = vmatprep.mubr.f32.mxu1 %v28232_v0 }
  0xe1   : > { %19104 = vmatpush1.msk.msra.mxu0 %vm432_vm1, %v1364_v60  ;;  %19116 = vmatpush1.msk.msra.mxu1 %vm432_vm1, %v1366_v61  ;;  %v19164_v60 = vld [vmem:[%s28185_s2 + $0x1a8] sm:$0xff]  ;;  %v19165_v61 = vld [vmem:[%s28185_s2 + $0x1b0] sm:$0xff] }
  0xe2   : > { %19137 = vmatprep.subr.msk.mxu0 %vm432_vm1, %v1717_v62  ;;  %19149 = vmatprep.subr.msk.mxu1 %vm432_vm1, %v1719_v63  ;;  %v19166_v62 = vld [vmem:[%s28185_s2 + $0x1b8] sm:$0xff]  ;;  %v19167_v63 = vld [vmem:[%s28185_s2 + $0x1c0] sm:$0xff] }
  0xe3   : > { %19072 = vmatmul.mubr.msk.f32.gmra.mrb[2].mxu0 %vm401_vm2, %v19060_v5  ;;  %19084 = vmatmul.mubr.msk.f32.gmra.mrb[2].mxu1 %vm401_vm2, %v19060_v5  ;;  %v19168_v5 = vld [vmem:[%s28185_s2 + $0x1c8] sm:$0xff] }
  0xe4   : > { %1130 = vmatprep.mubr.f32.mxu0 %v28232_v0  ;;  %1255 = vmatprep.mubr.f32.mxu1 %v28232_v0 }
  0xe7   : > { %19073 = vmatmul.mubr.msk.f32.gmra.mrb[4].mxu0 %vm401_vm2, %v19061_v6  ;;  %19085 = vmatmul.mubr.msk.f32.gmra.mrb[4].mxu1 %vm401_vm2, %v19061_v6  ;;  %v19169_v6 = vld [vmem:[%s28185_s2 + $0x1d0] sm:$0xff] }
  0xe8   : > { %1136 = vmatprep.mubr.f32.mxu0 %v28232_v0  ;;  %1261 = vmatprep.mubr.f32.mxu1 %v28232_v0 }
  0xeb   : > { %19074 = vmatmul.mubr.msk.f32.gmra.mrb[6].mxu0 %vm401_vm2, %v19062_v7  ;;  %19086 = vmatmul.mubr.msk.f32.gmra.mrb[6].mxu1 %vm401_vm2, %v19062_v7  ;;  %v23611_v7 = vpop.permute.xlu0 %3115 }
  0xec   : > { %1142 = vmatprep.mubr.f32.mxu0 %v28232_v0  ;;  %1267 = vmatprep.mubr.f32.mxu1 %v28232_v0 }
  0xef   : > { %19075 = vmatmul.mubr.msk.f32.gmra.mrb[8].mxu0 %vm401_vm2, %v19063_v8  ;;  %19087 = vmatmul.mubr.msk.f32.gmra.mrb[8].mxu1 %vm401_vm2, %v19063_v8  ;;  %v23613_v8 = vpop.permute.xlu1 %3117 }
  0xf0   : > { %1148 = vmatprep.mubr.f32.mxu0 %v28232_v0  ;;  %1273 = vmatprep.mubr.f32.mxu1 %v28232_v0  ;;  %v3124_v31 = vsel %vm3123_vm10, %v23611_v7, %v23613_v8 }
  0xf3   : > { %19076 = vmatmul.mubr.msk.f32.gmra.mrb[10].mxu0 %vm401_vm2, %v19064_v9  ;;  %19088 = vmatmul.mubr.msk.f32.gmra.mrb[10].mxu1 %vm401_vm2, %v19064_v9  ;;  %v19170_v9 = vld [vmem:[%s28185_s2 + $0x1d8] sm:$0xff] }
  0xf4   : > { %1154 = vmatprep.mubr.f32.mxu0 %v28232_v0  ;;  %1279 = vmatprep.mubr.f32.mxu1 %v28232_v0 }
  0xf7   : > { %19077 = vmatmul.mubr.msk.f32.gmra.mrb[12].mxu0 %vm401_vm2, %v19065_v10  ;;  %19089 = vmatmul.mubr.msk.f32.gmra.mrb[12].mxu1 %vm401_vm2, %v19065_v10  ;;  %v19195_v10 = vld [vmem:[%s28185_s2 + $0x1e0] sm:$0xff] }
  0xf8   : > { %1160 = vmatprep.mubr.f32.mxu0 %v28232_v0  ;;  %1285 = vmatprep.mubr.f32.mxu1 %v28232_v0 }
  0xfb   : > { %19078 = vmatmul.mubr.msk.f32.gmra.mrb[14].mxu0 %vm401_vm2, %v19066_v11  ;;  %19090 = vmatmul.mubr.msk.f32.gmra.mrb[14].mxu1 %vm401_vm2, %v19066_v11  ;;  %v23629_v11 = vpop.permute.xlu0 %3119 }
  0xfc   : > { %1166 = vmatprep.mubr.f32.mxu0 %v28232_v0  ;;  %1291 = vmatprep.mubr.f32.mxu1 %v28232_v0 }
  0xff   : > { %19079 = vmatmul.mubr.msk.f32.gmra.mrb[16].mxu0 %vm401_vm2, %v19067_v12  ;;  %19091 = vmatmul.mubr.msk.f32.gmra.mrb[16].mxu1 %vm401_vm2, %v19067_v12  ;;  %v23631_v12 = vpop.permute.xlu1 %3121 }
 0x100   : > { %1172 = vmatprep.mubr.f32.mxu0 %v28232_v0  ;;  %1297 = vmatprep.mubr.f32.mxu1 %v28232_v0  ;;  %v3126_v32 = vsel %vm3123_vm10, %v23629_v11, %v23631_v12 }
 0x103   : > { %19080 = vmatmul.mubr.msk.f32.gmra.mrb[18].mxu0 %vm401_vm2, %v19068_v15  ;;  %19092 = vmatmul.mubr.msk.f32.gmra.mrb[18].mxu1 %vm401_vm2, %v19068_v15  ;;  %v3125_v15 = vsel %vm3123_vm10, %v23613_v8, %v23629_v11 }
 0x104   : > { %1470 = vmatprep.mubr.f32.mxu0 %v28232_v0  ;;  %1595 = vmatprep.mubr.f32.mxu1 %v28232_v0 }
 0x107   : > { %19105 = vmatmul.mubr.msk.f32.vlgmr.msra.gmra.mrb[0].mxu0 %vm401_vm2, %v19093_v16  ;;  %19117 = vmatmul.mubr.msk.f32.vlgmr.msra.gmra.mrb[0].mxu1 %vm401_vm2, %v19093_v16  ;;  %v3127_v16 = vsel %vm3123_vm10, %v23631_v12, %v23611_v7  ;;  %v19298_v12 = vld [vmem:[%s28185_s2 + $0x2d8] sm:$0xff] }
 0x108   : > { %1476 = vmatprep.mubr.f32.mxu0 %v28232_v0  ;;  %1601 = vmatprep.mubr.f32.mxu1 %v28232_v0 }
 0x109   : > { %19138 = vmatpush1.msk.msra.mxu0 %vm432_vm1, %v1716_v19  ;;  %19150 = vmatpush1.msk.msra.mxu1 %vm432_vm1, %v1718_v20  ;;  %v19198_v19 = vld [vmem:[%s28185_s2 + $0x1f8] sm:$0xff]  ;;  %v19199_v20 = vld [vmem:[%s28185_s2 + $0x200] sm:$0xff] }
 0x10a   : > { %19171 = vmatprep.subr.msk.mxu0 %vm432_vm1, %v2069_v21  ;;  %19183 = vmatprep.subr.msk.mxu1 %vm432_vm1, %v2071_v22  ;;  %v19200_v21 = vld [vmem:[%s28185_s2 + $0x208] sm:$0xff]  ;;  %v19201_v22 = vld [vmem:[%s28185_s2 + $0x210] sm:$0xff] }
 0x10b   : > { %19106 = vmatmul.mubr.msk.f32.gmra.mrb[2].mxu0 %vm401_vm2, %v19094_v23  ;;  %19118 = vmatmul.mubr.msk.f32.gmra.mrb[2].mxu1 %vm401_vm2, %v19094_v23  ;;  %v19202_v23 = vld [vmem:[%s28185_s2 + $0x218] sm:$0xff] }
 0x10c   : > { %1482 = vmatprep.mubr.f32.mxu0 %v28232_v0  ;;  %1607 = vmatprep.mubr.f32.mxu1 %v28232_v0 }
 0x10f   : > { %19107 = vmatmul.mubr.msk.f32.gmra.mrb[4].mxu0 %vm401_vm2, %v19095_v24  ;;  %19119 = vmatmul.mubr.msk.f32.gmra.mrb[4].mxu1 %vm401_vm2, %v19095_v24  ;;  %v23703_v24 = vld [vmem:[%s22954_s18 + $0x8] sm:$0xff] }
 0x110   : > { %1488 = vmatprep.mubr.f32.mxu0 %v28232_v0  ;;  %1613 = vmatprep.mubr.f32.mxu1 %v28232_v0 }
 0x111   : > { %4866 = vrot.lane.b32.xlu0 %v23703_v24, %s28194_s16  ;;  %s28196_s16 = smov 126  }
 0x112   : > { %5216 = vrot.lane.b32.xlu1 %v22968_v4, %s28196_s16 }
 0x113   : > { %19108 = vmatmul.mubr.msk.f32.gmra.mrb[6].mxu0 %vm401_vm2, %v19096_v25  ;;  %19120 = vmatmul.mubr.msk.f32.gmra.mrb[6].mxu1 %vm401_vm2, %v19096_v25  ;;  %v23716_v25 = vpop.permute.xlu0 %3467 }
 0x114   : > { %1494 = vmatprep.mubr.f32.mxu0 %v28232_v0  ;;  %1619 = vmatprep.mubr.f32.mxu1 %v28232_v0 }
 0x116   : > { %5220 = vrot.lane.b32.xlu1 %v22964_v3, %s28196_s16 }
 0x117   : > { %19109 = vmatmul.mubr.msk.f32.gmra.mrb[8].mxu0 %vm401_vm2, %v19097_v26  ;;  %19121 = vmatmul.mubr.msk.f32.gmra.mrb[8].mxu1 %vm401_vm2, %v19097_v26  ;;  %v23718_v26 = vpop.permute.xlu1 %3469 }
 0x118   : > { %1500 = vmatprep.mubr.f32.mxu0 %v28232_v0  ;;  %1625 = vmatprep.mubr.f32.mxu1 %v28232_v0  ;;  %v3476_v50 = vsel %vm3475_vm11, %v23716_v25, %v23718_v26 }
 0x11b   : > { %19110 = vmatmul.mubr.msk.f32.gmra.mrb[10].mxu0 %vm401_vm2, %v19098_v27  ;;  %19122 = vmatmul.mubr.msk.f32.gmra.mrb[10].mxu1 %vm401_vm2, %v19098_v27  ;;  %v19204_v27 = vld [vmem:[%s28185_s2 + $0x228] sm:$0xff] }
 0x11c   : > { %1506 = vmatprep.mubr.f32.mxu0 %v28232_v0  ;;  %1631 = vmatprep.mubr.f32.mxu1 %v28232_v0 }
 0x11f   : > { %19111 = vmatmul.mubr.msk.f32.gmra.mrb[12].mxu0 %vm401_vm2, %v19099_v28  ;;  %19123 = vmatmul.mubr.msk.f32.gmra.mrb[12].mxu1 %vm401_vm2, %v19099_v28  ;;  %v19229_v28 = vld [vmem:[%s28185_s2 + $0x230] sm:$0xff] }
 0x120   : > { %1512 = vmatprep.mubr.f32.mxu0 %v28232_v0  ;;  %1637 = vmatprep.mubr.f32.mxu1 %v28232_v0 }
 0x123   : > { %19112 = vmatmul.mubr.msk.f32.gmra.mrb[14].mxu0 %vm401_vm2, %v19100_v29  ;;  %19124 = vmatmul.mubr.msk.f32.gmra.mrb[14].mxu1 %vm401_vm2, %v19100_v29  ;;  %v23734_v29 = vpop.permute.xlu0 %3471 }
 0x124   : > { %1518 = vmatprep.mubr.f32.mxu0 %v28232_v0  ;;  %1643 = vmatprep.mubr.f32.mxu1 %v28232_v0 }
 0x127   : > { %19113 = vmatmul.mubr.msk.f32.gmra.mrb[16].mxu0 %vm401_vm2, %v19101_v30  ;;  %19125 = vmatmul.mubr.msk.f32.gmra.mrb[16].mxu1 %vm401_vm2, %v19101_v30  ;;  %v23736_v30 = vpop.permute.xlu1 %3473 }
 0x128   : > { %1524 = vmatprep.mubr.f32.mxu0 %v28232_v0  ;;  %1649 = vmatprep.mubr.f32.mxu1 %v28232_v0 }
 0x12b   : > { %19114 = vmatmul.mubr.msk.f32.gmra.mrb[18].mxu0 %vm401_vm2, %v19102_v33  ;;  %19126 = vmatmul.mubr.msk.f32.gmra.mrb[18].mxu1 %vm401_vm2, %v19102_v33  ;;  %v3477_v33 = vsel %vm3475_vm11, %v23718_v26, %v23734_v29  ;;  %v19334_v26 = vld [vmem:[%s28185_s2 + $0x338] sm:$0xff] }
 0x12c   : > { %1822 = vmatprep.mubr.f32.mxu0 %v28232_v0  ;;  %1947 = vmatprep.mubr.f32.mxu1 %v28232_v0 }
 0x12f   : > { %19139 = vmatmul.mubr.msk.f32.vlgmr.msra.gmra.mrb[0].mxu0 %vm401_vm2, %v19127_v34  ;;  %19151 = vmatmul.mubr.msk.f32.vlgmr.msra.gmra.mrb[0].mxu1 %vm401_vm2, %v19127_v34  ;;  %v3479_v34 = vsel %vm3475_vm11, %v23736_v30, %v23716_v25  ;;  %v19333_v25 = vld [vmem:[%s28185_s2 + $0x330] sm:$0xff] }
 0x130   : > { %1828 = vmatprep.mubr.f32.mxu0 %v28232_v0  ;;  %1953 = vmatprep.mubr.f32.mxu1 %v28232_v0 }
 0x131   : > { %19172 = vmatpush1.msk.msra.mxu0 %vm432_vm1, %v2068_v37  ;;  %19184 = vmatpush1.msk.msra.mxu1 %vm432_vm1, %v2070_v38  ;;  %v19232_v37 = vld [vmem:[%s28185_s2 + $0x248] sm:$0xff]  ;;  %v19233_v38 = vld [vmem:[%s28185_s2 + $0x250] sm:$0xff] }
 0x132   : > { %19205 = vmatprep.subr.msk.mxu0 %vm432_vm1, %v2421_v39  ;;  %19217 = vmatprep.subr.msk.mxu1 %vm432_vm1, %v2423_v40  ;;  %v19234_v39 = vld [vmem:[%s28185_s2 + $0x258] sm:$0xff]  ;;  %v19235_v40 = vld [vmem:[%s28185_s2 + $0x260] sm:$0xff] }
 0x133   : > { %19140 = vmatmul.mubr.msk.f32.gmra.mrb[2].mxu0 %vm401_vm2, %v19128_v41  ;;  %19152 = vmatmul.mubr.msk.f32.gmra.mrb[2].mxu1 %vm401_vm2, %v19128_v41  ;;  %v23797_v41 = vld [vmem:[%s22954_s18] sm:$0xff] }
 0x134   : > { %1834 = vmatprep.mubr.f32.mxu0 %v28232_v0  ;;  %1959 = vmatprep.mubr.f32.mxu1 %v28232_v0 }
 0x135   : > { %5214 = vrot.lane.b32.xlu0 %v23797_v41, %s28196_s16 }
 0x137   : > { %19141 = vmatmul.mubr.msk.f32.gmra.mrb[4].mxu0 %vm401_vm2, %v19129_v42  ;;  %19153 = vmatmul.mubr.msk.f32.gmra.mrb[4].mxu1 %vm401_vm2, %v19129_v42  ;;  %v19236_v42 = vld [vmem:[%s28185_s2 + $0x268] sm:$0xff] }
 0x138   : > { %1840 = vmatprep.mubr.f32.mxu0 %v28232_v0  ;;  %1965 = vmatprep.mubr.f32.mxu1 %v28232_v0 }
 0x139   : > { %5218 = vrot.lane.b32.xlu0 %v23703_v24, %s28196_s16  ;;  %s28198_s16 = smov 110  }
 0x13a   : > { %5568 = vrot.lane.b32.xlu1 %v22968_v4, %s28198_s16 }
 0x13b   : > { %19142 = vmatmul.mubr.msk.f32.gmra.mrb[6].mxu0 %vm401_vm2, %v19130_v43  ;;  %19154 = vmatmul.mubr.msk.f32.gmra.mrb[6].mxu1 %vm401_vm2, %v19130_v43  ;;  %v19237_v43 = vld [vmem:[%s28185_s2 + $0x270] sm:$0xff] }
 0x13c   : > { %1846 = vmatprep.mubr.f32.mxu0 %v28232_v0  ;;  %1971 = vmatprep.mubr.f32.mxu1 %v28232_v0 }
 0x13d   : > { %5566 = vrot.lane.b32.xlu0 %v23797_v41, %s28198_s16 }
 0x13e   : > { %5572 = vrot.lane.b32.xlu1 %v22964_v3, %s28198_s16 }
 0x13f   : > { %19143 = vmatmul.mubr.msk.f32.gmra.mrb[8].mxu0 %vm401_vm2, %v19131_v44  ;;  %19155 = vmatmul.mubr.msk.f32.gmra.mrb[8].mxu1 %vm401_vm2, %v19131_v44  ;;  %v23821_v44 = vpop.permute.xlu0 %3819 }
 0x140   : > { %1852 = vmatprep.mubr.f32.mxu0 %v28232_v0  ;;  %1977 = vmatprep.mubr.f32.mxu1 %v28232_v0 }
 0x141   : > { %5570 = vrot.lane.b32.xlu0 %v23703_v24, %s28198_s16  ;;  %s28200_s16 = smov 109  }
 0x142   : > { %5920 = vrot.lane.b32.xlu1 %v22968_v4, %s28200_s16 }
 0x143   : > { %19144 = vmatmul.mubr.msk.f32.gmra.mrb[10].mxu0 %vm401_vm2, %v19132_v45  ;;  %19156 = vmatmul.mubr.msk.f32.gmra.mrb[10].mxu1 %vm401_vm2, %v19132_v45  ;;  %v23823_v45 = vpop.permute.xlu1 %3821 }
 0x144   : > { %1858 = vmatprep.mubr.f32.mxu0 %v28232_v0  ;;  %1983 = vmatprep.mubr.f32.mxu1 %v28232_v0  ;;  %v3828_v8 = vsel %vm3827_vm12, %v23821_v44, %v23823_v45 }
 0x145   : > { %5918 = vrot.lane.b32.xlu0 %v23797_v41, %s28200_s16 }
 0x146   : > { %5924 = vrot.lane.b32.xlu1 %v22964_v3, %s28200_s16 }
 0x147   : > { %19145 = vmatmul.mubr.msk.f32.gmra.mrb[12].mxu0 %vm401_vm2, %v19133_v46  ;;  %19157 = vmatmul.mubr.msk.f32.gmra.mrb[12].mxu1 %vm401_vm2, %v19133_v46  ;;  %v19238_v46 = vld [vmem:[%s28185_s2 + $0x278] sm:$0xff]  ;;  %v23841_v49 = vpop.permute.xlu1 %3825 }
 0x148   : > { %1864 = vmatprep.mubr.f32.mxu0 %v28232_v0  ;;  %1989 = vmatprep.mubr.f32.mxu1 %v28232_v0  ;;  %v3831_v52 = vsel %vm3827_vm12, %v23841_v49, %v23821_v44  ;;  %v19369_v44 = vld [vmem:[%s28185_s2 + $0x390] sm:$0xff] }
 0x149   : > { %5922 = vrot.lane.b32.xlu0 %v23703_v24, %s28200_s16  ;;  %s28202_s16 = smov 108  }
 0x14a   : > { %6272 = vrot.lane.b32.xlu1 %v22968_v4, %s28202_s16 }
 0x14b   : > { %19146 = vmatmul.mubr.msk.f32.gmra.mrb[14].mxu0 %vm401_vm2, %v19134_v47  ;;  %19158 = vmatmul.mubr.msk.f32.gmra.mrb[14].mxu1 %vm401_vm2, %v19134_v47  ;;  %v19263_v47 = vld [vmem:[%s28185_s2 + $0x280] sm:$0xff] }
 0x14c   : > { %1870 = vmatprep.mubr.f32.mxu0 %v28232_v0  ;;  %1995 = vmatprep.mubr.f32.mxu1 %v28232_v0 }
 0x14d   : > { %6270 = vrot.lane.b32.xlu0 %v23797_v41, %s28202_s16 }
 0x14e   : > { %6276 = vrot.lane.b32.xlu1 %v22964_v3, %s28202_s16 }
 0x14f   : > { %19147 = vmatmul.mubr.msk.f32.gmra.mrb[16].mxu0 %vm401_vm2, %v19135_v48  ;;  %19159 = vmatmul.mubr.msk.f32.gmra.mrb[16].mxu1 %vm401_vm2, %v19135_v48  ;;  %v23839_v48 = vpop.permute.xlu0 %3823 }
 0x150   : > { %1876 = vmatprep.mubr.f32.mxu0 %v28232_v0  ;;  %2001 = vmatprep.mubr.f32.mxu1 %v28232_v0 }
 0x151   : > { %6274 = vrot.lane.b32.xlu0 %v23703_v24, %s28202_s16  ;;  %s28204_s16 = smov 107  }
 0x152   : > { %6624 = vrot.lane.b32.xlu1 %v22968_v4, %s28204_s16 }
 0x153   : > { %19148 = vmatmul.mubr.msk.f32.gmra.mrb[18].mxu0 %vm401_vm2, %v19136_v1  ;;  %19160 = vmatmul.mubr.msk.f32.gmra.mrb[18].mxu1 %vm401_vm2, %v19136_v1  ;;  %v3478_v1 = vsel %vm3475_vm11, %v23734_v29, %v23736_v30  ;;  %v19337_v29 = vld [vmem:[%s28185_s2 + $0x350] sm:$0xff]  ;;  %v19338_v30 = vld [vmem:[%s28185_s2 + $0x358] sm:$0xff] }
 0x154   : > { %2174 = vmatprep.mubr.f32.mxu0 %v28232_v0  ;;  %2299 = vmatprep.mubr.f32.mxu1 %v28232_v0 }
 0x155   : > { %6622 = vrot.lane.b32.xlu0 %v23797_v41, %s28204_s16 }
 0x156   : > { %6628 = vrot.lane.b32.xlu1 %v22964_v3, %s28204_s16 }
 0x157   : > { %19173 = vmatmul.mubr.msk.f32.vlgmr.msra.gmra.mrb[0].mxu0 %vm401_vm2, %v19161_v51  ;;  %19185 = vmatmul.mubr.msk.f32.vlgmr.msra.gmra.mrb[0].mxu1 %vm401_vm2, %v19161_v51  ;;  %v3829_v51 = vsel %vm3827_vm12, %v23823_v45, %v23839_v48  ;;  %v19370_v45 = vld [vmem:[%s28185_s2 + $0x398] sm:$0xff] }
 0x158   : > { %2180 = vmatprep.mubr.f32.mxu0 %v28232_v0  ;;  %2305 = vmatprep.mubr.f32.mxu1 %v28232_v0 }
 0x159   : > { %19206 = vmatpush1.msk.msra.mxu0 %vm432_vm1, %v2420_v54  ;;  %19218 = vmatpush1.msk.msra.mxu1 %vm432_vm1, %v2422_v55  ;;  %v19265_v54 = vld [vmem:[%s28185_s2 + $0x290] sm:$0xff]  ;;  %v19266_v55 = vld [vmem:[%s28185_s2 + $0x298] sm:$0xff] }
 0x15a   : > { %19239 = vmatprep.subr.msk.mxu0 %vm432_vm1, %v2773_v56  ;;  %19251 = vmatprep.subr.msk.mxu1 %vm432_vm1, %v2775_v57  ;;  %v19267_v56 = vld [vmem:[%s28185_s2 + $0x2a0] sm:$0xff]  ;;  %v19268_v57 = vld [vmem:[%s28185_s2 + $0x2a8] sm:$0xff] }
 0x15b   : > { %19174 = vmatmul.mubr.msk.f32.gmra.mrb[2].mxu0 %vm401_vm2, %v19162_v58  ;;  %19186 = vmatmul.mubr.msk.f32.gmra.mrb[2].mxu1 %vm401_vm2, %v19162_v58  ;;  %v19269_v58 = vld [vmem:[%s28185_s2 + $0x2b0] sm:$0xff] }
 0x15c   : > { %2186 = vmatprep.mubr.f32.mxu0 %v28232_v0  ;;  %2311 = vmatprep.mubr.f32.mxu1 %v28232_v0 }
 0x15d   : > { %6626 = vrot.lane.b32.xlu0 %v23703_v24, %s28204_s16  ;;  %s28207_s16 = smov 106  }
 0x15e   : > { %6976 = vrot.lane.b32.xlu1 %v22968_v4, %s28207_s16 }
 0x15f   : > { %19175 = vmatmul.mubr.msk.f32.gmra.mrb[4].mxu0 %vm401_vm2, %v19163_v59  ;;  %19187 = vmatmul.mubr.msk.f32.gmra.mrb[4].mxu1 %vm401_vm2, %v19163_v59  ;;  %v19270_v59 = vld [vmem:[%s28185_s2 + $0x2b8] sm:$0xff] }
 0x160   : > { %2192 = vmatprep.mubr.f32.mxu0 %v28232_v0  ;;  %2317 = vmatprep.mubr.f32.mxu1 %v28232_v0 }
 0x161   : > { %6974 = vrot.lane.b32.xlu0 %v23797_v41, %s28207_s16 }
 0x162   : > { %6980 = vrot.lane.b32.xlu1 %v22964_v3, %s28207_s16 }
 0x163   : > { %19176 = vmatmul.mubr.msk.f32.gmra.mrb[6].mxu0 %vm401_vm2, %v19164_v60  ;;  %19188 = vmatmul.mubr.msk.f32.gmra.mrb[6].mxu1 %vm401_vm2, %v19164_v60  ;;  %v19271_v60 = vld [vmem:[%s28185_s2 + $0x2c0] sm:$0xff] }
 0x164   : > { %2198 = vmatprep.mubr.f32.mxu0 %v28232_v0  ;;  %2323 = vmatprep.mubr.f32.mxu1 %v28232_v0 }
 0x165   : > { %6978 = vrot.lane.b32.xlu0 %v23703_v24, %s28207_s16  ;;  %s28210_s16 = smov 90  }
 0x166   : > { %7328 = vrot.lane.b32.xlu1 %v22968_v4, %s28210_s16 }
 0x167   : > { %19177 = vmatmul.mubr.msk.f32.gmra.mrb[8].mxu0 %vm401_vm2, %v19165_v61  ;;  %19189 = vmatmul.mubr.msk.f32.gmra.mrb[8].mxu1 %vm401_vm2, %v19165_v61  ;;  %v23923_v61 = vpop.permute.xlu0 %4171 }
 0x168   : > { %2204 = vmatprep.mubr.f32.mxu0 %v28232_v0  ;;  %2329 = vmatprep.mubr.f32.mxu1 %v28232_v0 }
 0x169   : > { %7326 = vrot.lane.b32.xlu0 %v23797_v41, %s28210_s16 }
 0x16a   : > { %7332 = vrot.lane.b32.xlu1 %v22964_v3, %s28210_s16 }
 0x16b   : > { %19178 = vmatmul.mubr.msk.f32.gmra.mrb[10].mxu0 %vm401_vm2, %v19166_v62  ;;  %19190 = vmatmul.mubr.msk.f32.gmra.mrb[10].mxu1 %vm401_vm2, %v19166_v62  ;;  %v23925_v62 = vpop.permute.xlu1 %4173 }
 0x16c   : > { %2210 = vmatprep.mubr.f32.mxu0 %v28232_v0  ;;  %2335 = vmatprep.mubr.f32.mxu1 %v28232_v0 }
 0x16d   : > { %7330 = vrot.lane.b32.xlu0 %v23703_v24, %s28210_s16  ;;  %s28213_s16 = smov 89  }
 0x16e   : > { %7680 = vrot.lane.b32.xlu1 %v22968_v4, %s28213_s16 }
 0x16f   : > { %19179 = vmatmul.mubr.msk.f32.gmra.mrb[12].mxu0 %vm401_vm2, %v19167_v63  ;;  %19191 = vmatmul.mubr.msk.f32.gmra.mrb[12].mxu1 %vm401_vm2, %v19167_v63  ;;  %v19272_v63 = vld [vmem:[%s28185_s2 + $0x2c8] sm:$0xff]  ;;  %v23943_v7 = vpop.permute.xlu1 %4177 }
 0x170   : > { %2216 = vmatprep.mubr.f32.mxu0 %v28232_v0  ;;  %2341 = vmatprep.mubr.f32.mxu1 %v28232_v0  ;;  %v4183_v11 = vsel %vm4179_vm13, %v23943_v7, %v23923_v61 }
 0x171   : > { %7678 = vrot.lane.b32.xlu0 %v23797_v41, %s28213_s16 }
 0x172   : > { %7684 = vrot.lane.b32.xlu1 %v22964_v3, %s28213_s16 }
 0x173   : > { %19180 = vmatmul.mubr.msk.f32.gmra.mrb[14].mxu0 %vm401_vm2, %v19168_v5  ;;  %19192 = vmatmul.mubr.msk.f32.gmra.mrb[14].mxu1 %vm401_vm2, %v19168_v5  ;;  %v19297_v5 = vld [vmem:[%s28185_s2 + $0x2d0] sm:$0xff] }
 0x174   : > { %2222 = vmatprep.mubr.f32.mxu0 %v28232_v0  ;;  %2347 = vmatprep.mubr.f32.mxu1 %v28232_v0 }
 0x177   : > { %19181 = vmatmul.mubr.msk.f32.gmra.mrb[16].mxu0 %vm401_vm2, %v19169_v6  ;;  %19193 = vmatmul.mubr.msk.f32.gmra.mrb[16].mxu1 %vm401_vm2, %v19169_v6  ;;  %v23941_v6 = vpop.permute.xlu0 %4175 }
 0x178   : > { %2228 = vmatprep.mubr.f32.mxu0 %v28232_v0  ;;  %2353 = vmatprep.mubr.f32.mxu1 %v28232_v0 }
 0x17b   : > { %19182 = vmatmul.mubr.msk.f32.gmra.mrb[18].mxu0 %vm401_vm2, %v19170_v9  ;;  %19194 = vmatmul.mubr.msk.f32.gmra.mrb[18].mxu1 %vm401_vm2, %v19170_v9  ;;  %v3830_v9 = vsel %vm3827_vm12, %v23839_v48, %v23841_v49  ;;  %v19373_v48 = vld [vmem:[%s28185_s2 + $0x3b0] sm:$0xff] }
 0x17c   : > { %2526 = vmatprep.mubr.f32.mxu0 %v28232_v0  ;;  %2651 = vmatprep.mubr.f32.mxu1 %v28232_v0 }
 0x17f   : > { %19207 = vmatmul.mubr.msk.f32.vlgmr.msra.gmra.mrb[0].mxu0 %vm401_vm2, %v19195_v10  ;;  %19219 = vmatmul.mubr.msk.f32.vlgmr.msra.gmra.mrb[0].mxu1 %vm401_vm2, %v19195_v10  ;;  %v4181_v10 = vsel %vm4179_vm13, %v23925_v62, %v23941_v6 }
 0x180   : > { %2532 = vmatprep.mubr.f32.mxu0 %v28232_v0  ;;  %2657 = vmatprep.mubr.f32.mxu1 %v28232_v0 }
 0x181   : > { %19240 = vmatpush1.msk.msra.mxu0 %vm432_vm1, %v2772_v13  ;;  %19252 = vmatpush1.msk.msra.mxu1 %vm432_vm1, %v2774_v14  ;;  %v19299_v13 = vld [vmem:[%s28185_s2 + $0x2e0] sm:$0xff]  ;;  %v19300_v14 = vld [vmem:[%s28185_s2 + $0x2e8] sm:$0xff] }
 0x182   : > { %19273 = vmatprep.subr.msk.mxu0 %vm432_vm1, %v3125_v15  ;;  %19285 = vmatprep.subr.msk.mxu1 %vm432_vm1, %v3127_v16  ;;  %v19301_v15 = vld [vmem:[%s28185_s2 + $0x2f0] sm:$0xff]  ;;  %v19302_v16 = vld [vmem:[%s28185_s2 + $0x2f8] sm:$0xff] }
 0x183   : > { %19208 = vmatmul.mubr.msk.f32.gmra.mrb[2].mxu0 %vm401_vm2, %v19196_v17  ;;  %19220 = vmatmul.mubr.msk.f32.gmra.mrb[2].mxu1 %vm401_vm2, %v19196_v17  ;;  %v19303_v17 = vld [vmem:[%s28185_s2 + $0x300] sm:$0xff] }
 0x184   : > { %2538 = vmatprep.mubr.f32.mxu0 %v28232_v0  ;;  %2663 = vmatprep.mubr.f32.mxu1 %v28232_v0 }
 0x187   : > { %19209 = vmatmul.mubr.msk.f32.gmra.mrb[4].mxu0 %vm401_vm2, %v19197_v18  ;;  %19221 = vmatmul.mubr.msk.f32.gmra.mrb[4].mxu1 %vm401_vm2, %v19197_v18  ;;  %v19304_v18 = vld [vmem:[%s28185_s2 + $0x308] sm:$0xff] }
 0x188   : > { %2544 = vmatprep.mubr.f32.mxu0 %v28232_v0  ;;  %2669 = vmatprep.mubr.f32.mxu1 %v28232_v0 }
 0x18b   : > { %19210 = vmatmul.mubr.msk.f32.gmra.mrb[6].mxu0 %vm401_vm2, %v19198_v19  ;;  %19222 = vmatmul.mubr.msk.f32.gmra.mrb[6].mxu1 %vm401_vm2, %v19198_v19  ;;  %v19305_v19 = vld [vmem:[%s28185_s2 + $0x310] sm:$0xff] }
 0x18c   : > { %2550 = vmatprep.mubr.f32.mxu0 %v28232_v0  ;;  %2675 = vmatprep.mubr.f32.mxu1 %v28232_v0 }
 0x18f   : > { %19211 = vmatmul.mubr.msk.f32.gmra.mrb[8].mxu0 %vm401_vm2, %v19199_v20  ;;  %19223 = vmatmul.mubr.msk.f32.gmra.mrb[8].mxu1 %vm401_vm2, %v19199_v20  ;;  %v19306_v20 = vld [vmem:[%s28185_s2 + $0x318] sm:$0xff] }
 0x190   : > { %2556 = vmatprep.mubr.f32.mxu0 %v28232_v0  ;;  %2681 = vmatprep.mubr.f32.mxu1 %v28232_v0 }
 0x193   : > { %19212 = vmatmul.mubr.msk.f32.gmra.mrb[10].mxu0 %vm401_vm2, %v19200_v21  ;;  %19224 = vmatmul.mubr.msk.f32.gmra.mrb[10].mxu1 %vm401_vm2, %v19200_v21  ;;  %v19331_v21 = vld [vmem:[%s28185_s2 + $0x320] sm:$0xff] }
 0x194   : > { %2562 = vmatprep.mubr.f32.mxu0 %v28232_v0  ;;  %2687 = vmatprep.mubr.f32.mxu1 %v28232_v0 }
 0x197   : > { %19213 = vmatmul.mubr.msk.f32.gmra.mrb[12].mxu0 %vm401_vm2, %v19201_v22  ;;  %19225 = vmatmul.mubr.msk.f32.gmra.mrb[12].mxu1 %vm401_vm2, %v19201_v22  ;;  %v4180_v22 = vsel %vm4179_vm13, %v23923_v61, %v23925_v62  ;;  %v19403_v61 = vld [vmem:[%s28185_s2 + $0x3e0] sm:$0xff]  ;;  %v19404_v62 = vld [vmem:[%s28185_s2 + $0x3e8] sm:$0xff] }
 0x198   : > { %2568 = vmatprep.mubr.f32.mxu0 %v28232_v0  ;;  %2693 = vmatprep.mubr.f32.mxu1 %v28232_v0 }
 0x19b   : > { %19214 = vmatmul.mubr.msk.f32.gmra.mrb[14].mxu0 %vm401_vm2, %v19202_v23  ;;  %19226 = vmatmul.mubr.msk.f32.gmra.mrb[14].mxu1 %vm401_vm2, %v19202_v23  ;;  %v4182_v23 = vsel %vm4179_vm13, %v23941_v6, %v23943_v7  ;;  %v19407_v6 = vld [vmem:[%s28185_s2 + $0x400] sm:$0xff] }
 0x19c   : > { %2574 = vmatprep.mubr.f32.mxu0 %v28232_v0  ;;  %2699 = vmatprep.mubr.f32.mxu1 %v28232_v0 }
 0x19f   : > { %19215 = vmatmul.mubr.msk.f32.gmra.mrb[16].mxu0 %vm401_vm2, %v19203_v2  ;;  %19227 = vmatmul.mubr.msk.f32.gmra.mrb[16].mxu1 %vm401_vm2, %v19203_v2  ;;  %v19332_v2 = vld [vmem:[%s28185_s2 + $0x328] sm:$0xff] }
 0x1a0   : > { %2580 = vmatprep.mubr.f32.mxu0 %v28232_v0  ;;  %2705 = vmatprep.mubr.f32.mxu1 %v28232_v0 }
 0x1a3   : > { %19216 = vmatmul.mubr.msk.f32.gmra.mrb[18].mxu0 %vm401_vm2, %v19204_v27  ;;  %19228 = vmatmul.mubr.msk.f32.gmra.mrb[18].mxu1 %vm401_vm2, %v19204_v27  ;;  %v19335_v27 = vld [vmem:[%s28185_s2 + $0x340] sm:$0xff] }
 0x1a4   : > { %2878 = vmatprep.mubr.f32.mxu0 %v28232_v0  ;;  %3003 = vmatprep.mubr.f32.mxu1 %v28232_v0 }
 0x1a7   : > { %19241 = vmatmul.mubr.msk.f32.vlgmr.msra.gmra.mrb[0].mxu0 %vm401_vm2, %v19229_v28  ;;  %19253 = vmatmul.mubr.msk.f32.vlgmr.msra.gmra.mrb[0].mxu1 %vm401_vm2, %v19229_v28  ;;  %v19336_v28 = vld [vmem:[%s28185_s2 + $0x348] sm:$0xff] }
 0x1a8   : > { %2884 = vmatprep.mubr.f32.mxu0 %v28232_v0  ;;  %3009 = vmatprep.mubr.f32.mxu1 %v28232_v0 }
 0x1a9   : > { %19274 = vmatpush1.msk.msra.mxu0 %vm432_vm1, %v3124_v31  ;;  %19286 = vmatpush1.msk.msra.mxu1 %vm432_vm1, %v3126_v32  ;;  %v19339_v31 = vld [vmem:[%s28185_s2 + $0x360] sm:$0xff]  ;;  %v24115_v32 = vpop.permute.xlu0 %4862 }
 0x1aa   : > { %19307 = vmatprep.subr.msk.mxu0 %vm432_vm1, %v3477_v33  ;;  %19319 = vmatprep.subr.msk.mxu1 %vm432_vm1, %v3479_v34  ;;  %v24117_v33 = vpop.permute.xlu1 %4864  ;;  %v19340_v34 = vld [vmem:[%s28185_s2 + $0x368] sm:$0xff] }
 0x1ab   : > { %19242 = vmatmul.mubr.msk.f32.gmra.mrb[2].mxu0 %vm401_vm2, %v19230_v35  ;;  %19254 = vmatmul.mubr.msk.f32.gmra.mrb[2].mxu1 %vm401_vm2, %v19230_v35  ;;  %v19365_v35 = vld [vmem:[%s28185_s2 + $0x370] sm:$0xff] }
 0x1ac   : > { %2890 = vmatprep.mubr.f32.mxu0 %v28232_v0  ;;  %3015 = vmatprep.mubr.f32.mxu1 %v28232_v0 }
 0x1af   : > { %19243 = vmatmul.mubr.msk.f32.gmra.mrb[4].mxu0 %vm401_vm2, %v19231_v36  ;;  %19255 = vmatmul.mubr.msk.f32.gmra.mrb[4].mxu1 %vm401_vm2, %v19231_v36  ;;  %v24133_v36 = vpop.permute.xlu0 %4866 }
 0x1b0   : > { %2896 = vmatprep.mubr.f32.mxu0 %v28232_v0  ;;  %3021 = vmatprep.mubr.f32.mxu1 %v28232_v0 }
 0x1b3   : > { %19244 = vmatmul.mubr.msk.f32.gmra.mrb[6].mxu0 %vm401_vm2, %v19232_v37  ;;  %19256 = vmatmul.mubr.msk.f32.gmra.mrb[6].mxu1 %vm401_vm2, %v19232_v37  ;;  %v24135_v37 = vpop.permute.xlu1 %4868  ;;  %v24213_v49 = vpop.permute.xlu0 %5214 }
 0x1b4   : > { %2902 = vmatprep.mubr.f32.mxu0 %v28232_v0  ;;  %3027 = vmatprep.mubr.f32.mxu1 %v28232_v0 }
 0x1b7   : > { %19245 = vmatmul.mubr.msk.f32.gmra.mrb[8].mxu0 %vm401_vm2, %v19233_v38  ;;  %19257 = vmatmul.mubr.msk.f32.gmra.mrb[8].mxu1 %vm401_vm2, %v19233_v38  ;;  %v4872_v38 = vsel %vm28206_vm14, %v24117_v33, %v24133_v36 }
 0x1b8   : > { %2908 = vmatprep.mubr.f32.mxu0 %v28232_v0  ;;  %3033 = vmatprep.mubr.f32.mxu1 %v28232_v0 }
 0x1bb   : > { %19246 = vmatmul.mubr.msk.f32.gmra.mrb[10].mxu0 %vm401_vm2, %v19234_v39  ;;  %19258 = vmatmul.mubr.msk.f32.gmra.mrb[10].mxu1 %vm401_vm2, %v19234_v39  ;;  %v4874_v39 = vsel %vm28206_vm14, %v24135_v37, %v24115_v32 }
 0x1bc   : > { %2914 = vmatprep.mubr.f32.mxu0 %v28232_v0  ;;  %3039 = vmatprep.mubr.f32.mxu1 %v28232_v0 }
 0x1bf   : > { %19247 = vmatmul.mubr.msk.f32.gmra.mrb[12].mxu0 %vm401_vm2, %v19235_v40  ;;  %19259 = vmatmul.mubr.msk.f32.gmra.mrb[12].mxu1 %vm401_vm2, %v19235_v40  ;;  %v19366_v40 = vld [vmem:[%s28185_s2 + $0x378] sm:$0xff] }
 0x1c0   : > { %2920 = vmatprep.mubr.f32.mxu0 %v28232_v0  ;;  %3045 = vmatprep.mubr.f32.mxu1 %v28232_v0 }
 0x1c3   : > { %19248 = vmatmul.mubr.msk.f32.gmra.mrb[14].mxu0 %vm401_vm2, %v19236_v42  ;;  %19260 = vmatmul.mubr.msk.f32.gmra.mrb[14].mxu1 %vm401_vm2, %v19236_v42  ;;  %v19367_v42 = vld [vmem:[%s28185_s2 + $0x380] sm:$0xff] }
 0x1c4   : > { %2926 = vmatprep.mubr.f32.mxu0 %v28232_v0  ;;  %3051 = vmatprep.mubr.f32.mxu1 %v28232_v0 }
 0x1c7   : > { %19249 = vmatmul.mubr.msk.f32.gmra.mrb[16].mxu0 %vm401_vm2, %v19237_v43  ;;  %19261 = vmatmul.mubr.msk.f32.gmra.mrb[16].mxu1 %vm401_vm2, %v19237_v43  ;;  %v19368_v43 = vld [vmem:[%s28185_s2 + $0x388] sm:$0xff] }
 0x1c8   : > { %2932 = vmatprep.mubr.f32.mxu0 %v28232_v0  ;;  %3057 = vmatprep.mubr.f32.mxu1 %v28232_v0 }
 0x1cb   : > { %19250 = vmatmul.mubr.msk.f32.gmra.mrb[18].mxu0 %vm401_vm2, %v19238_v46  ;;  %19262 = vmatmul.mubr.msk.f32.gmra.mrb[18].mxu1 %vm401_vm2, %v19238_v46  ;;  %v19371_v46 = vld [vmem:[%s28185_s2 + $0x3a0] sm:$0xff] }
 0x1cc   : > { %3230 = vmatprep.mubr.f32.mxu0 %v28232_v0  ;;  %3355 = vmatprep.mubr.f32.mxu1 %v28232_v0 }
 0x1cf   : > { %19275 = vmatmul.mubr.msk.f32.vlgmr.msra.gmra.mrb[0].mxu0 %vm401_vm2, %v19263_v47  ;;  %19287 = vmatmul.mubr.msk.f32.vlgmr.msra.gmra.mrb[0].mxu1 %vm401_vm2, %v19263_v47  ;;  %v19372_v47 = vld [vmem:[%s28185_s2 + $0x3a8] sm:$0xff] }
 0x1d0   : > { %3236 = vmatprep.mubr.f32.mxu0 %v28232_v0  ;;  %3361 = vmatprep.mubr.f32.mxu1 %v28232_v0 }
 0x1d1   : > { %19308 = vmatpush1.msk.msra.mxu0 %vm432_vm1, %v3476_v50  ;;  %19320 = vmatpush1.msk.msra.mxu1 %vm432_vm1, %v3478_v1  ;;  %v24215_v50 = vpop.permute.xlu1 %5216  ;;  %v19374_v1 = vld [vmem:[%s28185_s2 + $0x3b8] sm:$0xff] }
 0x1d2   : > { %19341 = vmatprep.subr.msk.mxu0 %vm432_vm1, %v3829_v51  ;;  %19353 = vmatprep.subr.msk.mxu1 %vm432_vm1, %v3831_v52  ;;  %v19399_v51 = vld [vmem:[%s28185_s2 + $0x3c0] sm:$0xff]  ;;  %v24231_v52 = vpop.permute.xlu0 %5218 }
 0x1d3   : > { %19276 = vmatmul.mubr.msk.f32.gmra.mrb[2].mxu0 %vm401_vm2, %v19264_v53  ;;  %19288 = vmatmul.mubr.msk.f32.gmra.mrb[2].mxu1 %vm401_vm2, %v19264_v53 }
 0x1d4   : > { %3242 = vmatprep.mubr.f32.mxu0 %v28232_v0  ;;  %3367 = vmatprep.mubr.f32.mxu1 %v28232_v0 }
 0x1d5   : > { %v24233_v53 = vpop.permute.xlu1 %5220 }
 0x1d6   : > { %v24315_v7 = vpop.permute.xlu0 %5566 }
 0x1d7   : > { %19277 = vmatmul.mubr.msk.f32.gmra.mrb[4].mxu0 %vm401_vm2, %v19265_v54  ;;  %19289 = vmatmul.mubr.msk.f32.gmra.mrb[4].mxu1 %vm401_vm2, %v19265_v54  ;;  %v4871_v54 = vsel %vm28206_vm14, %v24115_v32, %v24117_v33 }
 0x1d8   : > { %3248 = vmatprep.mubr.f32.mxu0 %v28232_v0  ;;  %3373 = vmatprep.mubr.f32.mxu1 %v28232_v0 }
 0x1db   : > { %19278 = vmatmul.mubr.msk.f32.gmra.mrb[6].mxu0 %vm401_vm2, %v19266_v55  ;;  %19290 = vmatmul.mubr.msk.f32.gmra.mrb[6].mxu1 %vm401_vm2, %v19266_v55  ;;  %v4873_v55 = vsel %vm28206_vm14, %v24133_v36, %v24135_v37  ;;  %vm28212_vm14 = vcmask 900096   ;;  %v19470_v36 = vld [vmem:[%s28185_s2 + $0x478] sm:$0xff]  ;;  %v19471_v37 = vld [vmem:[%s28185_s2 + $0x480] sm:$0xff] }
 0x1dc   : > { %3254 = vmatprep.mubr.f32.mxu0 %v28232_v0  ;;  %3379 = vmatprep.mubr.f32.mxu1 %v28232_v0 }
 0x1df   : > { %19279 = vmatmul.mubr.msk.f32.gmra.mrb[8].mxu0 %vm401_vm2, %v19267_v56  ;;  %19291 = vmatmul.mubr.msk.f32.gmra.mrb[8].mxu1 %vm401_vm2, %v19267_v56  ;;  %v5224_v56 = vsel %vm28209_vm15, %v24215_v50, %v24231_v52 }
 0x1e0   : > { %3260 = vmatprep.mubr.f32.mxu0 %v28232_v0  ;;  %3385 = vmatprep.mubr.f32.mxu1 %v28232_v0 }
 0x1e3   : > { %19280 = vmatmul.mubr.msk.f32.gmra.mrb[10].mxu0 %vm401_vm2, %v19268_v57  ;;  %19292 = vmatmul.mubr.msk.f32.gmra.mrb[10].mxu1 %vm401_vm2, %v19268_v57  ;;  %v5226_v57 = vsel %vm28209_vm15, %v24233_v53, %v24213_v49 }
 0x1e4   : > { %3266 = vmatprep.mubr.f32.mxu0 %v28232_v0  ;;  %3391 = vmatprep.mubr.f32.mxu1 %v28232_v0 }
 0x1e7   : > { %19281 = vmatmul.mubr.msk.f32.gmra.mrb[12].mxu0 %vm401_vm2, %v19269_v58  ;;  %19293 = vmatmul.mubr.msk.f32.gmra.mrb[12].mxu1 %vm401_vm2, %v19269_v58  ;;  %v19400_v58 = vld [vmem:[%s28185_s2 + $0x3c8] sm:$0xff] }
 0x1e8   : > { %3272 = vmatprep.mubr.f32.mxu0 %v28232_v0  ;;  %3397 = vmatprep.mubr.f32.mxu1 %v28232_v0 }
 0x1eb   : > { %19282 = vmatmul.mubr.msk.f32.gmra.mrb[14].mxu0 %vm401_vm2, %v19270_v59  ;;  %19294 = vmatmul.mubr.msk.f32.gmra.mrb[14].mxu1 %vm401_vm2, %v19270_v59  ;;  %v19401_v59 = vld [vmem:[%s28185_s2 + $0x3d0] sm:$0xff] }
 0x1ec   : > { %3278 = vmatprep.mubr.f32.mxu0 %v28232_v0  ;;  %3403 = vmatprep.mubr.f32.mxu1 %v28232_v0 }
 0x1ef   : > { %19283 = vmatmul.mubr.msk.f32.gmra.mrb[16].mxu0 %vm401_vm2, %v19271_v60  ;;  %19295 = vmatmul.mubr.msk.f32.gmra.mrb[16].mxu1 %vm401_vm2, %v19271_v60  ;;  %v19402_v60 = vld [vmem:[%s28185_s2 + $0x3d8] sm:$0xff] }
 0x1f0   : > { %3284 = vmatprep.mubr.f32.mxu0 %v28232_v0  ;;  %3409 = vmatprep.mubr.f32.mxu1 %v28232_v0 }
 0x1f3   : > { %19284 = vmatmul.mubr.msk.f32.gmra.mrb[18].mxu0 %vm401_vm2, %v19272_v63  ;;  %19296 = vmatmul.mubr.msk.f32.gmra.mrb[18].mxu1 %vm401_vm2, %v19272_v63  ;;  %v19405_v63 = vld [vmem:[%s28185_s2 + $0x3f0] sm:$0xff] }
 0x1f4   : > { %3582 = vmatprep.mubr.f32.mxu0 %v28232_v0  ;;  %3707 = vmatprep.mubr.f32.mxu1 %v28232_v0 }
 0x1f7   : > { %19309 = vmatmul.mubr.msk.f32.vlgmr.msra.gmra.mrb[0].mxu0 %vm401_vm2, %v19297_v5  ;;  %19321 = vmatmul.mubr.msk.f32.vlgmr.msra.gmra.mrb[0].mxu1 %vm401_vm2, %v19297_v5  ;;  %v19406_v5 = vld [vmem:[%s28185_s2 + $0x3f8] sm:$0xff] }
 0x1f8   : > { %3588 = vmatprep.mubr.f32.mxu0 %v28232_v0  ;;  %3713 = vmatprep.mubr.f32.mxu1 %v28232_v0 }
 0x1f9   : > { %19342 = vmatpush1.msk.msra.mxu0 %vm432_vm1, %v3828_v8  ;;  %19354 = vmatpush1.msk.msra.mxu1 %vm432_vm1, %v3830_v9  ;;  %v24317_v8 = vpop.permute.xlu1 %5568  ;;  %v19408_v9 = vld [vmem:[%s28185_s2 + $0x408] sm:$0xff] }
 0x1fa   : > { %19375 = vmatprep.subr.msk.mxu0 %vm432_vm1, %v4181_v10  ;;  %19387 = vmatprep.subr.msk.mxu1 %vm432_vm1, %v4183_v11  ;;  %v19433_v10 = vld [vmem:[%s28185_s2 + $0x410] sm:$0xff]  ;;  %v24333_v11 = vpop.permute.xlu0 %5570 }
 0x1fb   : > { %19310 = vmatmul.mubr.msk.f32.gmra.mrb[2].mxu0 %vm401_vm2, %v19298_v12  ;;  %19322 = vmatmul.mubr.msk.f32.gmra.mrb[2].mxu1 %vm401_vm2, %v19298_v12 }
 0x1fc   : > { %3594 = vmatprep.mubr.f32.mxu0 %v28232_v0  ;;  %3719 = vmatprep.mubr.f32.mxu1 %v28232_v0 }
 0x1fd   : > { %v24335_v12 = vpop.permute.xlu1 %5572 }
 0x1ff   : > { %19311 = vmatmul.mubr.msk.f32.gmra.mrb[4].mxu0 %vm401_vm2, %v19299_v13  ;;  %19323 = vmatmul.mubr.msk.f32.gmra.mrb[4].mxu1 %vm401_vm2, %v19299_v13  ;;  %v5223_v13 = vsel %vm28209_vm15, %v24213_v49, %v24215_v50 }
 0x200   : > { %3600 = vmatprep.mubr.f32.mxu0 %v28232_v0  ;;  %3725 = vmatprep.mubr.f32.mxu1 %v28232_v0 }
 0x203   : > { %19312 = vmatmul.mubr.msk.f32.gmra.mrb[6].mxu0 %vm401_vm2, %v19300_v14  ;;  %19324 = vmatmul.mubr.msk.f32.gmra.mrb[6].mxu1 %vm401_vm2, %v19300_v14  ;;  %v5225_v14 = vsel %vm28209_vm15, %v24231_v52, %v24233_v53  ;;  %vm28215_vm15 = vcmask 891904   ;;  %v19502_v52 = vld [vmem:[%s28185_s2 + $0x4b8] sm:$0xff]  ;;  %v19503_v53 = vld [vmem:[%s28185_s2 + $0x4c0] sm:$0xff] }
 0x204   : > { %3606 = vmatprep.mubr.f32.mxu0 %v28232_v0  ;;  %3731 = vmatprep.mubr.f32.mxu1 %v28232_v0 }
 0x207   : > { %19313 = vmatmul.mubr.msk.f32.gmra.mrb[8].mxu0 %vm401_vm2, %v19301_v15  ;;  %19325 = vmatmul.mubr.msk.f32.gmra.mrb[8].mxu1 %vm401_vm2, %v19301_v15  ;;  %v5576_v15 = vsel %vm28212_vm14, %v24317_v8, %v24333_v11 }
 0x208   : > { %3612 = vmatprep.mubr.f32.mxu0 %v28232_v0  ;;  %3737 = vmatprep.mubr.f32.mxu1 %v28232_v0 }
 0x20b   : > { %19314 = vmatmul.mubr.msk.f32.gmra.mrb[10].mxu0 %vm401_vm2, %v19302_v16  ;;  %19326 = vmatmul.mubr.msk.f32.gmra.mrb[10].mxu1 %vm401_vm2, %v19302_v16  ;;  %v5578_v16 = vsel %vm28212_vm14, %v24335_v12, %v24315_v7 }
 0x20c   : > { %3618 = vmatprep.mubr.f32.mxu0 %v28232_v0  ;;  %3743 = vmatprep.mubr.f32.mxu1 %v28232_v0 }
 0x20f   : > { %19315 = vmatmul.mubr.msk.f32.gmra.mrb[12].mxu0 %vm401_vm2, %v19303_v17  ;;  %19327 = vmatmul.mubr.msk.f32.gmra.mrb[12].mxu1 %vm401_vm2, %v19303_v17  ;;  %v19434_v17 = vld [vmem:[%s28185_s2 + $0x418] sm:$0xff] }
 0x210   : > { %3624 = vmatprep.mubr.f32.mxu0 %v28232_v0  ;;  %3749 = vmatprep.mubr.f32.mxu1 %v28232_v0 }
 0x213   : > { %19316 = vmatmul.mubr.msk.f32.gmra.mrb[14].mxu0 %vm401_vm2, %v19304_v18  ;;  %19328 = vmatmul.mubr.msk.f32.gmra.mrb[14].mxu1 %vm401_vm2, %v19304_v18  ;;  %v19435_v18 = vld [vmem:[%s28185_s2 + $0x420] sm:$0xff] }
 0x214   : > { %3630 = vmatprep.mubr.f32.mxu0 %v28232_v0  ;;  %3755 = vmatprep.mubr.f32.mxu1 %v28232_v0 }
 0x217   : > { %19317 = vmatmul.mubr.msk.f32.gmra.mrb[16].mxu0 %vm401_vm2, %v19305_v19  ;;  %19329 = vmatmul.mubr.msk.f32.gmra.mrb[16].mxu1 %vm401_vm2, %v19305_v19  ;;  %v19436_v19 = vld [vmem:[%s28185_s2 + $0x428] sm:$0xff] }
 0x218   : > { %3636 = vmatprep.mubr.f32.mxu0 %v28232_v0  ;;  %3761 = vmatprep.mubr.f32.mxu1 %v28232_v0 }
 0x21b   : > { %19318 = vmatmul.mubr.msk.f32.gmra.mrb[18].mxu0 %vm401_vm2, %v19306_v20  ;;  %19330 = vmatmul.mubr.msk.f32.gmra.mrb[18].mxu1 %vm401_vm2, %v19306_v20  ;;  %v19437_v20 = vld [vmem:[%s28185_s2 + $0x430] sm:$0xff] }
 0x21c   : > { %3934 = vmatprep.mubr.f32.mxu0 %v28232_v0  ;;  %4059 = vmatprep.mubr.f32.mxu1 %v28232_v0 }
 0x21f   : > { %19343 = vmatmul.mubr.msk.f32.vlgmr.msra.gmra.mrb[0].mxu0 %vm401_vm2, %v19331_v21  ;;  %19355 = vmatmul.mubr.msk.f32.vlgmr.msra.gmra.mrb[0].mxu1 %vm401_vm2, %v19331_v21  ;;  %v19438_v21 = vld [vmem:[%s28185_s2 + $0x438] sm:$0xff] }
 0x220   : > { %3940 = vmatprep.mubr.f32.mxu0 %v28232_v0  ;;  %4065 = vmatprep.mubr.f32.mxu1 %v28232_v0 }
 0x221   : > { %19376 = vmatpush1.msk.msra.mxu0 %vm432_vm1, %v4180_v22  ;;  %19388 = vmatpush1.msk.msra.mxu1 %vm432_vm1, %v4182_v23  ;;  %v19439_v22 = vld [vmem:[%s28185_s2 + $0x440] sm:$0xff]  ;;  %v19440_v23 = vld [vmem:[%s28185_s2 + $0x448] sm:$0xff] }
 0x222   : > { %19409 = vmatprep.subr.msk.mxu0 %vm432_vm1, %v22968_v4  ;;  %19421 = vmatprep.subr.msk.mxu1 %vm432_vm1, %v22964_v3 }
 0x223   : > { %19344 = vmatmul.mubr.msk.f32.gmra.mrb[2].mxu0 %vm401_vm2, %v19332_v2  ;;  %19356 = vmatmul.mubr.msk.f32.gmra.mrb[2].mxu1 %vm401_vm2, %v19332_v2  ;;  %v19441_v2 = vld [vmem:[%s28185_s2 + $0x450] sm:$0xff] }
 0x224   : > { %3946 = vmatprep.mubr.f32.mxu0 %v28232_v0  ;;  %4071 = vmatprep.mubr.f32.mxu1 %v28232_v0 }
 0x227   : > { %19345 = vmatmul.mubr.msk.f32.gmra.mrb[4].mxu0 %vm401_vm2, %v19333_v25  ;;  %19357 = vmatmul.mubr.msk.f32.gmra.mrb[4].mxu1 %vm401_vm2, %v19333_v25  ;;  %v24417_v25 = vpop.permute.xlu0 %5918 }
 0x228   : > { %3952 = vmatprep.mubr.f32.mxu0 %v28232_v0  ;;  %4077 = vmatprep.mubr.f32.mxu1 %v28232_v0 }
 0x22b   : > { %19346 = vmatmul.mubr.msk.f32.gmra.mrb[6].mxu0 %vm401_vm2, %v19334_v26  ;;  %19358 = vmatmul.mubr.msk.f32.gmra.mrb[6].mxu1 %vm401_vm2, %v19334_v26  ;;  %v24419_v26 = vpop.permute.xlu1 %5920 }
 0x22c   : > { %3958 = vmatprep.mubr.f32.mxu0 %v28232_v0  ;;  %4083 = vmatprep.mubr.f32.mxu1 %v28232_v0  ;;  %v5927_v49 = vsel %vm28215_vm15, %v24417_v25, %v24419_v26 }
 0x22f   : > { %19347 = vmatmul.mubr.msk.f32.gmra.mrb[8].mxu0 %vm401_vm2, %v19335_v27  ;;  %19359 = vmatmul.mubr.msk.f32.gmra.mrb[8].mxu1 %vm401_vm2, %v19335_v27  ;;  %v19467_v27 = vld [vmem:[%s28185_s2 + $0x460] sm:$0xff] }
 0x230   : > { %3964 = vmatprep.mubr.f32.mxu0 %v28232_v0  ;;  %4089 = vmatprep.mubr.f32.mxu1 %v28232_v0 }
 0x233   : > { %19348 = vmatmul.mubr.msk.f32.gmra.mrb[10].mxu0 %vm401_vm2, %v19336_v28  ;;  %19360 = vmatmul.mubr.msk.f32.gmra.mrb[10].mxu1 %vm401_vm2, %v19336_v28  ;;  %v24435_v28 = vpop.permute.xlu0 %5922 }
 0x234   : > { %3970 = vmatprep.mubr.f32.mxu0 %v28232_v0  ;;  %4095 = vmatprep.mubr.f32.mxu1 %v28232_v0  ;;  %v5928_v32 = vsel %vm28215_vm15, %v24419_v26, %v24435_v28 }
 0x237   : > { %19349 = vmatmul.mubr.msk.f32.gmra.mrb[12].mxu0 %vm401_vm2, %v19337_v29  ;;  %19361 = vmatmul.mubr.msk.f32.gmra.mrb[12].mxu1 %vm401_vm2, %v19337_v29  ;;  %v24437_v29 = vpop.permute.xlu1 %5924 }
 0x238   : > { %3976 = vmatprep.mubr.f32.mxu0 %v28232_v0  ;;  %4101 = vmatprep.mubr.f32.mxu1 %v28232_v0  ;;  %v5930_v33 = vsel %vm28215_vm15, %v24437_v29, %v24417_v25  ;;  %v5929_v50 = vsel %vm28215_vm15, %v24435_v28, %v24437_v29  ;;  %vm28219_vm15 = vcmask 875520   ;;  %v19570_v29 = vld [vmem:[%s28185_s2 + $0x558] sm:$0xff] }
 0x23b   : > { %19350 = vmatmul.mubr.msk.f32.gmra.mrb[14].mxu0 %vm401_vm2, %v19338_v30  ;;  %19362 = vmatmul.mubr.msk.f32.gmra.mrb[14].mxu1 %vm401_vm2, %v19338_v30  ;;  %v5575_v30 = vsel %vm28212_vm14, %v24315_v7, %v24317_v8 }
 0x23c   : > { %3982 = vmatprep.mubr.f32.mxu0 %v28232_v0  ;;  %4107 = vmatprep.mubr.f32.mxu1 %v28232_v0 }
 0x23f   : > { %19351 = vmatmul.mubr.msk.f32.gmra.mrb[16].mxu0 %vm401_vm2, %v19339_v31  ;;  %19363 = vmatmul.mubr.msk.f32.gmra.mrb[16].mxu1 %vm401_vm2, %v19339_v31  ;;  %v5577_v31 = vsel %vm28212_vm14, %v24333_v11, %v24335_v12  ;;  %vm28216_vm14 = vcmask 883712   ;;  %v19536_v12 = vld [vmem:[%s28185_s2 + $0x508] sm:$0xff] }
 0x240   : > { %3988 = vmatprep.mubr.f32.mxu0 %v28232_v0  ;;  %4113 = vmatprep.mubr.f32.mxu1 %v28232_v0 }
 0x243   : > { %19352 = vmatmul.mubr.msk.f32.gmra.mrb[18].mxu0 %vm401_vm2, %v19340_v34  ;;  %19364 = vmatmul.mubr.msk.f32.gmra.mrb[18].mxu1 %vm401_vm2, %v19340_v34  ;;  %v19468_v34 = vld [vmem:[%s28185_s2 + $0x468] sm:$0xff] }
 0x244   : > { %4286 = vmatprep.mubr.f32.mxu0 %v28232_v0  ;;  %4411 = vmatprep.mubr.f32.mxu1 %v28232_v0 }
 0x247   : > { %19377 = vmatmul.mubr.msk.f32.vlgmr.msra.gmra.mrb[0].mxu0 %vm401_vm2, %v19365_v35  ;;  %19389 = vmatmul.mubr.msk.f32.vlgmr.msra.gmra.mrb[0].mxu1 %vm401_vm2, %v19365_v35  ;;  %v19469_v35 = vld [vmem:[%s28185_s2 + $0x470] sm:$0xff] }
 0x248   : > { %4292 = vmatprep.mubr.f32.mxu0 %v28232_v0  ;;  %4417 = vmatprep.mubr.f32.mxu1 %v28232_v0 }
 0x249   : > { %19410 = vmatpush1.msk.msra.mxu0 %vm432_vm1, %v23797_v41  ;;  %19422 = vmatpush1.msk.msra.mxu1 %vm432_vm1, %v23703_v24  ;;  %v19442_v24 = vld [vmem:[%s28185_s2 + $0x458] sm:$0xff]  ;;  %v19475_v41 = vld [vmem:[%s28185_s2 + $0x4a0] sm:$0xff] }
 0x24a   : > { %19443 = vmatprep.subr.msk.mxu0 %vm432_vm1, %v4872_v38  ;;  %19455 = vmatprep.subr.msk.mxu1 %vm432_vm1, %v4874_v39  ;;  %v19472_v38 = vld [vmem:[%s28185_s2 + $0x488] sm:$0xff]  ;;  %v19473_v39 = vld [vmem:[%s28185_s2 + $0x490] sm:$0xff] }
 0x24b   : > { %19378 = vmatmul.mubr.msk.f32.gmra.mrb[2].mxu0 %vm401_vm2, %v19366_v40  ;;  %19390 = vmatmul.mubr.msk.f32.gmra.mrb[2].mxu1 %vm401_vm2, %v19366_v40  ;;  %v19474_v40 = vld [vmem:[%s28185_s2 + $0x498] sm:$0xff] }
 0x24c   : > { %4298 = vmatprep.mubr.f32.mxu0 %v28232_v0  ;;  %4423 = vmatprep.mubr.f32.mxu1 %v28232_v0 }
 0x24f   : > { %19379 = vmatmul.mubr.msk.f32.gmra.mrb[4].mxu0 %vm401_vm2, %v19367_v42  ;;  %19391 = vmatmul.mubr.msk.f32.gmra.mrb[4].mxu1 %vm401_vm2, %v19367_v42  ;;  %v24509_v42 = vld [vmem:[%s22954_s18 + $0x8] sm:$0xff] }
 0x250   : > { %4304 = vmatprep.mubr.f32.mxu0 %v28232_v0  ;;  %4429 = vmatprep.mubr.f32.mxu1 %v28232_v0 }
 0x251   : > { %7682 = vrot.lane.b32.xlu0 %v24509_v42, %s28213_s16  ;;  %s28225_s16 = smov 88  }
 0x252   : > { %8032 = vrot.lane.b32.xlu1 %v22968_v4, %s28225_s16 }
 0x253   : > { %19380 = vmatmul.mubr.msk.f32.gmra.mrb[6].mxu0 %vm401_vm2, %v19368_v43  ;;  %19392 = vmatmul.mubr.msk.f32.gmra.mrb[6].mxu1 %vm401_vm2, %v19368_v43  ;;  %v24522_v43 = vpop.permute.xlu0 %6270 }
 0x254   : > { %4310 = vmatprep.mubr.f32.mxu0 %v28232_v0  ;;  %4435 = vmatprep.mubr.f32.mxu1 %v28232_v0 }
 0x256   : > { %8036 = vrot.lane.b32.xlu1 %v22964_v3, %s28225_s16 }
 0x257   : > { %19381 = vmatmul.mubr.msk.f32.gmra.mrb[8].mxu0 %vm401_vm2, %v19369_v44  ;;  %19393 = vmatmul.mubr.msk.f32.gmra.mrb[8].mxu1 %vm401_vm2, %v19369_v44  ;;  %v24524_v44 = vpop.permute.xlu1 %6272 }
 0x258   : > { %4316 = vmatprep.mubr.f32.mxu0 %v28232_v0  ;;  %4441 = vmatprep.mubr.f32.mxu1 %v28232_v0  ;;  %v6279_v8 = vsel %vm28216_vm14, %v24522_v43, %v24524_v44 }
 0x25a   : > { %8384 = vrot.lane.b32.xlu1 %v22968_v4, %s28217_s17 }
 0x25b   : > { %19382 = vmatmul.mubr.msk.f32.gmra.mrb[10].mxu0 %vm401_vm2, %v19370_v45  ;;  %19394 = vmatmul.mubr.msk.f32.gmra.mrb[10].mxu1 %vm401_vm2, %v19370_v45  ;;  %v19476_v45 = vld [vmem:[%s28185_s2 + $0x4a8] sm:$0xff] }
 0x25c   : > { %4322 = vmatprep.mubr.f32.mxu0 %v28232_v0  ;;  %4447 = vmatprep.mubr.f32.mxu1 %v28232_v0 }
 0x25e   : > { %8388 = vrot.lane.b32.xlu1 %v22964_v3, %s28217_s17 }
 0x25f   : > { %19383 = vmatmul.mubr.msk.f32.gmra.mrb[12].mxu0 %vm401_vm2, %v19371_v46  ;;  %19395 = vmatmul.mubr.msk.f32.gmra.mrb[12].mxu1 %vm401_vm2, %v19371_v46  ;;  %v19501_v46 = vld [vmem:[%s28185_s2 + $0x4b0] sm:$0xff] }
 0x260   : > { %4328 = vmatprep.mubr.f32.mxu0 %v28232_v0  ;;  %4453 = vmatprep.mubr.f32.mxu1 %v28232_v0 }
 0x263   : > { %19384 = vmatmul.mubr.msk.f32.gmra.mrb[14].mxu0 %vm401_vm2, %v19372_v47  ;;  %19396 = vmatmul.mubr.msk.f32.gmra.mrb[14].mxu1 %vm401_vm2, %v19372_v47  ;;  %v24540_v47 = vpop.permute.xlu0 %6274 }
 0x264   : > { %4334 = vmatprep.mubr.f32.mxu0 %v28232_v0  ;;  %4459 = vmatprep.mubr.f32.mxu1 %v28232_v0 }
 0x267   : > { %19385 = vmatmul.mubr.msk.f32.gmra.mrb[16].mxu0 %vm401_vm2, %v19373_v48  ;;  %19397 = vmatmul.mubr.msk.f32.gmra.mrb[16].mxu1 %vm401_vm2, %v19373_v48  ;;  %v24542_v48 = vpop.permute.xlu1 %6276 }
 0x268   : > { %4340 = vmatprep.mubr.f32.mxu0 %v28232_v0  ;;  %4465 = vmatprep.mubr.f32.mxu1 %v28232_v0 }
 0x26b   : > { %19386 = vmatmul.mubr.msk.f32.gmra.mrb[18].mxu0 %vm401_vm2, %v19374_v1  ;;  %19398 = vmatmul.mubr.msk.f32.gmra.mrb[18].mxu1 %vm401_vm2, %v19374_v1  ;;  %v6280_v1 = vsel %vm28216_vm14, %v24524_v44, %v24540_v47 }
 0x26c   : > { %4625 = vmatprep.mubr.f32.mxu0 %v28232_v0  ;;  %4750 = vmatprep.mubr.f32.mxu1 %v28232_v0 }
 0x26f   : > { %19411 = vmatmul.mubr.msk.f32.vlgmr.msra.gmra.mrb[0].mxu0 %vm401_vm2, %v19399_v51  ;;  %19423 = vmatmul.mubr.msk.f32.vlgmr.msra.gmra.mrb[0].mxu1 %vm401_vm2, %v19399_v51  ;;  %v6282_v51 = vsel %vm28216_vm14, %v24542_v48, %v24522_v43 }
 0x270   : > { %4631 = vmatprep.mubr.f32.mxu0 %v28232_v0  ;;  %4756 = vmatprep.mubr.f32.mxu1 %v28232_v0 }
 0x271   : > { %19444 = vmatpush1.msk.msra.mxu0 %vm432_vm1, %v4871_v54  ;;  %19456 = vmatpush1.msk.msra.mxu1 %vm432_vm1, %v4873_v55  ;;  %v19504_v54 = vld [vmem:[%s28185_s2 + $0x4c8] sm:$0xff]  ;;  %v19505_v55 = vld [vmem:[%s28185_s2 + $0x4d0] sm:$0xff] }
 0x272   : > { %19477 = vmatprep.subr.msk.mxu0 %vm432_vm1, %v5224_v56  ;;  %19489 = vmatprep.subr.msk.mxu1 %vm432_vm1, %v5226_v57  ;;  %v19506_v56 = vld [vmem:[%s28185_s2 + $0x4d8] sm:$0xff]  ;;  %v19507_v57 = vld [vmem:[%s28185_s2 + $0x4e0] sm:$0xff] }
 0x273   : > { %19412 = vmatmul.mubr.msk.f32.gmra.mrb[2].mxu0 %vm401_vm2, %v19400_v58  ;;  %19424 = vmatmul.mubr.msk.f32.gmra.mrb[2].mxu1 %vm401_vm2, %v19400_v58  ;;  %v24603_v58 = vld [vmem:[%s22954_s18] sm:$0xff] }
 0x274   : > { %4637 = vmatprep.mubr.f32.mxu0 %v28232_v0  ;;  %4762 = vmatprep.mubr.f32.mxu1 %v28232_v0 }
 0x275   : > { %8030 = vrot.lane.b32.xlu0 %v24603_v58, %s28225_s16 }
 0x277   : > { %19413 = vmatmul.mubr.msk.f32.gmra.mrb[4].mxu0 %vm401_vm2, %v19401_v59  ;;  %19425 = vmatmul.mubr.msk.f32.gmra.mrb[4].mxu1 %vm401_vm2, %v19401_v59  ;;  %v19508_v59 = vld [vmem:[%s28185_s2 + $0x4e8] sm:$0xff] }
 0x278   : > { %4643 = vmatprep.mubr.f32.mxu0 %v28232_v0  ;;  %4768 = vmatprep.mubr.f32.mxu1 %v28232_v0 }
 0x279   : > { %8034 = vrot.lane.b32.xlu0 %v24509_v42, %s28225_s16  ;;  %s28276_s16 = smov 90  }
 0x27b   : > { %19414 = vmatmul.mubr.msk.f32.gmra.mrb[6].mxu0 %vm401_vm2, %v19402_v60  ;;  %19426 = vmatmul.mubr.msk.f32.gmra.mrb[6].mxu1 %vm401_vm2, %v19402_v60  ;;  %v19509_v60 = vld [vmem:[%s28185_s2 + $0x4f0] sm:$0xff] }
 0x27c   : > { %4649 = vmatprep.mubr.f32.mxu0 %v28232_v0  ;;  %4774 = vmatprep.mubr.f32.mxu1 %v28232_v0 }
 0x27d   : > { %8382 = vrot.lane.b32.xlu0 %v24603_v58, %s28217_s17 }
 0x27f   : > { %19415 = vmatmul.mubr.msk.f32.gmra.mrb[8].mxu0 %vm401_vm2, %v19403_v61  ;;  %19427 = vmatmul.mubr.msk.f32.gmra.mrb[8].mxu1 %vm401_vm2, %v19403_v61  ;;  %v24627_v61 = vpop.permute.xlu0 %6622 }
 0x280   : > { %4655 = vmatprep.mubr.f32.mxu0 %v28232_v0  ;;  %4780 = vmatprep.mubr.f32.mxu1 %v28232_v0 }
 0x281   : > { %8386 = vrot.lane.b32.xlu0 %v24509_v42, %s28217_s17  ;;  %s28223_s17 = smov 86  }
 0x282   : > { %8736 = vrot.lane.b32.xlu1 %v22968_v4, %s28223_s17  ;;  %v19577_v4 = vld [vmem:[%s28185_s2 + $0x590] sm:$0xff] }
 0x283   : > { %19416 = vmatmul.mubr.msk.f32.gmra.mrb[10].mxu0 %vm401_vm2, %v19404_v62  ;;  %19428 = vmatmul.mubr.msk.f32.gmra.mrb[10].mxu1 %vm401_vm2, %v19404_v62  ;;  %v24629_v62 = vpop.permute.xlu1 %6624 }
 0x284   : > { %4661 = vmatprep.mubr.f32.mxu0 %v28232_v0  ;;  %4786 = vmatprep.mubr.f32.mxu1 %v28232_v0  ;;  %v6631_v26 = vsel %vm28219_vm15, %v24627_v61, %v24629_v62 }
 0x285   : > { %8734 = vrot.lane.b32.xlu0 %v24603_v58, %s28223_s17 }
 0x286   : > { %8740 = vrot.lane.b32.xlu1 %v22964_v3, %s28223_s17  ;;  %v19578_v3 = vld [vmem:[%s28185_s2 + $0x598] sm:$0xff] }
 0x287   : > { %19417 = vmatmul.mubr.msk.f32.gmra.mrb[12].mxu0 %vm401_vm2, %v19405_v63  ;;  %19429 = vmatmul.mubr.msk.f32.gmra.mrb[12].mxu1 %vm401_vm2, %v19405_v63  ;;  %v19510_v63 = vld [vmem:[%s28185_s2 + $0x4f8] sm:$0xff]  ;;  %v24647_v7 = vpop.permute.xlu1 %6628 }
 0x288   : > { %4667 = vmatprep.mubr.f32.mxu0 %v28232_v0  ;;  %4792 = vmatprep.mubr.f32.mxu1 %v28232_v0  ;;  %v6634_v11 = vsel %vm28219_vm15, %v24647_v7, %v24627_v61 }
 0x289   : > { %8738 = vrot.lane.b32.xlu0 %v24509_v42, %s28223_s17 }
 0x28b   : > { %19418 = vmatmul.mubr.msk.f32.gmra.mrb[14].mxu0 %vm401_vm2, %v19406_v5  ;;  %19430 = vmatmul.mubr.msk.f32.gmra.mrb[14].mxu1 %vm401_vm2, %v19406_v5  ;;  %v19535_v5 = vld [vmem:[%s28185_s2 + $0x500] sm:$0xff] }
 0x28c   : > { %4673 = vmatprep.mubr.f32.mxu0 %v28232_v0  ;;  %4798 = vmatprep.mubr.f32.mxu1 %v28232_v0 }
 0x28f   : > { %19419 = vmatmul.mubr.msk.f32.gmra.mrb[16].mxu0 %vm401_vm2, %v19407_v6  ;;  %19431 = vmatmul.mubr.msk.f32.gmra.mrb[16].mxu1 %vm401_vm2, %v19407_v6  ;;  %v24645_v6 = vpop.permute.xlu0 %6626 }
 0x290   : > { %4679 = vmatprep.mubr.f32.mxu0 %v28232_v0  ;;  %4804 = vmatprep.mubr.f32.mxu1 %v28232_v0 }
 0x293   : > { %19420 = vmatmul.mubr.msk.f32.gmra.mrb[18].mxu0 %vm401_vm2, %v19408_v9  ;;  %19432 = vmatmul.mubr.msk.f32.gmra.mrb[18].mxu1 %vm401_vm2, %v19408_v9  ;;  %v6281_v9 = vsel %vm28216_vm14, %v24540_v47, %v24542_v48  ;;  %vm28220_vm14 = vcmask 867328   ;;  %v19606_v47 = vld [vmem:[%s28185_s2 + $0x5b8] sm:$0xff]  ;;  %v19607_v48 = vld [vmem:[%s28185_s2 + $0x5c0] sm:$0xff] }
 0x294   : > { %4977 = vmatprep.mubr.f32.mxu0 %v28232_v0  ;;  %5102 = vmatprep.mubr.f32.mxu1 %v28232_v0 }
 0x297   : > { %19445 = vmatmul.mubr.msk.f32.vlgmr.msra.gmra.mrb[0].mxu0 %vm401_vm2, %v19433_v10  ;;  %19457 = vmatmul.mubr.msk.f32.vlgmr.msra.gmra.mrb[0].mxu1 %vm401_vm2, %v19433_v10  ;;  %v6632_v10 = vsel %vm28219_vm15, %v24629_v62, %v24645_v6  ;;  %v19638_v62 = vld [vmem:[%s28185_s2 + $0x5f8] sm:$0xff] }
 0x298   : > { %4983 = vmatprep.mubr.f32.mxu0 %v28232_v0  ;;  %5108 = vmatprep.mubr.f32.mxu1 %v28232_v0 }
 0x299   : > { %19478 = vmatpush1.msk.msra.mxu0 %vm432_vm1, %v5223_v13  ;;  %19490 = vmatpush1.msk.msra.mxu1 %vm432_vm1, %v5225_v14  ;;  %v19537_v13 = vld [vmem:[%s28185_s2 + $0x510] sm:$0xff]  ;;  %v19538_v14 = vld [vmem:[%s28185_s2 + $0x518] sm:$0xff] }
 0x29a   : > { %19511 = vmatprep.subr.msk.mxu0 %vm432_vm1, %v5576_v15  ;;  %19523 = vmatprep.subr.msk.mxu1 %vm432_vm1, %v5578_v16  ;;  %v19539_v15 = vld [vmem:[%s28185_s2 + $0x520] sm:$0xff]  ;;  %v19540_v16 = vld [vmem:[%s28185_s2 + $0x528] sm:$0xff] }
 0x29b   : > { %19446 = vmatmul.mubr.msk.f32.gmra.mrb[2].mxu0 %vm401_vm2, %v19434_v17  ;;  %19458 = vmatmul.mubr.msk.f32.gmra.mrb[2].mxu1 %vm401_vm2, %v19434_v17  ;;  %v19541_v17 = vld [vmem:[%s28185_s2 + $0x530] sm:$0xff] }
 0x29c   : > { %4989 = vmatprep.mubr.f32.mxu0 %v28232_v0  ;;  %5114 = vmatprep.mubr.f32.mxu1 %v28232_v0 }
 0x29f   : > { %19447 = vmatmul.mubr.msk.f32.gmra.mrb[4].mxu0 %vm401_vm2, %v19435_v18  ;;  %19459 = vmatmul.mubr.msk.f32.gmra.mrb[4].mxu1 %vm401_vm2, %v19435_v18  ;;  %v19542_v18 = vld [vmem:[%s28185_s2 + $0x538] sm:$0xff] }
 0x2a0   : > { %4995 = vmatprep.mubr.f32.mxu0 %v28232_v0  ;;  %5120 = vmatprep.mubr.f32.mxu1 %v28232_v0 }
 0x2a3   : > { %19448 = vmatmul.mubr.msk.f32.gmra.mrb[6].mxu0 %vm401_vm2, %v19436_v19  ;;  %19460 = vmatmul.mubr.msk.f32.gmra.mrb[6].mxu1 %vm401_vm2, %v19436_v19  ;;  %v19543_v19 = vld [vmem:[%s28185_s2 + $0x540] sm:$0xff] }
 0x2a4   : > { %5001 = vmatprep.mubr.f32.mxu0 %v28232_v0  ;;  %5126 = vmatprep.mubr.f32.mxu1 %v28232_v0 }
 0x2a7   : > { %19449 = vmatmul.mubr.msk.f32.gmra.mrb[8].mxu0 %vm401_vm2, %v19437_v20  ;;  %19461 = vmatmul.mubr.msk.f32.gmra.mrb[8].mxu1 %vm401_vm2, %v19437_v20  ;;  %v24729_v20 = vpop.permute.xlu0 %6974 }
 0x2a8   : > { %5007 = vmatprep.mubr.f32.mxu0 %v28232_v0  ;;  %5132 = vmatprep.mubr.f32.mxu1 %v28232_v0 }
 0x2ab   : > { %19450 = vmatmul.mubr.msk.f32.gmra.mrb[10].mxu0 %vm401_vm2, %v19438_v21  ;;  %19462 = vmatmul.mubr.msk.f32.gmra.mrb[10].mxu1 %vm401_vm2, %v19438_v21  ;;  %v24731_v21 = vpop.permute.xlu1 %6976 }
 0x2ac   : > { %5013 = vmatprep.mubr.f32.mxu0 %v28232_v0  ;;  %5138 = vmatprep.mubr.f32.mxu1 %v28232_v0  ;;  %v6983_v42 = vsel %vm28220_vm14, %v24729_v20, %v24731_v21 }
 0x2af   : > { %19451 = vmatmul.mubr.msk.f32.gmra.mrb[12].mxu0 %vm401_vm2, %v19439_v22  ;;  %19463 = vmatmul.mubr.msk.f32.gmra.mrb[12].mxu1 %vm401_vm2, %v19439_v22  ;;  %v19544_v22 = vld [vmem:[%s28185_s2 + $0x548] sm:$0xff]  ;;  %v24749_v25 = vpop.permute.xlu1 %6980 }
 0x2b0   : > { %5019 = vmatprep.mubr.f32.mxu0 %v28232_v0  ;;  %5144 = vmatprep.mubr.f32.mxu1 %v28232_v0  ;;  %v6986_v28 = vsel %vm28220_vm14, %v24749_v25, %v24729_v20 }
 0x2b3   : > { %19452 = vmatmul.mubr.msk.f32.gmra.mrb[14].mxu0 %vm401_vm2, %v19440_v23  ;;  %19464 = vmatmul.mubr.msk.f32.gmra.mrb[14].mxu1 %vm401_vm2, %v19440_v23  ;;  %v19569_v23 = vld [vmem:[%s28185_s2 + $0x550] sm:$0xff] }
 0x2b4   : > { %5025 = vmatprep.mubr.f32.mxu0 %v28232_v0  ;;  %5150 = vmatprep.mubr.f32.mxu1 %v28232_v0 }
 0x2b7   : > { %19453 = vmatmul.mubr.msk.f32.gmra.mrb[16].mxu0 %vm401_vm2, %v19441_v2  ;;  %19465 = vmatmul.mubr.msk.f32.gmra.mrb[16].mxu1 %vm401_vm2, %v19441_v2  ;;  %v24747_v2 = vpop.permute.xlu0 %6978 }
 0x2b8   : > { %5031 = vmatprep.mubr.f32.mxu0 %v28232_v0  ;;  %5156 = vmatprep.mubr.f32.mxu1 %v28232_v0 }
 0x2bb   : > { %19454 = vmatmul.mubr.msk.f32.gmra.mrb[18].mxu0 %vm401_vm2, %v19442_v24  ;;  %19466 = vmatmul.mubr.msk.f32.gmra.mrb[18].mxu1 %vm401_vm2, %v19442_v24  ;;  %v6633_v24 = vsel %vm28219_vm15, %v24645_v6, %v24647_v7  ;;  %vm28221_vm15 = vcmask 736256   ;;  %v19641_v6 = vld [vmem:[%s28185_s2 + $0x610] sm:$0xff]  ;;  %v19642_v7 = vld [vmem:[%s28185_s2 + $0x618] sm:$0xff] }
 0x2bc   : > { %5329 = vmatprep.mubr.f32.mxu0 %v28232_v0  ;;  %5454 = vmatprep.mubr.f32.mxu1 %v28232_v0 }
 0x2bf   : > { %19479 = vmatmul.mubr.msk.f32.vlgmr.msra.gmra.mrb[0].mxu0 %vm401_vm2, %v19467_v27  ;;  %19491 = vmatmul.mubr.msk.f32.vlgmr.msra.gmra.mrb[0].mxu1 %vm401_vm2, %v19467_v27  ;;  %v6984_v27 = vsel %vm28220_vm14, %v24731_v21, %v24747_v2  ;;  %v19672_v21 = vld [vmem:[%s28185_s2 + $0x648] sm:$0xff] }
 0x2c0   : > { %5335 = vmatprep.mubr.f32.mxu0 %v28232_v0  ;;  %5460 = vmatprep.mubr.f32.mxu1 %v28232_v0 }
 0x2c1   : > { %19512 = vmatpush1.msk.msra.mxu0 %vm432_vm1, %v5575_v30  ;;  %19524 = vmatpush1.msk.msra.mxu1 %vm432_vm1, %v5577_v31  ;;  %v19571_v30 = vld [vmem:[%s28185_s2 + $0x560] sm:$0xff]  ;;  %v19572_v31 = vld [vmem:[%s28185_s2 + $0x568] sm:$0xff] }
 0x2c2   : > { %19545 = vmatprep.subr.msk.mxu0 %vm432_vm1, %v5928_v32  ;;  %19557 = vmatprep.subr.msk.mxu1 %vm432_vm1, %v5930_v33  ;;  %v19573_v32 = vld [vmem:[%s28185_s2 + $0x570] sm:$0xff]  ;;  %v19574_v33 = vld [vmem:[%s28185_s2 + $0x578] sm:$0xff] }
 0x2c3   : > { %19480 = vmatmul.mubr.msk.f32.gmra.mrb[2].mxu0 %vm401_vm2, %v19468_v34  ;;  %19492 = vmatmul.mubr.msk.f32.gmra.mrb[2].mxu1 %vm401_vm2, %v19468_v34  ;;  %v19575_v34 = vld [vmem:[%s28185_s2 + $0x580] sm:$0xff] }
 0x2c4   : > { %5341 = vmatprep.mubr.f32.mxu0 %v28232_v0  ;;  %5466 = vmatprep.mubr.f32.mxu1 %v28232_v0 }
 0x2c7   : > { %19481 = vmatmul.mubr.msk.f32.gmra.mrb[4].mxu0 %vm401_vm2, %v19469_v35  ;;  %19493 = vmatmul.mubr.msk.f32.gmra.mrb[4].mxu1 %vm401_vm2, %v19469_v35  ;;  %v19576_v35 = vld [vmem:[%s28185_s2 + $0x588] sm:$0xff] }
 0x2c8   : > { %5347 = vmatprep.mubr.f32.mxu0 %v28232_v0  ;;  %5472 = vmatprep.mubr.f32.mxu1 %v28232_v0 }
 0x2cb   : > { %19482 = vmatmul.mubr.msk.f32.gmra.mrb[6].mxu0 %vm401_vm2, %v19470_v36  ;;  %19494 = vmatmul.mubr.msk.f32.gmra.mrb[6].mxu1 %vm401_vm2, %v19470_v36  ;;  %v24831_v36 = vpop.permute.xlu0 %7326 }
 0x2cc   : > { %5353 = vmatprep.mubr.f32.mxu0 %v28232_v0  ;;  %5478 = vmatprep.mubr.f32.mxu1 %v28232_v0 }
 0x2cf   : > { %19483 = vmatmul.mubr.msk.f32.gmra.mrb[8].mxu0 %vm401_vm2, %v19471_v37  ;;  %19495 = vmatmul.mubr.msk.f32.gmra.mrb[8].mxu1 %vm401_vm2, %v19471_v37  ;;  %v24833_v37 = vpop.permute.xlu1 %7328 }
 0x2d0   : > { %5359 = vmatprep.mubr.f32.mxu0 %v28232_v0  ;;  %5484 = vmatprep.mubr.f32.mxu1 %v28232_v0  ;;  %v7335_v58 = vsel %vm28221_vm15, %v24831_v36, %v24833_v37 }
 0x2d3   : > { %19484 = vmatmul.mubr.msk.f32.gmra.mrb[10].mxu0 %vm401_vm2, %v19472_v38  ;;  %19496 = vmatmul.mubr.msk.f32.gmra.mrb[10].mxu1 %vm401_vm2, %v19472_v38  ;;  %v19603_v38 = vld [vmem:[%s28185_s2 + $0x5a0] sm:$0xff] }
 0x2d4   : > { %5365 = vmatprep.mubr.f32.mxu0 %v28232_v0  ;;  %5490 = vmatprep.mubr.f32.mxu1 %v28232_v0 }
 0x2d7   : > { %19485 = vmatmul.mubr.msk.f32.gmra.mrb[12].mxu0 %vm401_vm2, %v19473_v39  ;;  %19497 = vmatmul.mubr.msk.f32.gmra.mrb[12].mxu1 %vm401_vm2, %v19473_v39  ;;  %v24849_v39 = vpop.permute.xlu0 %7330 }
 0x2d8   : > { %5371 = vmatprep.mubr.f32.mxu0 %v28232_v0  ;;  %5496 = vmatprep.mubr.f32.mxu1 %v28232_v0  ;;  %v7336_v43 = vsel %vm28221_vm15, %v24833_v37, %v24849_v39  ;;  %v19706_v37 = vld [vmem:[%s28185_s2 + $0x698] sm:$0xff] }
 0x2db   : > { %19486 = vmatmul.mubr.msk.f32.gmra.mrb[14].mxu0 %vm401_vm2, %v19474_v40  ;;  %19498 = vmatmul.mubr.msk.f32.gmra.mrb[14].mxu1 %vm401_vm2, %v19474_v40  ;;  %v24851_v40 = vpop.permute.xlu1 %7332 }
 0x2dc   : > { %5377 = vmatprep.mubr.f32.mxu0 %v28232_v0  ;;  %5502 = vmatprep.mubr.f32.mxu1 %v28232_v0  ;;  %v7338_v44 = vsel %vm28221_vm15, %v24851_v40, %v24831_v36 }
 0x2df   : > { %19487 = vmatmul.mubr.msk.f32.gmra.mrb[16].mxu0 %vm401_vm2, %v19475_v41  ;;  %19499 = vmatmul.mubr.msk.f32.gmra.mrb[16].mxu1 %vm401_vm2, %v19475_v41  ;;  %v6985_v41 = vsel %vm28220_vm14, %v24747_v2, %v24749_v25  ;;  %vm28222_vm14 = vcmask 728064   ;;  %v19675_v2 = vld [vmem:[%s28185_s2 + $0x660] sm:$0xff]  ;;  %v19676_v25 = vld [vmem:[%s28185_s2 + $0x668] sm:$0xff] }
 0x2e0   : > { %5383 = vmatprep.mubr.f32.mxu0 %v28232_v0  ;;  %5508 = vmatprep.mubr.f32.mxu1 %v28232_v0 }
 0x2e3   : > { %19488 = vmatmul.mubr.msk.f32.gmra.mrb[18].mxu0 %vm401_vm2, %v19476_v45  ;;  %19500 = vmatmul.mubr.msk.f32.gmra.mrb[18].mxu1 %vm401_vm2, %v19476_v45  ;;  %v19604_v45 = vld [vmem:[%s28185_s2 + $0x5a8] sm:$0xff] }
 0x2e4   : > { %5681 = vmatprep.mubr.f32.mxu0 %v28232_v0  ;;  %5806 = vmatprep.mubr.f32.mxu1 %v28232_v0 }
 0x2e7   : > { %19513 = vmatmul.mubr.msk.f32.vlgmr.msra.gmra.mrb[0].mxu0 %vm401_vm2, %v19501_v46  ;;  %19525 = vmatmul.mubr.msk.f32.vlgmr.msra.gmra.mrb[0].mxu1 %vm401_vm2, %v19501_v46  ;;  %v19605_v46 = vld [vmem:[%s28185_s2 + $0x5b0] sm:$0xff] }
 0x2e8   : > { %5687 = vmatprep.mubr.f32.mxu0 %v28232_v0  ;;  %5812 = vmatprep.mubr.f32.mxu1 %v28232_v0 }
 0x2e9   : > { %19546 = vmatpush1.msk.msra.mxu0 %vm432_vm1, %v5927_v49  ;;  %19558 = vmatpush1.msk.msra.mxu1 %vm432_vm1, %v5929_v50  ;;  %v19608_v49 = vld [vmem:[%s28185_s2 + $0x5c8] sm:$0xff]  ;;  %v19609_v50 = vld [vmem:[%s28185_s2 + $0x5d0] sm:$0xff] }
 0x2ea   : > { %19579 = vmatprep.subr.msk.mxu0 %vm432_vm1, %v6280_v1  ;;  %19591 = vmatprep.subr.msk.mxu1 %vm432_vm1, %v6282_v51  ;;  %v19610_v1 = vld [vmem:[%s28185_s2 + $0x5d8] sm:$0xff]  ;;  %v19611_v51 = vld [vmem:[%s28185_s2 + $0x5e0] sm:$0xff] }
 0x2eb   : > { %19514 = vmatmul.mubr.msk.f32.gmra.mrb[2].mxu0 %vm401_vm2, %v19502_v52  ;;  %19526 = vmatmul.mubr.msk.f32.gmra.mrb[2].mxu1 %vm401_vm2, %v19502_v52  ;;  %v24925_v52 = vpop.permute.xlu0 %7678 }
 0x2ec   : > { %5693 = vmatprep.mubr.f32.mxu0 %v28232_v0  ;;  %5818 = vmatprep.mubr.f32.mxu1 %v28232_v0 }
 0x2ef   : > { %19515 = vmatmul.mubr.msk.f32.gmra.mrb[4].mxu0 %vm401_vm2, %v19503_v53  ;;  %19527 = vmatmul.mubr.msk.f32.gmra.mrb[4].mxu1 %vm401_vm2, %v19503_v53  ;;  %v24927_v53 = vpop.permute.xlu1 %7680 }
 0x2f0   : > { %5699 = vmatprep.mubr.f32.mxu0 %v28232_v0  ;;  %5824 = vmatprep.mubr.f32.mxu1 %v28232_v0 }
 0x2f3   : > { %19516 = vmatmul.mubr.msk.f32.gmra.mrb[6].mxu0 %vm401_vm2, %v19504_v54  ;;  %19528 = vmatmul.mubr.msk.f32.gmra.mrb[6].mxu1 %vm401_vm2, %v19504_v54  ;;  %v19612_v54 = vld [vmem:[%s28185_s2 + $0x5e8] sm:$0xff] }
 0x2f4   : > { %5705 = vmatprep.mubr.f32.mxu0 %v28232_v0  ;;  %5830 = vmatprep.mubr.f32.mxu1 %v28232_v0 }
 0x2f7   : > { %19517 = vmatmul.mubr.msk.f32.gmra.mrb[8].mxu0 %vm401_vm2, %v19505_v55  ;;  %19529 = vmatmul.mubr.msk.f32.gmra.mrb[8].mxu1 %vm401_vm2, %v19505_v55  ;;  %v19637_v55 = vld [vmem:[%s28185_s2 + $0x5f0] sm:$0xff] }
 0x2f8   : > { %5711 = vmatprep.mubr.f32.mxu0 %v28232_v0  ;;  %5836 = vmatprep.mubr.f32.mxu1 %v28232_v0 }
 0x2fb   : > { %19518 = vmatmul.mubr.msk.f32.gmra.mrb[10].mxu0 %vm401_vm2, %v19506_v56  ;;  %19530 = vmatmul.mubr.msk.f32.gmra.mrb[10].mxu1 %vm401_vm2, %v19506_v56  ;;  %v24943_v56 = vpop.permute.xlu0 %7682 }
 0x2fc   : > { %5717 = vmatprep.mubr.f32.mxu0 %v28232_v0  ;;  %5842 = vmatprep.mubr.f32.mxu1 %v28232_v0 }
 0x2ff   : > { %19519 = vmatmul.mubr.msk.f32.gmra.mrb[12].mxu0 %vm401_vm2, %v19507_v57  ;;  %19531 = vmatmul.mubr.msk.f32.gmra.mrb[12].mxu1 %vm401_vm2, %v19507_v57  ;;  %v24945_v57 = vpop.permute.xlu1 %7684 }
 0x300   : > { %5723 = vmatprep.mubr.f32.mxu0 %v28232_v0  ;;  %5848 = vmatprep.mubr.f32.mxu1 %v28232_v0  ;;  %v7690_v61 = vsel %vm28222_vm14, %v24945_v57, %v24925_v52 }
 0x303   : > { %19520 = vmatmul.mubr.msk.f32.gmra.mrb[14].mxu0 %vm401_vm2, %v19508_v59  ;;  %19532 = vmatmul.mubr.msk.f32.gmra.mrb[14].mxu1 %vm401_vm2, %v19508_v59  ;;  %v7337_v59 = vsel %vm28221_vm15, %v24849_v39, %v24851_v40  ;;  %vm28231_vm15 = vcmask 719872   ;;  %v19709_v39 = vld [vmem:[%s28185_s2 + $0x6b0] sm:$0xff]  ;;  %v19710_v40 = vld [vmem:[%s28185_s2 + $0x6b8] sm:$0xff] }
 0x304   : > { %5729 = vmatprep.mubr.f32.mxu0 %v28232_v0  ;;  %5854 = vmatprep.mubr.f32.mxu1 %v28232_v0 }
 0x307   : > { %19521 = vmatmul.mubr.msk.f32.gmra.mrb[16].mxu0 %vm401_vm2, %v19509_v60  ;;  %19533 = vmatmul.mubr.msk.f32.gmra.mrb[16].mxu1 %vm401_vm2, %v19509_v60  ;;  %v7688_v60 = vsel %vm28222_vm14, %v24927_v53, %v24943_v56 }
 0x308   : > { %5735 = vmatprep.mubr.f32.mxu0 %v28232_v0  ;;  %5860 = vmatprep.mubr.f32.mxu1 %v28232_v0 }
 0x30b   : > { %19522 = vmatmul.mubr.msk.f32.gmra.mrb[18].mxu0 %vm401_vm2, %v19510_v63  ;;  %19534 = vmatmul.mubr.msk.f32.gmra.mrb[18].mxu1 %vm401_vm2, %v19510_v63  ;;  %v19639_v63 = vld [vmem:[%s28185_s2 + $0x600] sm:$0xff] }
 0x30c   : > { %6033 = vmatprep.mubr.f32.mxu0 %v28232_v0  ;;  %6158 = vmatprep.mubr.f32.mxu1 %v28232_v0 }
 0x30f   : > { %19547 = vmatmul.mubr.msk.f32.vlgmr.msra.gmra.mrb[0].mxu0 %vm401_vm2, %v19535_v5  ;;  %19559 = vmatmul.mubr.msk.f32.vlgmr.msra.gmra.mrb[0].mxu1 %vm401_vm2, %v19535_v5  ;;  %v19640_v5 = vld [vmem:[%s28185_s2 + $0x608] sm:$0xff] }
 0x310   : > { %6039 = vmatprep.mubr.f32.mxu0 %v28232_v0  ;;  %6164 = vmatprep.mubr.f32.mxu1 %v28232_v0 }
 0x311   : > { %19580 = vmatpush1.msk.msra.mxu0 %vm432_vm1, %v6279_v8  ;;  %19592 = vmatpush1.msk.msra.mxu1 %vm432_vm1, %v6281_v9  ;;  %v19643_v8 = vld [vmem:[%s28185_s2 + $0x620] sm:$0xff]  ;;  %v19644_v9 = vld [vmem:[%s28185_s2 + $0x628] sm:$0xff] }
 0x312   : > { %19613 = vmatprep.subr.msk.mxu0 %vm432_vm1, %v6632_v10  ;;  %19625 = vmatprep.subr.msk.mxu1 %vm432_vm1, %v6634_v11  ;;  %v19645_v10 = vld [vmem:[%s28185_s2 + $0x630] sm:$0xff]  ;;  %v25019_v11 = vpop.permute.xlu0 %8030 }
 0x313   : > { %19548 = vmatmul.mubr.msk.f32.gmra.mrb[2].mxu0 %vm401_vm2, %v19536_v12  ;;  %19560 = vmatmul.mubr.msk.f32.gmra.mrb[2].mxu1 %vm401_vm2, %v19536_v12  ;;  %v25021_v12 = vpop.permute.xlu1 %8032 }
 0x314   : > { %6045 = vmatprep.mubr.f32.mxu0 %v28232_v0  ;;  %6170 = vmatprep.mubr.f32.mxu1 %v28232_v0 }
 0x317   : > { %19549 = vmatmul.mubr.msk.f32.gmra.mrb[4].mxu0 %vm401_vm2, %v19537_v13  ;;  %19561 = vmatmul.mubr.msk.f32.gmra.mrb[4].mxu1 %vm401_vm2, %v19537_v13  ;;  %v19646_v13 = vld [vmem:[%s28185_s2 + $0x638] sm:$0xff] }
 0x318   : > { %6051 = vmatprep.mubr.f32.mxu0 %v28232_v0  ;;  %6176 = vmatprep.mubr.f32.mxu1 %v28232_v0 }
 0x31b   : > { %19550 = vmatmul.mubr.msk.f32.gmra.mrb[6].mxu0 %vm401_vm2, %v19538_v14  ;;  %19562 = vmatmul.mubr.msk.f32.gmra.mrb[6].mxu1 %vm401_vm2, %v19538_v14  ;;  %v19671_v14 = vld [vmem:[%s28185_s2 + $0x640] sm:$0xff] }
 0x31c   : > { %6057 = vmatprep.mubr.f32.mxu0 %v28232_v0  ;;  %6182 = vmatprep.mubr.f32.mxu1 %v28232_v0 }
 0x31f   : > { %19551 = vmatmul.mubr.msk.f32.gmra.mrb[8].mxu0 %vm401_vm2, %v19539_v15  ;;  %19563 = vmatmul.mubr.msk.f32.gmra.mrb[8].mxu1 %vm401_vm2, %v19539_v15  ;;  %v25037_v15 = vpop.permute.xlu0 %8034 }
 0x320   : > { %6063 = vmatprep.mubr.f32.mxu0 %v28232_v0  ;;  %6188 = vmatprep.mubr.f32.mxu1 %v28232_v0 }
 0x323   : > { %19552 = vmatmul.mubr.msk.f32.gmra.mrb[10].mxu0 %vm401_vm2, %v19540_v16  ;;  %19564 = vmatmul.mubr.msk.f32.gmra.mrb[10].mxu1 %vm401_vm2, %v19540_v16  ;;  %v25039_v16 = vpop.permute.xlu1 %8036 }
 0x324   : > { %6069 = vmatprep.mubr.f32.mxu0 %v28232_v0  ;;  %6194 = vmatprep.mubr.f32.mxu1 %v28232_v0  ;;  %v8042_v20 = vsel %vm28231_vm15, %v25039_v16, %v25019_v11 }
 0x327   : > { %19553 = vmatmul.mubr.msk.f32.gmra.mrb[12].mxu0 %vm401_vm2, %v19541_v17  ;;  %19565 = vmatmul.mubr.msk.f32.gmra.mrb[12].mxu1 %vm401_vm2, %v19541_v17  ;;  %v7687_v17 = vsel %vm28222_vm14, %v24925_v52, %v24927_v53 }
 0x328   : > { %6075 = vmatprep.mubr.f32.mxu0 %v28232_v0  ;;  %6200 = vmatprep.mubr.f32.mxu1 %v28232_v0 }
 0x32b   : > { %19554 = vmatmul.mubr.msk.f32.gmra.mrb[14].mxu0 %vm401_vm2, %v19542_v18  ;;  %19566 = vmatmul.mubr.msk.f32.gmra.mrb[14].mxu1 %vm401_vm2, %v19542_v18  ;;  %v7689_v18 = vsel %vm28222_vm14, %v24943_v56, %v24945_v57  ;;  %vm8390_vm14 = vcmask 711680   ;;  %v19740_v56 = vld [vmem:[%s28185_s2 + $0x6e8] sm:$0xff]  ;;  %v19741_v57 = vld [vmem:[%s28185_s2 + $0x6f0] sm:$0xff] }
 0x32c   : > { %6081 = vmatprep.mubr.f32.mxu0 %v28232_v0  ;;  %6206 = vmatprep.mubr.f32.mxu1 %v28232_v0 }
 0x32f   : > { %19555 = vmatmul.mubr.msk.f32.gmra.mrb[16].mxu0 %vm401_vm2, %v19543_v19  ;;  %19567 = vmatmul.mubr.msk.f32.gmra.mrb[16].mxu1 %vm401_vm2, %v19543_v19  ;;  %v8040_v19 = vsel %vm28231_vm15, %v25021_v12, %v25037_v15 }
 0x330   : > { %6087 = vmatprep.mubr.f32.mxu0 %v28232_v0  ;;  %6212 = vmatprep.mubr.f32.mxu1 %v28232_v0 }
 0x333   : > { %19556 = vmatmul.mubr.msk.f32.gmra.mrb[18].mxu0 %vm401_vm2, %v19544_v22  ;;  %19568 = vmatmul.mubr.msk.f32.gmra.mrb[18].mxu1 %vm401_vm2, %v19544_v22  ;;  %v19673_v22 = vld [vmem:[%s28185_s2 + $0x650] sm:$0xff] }
 0x334   : > { %6385 = vmatprep.mubr.f32.mxu0 %v28232_v0  ;;  %6510 = vmatprep.mubr.f32.mxu1 %v28232_v0 }
 0x337   : > { %19581 = vmatmul.mubr.msk.f32.vlgmr.msra.gmra.mrb[0].mxu0 %vm401_vm2, %v19569_v23  ;;  %19593 = vmatmul.mubr.msk.f32.vlgmr.msra.gmra.mrb[0].mxu1 %vm401_vm2, %v19569_v23  ;;  %v19674_v23 = vld [vmem:[%s28185_s2 + $0x658] sm:$0xff] }
 0x338   : > { %6391 = vmatprep.mubr.f32.mxu0 %v28232_v0  ;;  %6516 = vmatprep.mubr.f32.mxu1 %v28232_v0 }
 0x339   : > { %19614 = vmatpush1.msk.msra.mxu0 %vm432_vm1, %v6631_v26  ;;  %19626 = vmatpush1.msk.msra.mxu1 %vm432_vm1, %v6633_v24  ;;  %v19677_v26 = vld [vmem:[%s28185_s2 + $0x670] sm:$0xff]  ;;  %v19678_v24 = vld [vmem:[%s28185_s2 + $0x678] sm:$0xff] }
 0x33a   : > { %19647 = vmatprep.subr.msk.mxu0 %vm432_vm1, %v6984_v27  ;;  %19659 = vmatprep.subr.msk.mxu1 %vm432_vm1, %v6986_v28  ;;  %v19679_v27 = vld [vmem:[%s28185_s2 + $0x680] sm:$0xff]  ;;  %v25113_v28 = vpop.permute.xlu0 %8382 }
 0x33b   : > { %19582 = vmatmul.mubr.msk.f32.gmra.mrb[2].mxu0 %vm401_vm2, %v19570_v29  ;;  %19594 = vmatmul.mubr.msk.f32.gmra.mrb[2].mxu1 %vm401_vm2, %v19570_v29  ;;  %v25115_v29 = vpop.permute.xlu1 %8384 }
 0x33c   : > { %6397 = vmatprep.mubr.f32.mxu0 %v28232_v0  ;;  %6522 = vmatprep.mubr.f32.mxu1 %v28232_v0  ;;  %v8391_v52 = vsel %vm8390_vm14, %v25113_v28, %v25115_v29 }
 0x33f   : > { %19583 = vmatmul.mubr.msk.f32.gmra.mrb[4].mxu0 %vm401_vm2, %v19571_v30  ;;  %19595 = vmatmul.mubr.msk.f32.gmra.mrb[4].mxu1 %vm401_vm2, %v19571_v30  ;;  %v19680_v30 = vld [vmem:[%s28185_s2 + $0x688] sm:$0xff] }
 0x340   : > { %6403 = vmatprep.mubr.f32.mxu0 %v28232_v0  ;;  %6528 = vmatprep.mubr.f32.mxu1 %v28232_v0 }
 0x343   : > { %19584 = vmatmul.mubr.msk.f32.gmra.mrb[6].mxu0 %vm401_vm2, %v19572_v31  ;;  %19596 = vmatmul.mubr.msk.f32.gmra.mrb[6].mxu1 %vm401_vm2, %v19572_v31  ;;  %v19705_v31 = vld [vmem:[%s28185_s2 + $0x690] sm:$0xff] }
 0x344   : > { %6409 = vmatprep.mubr.f32.mxu0 %v28232_v0  ;;  %6534 = vmatprep.mubr.f32.mxu1 %v28232_v0 }
 0x347   : > { %19585 = vmatmul.mubr.msk.f32.gmra.mrb[8].mxu0 %vm401_vm2, %v19573_v32  ;;  %19597 = vmatmul.mubr.msk.f32.gmra.mrb[8].mxu1 %vm401_vm2, %v19573_v32  ;;  %v25131_v32 = vpop.permute.xlu0 %8386 }
 0x348   : > { %6415 = vmatprep.mubr.f32.mxu0 %v28232_v0  ;;  %6540 = vmatprep.mubr.f32.mxu1 %v28232_v0 }
 0x34b   : > { %19586 = vmatmul.mubr.msk.f32.gmra.mrb[10].mxu0 %vm401_vm2, %v19574_v33  ;;  %19598 = vmatmul.mubr.msk.f32.gmra.mrb[10].mxu1 %vm401_vm2, %v19574_v33  ;;  %v25133_v33 = vpop.permute.xlu1 %8388 }
 0x34c   : > { %6421 = vmatprep.mubr.f32.mxu0 %v28232_v0  ;;  %6546 = vmatprep.mubr.f32.mxu1 %v28232_v0  ;;  %v8394_v36 = vsel %vm8390_vm14, %v25133_v33, %v25113_v28  ;;  %v8393_v53 = vsel %vm8390_vm14, %v25131_v32, %v25133_v33 }
 0x34f   : > { %19587 = vmatmul.mubr.msk.f32.gmra.mrb[12].mxu0 %vm401_vm2, %v19575_v34  ;;  %19599 = vmatmul.mubr.msk.f32.gmra.mrb[12].mxu1 %vm401_vm2, %v19575_v34  ;;  %v8039_v34 = vsel %vm28231_vm15, %v25019_v11, %v25021_v12  ;;  %v19776_v11 = vld [vmem:[%s28185_s2 + $0x748] sm:$0xff]  ;;  %v19777_v12 = vld [vmem:[%s28185_s2 + $0x750] sm:$0xff] }
 0x350   : > { %6427 = vmatprep.mubr.f32.mxu0 %v28232_v0  ;;  %6552 = vmatprep.mubr.f32.mxu1 %v28232_v0 }
 0x353   : > { %19588 = vmatmul.mubr.msk.f32.gmra.mrb[14].mxu0 %vm401_vm2, %v19576_v35  ;;  %19600 = vmatmul.mubr.msk.f32.gmra.mrb[14].mxu1 %vm401_vm2, %v19576_v35  ;;  %v8041_v35 = vsel %vm28231_vm15, %v25037_v15, %v25039_v16  ;;  %vm8742_vm15 = vcmask 703488   ;;  %v19780_v15 = vld [vmem:[%s28185_s2 + $0x768] sm:$0xff]  ;;  %v19781_v16 = vld [vmem:[%s28185_s2 + $0x770] sm:$0xff] }
 0x354   : > { %6433 = vmatprep.mubr.f32.mxu0 %v28232_v0  ;;  %6558 = vmatprep.mubr.f32.mxu1 %v28232_v0 }
 0x357   : > { %19589 = vmatmul.mubr.msk.f32.gmra.mrb[16].mxu0 %vm401_vm2, %v19577_v4  ;;  %19601 = vmatmul.mubr.msk.f32.gmra.mrb[16].mxu1 %vm401_vm2, %v19577_v4  ;;  %v8392_v4 = vsel %vm8390_vm14, %v25115_v29, %v25131_v32 }
 0x358   : > { %6439 = vmatprep.mubr.f32.mxu0 %v28232_v0  ;;  %6564 = vmatprep.mubr.f32.mxu1 %v28232_v0 }
 0x35b   : > { %19590 = vmatmul.mubr.msk.f32.gmra.mrb[18].mxu0 %vm401_vm2, %v19578_v3  ;;  %19602 = vmatmul.mubr.msk.f32.gmra.mrb[18].mxu1 %vm401_vm2, %v19578_v3  ;;  %v19707_v3 = vld [vmem:[%s28185_s2 + $0x6a0] sm:$0xff] }
 0x35c   : > { %6737 = vmatprep.mubr.f32.mxu0 %v28232_v0  ;;  %6862 = vmatprep.mubr.f32.mxu1 %v28232_v0 }
 0x35f   : > { %19615 = vmatmul.mubr.msk.f32.vlgmr.msra.gmra.mrb[0].mxu0 %vm401_vm2, %v19603_v38  ;;  %19627 = vmatmul.mubr.msk.f32.vlgmr.msra.gmra.mrb[0].mxu1 %vm401_vm2, %v19603_v38  ;;  %v19708_v38 = vld [vmem:[%s28185_s2 + $0x6a8] sm:$0xff] }
 0x360   : > { %6743 = vmatprep.mubr.f32.mxu0 %v28232_v0  ;;  %6868 = vmatprep.mubr.f32.mxu1 %v28232_v0 }
 0x361   : > { %19648 = vmatpush1.msk.msra.mxu0 %vm432_vm1, %v6983_v42  ;;  %19660 = vmatpush1.msk.msra.mxu1 %vm432_vm1, %v6985_v41  ;;  %v19711_v42 = vld [vmem:[%s28185_s2 + $0x6c0] sm:$0xff]  ;;  %v19712_v41 = vld [vmem:[%s28185_s2 + $0x6c8] sm:$0xff] }
 0x362   : > { %19681 = vmatprep.subr.msk.mxu0 %vm432_vm1, %v7336_v43  ;;  %19693 = vmatprep.subr.msk.mxu1 %vm432_vm1, %v7338_v44  ;;  %v9081_v43 = vld [vmem:[%s28186_s3 + $0x30] sm:$0xff]  ;;  %v9082_v44 = vld [vmem:[%s28186_s3 + $0x38] sm:$0xff] }
 0x363   : > { %19616 = vmatmul.mubr.msk.f32.gmra.mrb[2].mxu0 %vm401_vm2, %v19604_v45  ;;  %19628 = vmatmul.mubr.msk.f32.gmra.mrb[2].mxu1 %vm401_vm2, %v19604_v45  ;;  %v19713_v45 = vld [vmem:[%s28185_s2 + $0x6d0] sm:$0xff] }
 0x364   : > { %6749 = vmatprep.mubr.f32.mxu0 %v28232_v0  ;;  %6874 = vmatprep.mubr.f32.mxu1 %v28232_v0 }
 0x367   : > { %19617 = vmatmul.mubr.msk.f32.gmra.mrb[4].mxu0 %vm401_vm2, %v19605_v46  ;;  %19629 = vmatmul.mubr.msk.f32.gmra.mrb[4].mxu1 %vm401_vm2, %v19605_v46  ;;  %v22882_v46 = vmov 0  }
 0x368   : > { %6755 = vmatprep.mubr.f32.mxu0 %v28232_v0  ;;  %6880 = vmatprep.mubr.f32.mxu1 %v28232_v0 }
 0x369   : > { %22041 = vset.pattern.permute.xlu0 %v22882_v46  ;;  %22042 = vset.pattern.permute.xlu1 %v22882_v46 }
 0x36a   : > { %9117 = vperm.xlu0 %22041, %v9081_v43   ;;  %9122 = vperm.xlu1 %22042, %v9082_v44  }
 0x36b   : > { %19618 = vmatmul.mubr.msk.f32.gmra.mrb[6].mxu0 %vm401_vm2, %v19606_v47  ;;  %19630 = vmatmul.mubr.msk.f32.gmra.mrb[6].mxu1 %vm401_vm2, %v19606_v47  ;;  %v25213_v47 = vpop.permute.xlu0 %8734 }
 0x36c   : > { %6761 = vmatprep.mubr.f32.mxu0 %v28232_v0  ;;  %6886 = vmatprep.mubr.f32.mxu1 %v28232_v0 }
 0x36f   : > { %19619 = vmatmul.mubr.msk.f32.gmra.mrb[8].mxu0 %vm401_vm2, %v19607_v48  ;;  %19631 = vmatmul.mubr.msk.f32.gmra.mrb[8].mxu1 %vm401_vm2, %v19607_v48  ;;  %v25215_v48 = vpop.permute.xlu1 %8736 }
 0x370   : > { %6767 = vmatprep.mubr.f32.mxu0 %v28232_v0  ;;  %6892 = vmatprep.mubr.f32.mxu1 %v28232_v0 }
 0x373   : > { %19620 = vmatmul.mubr.msk.f32.gmra.mrb[10].mxu0 %vm401_vm2, %v19608_v49  ;;  %19632 = vmatmul.mubr.msk.f32.gmra.mrb[10].mxu1 %vm401_vm2, %v19608_v49  ;;  %v19714_v49 = vld [vmem:[%s28185_s2 + $0x6d8] sm:$0xff] }
 0x374   : > { %6773 = vmatprep.mubr.f32.mxu0 %v28232_v0  ;;  %6898 = vmatprep.mubr.f32.mxu1 %v28232_v0 }
 0x377   : > { %19621 = vmatmul.mubr.msk.f32.gmra.mrb[12].mxu0 %vm401_vm2, %v19609_v50  ;;  %19633 = vmatmul.mubr.msk.f32.gmra.mrb[12].mxu1 %vm401_vm2, %v19609_v50  ;;  %v19739_v50 = vld [vmem:[%s28185_s2 + $0x6e0] sm:$0xff] }
 0x378   : > { %6779 = vmatprep.mubr.f32.mxu0 %v28232_v0  ;;  %6904 = vmatprep.mubr.f32.mxu1 %v28232_v0 }
 0x37b   : > { %19622 = vmatmul.mubr.msk.f32.gmra.mrb[14].mxu0 %vm401_vm2, %v19610_v1  ;;  %19634 = vmatmul.mubr.msk.f32.gmra.mrb[14].mxu1 %vm401_vm2, %v19610_v1  ;;  %v8739_v1 = vpop.permute.xlu0 %8738 }
 0x37c   : > { %6785 = vmatprep.mubr.f32.mxu0 %v28232_v0  ;;  %6910 = vmatprep.mubr.f32.mxu1 %v28232_v0 }
 0x37f   : > { %19623 = vmatmul.mubr.msk.f32.gmra.mrb[16].mxu0 %vm401_vm2, %v19611_v51  ;;  %19635 = vmatmul.mubr.msk.f32.gmra.mrb[16].mxu1 %vm401_vm2, %v19611_v51  ;;  %v8741_v51 = vpop.permute.xlu1 %8740 }
 0x380   : > { %6791 = vmatprep.mubr.f32.mxu0 %v28232_v0  ;;  %6916 = vmatprep.mubr.f32.mxu1 %v28232_v0 }
 0x383   : > { %19624 = vmatmul.mubr.msk.f32.gmra.mrb[18].mxu0 %vm401_vm2, %v19612_v54  ;;  %19636 = vmatmul.mubr.msk.f32.gmra.mrb[18].mxu1 %vm401_vm2, %v19612_v54  ;;  %v8744_v54 = vsel %vm8742_vm15, %v25215_v48, %v8739_v1 }
 0x384   : > { %7089 = vmatprep.mubr.f32.mxu0 %v28232_v0  ;;  %7214 = vmatprep.mubr.f32.mxu1 %v28232_v0 }
 0x387   : > { %19649 = vmatmul.mubr.msk.f32.vlgmr.msra.gmra.mrb[0].mxu0 %vm401_vm2, %v19637_v55  ;;  %19661 = vmatmul.mubr.msk.f32.vlgmr.msra.gmra.mrb[0].mxu1 %vm401_vm2, %v19637_v55  ;;  %v8746_v55 = vsel %vm8742_vm15, %v8741_v51, %v25213_v47 }
 0x388   : > { %7095 = vmatprep.mubr.f32.mxu0 %v28232_v0  ;;  %7220 = vmatprep.mubr.f32.mxu1 %v28232_v0 }
 0x389   : > { %19682 = vmatpush1.msk.msra.mxu0 %vm432_vm1, %v7335_v58  ;;  %19694 = vmatpush1.msk.msra.mxu1 %vm432_vm1, %v7337_v59  ;;  %v19742_v58 = vld [vmem:[%s28185_s2 + $0x6f8] sm:$0xff]  ;;  %v19743_v59 = vld [vmem:[%s28185_s2 + $0x700] sm:$0xff] }
 0x38a   : > { %19715 = vmatprep.subr.msk.mxu0 %vm432_vm1, %v7688_v60  ;;  %19727 = vmatprep.subr.msk.mxu1 %vm432_vm1, %v7690_v61  ;;  %v19744_v60 = vld [vmem:[%s28185_s2 + $0x708] sm:$0xff]  ;;  %v19745_v61 = vld [vmem:[%s28185_s2 + $0x710] sm:$0xff] }
 0x38b   : > { %19650 = vmatmul.mubr.msk.f32.gmra.mrb[2].mxu0 %vm401_vm2, %v19638_v62  ;;  %19662 = vmatmul.mubr.msk.f32.gmra.mrb[2].mxu1 %vm401_vm2, %v19638_v62  ;;  %v19746_v62 = vld [vmem:[%s28185_s2 + $0x718] sm:$0xff] }
 0x38c   : > { %7101 = vmatprep.mubr.f32.mxu0 %v28232_v0  ;;  %7226 = vmatprep.mubr.f32.mxu1 %v28232_v0 }
 0x38f   : > { %19651 = vmatmul.mubr.msk.f32.gmra.mrb[4].mxu0 %vm401_vm2, %v19639_v63  ;;  %19663 = vmatmul.mubr.msk.f32.gmra.mrb[4].mxu1 %vm401_vm2, %v19639_v63  ;;  %v19747_v63 = vld [vmem:[%s28185_s2 + $0x720] sm:$0xff] }
 0x390   : > { %7107 = vmatprep.mubr.f32.mxu0 %v28232_v0  ;;  %7232 = vmatprep.mubr.f32.mxu1 %v28232_v0 }
 0x393   : > { %19652 = vmatmul.mubr.msk.f32.gmra.mrb[6].mxu0 %vm401_vm2, %v19640_v5  ;;  %19664 = vmatmul.mubr.msk.f32.gmra.mrb[6].mxu1 %vm401_vm2, %v19640_v5  ;;  %v19748_v5 = vld [vmem:[%s28185_s2 + $0x728] sm:$0xff] }
 0x394   : > { %7113 = vmatprep.mubr.f32.mxu0 %v28232_v0  ;;  %7238 = vmatprep.mubr.f32.mxu1 %v28232_v0 }
 0x397   : > { %19653 = vmatmul.mubr.msk.f32.gmra.mrb[8].mxu0 %vm401_vm2, %v19641_v6  ;;  %19665 = vmatmul.mubr.msk.f32.gmra.mrb[8].mxu1 %vm401_vm2, %v19641_v6  ;;  %v19773_v6 = vld [vmem:[%s28185_s2 + $0x730] sm:$0xff] }
 0x398   : > { %7119 = vmatprep.mubr.f32.mxu0 %v28232_v0  ;;  %7244 = vmatprep.mubr.f32.mxu1 %v28232_v0 }
 0x39b   : > { %19654 = vmatmul.mubr.msk.f32.gmra.mrb[10].mxu0 %vm401_vm2, %v19642_v7  ;;  %19666 = vmatmul.mubr.msk.f32.gmra.mrb[10].mxu1 %vm401_vm2, %v19642_v7  ;;  %v8743_v7 = vsel %vm8742_vm15, %v25213_v47, %v25215_v48 }
 0x39c   : > { %7125 = vmatprep.mubr.f32.mxu0 %v28232_v0  ;;  %7250 = vmatprep.mubr.f32.mxu1 %v28232_v0 }
 0x39f   : > { %19655 = vmatmul.mubr.msk.f32.gmra.mrb[12].mxu0 %vm401_vm2, %v19643_v8  ;;  %19667 = vmatmul.mubr.msk.f32.gmra.mrb[12].mxu1 %vm401_vm2, %v19643_v8  ;;  %v8745_v8 = vsel %vm8742_vm15, %v8739_v1, %v8741_v51  ;;  %v362_v1 = vld [vmem:[%s28184_s1] sm:$0xf] }
 0x3a0   : > { %7131 = vmatprep.mubr.f32.mxu0 %v28232_v0  ;;  %7256 = vmatprep.mubr.f32.mxu1 %v28232_v0 }
 0x3a3   : > { %19656 = vmatmul.mubr.msk.f32.gmra.mrb[14].mxu0 %vm401_vm2, %v19644_v9  ;;  %19668 = vmatmul.mubr.msk.f32.gmra.mrb[14].mxu1 %vm401_vm2, %v19644_v9  ;;  %v19774_v9 = vld [vmem:[%s28185_s2 + $0x738] sm:$0xff] }
 0x3a4   : > { %7137 = vmatprep.mubr.f32.mxu0 %v28232_v0  ;;  %7262 = vmatprep.mubr.f32.mxu1 %v28232_v0 }
 0x3a7   : > { %19657 = vmatmul.mubr.msk.f32.gmra.mrb[16].mxu0 %vm401_vm2, %v19645_v10  ;;  %19669 = vmatmul.mubr.msk.f32.gmra.mrb[16].mxu1 %vm401_vm2, %v19645_v10  ;;  %v19775_v10 = vld [vmem:[%s28185_s2 + $0x740] sm:$0xff] }
 0x3a8   : > { %7143 = vmatprep.mubr.f32.mxu0 %v28232_v0  ;;  %7268 = vmatprep.mubr.f32.mxu1 %v28232_v0 }
 0x3ab   : > { %19658 = vmatmul.mubr.msk.f32.gmra.mrb[18].mxu0 %vm401_vm2, %v19646_v13  ;;  %19670 = vmatmul.mubr.msk.f32.gmra.mrb[18].mxu1 %vm401_vm2, %v19646_v13  ;;  %v19778_v13 = vld [vmem:[%s28185_s2 + $0x758] sm:$0xff] }
 0x3ac   : > { %7441 = vmatprep.mubr.f32.mxu0 %v28232_v0  ;;  %7566 = vmatprep.mubr.f32.mxu1 %v28232_v0 }
 0x3af   : > { %19683 = vmatmul.mubr.msk.f32.vlgmr.msra.gmra.mrb[0].mxu0 %vm401_vm2, %v19671_v14  ;;  %19695 = vmatmul.mubr.msk.f32.vlgmr.msra.gmra.mrb[0].mxu1 %vm401_vm2, %v19671_v14  ;;  %v19779_v14 = vld [vmem:[%s28185_s2 + $0x760] sm:$0xff] }
 0x3b0   : > { %7447 = vmatprep.mubr.f32.mxu0 %v28232_v0  ;;  %7572 = vmatprep.mubr.f32.mxu1 %v28232_v0 }
 0x3b1   : > { %19716 = vmatpush1.msk.msra.mxu0 %vm432_vm1, %v7687_v17  ;;  %19728 = vmatpush1.msk.msra.mxu1 %vm432_vm1, %v7689_v18  ;;  %v19782_v17 = vld [vmem:[%s28185_s2 + $0x778] sm:$0xff]  ;;  %v19807_v18 = vld [vmem:[%s28185_s2 + $0x780] sm:$0xff] }
 0x3b2   : > { %19749 = vmatprep.subr.msk.mxu0 %vm432_vm1, %v8040_v19  ;;  %19761 = vmatprep.subr.msk.mxu1 %vm432_vm1, %v8042_v20  ;;  %v19808_v19 = vld [vmem:[%s28185_s2 + $0x788] sm:$0xff]  ;;  %v19809_v20 = vld [vmem:[%s28185_s2 + $0x790] sm:$0xff] }
 0x3b3   : > { %19684 = vmatmul.mubr.msk.f32.gmra.mrb[2].mxu0 %vm401_vm2, %v19672_v21  ;;  %19696 = vmatmul.mubr.msk.f32.gmra.mrb[2].mxu1 %vm401_vm2, %v19672_v21  ;;  %v19810_v21 = vld [vmem:[%s28185_s2 + $0x798] sm:$0xff] }
 0x3b4   : > { %7453 = vmatprep.mubr.f32.mxu0 %v28232_v0  ;;  %7578 = vmatprep.mubr.f32.mxu1 %v28232_v0 }
 0x3b7   : > { %19685 = vmatmul.mubr.msk.f32.gmra.mrb[4].mxu0 %vm401_vm2, %v19673_v22  ;;  %19697 = vmatmul.mubr.msk.f32.gmra.mrb[4].mxu1 %vm401_vm2, %v19673_v22  ;;  %v19811_v22 = vld [vmem:[%s28185_s2 + $0x7a0] sm:$0xff] }
 0x3b8   : > { %7459 = vmatprep.mubr.f32.mxu0 %v28232_v0  ;;  %7584 = vmatprep.mubr.f32.mxu1 %v28232_v0 }
 0x3bb   : > { %19686 = vmatmul.mubr.msk.f32.gmra.mrb[6].mxu0 %vm401_vm2, %v19674_v23  ;;  %19698 = vmatmul.mubr.msk.f32.gmra.mrb[6].mxu1 %vm401_vm2, %v19674_v23  ;;  %v19812_v23 = vld [vmem:[%s28185_s2 + $0x7a8] sm:$0xff] }
 0x3bc   : > { %7465 = vmatprep.mubr.f32.mxu0 %v28232_v0  ;;  %7590 = vmatprep.mubr.f32.mxu1 %v28232_v0 }
 0x3bf   : > { %19687 = vmatmul.mubr.msk.f32.gmra.mrb[8].mxu0 %vm401_vm2, %v19675_v2  ;;  %19699 = vmatmul.mubr.msk.f32.gmra.mrb[8].mxu1 %vm401_vm2, %v19675_v2  ;;  %v19813_v2 = vld [vmem:[%s28185_s2 + $0x7b0] sm:$0xff] }
 0x3c0   : > { %7471 = vmatprep.mubr.f32.mxu0 %v28232_v0  ;;  %7596 = vmatprep.mubr.f32.mxu1 %v28232_v0 }
 0x3c3   : > { %19688 = vmatmul.mubr.msk.f32.gmra.mrb[10].mxu0 %vm401_vm2, %v19676_v25  ;;  %19700 = vmatmul.mubr.msk.f32.gmra.mrb[10].mxu1 %vm401_vm2, %v19676_v25  ;;  %v19814_v25 = vld [vmem:[%s28185_s2 + $0x7b8] sm:$0xff] }
 0x3c4   : > { %7477 = vmatprep.mubr.f32.mxu0 %v28232_v0  ;;  %7602 = vmatprep.mubr.f32.mxu1 %v28232_v0 }
 0x3c7   : > { %19689 = vmatmul.mubr.msk.f32.gmra.mrb[12].mxu0 %vm401_vm2, %v19677_v26  ;;  %19701 = vmatmul.mubr.msk.f32.gmra.mrb[12].mxu1 %vm401_vm2, %v19677_v26  ;;  %v19815_v26 = vld [vmem:[%s28185_s2 + $0x7c0] sm:$0xff] }
 0x3c8   : > { %7483 = vmatprep.mubr.f32.mxu0 %v28232_v0  ;;  %7608 = vmatprep.mubr.f32.mxu1 %v28232_v0 }
 0x3cb   : > { %19690 = vmatmul.mubr.msk.f32.gmra.mrb[14].mxu0 %vm401_vm2, %v19678_v24  ;;  %19702 = vmatmul.mubr.msk.f32.gmra.mrb[14].mxu1 %vm401_vm2, %v19678_v24  ;;  %v19816_v24 = vld [vmem:[%s28185_s2 + $0x7c8] sm:$0xff] }
 0x3cc   : > { %7489 = vmatprep.mubr.f32.mxu0 %v28232_v0  ;;  %7614 = vmatprep.mubr.f32.mxu1 %v28232_v0 }
 0x3cf   : > { %19691 = vmatmul.mubr.msk.f32.gmra.mrb[16].mxu0 %vm401_vm2, %v19679_v27  ;;  %19703 = vmatmul.mubr.msk.f32.gmra.mrb[16].mxu1 %vm401_vm2, %v19679_v27 }
 0x3d0   : > { %7495 = vmatprep.mubr.f32.mxu0 %v28232_v0  ;;  %7620 = vmatprep.mubr.f32.mxu1 %v28232_v0 }
 0x3d3   : > { %19692 = vmatmul.mubr.msk.f32.gmra.mrb[18].mxu0 %vm401_vm2, %v19680_v30  ;;  %19704 = vmatmul.mubr.msk.f32.gmra.mrb[18].mxu1 %vm401_vm2, %v19680_v30 }
 0x3d4   : > { %7793 = vmatprep.mubr.f32.mxu0 %v28232_v0  ;;  %7918 = vmatprep.mubr.f32.mxu1 %v28232_v0 }
 0x3d7   : > { %19717 = vmatmul.mubr.msk.f32.vlgmr.msra.gmra.mrb[0].mxu0 %vm401_vm2, %v19705_v31  ;;  %19729 = vmatmul.mubr.msk.f32.vlgmr.msra.gmra.mrb[0].mxu1 %vm401_vm2, %v19705_v31 }
 0x3d8   : > { %7799 = vmatprep.mubr.f32.mxu0 %v28232_v0  ;;  %7924 = vmatprep.mubr.f32.mxu1 %v28232_v0 }
 0x3d9   : > { %19750 = vmatpush1.msk.msra.mxu0 %vm432_vm1, %v8039_v34  ;;  %19762 = vmatpush1.msk.msra.mxu1 %vm432_vm1, %v8041_v35 }
 0x3da   : > { %19783 = vmatprep.subr.msk.mxu0 %vm432_vm1, %v8392_v4  ;;  %19795 = vmatprep.subr.msk.mxu1 %vm432_vm1, %v8394_v36 }
 0x3db   : > { %19718 = vmatmul.mubr.msk.f32.gmra.mrb[2].mxu0 %vm401_vm2, %v19706_v37  ;;  %19730 = vmatmul.mubr.msk.f32.gmra.mrb[2].mxu1 %vm401_vm2, %v19706_v37 }
 0x3dc   : > { %7805 = vmatprep.mubr.f32.mxu0 %v28232_v0  ;;  %7930 = vmatprep.mubr.f32.mxu1 %v28232_v0 }
 0x3df   : > { %19719 = vmatmul.mubr.msk.f32.gmra.mrb[4].mxu0 %vm401_vm2, %v19707_v3  ;;  %19731 = vmatmul.mubr.msk.f32.gmra.mrb[4].mxu1 %vm401_vm2, %v19707_v3  ;;  %v9176_v3 = vlaneseq }
 0x3e0   : > { %7811 = vmatprep.mubr.f32.mxu0 %v28232_v0  ;;  %7936 = vmatprep.mubr.f32.mxu1 %v28232_v0 }
 0x3e3   : > { %19720 = vmatmul.mubr.msk.f32.gmra.mrb[6].mxu0 %vm401_vm2, %v19708_v38  ;;  %19732 = vmatmul.mubr.msk.f32.gmra.mrb[6].mxu1 %vm401_vm2, %v19708_v38 }
 0x3e4   : > { %7817 = vmatprep.mubr.f32.mxu0 %v28232_v0  ;;  %7942 = vmatprep.mubr.f32.mxu1 %v28232_v0 }
 0x3e7   : > { %19721 = vmatmul.mubr.msk.f32.gmra.mrb[8].mxu0 %vm401_vm2, %v19709_v39  ;;  %19733 = vmatmul.mubr.msk.f32.gmra.mrb[8].mxu1 %vm401_vm2, %v19709_v39 }
 0x3e8   : > { %7823 = vmatprep.mubr.f32.mxu0 %v28232_v0  ;;  %7948 = vmatprep.mubr.f32.mxu1 %v28232_v0 }
 0x3eb   : > { %19722 = vmatmul.mubr.msk.f32.gmra.mrb[10].mxu0 %vm401_vm2, %v19710_v40  ;;  %19734 = vmatmul.mubr.msk.f32.gmra.mrb[10].mxu1 %vm401_vm2, %v19710_v40 }
 0x3ec   : > { %7829 = vmatprep.mubr.f32.mxu0 %v28232_v0  ;;  %7954 = vmatprep.mubr.f32.mxu1 %v28232_v0 }
 0x3ef   : > { %19723 = vmatmul.mubr.msk.f32.gmra.mrb[12].mxu0 %vm401_vm2, %v19711_v42  ;;  %19735 = vmatmul.mubr.msk.f32.gmra.mrb[12].mxu1 %vm401_vm2, %v19711_v42 }
 0x3f0   : > { %7835 = vmatprep.mubr.f32.mxu0 %v28232_v0  ;;  %7960 = vmatprep.mubr.f32.mxu1 %v28232_v0 }
 0x3f3   : > { %19724 = vmatmul.mubr.msk.f32.gmra.mrb[14].mxu0 %vm401_vm2, %v19712_v41  ;;  %19736 = vmatmul.mubr.msk.f32.gmra.mrb[14].mxu1 %vm401_vm2, %v19712_v41  ;;  %v9177_v41 = vshrl.u32 %v9176_v3, 7 }
 0x3f4   : > { %7841 = vmatprep.mubr.f32.mxu0 %v28232_v0  ;;  %7966 = vmatprep.mubr.f32.mxu1 %v28232_v0 }
 0x3f5   : > { %v9178_v47 = vsub.s32 0, %v9177_v41  ;;  %v9186_v48 = vsub.s32 2, %v9177_v41  ;;  %v9182_v51 = vsub.s32 1, %v9177_v41 }
 0x3f7   : > { %19725 = vmatmul.mubr.msk.f32.gmra.mrb[16].mxu0 %vm401_vm2, %v19713_v45  ;;  %19737 = vmatmul.mubr.msk.f32.gmra.mrb[16].mxu1 %vm401_vm2, %v19713_v45 }
 0x3f8   : > { %7847 = vmatprep.mubr.f32.mxu0 %v28232_v0  ;;  %7972 = vmatprep.mubr.f32.mxu1 %v28232_v0 }
 0x3fb   : > { %19726 = vmatmul.mubr.msk.f32.gmra.mrb[18].mxu0 %vm401_vm2, %v19714_v49  ;;  %19738 = vmatmul.mubr.msk.f32.gmra.mrb[18].mxu1 %vm401_vm2, %v19714_v49 }
 0x3fc   : > { %8145 = vmatprep.mubr.f32.mxu0 %v28232_v0  ;;  %8270 = vmatprep.mubr.f32.mxu1 %v28232_v0 }
 0x3ff   : > { %19751 = vmatmul.mubr.msk.f32.vlgmr.msra.gmra.mrb[0].mxu0 %vm401_vm2, %v19739_v50  ;;  %19763 = vmatmul.mubr.msk.f32.vlgmr.msra.gmra.mrb[0].mxu1 %vm401_vm2, %v19739_v50 }
 0x400   : > { %8151 = vmatprep.mubr.f32.mxu0 %v28232_v0  ;;  %8276 = vmatprep.mubr.f32.mxu1 %v28232_v0 }
 0x401   : > { %19784 = vmatpush1.msk.msra.mxu0 %vm432_vm1, %v8391_v52  ;;  %19796 = vmatpush1.msk.msra.mxu1 %vm432_vm1, %v8393_v53  ;;  %v9190_v52 = vsub.s32 3, %v9177_v41 }
 0x402   : > { %19817 = vmatprep.subr.msk.mxu0 %vm432_vm1, %v8744_v54  ;;  %19829 = vmatprep.subr.msk.mxu1 %vm432_vm1, %v8746_v55  ;;  %v9118_v55 = vpop.permute.xlu0 %9117 }
 0x403   : > { %19752 = vmatmul.mubr.msk.f32.gmra.mrb[2].mxu0 %vm401_vm2, %v19740_v56  ;;  %19764 = vmatmul.mubr.msk.f32.gmra.mrb[2].mxu1 %vm401_vm2, %v19740_v56  ;;  %v25509_v56 = vrot.slane %v362_v1, %v9178_v47 }
 0x404   : > { %8157 = vmatprep.mubr.f32.mxu0 %v28232_v0  ;;  %8282 = vmatprep.mubr.f32.mxu1 %v28232_v0 }
 0x407   : > { %19753 = vmatmul.mubr.msk.f32.gmra.mrb[4].mxu0 %vm401_vm2, %v19741_v57  ;;  %19765 = vmatmul.mubr.msk.f32.gmra.mrb[4].mxu1 %vm401_vm2, %v19741_v57  ;;  %v25511_v57 = vrot.slane %v362_v1, %v9186_v48 }
 0x408   : > { %8163 = vmatprep.mubr.f32.mxu0 %v28232_v0  ;;  %8288 = vmatprep.mubr.f32.mxu1 %v28232_v0 }
 0x40b   : > { %19754 = vmatmul.mubr.msk.f32.gmra.mrb[6].mxu0 %vm401_vm2, %v19742_v58  ;;  %19766 = vmatmul.mubr.msk.f32.gmra.mrb[6].mxu1 %vm401_vm2, %v19742_v58 }
 0x40c   : > { %8169 = vmatprep.mubr.f32.mxu0 %v28232_v0  ;;  %8294 = vmatprep.mubr.f32.mxu1 %v28232_v0 }
 0x40f   : > { %19755 = vmatmul.mubr.msk.f32.gmra.mrb[8].mxu0 %vm401_vm2, %v19743_v59  ;;  %19767 = vmatmul.mubr.msk.f32.gmra.mrb[8].mxu1 %vm401_vm2, %v19743_v59 }
 0x410   : > { %8175 = vmatprep.mubr.f32.mxu0 %v28232_v0  ;;  %8300 = vmatprep.mubr.f32.mxu1 %v28232_v0 }
 0x413   : > { %19756 = vmatmul.mubr.msk.f32.gmra.mrb[10].mxu0 %vm401_vm2, %v19744_v60  ;;  %19768 = vmatmul.mubr.msk.f32.gmra.mrb[10].mxu1 %vm401_vm2, %v19744_v60  ;;  %v25513_v60 = vrot.slane %v362_v1, %v9182_v51 }
 0x414   : > { %8181 = vmatprep.mubr.f32.mxu0 %v28232_v0  ;;  %8306 = vmatprep.mubr.f32.mxu1 %v28232_v0 }
 0x417   : > { %19757 = vmatmul.mubr.msk.f32.gmra.mrb[12].mxu0 %vm401_vm2, %v19745_v61  ;;  %19769 = vmatmul.mubr.msk.f32.gmra.mrb[12].mxu1 %vm401_vm2, %v19745_v61  ;;  %v25515_v61 = vrot.slane %v362_v1, %v9190_v52 }
 0x418   : > { %8187 = vmatprep.mubr.f32.mxu0 %v28232_v0  ;;  %8312 = vmatprep.mubr.f32.mxu1 %v28232_v0 }
 0x41b   : > { %19758 = vmatmul.mubr.msk.f32.gmra.mrb[14].mxu0 %vm401_vm2, %v19746_v62  ;;  %19770 = vmatmul.mubr.msk.f32.gmra.mrb[14].mxu1 %vm401_vm2, %v19746_v62 }
 0x41c   : > { %8193 = vmatprep.mubr.f32.mxu0 %v28232_v0  ;;  %8318 = vmatprep.mubr.f32.mxu1 %v28232_v0 }
 0x41f   : > { %19759 = vmatmul.mubr.msk.f32.gmra.mrb[16].mxu0 %vm401_vm2, %v19747_v63  ;;  %19771 = vmatmul.mubr.msk.f32.gmra.mrb[16].mxu1 %vm401_vm2, %v19747_v63 }
 0x420   : > { %8199 = vmatprep.mubr.f32.mxu0 %v28232_v0  ;;  %8324 = vmatprep.mubr.f32.mxu1 %v28232_v0 }
 0x423   : > { %19760 = vmatmul.mubr.msk.f32.gmra.mrb[18].mxu0 %vm401_vm2, %v19748_v5  ;;  %19772 = vmatmul.mubr.msk.f32.gmra.mrb[18].mxu1 %vm401_vm2, %v19748_v5 }
 0x424   : > { %8497 = vmatprep.mubr.f32.mxu0 %v28232_v0  ;;  %8622 = vmatprep.mubr.f32.mxu1 %v28232_v0 }
 0x427   : > { %19785 = vmatmul.mubr.msk.f32.vlgmr.msra.gmra.mrb[0].mxu0 %vm401_vm2, %v19773_v6  ;;  %19797 = vmatmul.mubr.msk.f32.vlgmr.msra.gmra.mrb[0].mxu1 %vm401_vm2, %v19773_v6 }
 0x428   : > { %8503 = vmatprep.mubr.f32.mxu0 %v28232_v0  ;;  %8628 = vmatprep.mubr.f32.mxu1 %v28232_v0 }
 0x429   : > { %19818 = vmatpush1.msk.msra.mxu0 %vm432_vm1, %v8743_v7  ;;  %19830 = vmatpush1.msk.msra.mxu1 %vm432_vm1, %v8745_v8  ;;  %vm28310_vm1 = vcmask 1039360  }
 0x42b   : > { %19786 = vmatmul.mubr.msk.f32.gmra.mrb[2].mxu0 %vm401_vm2, %v19774_v9  ;;  %19798 = vmatmul.mubr.msk.f32.gmra.mrb[2].mxu1 %vm401_vm2, %v19774_v9  ;;  %v9123_v9 = vpop.permute.xlu1 %9122 }
 0x42c   : > { %8509 = vmatprep.mubr.f32.mxu0 %v28232_v0  ;;  %8634 = vmatprep.mubr.f32.mxu1 %v28232_v0 }
 0x42f   : > { %19787 = vmatmul.mubr.msk.f32.gmra.mrb[4].mxu0 %vm401_vm2, %v19775_v10  ;;  %19799 = vmatmul.mubr.msk.f32.gmra.mrb[4].mxu1 %vm401_vm2, %v19775_v10 }
 0x430   : > { %8515 = vmatprep.mubr.f32.mxu0 %v28232_v0  ;;  %8640 = vmatprep.mubr.f32.mxu1 %v28232_v0 }
 0x433   : > { %19788 = vmatmul.mubr.msk.f32.gmra.mrb[6].mxu0 %vm401_vm2, %v19776_v11  ;;  %19800 = vmatmul.mubr.msk.f32.gmra.mrb[6].mxu1 %vm401_vm2, %v19776_v11 }
 0x434   : > { %8521 = vmatprep.mubr.f32.mxu0 %v28232_v0  ;;  %8646 = vmatprep.mubr.f32.mxu1 %v28232_v0 }
 0x437   : > { %19789 = vmatmul.mubr.msk.f32.gmra.mrb[8].mxu0 %vm401_vm2, %v19777_v12  ;;  %19801 = vmatmul.mubr.msk.f32.gmra.mrb[8].mxu1 %vm401_vm2, %v19777_v12 }
 0x438   : > { %8527 = vmatprep.mubr.f32.mxu0 %v28232_v0  ;;  %8652 = vmatprep.mubr.f32.mxu1 %v28232_v0 }
 0x43b   : > { %19790 = vmatmul.mubr.msk.f32.gmra.mrb[10].mxu0 %vm401_vm2, %v19778_v13  ;;  %19802 = vmatmul.mubr.msk.f32.gmra.mrb[10].mxu1 %vm401_vm2, %v19778_v13 }
 0x43c   : > { %8533 = vmatprep.mubr.f32.mxu0 %v28232_v0  ;;  %8658 = vmatprep.mubr.f32.mxu1 %v28232_v0 }
 0x43f   : > { %19791 = vmatmul.mubr.msk.f32.gmra.mrb[12].mxu0 %vm401_vm2, %v19779_v14  ;;  %19803 = vmatmul.mubr.msk.f32.gmra.mrb[12].mxu1 %vm401_vm2, %v19779_v14 }
 0x440   : > { %8539 = vmatprep.mubr.f32.mxu0 %v28232_v0  ;;  %8664 = vmatprep.mubr.f32.mxu1 %v28232_v0 }
 0x443   : > { %19792 = vmatmul.mubr.msk.f32.gmra.mrb[14].mxu0 %vm401_vm2, %v19780_v15  ;;  %19804 = vmatmul.mubr.msk.f32.gmra.mrb[14].mxu1 %vm401_vm2, %v19780_v15 }
 0x444   : > { %8545 = vmatprep.mubr.f32.mxu0 %v28232_v0  ;;  %8670 = vmatprep.mubr.f32.mxu1 %v28232_v0 }
 0x447   : > { %19793 = vmatmul.mubr.msk.f32.gmra.mrb[16].mxu0 %vm401_vm2, %v19781_v16  ;;  %19805 = vmatmul.mubr.msk.f32.gmra.mrb[16].mxu1 %vm401_vm2, %v19781_v16 }
 0x448   : > { %8551 = vmatprep.mubr.f32.mxu0 %v28232_v0  ;;  %8676 = vmatprep.mubr.f32.mxu1 %v28232_v0 }
 0x44b   : > { %19794 = vmatmul.mubr.msk.f32.gmra.mrb[18].mxu0 %vm401_vm2, %v19782_v17  ;;  %19806 = vmatmul.mubr.msk.f32.gmra.mrb[18].mxu1 %vm401_vm2, %v19782_v17 }
 0x44c   : > { %8849 = vmatprep.mubr.f32.mxu0 %v28232_v0  ;;  %8974 = vmatprep.mubr.f32.mxu1 %v28232_v0 }
 0x44f   : > { %19819 = vmatmul.mubr.msk.f32.vlgmr.msra.gmra.mrb[0].mxu0 %vm401_vm2, %v19807_v18  ;;  %19831 = vmatmul.mubr.msk.f32.vlgmr.msra.gmra.mrb[0].mxu1 %vm401_vm2, %v19807_v18 }
 0x450   : > { %8855 = vmatprep.mubr.f32.mxu0 %v28232_v0  ;;  %8980 = vmatprep.mubr.f32.mxu1 %v28232_v0 }
 0x453   : > { %19820 = vmatmul.mubr.msk.f32.gmra.mrb[2].mxu0 %vm401_vm2, %v19808_v19  ;;  %19832 = vmatmul.mubr.msk.f32.gmra.mrb[2].mxu1 %vm401_vm2, %v19808_v19 }
 0x454   : > { %8861 = vmatprep.mubr.f32.mxu0 %v28232_v0  ;;  %8986 = vmatprep.mubr.f32.mxu1 %v28232_v0 }
 0x457   : > { %19821 = vmatmul.mubr.msk.f32.gmra.mrb[4].mxu0 %vm401_vm2, %v19809_v20  ;;  %19833 = vmatmul.mubr.msk.f32.gmra.mrb[4].mxu1 %vm401_vm2, %v19809_v20 }
 0x458   : > { %8867 = vmatprep.mubr.f32.mxu0 %v28232_v0  ;;  %8992 = vmatprep.mubr.f32.mxu1 %v28232_v0 }
 0x45b   : > { %19822 = vmatmul.mubr.msk.f32.gmra.mrb[6].mxu0 %vm401_vm2, %v19810_v21  ;;  %19834 = vmatmul.mubr.msk.f32.gmra.mrb[6].mxu1 %vm401_vm2, %v19810_v21 }
 0x45c   : > { %8873 = vmatprep.mubr.f32.mxu0 %v28232_v0  ;;  %8998 = vmatprep.mubr.f32.mxu1 %v28232_v0 }
 0x45f   : > { %19823 = vmatmul.mubr.msk.f32.gmra.mrb[8].mxu0 %vm401_vm2, %v19811_v22  ;;  %19835 = vmatmul.mubr.msk.f32.gmra.mrb[8].mxu1 %vm401_vm2, %v19811_v22 }
 0x460   : > { %8879 = vmatprep.mubr.f32.mxu0 %v28232_v0  ;;  %9004 = vmatprep.mubr.f32.mxu1 %v28232_v0 }
 0x463   : > { %19824 = vmatmul.mubr.msk.f32.gmra.mrb[10].mxu0 %vm401_vm2, %v19812_v23  ;;  %19836 = vmatmul.mubr.msk.f32.gmra.mrb[10].mxu1 %vm401_vm2, %v19812_v23 }
 0x464   : > { %8885 = vmatprep.mubr.f32.mxu0 %v28232_v0  ;;  %9010 = vmatprep.mubr.f32.mxu1 %v28232_v0 }
 0x467   : > { %19825 = vmatmul.mubr.msk.f32.gmra.mrb[12].mxu0 %vm401_vm2, %v19813_v2  ;;  %19837 = vmatmul.mubr.msk.f32.gmra.mrb[12].mxu1 %vm401_vm2, %v19813_v2 }
 0x468   : > { %8891 = vmatprep.mubr.f32.mxu0 %v28232_v0  ;;  %9016 = vmatprep.mubr.f32.mxu1 %v28232_v0 }
 0x46b   : > { %19826 = vmatmul.mubr.msk.f32.gmra.mrb[14].mxu0 %vm401_vm2, %v19814_v25  ;;  %19838 = vmatmul.mubr.msk.f32.gmra.mrb[14].mxu1 %vm401_vm2, %v19814_v25 }
 0x46c   : > { %8897 = vmatprep.mubr.f32.mxu0 %v28232_v0  ;;  %9022 = vmatprep.mubr.f32.mxu1 %v28232_v0 }
 0x46f   : > { %19827 = vmatmul.mubr.msk.f32.gmra.mrb[16].mxu0 %vm401_vm2, %v19815_v26  ;;  %19839 = vmatmul.mubr.msk.f32.gmra.mrb[16].mxu1 %vm401_vm2, %v19815_v26 }
 0x470   : > { %8903 = vmatprep.mubr.f32.mxu0 %v28232_v0  ;;  %9028 = vmatprep.mubr.f32.mxu1 %v28232_v0 }
 0x473   : > { %19828 = vmatmul.mubr.msk.f32.gmra.mrb[18].mxu0 %vm401_vm2, %v19816_v24  ;;  %19840 = vmatmul.mubr.msk.f32.gmra.mrb[18].mxu1 %vm401_vm2, %v19816_v24  ;;  %vm28311_vm2 = vmmov %vm28310_vm1 }
 0x474   : > { %9325 = vmatprep.mubr.f32.mxu0 %v28232_v0  ;;  %9408 = vmatprep.mubr.f32.mxu1 %v28232_v0 }
 0x522   : > { %v25458_v27 = vpop.f32.mrb[0].mxu0  ;;  %v25460_v28 = vpop.f32.mrb[0].mxu1 }
 0x523   : > { %28241 = vst [vmem:[#allocation2_spill] sm:$0xff] %v25458_v27  ;;  %28242 = vst [vmem:[#allocation3_spill] sm:$0xff] %v25460_v28  ;;  %v25462_v29 = vpop.f32.mrb[1].mxu0  ;;  %v25464_v30 = vpop.f32.mrb[1].mxu1 }
 0x524   : > { %28243 = vst [vmem:[#allocation4_spill] sm:$0xff] %v25462_v29  ;;  %28244 = vst [vmem:[#allocation5_spill] sm:$0xff] %v25464_v30 }
 0x526   : > { %v25466_v31 = vpop.f32.mrb[2].mxu0  ;;  %v25468_v32 = vpop.f32.mrb[2].mxu1 }
 0x527   : > { %v25470_v33 = vpop.f32.mrb[3].mxu0  ;;  %v25472_v34 = vpop.f32.mrb[3].mxu1 }
 0x528   : > { %28245 = vst [vmem:[#allocation6_spill] sm:$0xff] %v25472_v34 }
 0x52a   : > { %v25474_v35 = vpop.f32.mrb[4].mxu0  ;;  %v25476_v4 = vpop.f32.mrb[4].mxu1 }
 0x52b   : > { %28246 = vst [vmem:[#allocation7_spill] sm:$0xff] %v25474_v35  ;;  %28247 = vst [vmem:[#allocation8_spill] sm:$0xff] %v25476_v4  ;;  %v25478_v36 = vpop.f32.mrb[5].mxu0  ;;  %v25480_v37 = vpop.f32.mrb[5].mxu1 }
 0x52c   : > { %28248 = vst [vmem:[#allocation9_spill] sm:$0xff] %v25478_v36  ;;  %28249 = vst [vmem:[#allocation10_spill] sm:$0xff] %v25480_v37 }
 0x52e   : > { %v25482_v38 = vpop.f32.mrb[6].mxu0  ;;  %v25484_v39 = vpop.f32.mrb[6].mxu1 }
 0x52f   : > { %28250 = vst [vmem:[#allocation11_spill] sm:$0xff] %v25482_v38  ;;  %28251 = vst [vmem:[#allocation12_spill] sm:$0xff] %v25484_v39  ;;  %v25486_v40 = vpop.f32.mrb[7].mxu0  ;;  %v25488_v42 = vpop.f32.mrb[7].mxu1 }
 0x530   : > { %28252 = vst [vmem:[#allocation13_spill] sm:$0xff] %v25486_v40  ;;  %28253 = vst [vmem:[#allocation14_spill] sm:$0xff] %v25488_v42 }
 0x532   : > { %v25490_v43 = vpop.f32.mrb[8].mxu0  ;;  %v25492_v44 = vpop.f32.mrb[8].mxu1 }
 0x533   : > { %28254 = vst [vmem:[#allocation15_spill] sm:$0xff] %v25490_v43  ;;  %28255 = vst [vmem:[#allocation16_spill] sm:$0xff] %v25492_v44  ;;  %v25494_v45 = vpop.f32.mrb[9].mxu0  ;;  %v25496_v46 = vpop.f32.mrb[9].mxu1 }
 0x534   : > { %28256 = vst [vmem:[#allocation17_spill] sm:$0xff] %v25494_v45  ;;  %28257 = vst [vmem:[#allocation18_spill] sm:$0xff] %v25496_v46 }
 0x536   : > { %v25498_v49 = vpop.f32.mrb[10].mxu0  ;;  %v25500_v50 = vpop.f32.mrb[10].mxu1 }
 0x537   : > { %28258 = vst [vmem:[#allocation19_spill] sm:$0xff] %v25498_v49  ;;  %28259 = vst [vmem:[#allocation20_spill] sm:$0xff] %v25500_v50  ;;  %v25505_v53 = vpop.f32.mrb[11].mxu0  ;;  %v25507_v54 = vpop.f32.mrb[11].mxu1 }
 0x538   : > { %28260 = vst [vmem:[#allocation21_spill] sm:$0xff] %v25505_v53  ;;  %28261 = vst [vmem:[#allocation22_spill] sm:$0xff] %v25507_v54 }
 0x53a   : > { %v8887_v58 = vpop.f32.mrb[12].mxu0  ;;  %v9012_v59 = vpop.f32.mrb[12].mxu1 }
 0x53b   : > { %v9159_v62 = vadd.f32 %v9118_v55, %v8887_v58  ;;  %v9161_v63 = vadd.f32 %v9118_v55, %v9012_v59  ;;  %v8889_v5 = vpop.f32.mrb[13].mxu0  ;;  %v9014_v6 = vpop.f32.mrb[13].mxu1 }
 0x53c   : > { %v9160_v7 = vadd.f32 %v9118_v55, %v8889_v5  ;;  %v9162_v8 = vadd.f32 %v9118_v55, %v9014_v6 }
 0x53d   : > { %v25518_v10 = vmul.f32 %v25509_v56, %v9159_v62  ;;  %v25521_v11 = vmul.f32 %v25511_v57, %v9161_v63 }
 0x53e   : > { %v25524_v12 = vmul.f32 %v25513_v60, %v9160_v7  ;;  %v25527_v13 = vmul.f32 %v25515_v61, %v9162_v8  ;;  %v8893_v14 = vpop.f32.mrb[14].mxu0  ;;  %v9018_v15 = vpop.f32.mrb[14].mxu1 }
 0x53f   : > { %v9163_v16 = vadd.f32 %v9123_v9, %v8893_v14  ;;  %v9165_v17 = vadd.f32 %v9123_v9, %v9018_v15  ;;  %v8895_v18 = vpop.f32.mrb[15].mxu0  ;;  %v9020_v19 = vpop.f32.mrb[15].mxu1 }
 0x540   : > { %v9164_v20 = vadd.f32 %v9123_v9, %v8895_v18  ;;  %v9166_v21 = vadd.f32 %v9123_v9, %v9020_v19  ;;  %v25531_v22 = vpack.i.bf16 %v25521_v11, %v25524_v12  ;;  %v25535_v23 = vpack.i.bf16 %v25518_v10, %v25527_v13 }
 0x541   : > { %v25538_v2 = vmul.f32 %v25509_v56, %v9163_v16  ;;  %v25541_v25 = vmul.f32 %v25511_v57, %v9165_v17  ;;  %v25583_v62 = vpack.i.bf16 %v25527_v13, %v25521_v11  ;;  %v25587_v63 = vpack.i.bf16 %v25524_v12, %v25518_v10 }
 0x542   : > { %v25544_v26 = vmul.f32 %v25513_v60, %v9164_v20  ;;  %v25547_v24 = vmul.f32 %v25515_v61, %v9166_v21  ;;  %v25549_v3 = vpop.f32.mrb[16].mxu0  ;;  %22049 = vrot.lane.b32.xlu0 %v25531_v22, %s22858_s19  ;;  %22044 = vrot.lane.b32.xlu1 %v25535_v23, %s22858_s19  ;;  %v25555_v41 = vpop.f32.mrb[16].mxu1 }
 0x543   : > { %v25557_v47 = vpop.f32.mrb[17].mxu0  ;;  %v25559_v48 = vpop.f32.mrb[17].mxu1 }
 0x544   : > { %v22058_v1 = vpack.i.bf16 %v25541_v25, %v25544_v26  ;;  %v22053_v51 = vpack.i.bf16 %v25538_v2, %v25547_v24  ;;  %v25591_v5 = vpack.i.bf16 %v25547_v24, %v25541_v25  ;;  %v25595_v6 = vpack.i.bf16 %v25544_v26, %v25538_v2 }
 0x546   : > { %v25565_v52 = vpop.f32.mrb[18].mxu0  ;;  %v25567_v55 = vpop.f32.mrb[18].mxu1  ;;  %22059 = vrot.lane.b32.xlu0 %v22058_v1, %s22858_s19  ;;  %22054 = vrot.lane.b32.xlu1 %v22053_v51, %s22858_s19  ;;  %s28262_s19 = smov 2  }
 0x547   : > { %v25571_v58 = vpop.f32.mrb[19].mxu0  ;;  %v25573_v59 = vpop.f32.mrb[19].mxu1 }
 0x54a   : > { %22069 = vrot.lane.b32.xlu0 %v25531_v22, %s22859_s20  ;;  %22064 = vrot.lane.b32.xlu1 %v25535_v23, %s22859_s20 }
 0x54e   : > { %22079 = vrot.lane.b32.xlu0 %v22058_v1, %s22859_s20  ;;  %22074 = vrot.lane.b32.xlu1 %v22053_v51, %s22859_s20  ;;  %s28263_s20 = smov 1  }
 0x552   : > { %22089 = vrot.lane.b32.xlu0 %v25531_v22, %s22860_s21  ;;  %22084 = vrot.lane.b32.xlu1 %v25535_v23, %s22860_s21 }
 0x556   : > { %22099 = vrot.lane.b32.xlu0 %v22058_v1, %s22860_s21  ;;  %22094 = vrot.lane.b32.xlu1 %v22053_v51, %s22860_s21  ;;  %s28264_s21 = smov 127  }
 0x55a   : > { %22109 = vrot.lane.b32.xlu0 %v25531_v22, %s22861_s22  ;;  %22104 = vrot.lane.b32.xlu1 %v25535_v23, %s22861_s22 }
 0x55e   : > { %22119 = vrot.lane.b32.xlu0 %v22058_v1, %s22861_s22  ;;  %22114 = vrot.lane.b32.xlu1 %v22053_v51, %s22861_s22  ;;  %s28265_s22 = smov 126  }
 0x562   : > { %22129 = vrot.lane.b32.xlu0 %v25531_v22, %s22862_s23  ;;  %22124 = vrot.lane.b32.xlu1 %v25535_v23, %s22862_s23 }
 0x566   : > { %22139 = vrot.lane.b32.xlu0 %v22058_v1, %s22862_s23  ;;  %22134 = vrot.lane.b32.xlu1 %v22053_v51, %s22862_s23  ;;  %s28266_s23 = smov 110  }
 0x56a   : > { %22149 = vrot.lane.b32.xlu0 %v25531_v22, %s22863_s24  ;;  %22144 = vrot.lane.b32.xlu1 %v25535_v23, %s22863_s24 }
 0x56e   : > { %22159 = vrot.lane.b32.xlu0 %v22058_v1, %s22863_s24  ;;  %22154 = vrot.lane.b32.xlu1 %v22053_v51, %s22863_s24  ;;  %s28267_s24 = smov 109  }
 0x572   : > { %22169 = vrot.lane.b32.xlu0 %v25531_v22, %s22864_s25  ;;  %22164 = vrot.lane.b32.xlu1 %v25535_v23, %s22864_s25 }
 0x576   : > { %22179 = vrot.lane.b32.xlu0 %v22058_v1, %s22864_s25  ;;  %22174 = vrot.lane.b32.xlu1 %v22053_v51, %s22864_s25 }
 0x57a   : > { %22189 = vrot.lane.b32.xlu0 %v25531_v22, %s22865_s30  ;;  %22184 = vrot.lane.b32.xlu1 %v25535_v23, %s22865_s30 }
 0x57e   : > { %22199 = vrot.lane.b32.xlu0 %v22058_v1, %s22865_s30  ;;  %22194 = vrot.lane.b32.xlu1 %v22053_v51, %s22865_s30 }
 0x582   : > { %22209 = vrot.lane.b32.xlu0 %v25531_v22, %s22866_s15  ;;  %22204 = vrot.lane.b32.xlu1 %v25535_v23, %s22866_s15 }
 0x586   : > { %22219 = vrot.lane.b32.xlu0 %v22058_v1, %s22866_s15  ;;  %22214 = vrot.lane.b32.xlu1 %v22053_v51, %s22866_s15 }
 0x58a   : > { %22229 = vrot.lane.b32.xlu0 %v25531_v22, %s22867_s28  ;;  %22224 = vrot.lane.b32.xlu1 %v25535_v23, %s22867_s28 }
 0x58e   : > { %22239 = vrot.lane.b32.xlu0 %v22058_v1, %s22867_s28  ;;  %22234 = vrot.lane.b32.xlu1 %v22053_v51, %s22867_s28  ;;  %s28271_s28 = smov 106  }
 0x592   : > { %22249 = vrot.lane.b32.xlu0 %v25531_v22, %s28262_s19  ;;  %22244 = vrot.lane.b32.xlu1 %v25535_v23, %s28262_s19 }
 0x596   : > { %22259 = vrot.lane.b32.xlu0 %v22058_v1, %s28262_s19  ;;  %22254 = vrot.lane.b32.xlu1 %v22053_v51, %s28262_s19 }
 0x59a   : > { %22269 = vrot.lane.b32.xlu0 %v25531_v22, %s28263_s20  ;;  %22264 = vrot.lane.b32.xlu1 %v25535_v23, %s28263_s20 }
 0x59e   : > { %22279 = vrot.lane.b32.xlu0 %v22058_v1, %s28263_s20  ;;  %22274 = vrot.lane.b32.xlu1 %v22053_v51, %s28263_s20 }
 0x5a2   : > { %22289 = vrot.lane.b32.xlu0 %v25583_v62, %s28264_s21  ;;  %22284 = vrot.lane.b32.xlu1 %v25587_v63, %s28264_s21 }
 0x5a6   : > { %22299 = vrot.lane.b32.xlu0 %v25591_v5, %s28264_s21  ;;  %22294 = vrot.lane.b32.xlu1 %v25595_v6, %s28264_s21 }
 0x5aa   : > { %22309 = vrot.lane.b32.xlu0 %v25583_v62, %s28265_s22  ;;  %22304 = vrot.lane.b32.xlu1 %v25587_v63, %s28265_s22 }
 0x5ae   : > { %22319 = vrot.lane.b32.xlu0 %v25591_v5, %s28265_s22  ;;  %22314 = vrot.lane.b32.xlu1 %v25595_v6, %s28265_s22 }
 0x5b2   : > { %22329 = vrot.lane.b32.xlu0 %v25583_v62, %s28266_s23  ;;  %22324 = vrot.lane.b32.xlu1 %v25587_v63, %s28266_s23 }
 0x5b4   : > { %v22050_v15 = vpop.permute.xlu0 %22049  ;;  %v22045_v16 = vpop.permute.xlu1 %22044 }
 0x5b5   : > { %v22052_v17 = vunpack.i.h.bf16 %v22050_v15  ;;  %v22051_v18 = vunpack.i.l.bf16 %v22050_v15  ;;  %v22047_v19 = vunpack.i.h.bf16 %v22045_v16  ;;  %v22046_v20 = vunpack.i.l.bf16 %v22045_v16 }
 0x5b6   : > { %22339 = vrot.lane.b32.xlu0 %v25591_v5, %s28266_s23  ;;  %22334 = vrot.lane.b32.xlu1 %v25595_v6, %s28266_s23 }
 0x5b7   : > { %v9237_v21 = vsel %vm396_vm0, %v22051_v18, %v22052_v17  ;;  %v9235_v8 = vsel %vm396_vm0, %v22046_v20, %v22047_v19  ;;  %v9236_v15 = vsel %vm396_vm0, %v22047_v19, %v22051_v18  ;;  %v9238_v16 = vsel %vm396_vm0, %v22052_v17, %v22046_v20 }
 0x5b8   : > { %v22060_v22 = vpop.permute.xlu0 %22059  ;;  %v22055_v23 = vpop.permute.xlu1 %22054 }
 0x5b9   : > { %v22062_v1 = vunpack.i.h.bf16 %v22060_v22  ;;  %v22061_v51 = vunpack.i.l.bf16 %v22060_v22  ;;  %v22057_v14 = vunpack.i.h.bf16 %v22055_v23  ;;  %v22056_v9 = vunpack.i.l.bf16 %v22055_v23 }
 0x5ba   : > { %22349 = vrot.lane.b32.xlu0 %v25583_v62, %s28267_s24  ;;  %22344 = vrot.lane.b32.xlu1 %v25587_v63, %s28267_s24 }
 0x5bb   : > { %v9241_v7 = vsel %vm396_vm0, %v22061_v51, %v22062_v1  ;;  %v9239_v0 = vsel %vm396_vm0, %v22056_v9, %v22057_v14  ;;  %v9240_v22 = vsel %vm396_vm0, %v22057_v14, %v22061_v51  ;;  %v9242_v23 = vsel %vm396_vm0, %v22062_v1, %v22056_v9  ;;  %v19842_v51 = vld [vmem:[%s28187_s4 + $0x20] sm:$0xff] }
 0x5bc   : > { %v22070_v46 = vpop.permute.xlu0 %22069  ;;  %v22065_v44 = vpop.permute.xlu1 %22064  ;;  %v20222_v45 = vpack.c.bf16 %v9240_v22, %v9236_v15  ;;  %v20226_v43 = vpack.c.bf16 %v9242_v23, %v9238_v16  ;;  %v20224_v54 = vpack.c.bf16 %v9239_v0, %v9235_v8  ;;  %v20228_v50 = vpack.c.bf16 %v9241_v7, %v9237_v21  ;;  %v19841_v0 = vld [vmem:[%s28187_s4 + $0x18] sm:$0xff] }
 0x5bd   : > { %v22071_v53 = vunpack.i.l.bf16 %v22070_v46  ;;  %v22067_v49 = vunpack.i.h.bf16 %v22065_v44  ;;  %v22072_v17 = vunpack.i.h.bf16 %v22070_v46  ;;  %v22066_v14 = vunpack.i.l.bf16 %v22065_v44 }
 0x5be   : > { %22359 = vrot.lane.b32.xlu0 %v25591_v5, %s28267_s24  ;;  %22354 = vrot.lane.b32.xlu1 %v25595_v6, %s28267_s24  ;;  %vm9251_vm0 = vcmask 130048   ;;  %v28269_v1 = vmov 0.0  }
 0x5bf   : > { %20223 = vmatprep.subr.bf16.mxu0 %v20222_v45  ;;  %20227 = vmatprep.subr.bf16.mxu1 %v20226_v43  ;;  %v9444_v43 = vsel %vm699_vm3, %v22067_v49, %v22071_v53  ;;  %v9445_v22 = vsel %vm699_vm3, %v22071_v53, %v22072_v17  ;;  %v9446_v23 = vsel %vm699_vm3, %v22072_v17, %v22066_v14 }
 0x5c0   : > { %20225 = vmatpush1.bf16.msra.mxu0 %v20224_v54  ;;  %20229 = vmatpush1.bf16.msra.mxu1 %v20228_v50  ;;  %v22080_v9 = vpop.permute.xlu0 %22079  ;;  %v22075_v18 = vpop.permute.xlu1 %22074  ;;  %v9443_v50 = vsel %vm699_vm3, %v22066_v14, %v22067_v49 }
 0x5c1   : > { %v22082_v7 = vunpack.i.h.bf16 %v22080_v9  ;;  %v22081_v8 = vunpack.i.l.bf16 %v22080_v9  ;;  %v22077_v19 = vunpack.i.h.bf16 %v22075_v18  ;;  %v22076_v20 = vunpack.i.l.bf16 %v22075_v18 }
 0x5c2   : > { %22369 = vrot.lane.b32.xlu0 %v25583_v62, %s28268_s27  ;;  %22364 = vrot.lane.b32.xlu1 %v25587_v63, %s28268_s27 }
 0x5c3   : > { %v9449_v44 = vsel %vm699_vm3, %v22081_v8, %v22082_v7  ;;  %v9447_v45 = vsel %vm699_vm3, %v22076_v20, %v22077_v19  ;;  %19844 = vmatmul.mubr.msk.f32.vlgmr.msra.gmra.mrb[20].mxu0 %vm9251_vm0, %v19841_v0  ;;  %19847 = vmatmul.mubr.msk.f32.vlgmr.msra.gmra.mrb[20].mxu1 %vm9251_vm0, %v19841_v0  ;;  %v9448_v46 = vsel %vm699_vm3, %v22077_v19, %v22081_v8 }
 0x5c4   : > { %v22090_v54 = vpop.permute.xlu0 %22089  ;;  %v22085_v21 = vpop.permute.xlu1 %22084  ;;  %9331 = vmatprep.mubr.f32.mxu0 %v28269_v1  ;;  %9414 = vmatprep.mubr.f32.mxu1 %v28269_v1  ;;  %v20230_v15 = vpack.c.bf16 %v9448_v46, %v9444_v43  ;;  %v9450_v16 = vsel %vm699_vm3, %v22082_v7, %v22076_v20  ;;  %v20232_v9 = vpack.c.bf16 %v9447_v45, %v9443_v50  ;;  %vm28312_vm3 = vmmov %vm28310_vm1 }
 0x5c5   : > { %v22091_v18 = vunpack.i.l.bf16 %v22090_v54  ;;  %v22087_v49 = vunpack.i.h.bf16 %v22085_v21  ;;  %v20234_v0 = vpack.c.bf16 %v9450_v16, %v9446_v23  ;;  %v20236_v8 = vpack.c.bf16 %v9449_v44, %v9445_v22  ;;  %v19843_v44 = vld [vmem:[%s28187_s4 + $0x28] sm:$0xff] }
 0x5c6   : > { %22379 = vrot.lane.b32.xlu0 %v25591_v5, %s28268_s27  ;;  %22374 = vrot.lane.b32.xlu1 %v25595_v6, %s28268_s27  ;;  %v22092_v7 = vunpack.i.h.bf16 %v22090_v54  ;;  %v22086_v19 = vunpack.i.l.bf16 %v22085_v21 }
 0x5c7   : > { %19845 = vmatmul.mubr.msk.f32.gmra.mrb[22].mxu0 %vm9251_vm0, %v19842_v51  ;;  %19848 = vmatmul.mubr.msk.f32.gmra.mrb[22].mxu1 %vm9251_vm0, %v19842_v51  ;;  %v9655_v46 = vsel %vm1011_vm4, %v22087_v49, %v22091_v18 }
 0x5c8   : > { %20231 = vmatprep.subr.bf16.mxu0 %v20230_v15  ;;  %20235 = vmatprep.subr.bf16.mxu1 %v20234_v0  ;;  %v22100_v53 = vpop.permute.xlu0 %22099  ;;  %v22095_v17 = vpop.permute.xlu1 %22094  ;;  %v9654_v51 = vsel %vm1011_vm4, %v22086_v19, %v22087_v49  ;;  %v9204_v49 = vld [vmem:[%s28187_s4] sm:$0xff]  ;;  %v9657_v0 = vsel %vm1011_vm4, %v22092_v7, %v22086_v19 }
 0x5c9   : > { %20233 = vmatpush1.bf16.msra.mxu0 %v20232_v9  ;;  %20237 = vmatpush1.bf16.msra.mxu1 %v20236_v8  ;;  %v22102_v14 = vunpack.i.h.bf16 %v22100_v53  ;;  %v22101_v20 = vunpack.i.l.bf16 %v22100_v53  ;;  %v22097_v43 = vunpack.i.h.bf16 %v22095_v17  ;;  %v22096_v45 = vunpack.i.l.bf16 %v22095_v17 }
 0x5ca   : > { %9337 = vmatprep.mubr.f32.mxu0 %v28269_v1  ;;  %9420 = vmatprep.mubr.f32.mxu1 %v28269_v1  ;;  %v9656_v9 = vsel %vm1011_vm4, %v22091_v18, %v22092_v7 }
 0x5cb   : > { %v9660_v50 = vsel %vm1011_vm4, %v22101_v20, %v22102_v14  ;;  %v9658_v54 = vsel %vm1011_vm4, %v22096_v45, %v22097_v43  ;;  %22389 = vrot.lane.b32.xlu0 %v25583_v62, %s28270_s29  ;;  %22384 = vrot.lane.b32.xlu1 %v25587_v63, %s28270_s29  ;;  %v9659_v21 = vsel %vm1011_vm4, %v22097_v43, %v22101_v20 }
 0x5cc   : > { %19846 = vmatmul.mubr.msk.f32.gmra.mrb[24].mxu0 %vm9251_vm0, %v19843_v44  ;;  %19849 = vmatmul.mubr.msk.f32.gmra.mrb[24].mxu1 %vm9251_vm0, %v19843_v44  ;;  %v25749_v15 = vpop.permute.xlu0 %22109  ;;  %v25751_v16 = vpop.permute.xlu1 %22104  ;;  %v20238_v22 = vpack.c.bf16 %v9659_v21, %v9655_v46  ;;  %v9661_v23 = vsel %vm1011_vm4, %v22102_v14, %v22096_v45  ;;  %v20240_v8 = vpack.c.bf16 %v9658_v54, %v9654_v51  ;;  %v9205_v54 = vld [vmem:[%s28187_s4 + $0x8] sm:$0xff]  ;;  %vm28313_vm4 = vmmov %vm28310_vm1 }
 0x5cd   : > { %9532 = vmatprep.mubr.f32.mxu0 %v28269_v1  ;;  %9615 = vmatprep.mubr.f32.mxu1 %v28269_v1  ;;  %v20242_v53 = vpack.c.bf16 %v9661_v23, %v9657_v0  ;;  %v20244_v17 = vpack.c.bf16 %v9660_v50, %v9656_v9  ;;  %v22111_v20 = vunpack.i.l.bf16 %v25749_v15  ;;  %v22107_v14 = vunpack.i.h.bf16 %v25751_v16  ;;  %v9206_v9 = vld [vmem:[%s28187_s4 + $0x10] sm:$0xff] }
 0x5ce   : > { %20239 = vmatprep.subr.bf16.mxu0 %v20238_v22  ;;  %v22112_v18 = vunpack.i.h.bf16 %v25749_v15  ;;  %v22106_v43 = vunpack.i.l.bf16 %v25751_v16 }
 0x5cf   : > { %22399 = vrot.lane.b32.xlu0 %v25591_v5, %s28270_s29  ;;  %22394 = vrot.lane.b32.xlu1 %v25595_v6, %s28270_s29  ;;  %v9878_v21 = vsel %vm1363_vm5, %v22107_v14, %v22111_v20 }
 0x5d0   : > { %19850 = vmatmul.mubr.msk.f32.vlgmr.msra.gmra.mrb[20].mxu0 %vm9251_vm0, %v9204_v49  ;;  %19853 = vmatmul.mubr.msk.f32.vlgmr.msra.gmra.mrb[20].mxu1 %vm9251_vm0, %v9204_v49  ;;  %v22120_v7 = vpop.permute.xlu0 %22119  ;;  %v22115_v19 = vpop.permute.xlu1 %22114  ;;  %v9880_v49 = vsel %vm1363_vm5, %v22112_v18, %v22106_v43 }
 0x5d1   : > { %20243 = vmatprep.subr.bf16.mxu1 %v20242_v53  ;;  %20241 = vmatpush1.bf16.msra.mxu0 %v20240_v8  ;;  %v22122_v45 = vunpack.i.h.bf16 %v22120_v7  ;;  %v22121_v44 = vunpack.i.l.bf16 %v22120_v7  ;;  %v22117_v46 = vunpack.i.h.bf16 %v22115_v19  ;;  %v22116_v50 = vunpack.i.l.bf16 %v22115_v19 }
 0x5d2   : > { %20245 = vmatpush1.bf16.msra.mxu1 %v20244_v17  ;;  %9538 = vmatprep.mubr.f32.mxu0 %v28269_v1  ;;  %v9877_v17 = vsel %vm1363_vm5, %v22106_v43, %v22107_v14 }
 0x5d3   : > { %9621 = vmatprep.mubr.f32.mxu1 %v28269_v1  ;;  %22409 = vrot.lane.b32.xlu0 %v25583_v62, %s28271_s28  ;;  %v9882_v51 = vsel %vm1363_vm5, %v22117_v46, %v22121_v44  ;;  %v9884_v23 = vsel %vm1363_vm5, %v22122_v45, %v22116_v50  ;;  %v9883_v8 = vsel %vm1363_vm5, %v22121_v44, %v22122_v45  ;;  %v9084_v44 = vld [vmem:[%s28186_s3 + $0x48] sm:$0xff] }
 0x5d4   : > { %22404 = vrot.lane.b32.xlu1 %v25587_v63, %s28271_s28  ;;  %19851 = vmatmul.mubr.msk.f32.gmra.mrb[22].mxu0 %vm9251_vm0, %v9205_v54  ;;  %v25783_v15 = vpop.permute.xlu0 %22129  ;;  %v25785_v16 = vpop.permute.xlu1 %22124  ;;  %v20246_v22 = vpack.c.bf16 %v9882_v51, %v9878_v21  ;;  %v20250_v0 = vpack.c.bf16 %v9884_v23, %v9880_v49  ;;  %v9881_v53 = vsel %vm1363_vm5, %v22116_v50, %v22117_v46  ;;  %v9083_v23 = vld [vmem:[%s28186_s3 + $0x40] sm:$0xff]  ;;  %v19856_v49 = vld [vmem:[%s28187_s4 + $0x30] sm:$0xff] }
 0x5d5   : > { %19854 = vmatmul.mubr.msk.f32.gmra.mrb[22].mxu1 %vm9251_vm0, %v9205_v54  ;;  %9544 = vmatprep.mubr.f32.mxu0 %v28269_v1  ;;  %v28272_v14 = vunpack.i.l.bf16 %v25783_v15  ;;  %v28273_v43 = vunpack.i.h.bf16 %v25785_v16  ;;  %v28280_v4 = vunpack.i.h.bf16 %v25783_v15  ;;  %v28281_v36 = vunpack.i.l.bf16 %v25783_v15 }
 0x5d6   : > { %9627 = vmatprep.mubr.f32.mxu1 %v28269_v1  ;;  %20247 = vmatprep.subr.bf16.mxu0 %v20246_v22 }
 0x5d7   : > { %22419 = vrot.lane.b32.xlu0 %v25591_v5, %s28271_s28  ;;  %20251 = vmatprep.subr.bf16.mxu1 %v20250_v0  ;;  %v20248_v0 = vpack.c.bf16 %v9881_v53, %v9877_v17  ;;  %v28275_v17 = vunpack.i.h.bf16 %v25783_v15 }
 0x5d8   : > { %22414 = vrot.lane.b32.xlu1 %v25595_v6, %s28271_s28  ;;  %19852 = vmatmul.mubr.msk.f32.gmra.mrb[24].mxu0 %vm9251_vm0, %v9206_v9  ;;  %v25806_v21 = vpop.permute.xlu0 %22139  ;;  %v22135_v45 = vpop.permute.xlu1 %22134 }
 0x5d9   : > { %19855 = vmatmul.mubr.msk.f32.gmra.mrb[24].mxu1 %vm9251_vm0, %v9206_v9  ;;  %v22142_v46 = vunpack.i.h.bf16 %v25806_v21  ;;  %v22141_v50 = vunpack.i.l.bf16 %v25806_v21  ;;  %v22137_v51 = vunpack.i.h.bf16 %v22135_v45  ;;  %v22136_v22 = vunpack.i.l.bf16 %v22135_v45  ;;  %9743 = vmatprep.mubr.f32.mxu0 %v28269_v1 }
 0x5da   : > { %9826 = vmatprep.mubr.f32.mxu1 %v28269_v1  ;;  %v9879_v9 = vsel %vm1363_vm5, %v22111_v20, %v22112_v18  ;;  %v10101_v20 = vsel %vm1715_vm6, %v28273_v43, %v28272_v14  ;;  %v19857_v18 = vld [vmem:[%s28187_s4 + $0x38] sm:$0xff]  ;;  %vm28316_vm5 = vmmov %vm28310_vm1 }
 0x5db   : > { %9132 = vperm.xlu0 %22041, %v9084_v44   ;;  %v10105_v21 = vsel %vm1715_vm6, %v22137_v51, %v22141_v50  ;;  %v10107_v45 = vsel %vm1715_vm6, %v22142_v46, %v22136_v22  ;;  %v20252_v54 = vpack.c.bf16 %v9883_v8, %v9879_v9  ;;  %v28274_v8 = vunpack.i.l.bf16 %v25785_v16 }
 0x5dc   : > { %9127 = vperm.xlu1 %22042, %v9083_v23   ;;  %19859 = vmatmul.mubr.msk.f32.vlgmr.msra.gmra.mrb[20].mxu0 %vm9251_vm0, %v19856_v49  ;;  %v25827_v19 = vpop.permute.xlu0 %22149  ;;  %v25829_v7 = vpop.permute.xlu1 %22144  ;;  %v20254_v53 = vpack.c.bf16 %v10105_v21, %v10101_v20  ;;  %v19858_v20 = vld [vmem:[%s28187_s4 + $0x40] sm:$0xff] }
 0x5dd   : > { %19862 = vmatmul.mubr.msk.f32.vlgmr.msra.gmra.mrb[20].mxu1 %vm9251_vm0, %v19856_v49  ;;  %20249 = vmatpush1.bf16.msra.mxu0 %v20248_v0  ;;  %v10103_v44 = vsel %vm1715_vm6, %v28275_v17, %v28274_v8  ;;  %v28236_v49 = vunpack.i.l.bf16 %v25827_v19  ;;  %v22147_v9 = vunpack.i.h.bf16 %v25829_v7  ;;  %v22146_v17 = vunpack.i.l.bf16 %v25829_v7 }
 0x5de   : > { %20253 = vmatpush1.bf16.msra.mxu1 %v20252_v54  ;;  %9749 = vmatprep.mubr.f32.mxu0 %v28269_v1  ;;  %v20258_v23 = vpack.c.bf16 %v10107_v45, %v10103_v44  ;;  %v10106_v8 = vsel %vm1715_vm6, %v22141_v50, %v22142_v46 }
 0x5df   : > { %9832 = vmatprep.mubr.f32.mxu1 %v28269_v1  ;;  %22429 = vrot.lane.b32.xlu0 %v25583_v62, %s28276_s16 }
 0x5e0   : > { %22424 = vrot.lane.b32.xlu1 %v25587_v63, %s28276_s16  ;;  %19860 = vmatmul.mubr.msk.f32.gmra.mrb[22].mxu0 %vm9251_vm0, %v19857_v18  ;;  %v25854_v0 = vpop.permute.xlu0 %22159  ;;  %v25856_v54 = vpop.permute.xlu1 %22154 }
 0x5e1   : > { %19863 = vmatmul.mubr.msk.f32.gmra.mrb[22].mxu1 %vm9251_vm0, %v19857_v18  ;;  %20255 = vmatprep.subr.bf16.mxu0 %v20254_v53  ;;  %v28235_v21 = vunpack.i.h.bf16 %v25854_v0  ;;  %v28234_v45 = vunpack.i.l.bf16 %v25854_v0  ;;  %v22157_v14 = vunpack.i.h.bf16 %v25856_v54  ;;  %v22156_v43 = vunpack.i.l.bf16 %v25856_v54 }
 0x5e2   : > { %20259 = vmatprep.subr.bf16.mxu1 %v20258_v23  ;;  %9755 = vmatprep.mubr.f32.mxu0 %v28269_v1  ;;  %v10104_v53 = vsel %vm1715_vm6, %v22136_v22, %v22137_v51  ;;  %v19865_v51 = vld [vmem:[%s28187_s4 + $0x48] sm:$0xff]  ;;  %v10324_v22 = vsel %vm2067_vm7, %v22147_v9, %v28236_v49  ;;  %v10102_v49 = vsel %vm1715_vm6, %v28281_v36, %v28280_v4  ;;  %v19866_v4 = vld [vmem:[%s28187_s4 + $0x50] sm:$0xff] }
 0x5e3   : > { %9838 = vmatprep.mubr.f32.mxu1 %v28269_v1  ;;  %22439 = vrot.lane.b32.xlu0 %v25591_v5, %s28276_s16  ;;  %v10328_v18 = vsel %vm2067_vm7, %v22157_v14, %v28234_v45  ;;  %v10330_v54 = vsel %vm2067_vm7, %v28235_v21, %v22156_v43  ;;  %v28277_v45 = vunpack.i.h.bf16 %v25785_v16  ;;  %v28278_v21 = vunpack.i.l.bf16 %v25785_v16 }
 0x5e4   : > { %22434 = vrot.lane.b32.xlu1 %v25595_v6, %s28276_s16  ;;  %19861 = vmatmul.mubr.msk.f32.gmra.mrb[24].mxu0 %vm9251_vm0, %v19858_v20  ;;  %v25879_v44 = vpop.permute.xlu0 %22169  ;;  %v25881_v23 = vpop.permute.xlu1 %22164  ;;  %v20262_v50 = vpack.c.bf16 %v10328_v18, %v10324_v22  ;;  %s28283_s16 = smov 88  }
 0x5e5   : > { %19864 = vmatmul.mubr.msk.f32.gmra.mrb[24].mxu1 %vm9251_vm0, %v19858_v20  ;;  %9966 = vmatprep.mubr.f32.mxu0 %v28269_v1  ;;  %v10100_v46 = vsel %vm1715_vm6, %v28278_v21, %v28277_v45  ;;  %v28279_v20 = vunpack.i.h.bf16 %v25827_v19  ;;  %v20260_v45 = vpack.c.bf16 %v10106_v8, %v10102_v49  ;;  %v19867_v8 = vld [vmem:[%s28187_s4 + $0x58] sm:$0xff]  ;;  %v28288_v7 = vunpack.i.l.bf16 %v25879_v44  ;;  %vm28317_vm6 = vmmov %vm28310_vm1 }
 0x5e6   : > { %10049 = vmatprep.mubr.f32.mxu1 %v28269_v1  ;;  %v20256_v16 = vpack.c.bf16 %v10104_v53, %v10100_v46  ;;  %v28285_v46 = vunpack.i.l.bf16 %v25854_v0  ;;  %v28296_v42 = vunpack.i.h.bf16 %v25879_v44  ;;  %v28297_v39 = vunpack.i.l.bf16 %v25879_v44 }
 0x5e7   : > { %v10326_v37 = vsel %vm2067_vm7, %v28279_v20, %v22146_v17  ;;  %22449 = vrot.lane.b32.xlu0 %v25583_v62, %s28282_s11 }
 0x5e8   : > { %v20266_v21 = vpack.c.bf16 %v10330_v54, %v10326_v37  ;;  %22444 = vrot.lane.b32.xlu1 %v25587_v63, %s28282_s11  ;;  %19868 = vmatmul.mubr.msk.f32.vlgmr.msra.gmra.mrb[20].mxu0 %vm9251_vm0, %v19865_v51  ;;  %v25918_v18 = vpop.permute.xlu0 %22179  ;;  %v25920_v22 = vpop.permute.xlu1 %22174 }
 0x5e9   : > { %19871 = vmatmul.mubr.msk.f32.vlgmr.msra.gmra.mrb[20].mxu1 %vm9251_vm0, %v19865_v51  ;;  %20257 = vmatpush1.bf16.msra.mxu0 %v20256_v16  ;;  %v28237_v15 = vunpack.i.l.bf16 %v25918_v18  ;;  %v28238_v49 = vunpack.i.h.bf16 %v25920_v22  ;;  %v22182_v53 = vunpack.i.h.bf16 %v25918_v18  ;;  %v22176_v54 = vunpack.i.l.bf16 %v25920_v22 }
 0x5ea   : > { %20261 = vmatpush1.bf16.msra.mxu1 %v20260_v45  ;;  %20263 = vmatprep.subr.bf16.mxu0 %v20262_v50  ;;  %v10327_v16 = vsel %vm2067_vm7, %v22156_v43, %v22157_v14  ;;  %v22166_v45 = vunpack.i.l.bf16 %v25881_v23  ;;  %v19874_v14 = vld [vmem:[%s28187_s4 + $0x60] sm:$0xff] }
 0x5eb   : > { %20267 = vmatprep.subr.bf16.mxu1 %v20266_v21  ;;  %9972 = vmatprep.mubr.f32.mxu0 %v28269_v1  ;;  %v10551_v43 = vsel %vm2419_vm8, %v28238_v49, %v28237_v15 }
 0x5ec   : > { %10055 = vmatprep.mubr.f32.mxu1 %v28269_v1  ;;  %22459 = vrot.lane.b32.xlu0 %v25591_v5, %s28282_s11  ;;  %v25930_v36 = vpop.permute.xlu0 %22189  ;;  %v25932_v37 = vpop.permute.xlu1 %22184 }
 0x5ed   : > { %22454 = vrot.lane.b32.xlu1 %v25595_v6, %s28282_s11  ;;  %19869 = vmatmul.mubr.msk.f32.gmra.mrb[22].mxu0 %vm9251_vm0, %v19866_v4  ;;  %s28291_s11 = smov 87  }
 0x5ee   : > { %19872 = vmatmul.mubr.msk.f32.gmra.mrb[22].mxu1 %vm9251_vm0, %v19866_v4  ;;  %9978 = vmatprep.mubr.f32.mxu0 %v28269_v1  ;;  %v28284_v4 = vunpack.i.h.bf16 %v25854_v0  ;;  %v10323_v0 = vsel %vm2067_vm7, %v22146_v17, %v22147_v9  ;;  %v28289_v9 = vunpack.i.h.bf16 %v25881_v23 }
 0x5ef   : > { %10061 = vmatprep.mubr.f32.mxu1 %v28269_v1  ;;  %v20264_v15 = vpack.c.bf16 %v10327_v16, %v10323_v0 }
 0x5f0   : > { %22469 = vrot.lane.b32.xlu0 %v25583_v62, %s28283_s16  ;;  %v25951_v50 = vpop.permute.xlu0 %22199  ;;  %v25953_v20 = vpop.permute.xlu1 %22194  ;;  %v10329_v51 = vsel %vm2067_vm7, %v28285_v46, %v28284_v4  ;;  %v28286_v46 = vunpack.i.h.bf16 %v25827_v19  ;;  %v28287_v4 = vunpack.i.l.bf16 %v25827_v19  ;;  %v10547_v17 = vsel %vm2419_vm8, %v28289_v9, %v28288_v7  ;;  %v19875_v7 = vld [vmem:[%s28187_s4 + $0x68] sm:$0xff] }
 0x5f1   : > { %22464 = vrot.lane.b32.xlu1 %v25587_v63, %s28283_s16  ;;  %19870 = vmatmul.mubr.msk.f32.gmra.mrb[24].mxu0 %vm9251_vm0, %v19867_v8 }
 0x5f2   : > { %19873 = vmatmul.mubr.msk.f32.gmra.mrb[24].mxu1 %vm9251_vm0, %v19867_v8  ;;  %10189 = vmatprep.mubr.f32.mxu0 %v28269_v1  ;;  %v10553_v8 = vsel %vm2419_vm8, %v22182_v53, %v22176_v54  ;;  %v10325_v21 = vsel %vm2067_vm7, %v28287_v4, %v28286_v46  ;;  %v20270_v46 = vpack.c.bf16 %v10551_v43, %v10547_v17  ;;  %v28290_v4 = vunpack.i.h.bf16 %v25879_v44 }
 0x5f3   : > { %10272 = vmatprep.mubr.f32.mxu1 %v28269_v1  ;;  %v20268_v19 = vpack.c.bf16 %v10329_v51, %v10325_v21  ;;  %v28240_v21 = vunpack.i.h.bf16 %v25953_v20  ;;  %v22186_v43 = vunpack.i.l.bf16 %v25932_v37  ;;  %v28301_v44 = vunpack.i.h.bf16 %v25930_v36 }
 0x5f4   : > { %22479 = vrot.lane.b32.xlu0 %v25591_v5, %s28283_s16  ;;  %v25997_v49 = vpop.permute.xlu0 %22209  ;;  %v25999_v35 = vpop.permute.xlu1 %22204  ;;  %v10549_v16 = vsel %vm2419_vm8, %v28290_v4, %v22166_v45  ;;  %v28293_v4 = vunpack.i.l.bf16 %v25918_v18  ;;  %vm28318_vm7 = vcmask 1031168  }
 0x5f5   : > { %22474 = vrot.lane.b32.xlu1 %v25595_v6, %s28283_s16  ;;  %19877 = vmatmul.mubr.msk.f32.vlgmr.msra.gmra.mrb[20].mxu0 %vm9251_vm0, %v19874_v14  ;;  %v20274_v0 = vpack.c.bf16 %v10553_v8, %v10549_v16  ;;  %v22196_v8 = vunpack.i.l.bf16 %v25953_v20  ;;  %v28292_v16 = vunpack.i.h.bf16 %v25920_v22  ;;  %v19883_v22 = vld [vmem:[%s28187_s4 + $0x78] sm:$0xff]  ;;  %s28298_s16 = smov 86  }
 0x5f6   : > { %19880 = vmatmul.mubr.msk.f32.vlgmr.msra.gmra.mrb[20].mxu1 %vm9251_vm0, %v19874_v14  ;;  %20265 = vmatpush1.bf16.msra.mxu0 %v20264_v15  ;;  %v28239_v15 = vunpack.i.l.bf16 %v25951_v50  ;;  %v19876_v14 = vld [vmem:[%s28187_s4 + $0x70] sm:$0xff] }
 0x5f7   : > { %20269 = vmatpush1.bf16.msra.mxu1 %v20268_v19  ;;  %20271 = vmatprep.subr.bf16.mxu0 %v20270_v46  ;;  %v10552_v46 = vsel %vm2419_vm8, %v28293_v4, %v22182_v53  ;;  %v28295_v53 = vunpack.i.h.bf16 %v25951_v50 }
 0x5f8   : > { %20275 = vmatprep.subr.bf16.mxu1 %v20274_v0  ;;  %10195 = vmatprep.mubr.f32.mxu0 %v28269_v1  ;;  %v26012_v9 = vpop.permute.xlu0 %22219  ;;  %v26014_v51 = vpop.permute.xlu1 %22214  ;;  %v10550_v0 = vsel %vm2419_vm8, %v22176_v54, %v28292_v16  ;;  %v10774_v54 = vsel %vm2771_vm9, %v28240_v21, %v28239_v15  ;;  %v28294_v16 = vunpack.i.h.bf16 %v25881_v23  ;;  %v10548_v15 = vsel %vm2419_vm8, %v28297_v39, %v28296_v42 }
 0x5f9   : > { %10278 = vmatprep.mubr.f32.mxu1 %v28269_v1  ;;  %22489 = vrot.lane.b32.xlu0 %v25583_v62, %s28291_s11  ;;  %v20276_v21 = vpack.c.bf16 %v10552_v46, %v10548_v15  ;;  %v10772_v39 = vsel %vm2771_vm9, %v28301_v44, %v22186_v43  ;;  %v22217_v15 = vunpack.i.h.bf16 %v26014_v51  ;;  %v28305_v44 = vunpack.i.h.bf16 %v25932_v37 }
 0x5fa   : > { %22484 = vrot.lane.b32.xlu1 %v25587_v63, %s28291_s11  ;;  %19878 = vmatmul.mubr.msk.f32.gmra.mrb[22].mxu0 %vm9251_vm0, %v19875_v7  ;;  %v10546_v18 = vsel %vm2419_vm8, %v22166_v45, %v28294_v16  ;;  %v28299_v45 = vunpack.i.l.bf16 %v25930_v36  ;;  %v28300_v16 = vunpack.i.h.bf16 %v25932_v37 }
 0x5fb   : > { %19881 = vmatmul.mubr.msk.f32.gmra.mrb[22].mxu1 %vm9251_vm0, %v19875_v7  ;;  %10201 = vmatprep.mubr.f32.mxu0 %v28269_v1  ;;  %v20272_v23 = vpack.c.bf16 %v10550_v0, %v10546_v18  ;;  %v22207_v18 = vunpack.i.h.bf16 %v25999_v35 }
 0x5fc   : > { %10284 = vmatprep.mubr.f32.mxu1 %v28269_v1  ;;  %v26032_v17 = vpop.permute.xlu0 %22229  ;;  %v26034_v19 = vpop.permute.xlu1 %22224 }
 0x5fd   : > { %22499 = vrot.lane.b32.xlu0 %v25591_v5, %s28291_s11 }
 0x5fe   : > { %22494 = vrot.lane.b32.xlu1 %v25595_v6, %s28291_s11  ;;  %19879 = vmatmul.mubr.msk.f32.gmra.mrb[24].mxu0 %vm9251_vm0, %v19876_v14 }
 0x5ff   : > { %19882 = vmatmul.mubr.msk.f32.gmra.mrb[24].mxu1 %vm9251_vm0, %v19876_v14  ;;  %10412 = vmatprep.mubr.f32.mxu0 %v28269_v1  ;;  %v10776_v14 = vsel %vm2771_vm9, %v28295_v53, %v22196_v8  ;;  %v10770_v53 = vsel %vm2771_vm9, %v28300_v16, %v28299_v45  ;;  %v22212_v45 = vunpack.i.h.bf16 %v25997_v49  ;;  %v22206_v16 = vunpack.i.l.bf16 %v25999_v35 }
 0x600   : > { %10495 = vmatprep.mubr.f32.mxu1 %v28269_v1  ;;  %v26070_v4 = vpop.permute.xlu0 %22239  ;;  %v26072_v7 = vpop.permute.xlu1 %22234  ;;  %v20278_v40 = vpack.c.bf16 %v10774_v54, %v10770_v53  ;;  %v20282_v42 = vpack.c.bf16 %v10776_v14, %v10772_v39  ;;  %v22211_v54 = vunpack.i.l.bf16 %v25997_v49  ;;  %v28302_v14 = vunpack.i.h.bf16 %v25953_v20  ;;  %v19892_v20 = vld [vmem:[%s28187_s4 + $0x90] sm:$0xff] }
 0x601   : > { %22509 = vrot.lane.b32.xlu0 %v25583_v62, %s28298_s16  ;;  %v19884_v62 = vld [vmem:[%s28187_s4 + $0x80] sm:$0xff]  ;;  %v10995_v37 = vsel %vm3123_vm10, %v22212_v45, %v22206_v16 }
 0x602   : > { %22504 = vrot.lane.b32.xlu1 %v25587_v63, %s28298_s16  ;;  %19886 = vmatmul.mubr.msk.f32.vlgmr.msra.gmra.mrb[20].mxu0 %vm9251_vm0, %v19883_v22 }
 0x603   : > { %19889 = vmatmul.mubr.msk.f32.vlgmr.msra.gmra.mrb[20].mxu1 %vm9251_vm0, %v19883_v22  ;;  %20273 = vmatpush1.bf16.msra.mxu0 %v20272_v23  ;;  %v22216_v22 = vunpack.i.l.bf16 %v26014_v51  ;;  %v10773_v23 = vsel %vm2771_vm9, %v22196_v8, %v28302_v14  ;;  %v28304_v51 = vunpack.i.l.bf16 %v25951_v50 }
 0x604   : > { %20277 = vmatpush1.bf16.msra.mxu1 %v20276_v21  ;;  %20279 = vmatprep.subr.bf16.mxu0 %v20278_v40  ;;  %v26096_v0 = vpop.permute.xlu0 %22249  ;;  %v26098_v63 = vpop.permute.xlu1 %22244  ;;  %v22221_v40 = vunpack.i.l.bf16 %v26012_v9  ;;  %v19885_v21 = vld [vmem:[%s28187_s4 + $0x88] sm:$0xff] }
 0x605   : > { %20283 = vmatprep.subr.bf16.mxu1 %v20282_v42  ;;  %10418 = vmatprep.mubr.f32.mxu0 %v28269_v1  ;;  %v28306_v42 = vunpack.i.h.bf16 %v25930_v36 }
 0x606   : > { %10501 = vmatprep.mubr.f32.mxu1 %v28269_v1  ;;  %22519 = vrot.lane.b32.xlu0 %v25591_v5, %s28298_s16  ;;  %v10997_v49 = vsel %vm3123_vm10, %v22217_v15, %v22221_v40 }
 0x607   : > { %22514 = vrot.lane.b32.xlu1 %v25595_v6, %s28298_s16  ;;  %19887 = vmatmul.mubr.msk.f32.gmra.mrb[22].mxu0 %vm9251_vm0, %v19884_v62  ;;  %v22222_v6 = vunpack.i.h.bf16 %v26012_v9  ;;  %v28303_v9 = vunpack.i.h.bf16 %v25951_v50  ;;  %v10769_v50 = vsel %vm2771_vm9, %v22186_v43, %v28305_v44  ;;  %v19893_v44 = vld [vmem:[%s28187_s4 + $0x98] sm:$0xff] }
 0x608   : > { %19890 = vmatmul.mubr.msk.f32.gmra.mrb[22].mxu1 %vm9251_vm0, %v19884_v62  ;;  %10424 = vmatprep.mubr.f32.mxu0 %v28269_v1  ;;  %v26114_v46 = vpop.permute.xlu0 %22259  ;;  %v26116_v5 = vpop.permute.xlu1 %22254  ;;  %v28307_v62 = vunpack.i.l.bf16 %v25930_v36  ;;  %v20280_v14 = vpack.c.bf16 %v10773_v23, %v10769_v50  ;;  %v22241_v23 = vunpack.i.l.bf16 %v26070_v4  ;;  %v22242_v50 = vunpack.i.h.bf16 %v26070_v4 }
 0x609   : > { %10507 = vmatprep.mubr.f32.mxu1 %v28269_v1  ;;  %v10775_v53 = vsel %vm2771_vm9, %v28304_v51, %v28303_v9  ;;  %v10999_v39 = vsel %vm3123_vm10, %v22222_v6, %v22216_v22  ;;  %v10993_v9 = vsel %vm3123_vm10, %v22207_v18, %v22211_v54 }
 0x60a   : > { %v20286_v38 = vpack.c.bf16 %v10997_v49, %v10993_v9  ;;  %v20290_v43 = vpack.c.bf16 %v10999_v39, %v10995_v37  ;;  %v22236_v39 = vunpack.i.l.bf16 %v26072_v7  ;;  %v22232_v9 = vunpack.i.h.bf16 %v26032_v17 }
 0x60b   : > { %19888 = vmatmul.mubr.msk.f32.gmra.mrb[24].mxu0 %vm9251_vm0, %v19885_v21  ;;  %v10998_v37 = vsel %vm3123_vm10, %v22221_v40, %v22222_v6  ;;  %v10994_v40 = vsel %vm3123_vm10, %v22211_v54, %v22212_v45  ;;  %v22261_v45 = vunpack.i.l.bf16 %v26114_v46 }
 0x60c   : > { %19891 = vmatmul.mubr.msk.f32.gmra.mrb[24].mxu1 %vm9251_vm0, %v19885_v21  ;;  %10635 = vmatprep.mubr.f32.mxu0 %v28269_v1  ;;  %v26140_v8 = vpop.permute.xlu0 %22269  ;;  %v26142_v35 = vpop.permute.xlu1 %22264  ;;  %v10771_v21 = vsel %vm2771_vm9, %v28307_v62, %v28306_v42  ;;  %v22231_v62 = vunpack.i.l.bf16 %v26032_v17  ;;  %v10992_v17 = vsel %vm3123_vm10, %v22206_v16, %v22207_v18  ;;  %v19902_v18 = vld [vmem:[%s28187_s4 + $0xb0] sm:$0xff] }
 0x60d   : > { %10718 = vmatprep.mubr.f32.mxu1 %v28269_v1  ;;  %v20284_v51 = vpack.c.bf16 %v10775_v53, %v10771_v21  ;;  %v22237_v53 = vunpack.i.h.bf16 %v26072_v7  ;;  %v22227_v21 = vunpack.i.h.bf16 %v26034_v19  ;;  %v19901_v7 = vld [vmem:[%s28187_s4 + $0xa8] sm:$0xff] }
 0x60f   : > { %19895 = vmatmul.mubr.msk.f32.vlgmr.msra.gmra.mrb[20].mxu0 %vm9251_vm0, %v19892_v20  ;;  %v11220_v4 = vsel %vm3475_vm11, %v22237_v53, %v22241_v23 }
 0x610   : > { %19898 = vmatmul.mubr.msk.f32.vlgmr.msra.gmra.mrb[20].mxu1 %vm9251_vm0, %v19892_v20  ;;  %20281 = vmatpush1.bf16.msra.mxu0 %v20280_v14  ;;  %v26161_v36 = vpop.permute.xlu0 %22279  ;;  %v26163_v42 = vpop.permute.xlu1 %22274  ;;  %v19894_v20 = vld [vmem:[%s28187_s4 + $0xa0] sm:$0xff]  ;;  %v10996_v14 = vsel %vm3123_vm10, %v22216_v22, %v22217_v15  ;;  %v11216_v22 = vsel %vm3475_vm11, %v22227_v21, %v22231_v62 }
 0x611   : > { %20285 = vmatpush1.bf16.msra.mxu1 %v20284_v51  ;;  %20287 = vmatprep.subr.bf16.mxu0 %v20286_v38  ;;  %v22226_v51 = vunpack.i.l.bf16 %v26034_v19  ;;  %v11222_v19 = vsel %vm3475_vm11, %v22242_v50, %v22236_v39  ;;  %v20288_v6 = vpack.c.bf16 %v10996_v14, %v10992_v17  ;;  %v19903_v14 = vld [vmem:[%s28187_s4 + $0xb8] sm:$0xff]  ;;  %v22251_v17 = vunpack.i.l.bf16 %v26096_v0 }
 0x612   : > { %20291 = vmatprep.subr.bf16.mxu1 %v20290_v43  ;;  %10641 = vmatprep.mubr.f32.mxu0 %v28269_v1 }
 0x613   : > { %10724 = vmatprep.mubr.f32.mxu1 %v28269_v1  ;;  %19896 = vmatmul.mubr.msk.f32.gmra.mrb[22].mxu0 %vm9251_vm0, %v19893_v44  ;;  %v11218_v30 = vsel %vm3475_vm11, %v22232_v9, %v22226_v51 }
 0x614   : > { %19899 = vmatmul.mubr.msk.f32.gmra.mrb[22].mxu1 %vm9251_vm0, %v19893_v44  ;;  %10647 = vmatprep.mubr.f32.mxu0 %v28269_v1  ;;  %v26175_v38 = vpop.permute.xlu0 %22289  ;;  %v26177_v49 = vpop.permute.xlu1 %22284  ;;  %v20292_v44 = vpack.c.bf16 %v10998_v37, %v10994_v40  ;;  %v20298_v28 = vpack.c.bf16 %v11222_v19, %v11218_v30  ;;  %v22257_v30 = vunpack.i.h.bf16 %v26116_v5  ;;  %v22247_v19 = vunpack.i.h.bf16 %v26098_v63 }
 0x615   : > { %10730 = vmatprep.mubr.f32.mxu1 %v28269_v1  ;;  %v11219_v40 = vsel %vm3475_vm11, %v22236_v39, %v22237_v53 }
 0x616   : > { %v11439_v39 = vsel %vm3827_vm12, %v22247_v19, %v22251_v17 }
 0x617   : > { %19897 = vmatmul.mubr.msk.f32.gmra.mrb[24].mxu0 %vm9251_vm0, %v19894_v20 }
 0x618   : > { %19900 = vmatmul.mubr.msk.f32.gmra.mrb[24].mxu1 %vm9251_vm0, %v19894_v20  ;;  %10858 = vmatprep.mubr.f32.mxu0 %v28269_v1  ;;  %v26195_v43 = vpop.permute.xlu0 %22299  ;;  %v26197_v15 = vpop.permute.xlu1 %22294  ;;  %v20294_v20 = vpack.c.bf16 %v11220_v4, %v11216_v22  ;;  %v22256_v4 = vunpack.i.l.bf16 %v26116_v5  ;;  %v22246_v22 = vunpack.i.l.bf16 %v26098_v63  ;;  %v11443_v5 = vsel %vm3827_vm12, %v22257_v30, %v22261_v45 }
 0x619   : > { %10941 = vmatprep.mubr.f32.mxu1 %v28269_v1 }
 0x61b   : > { %19904 = vmatmul.mubr.msk.f32.vlgmr.msra.gmra.mrb[20].mxu0 %vm9251_vm0, %v19901_v7 }
 0x61c   : > { %19907 = vmatmul.mubr.msk.f32.vlgmr.msra.gmra.mrb[20].mxu1 %vm9251_vm0, %v19901_v7  ;;  %20289 = vmatpush1.bf16.msra.mxu0 %v20288_v6  ;;  %v26210_v16 = vpop.permute.xlu0 %22309  ;;  %v26212_v54 = vpop.permute.xlu1 %22304  ;;  %v22262_v7 = vunpack.i.h.bf16 %v26114_v46  ;;  %v22252_v6 = vunpack.i.h.bf16 %v26096_v0  ;;  %v19910_v46 = vld [vmem:[%s28187_s4 + $0xc0] sm:$0xff]  ;;  %v11215_v0 = vsel %vm3475_vm11, %v22226_v51, %v22227_v21  ;;  %v19911_v21 = vld [vmem:[%s28187_s4 + $0xc8] sm:$0xff] }
 0x61d   : > { %20293 = vmatpush1.bf16.msra.mxu1 %v20292_v44  ;;  %20295 = vmatprep.subr.bf16.mxu0 %v20294_v20  ;;  %v11221_v44 = vsel %vm3475_vm11, %v22241_v23, %v22242_v50  ;;  %v11217_v23 = vsel %vm3475_vm11, %v22231_v62, %v22232_v9  ;;  %v20296_v50 = vpack.c.bf16 %v11219_v40, %v11215_v0  ;;  %v22281_v9 = vunpack.i.l.bf16 %v26161_v36  ;;  %v19912_v40 = vld [vmem:[%s28187_s4 + $0xd0] sm:$0xff]  ;;  %vm28319_vm11 = vmmov %vm28310_vm1 }
 0x61e   : > { %20299 = vmatprep.subr.bf16.mxu1 %v20298_v28  ;;  %10864 = vmatprep.mubr.f32.mxu0 %v28269_v1  ;;  %v11445_v63 = vsel %vm3827_vm12, %v22262_v7, %v22256_v4  ;;  %v11441_v29 = vsel %vm3827_vm12, %v22252_v6, %v22246_v22  ;;  %v22271_v0 = vunpack.i.l.bf16 %v26140_v8 }
 0x61f   : > { %10947 = vmatprep.mubr.f32.mxu1 %v28269_v1  ;;  %19905 = vmatmul.mubr.msk.f32.gmra.mrb[22].mxu0 %vm9251_vm0, %v19902_v18  ;;  %v20306_v27 = vpack.c.bf16 %v11445_v63, %v11441_v29  ;;  %v22277_v29 = vunpack.i.h.bf16 %v26163_v42  ;;  %v22267_v63 = vunpack.i.h.bf16 %v26142_v35 }
 0x620   : > { %19908 = vmatmul.mubr.msk.f32.gmra.mrb[22].mxu1 %vm9251_vm0, %v19902_v18  ;;  %10870 = vmatprep.mubr.f32.mxu0 %v28269_v1  ;;  %v26224_v37 = vpop.permute.xlu0 %22319  ;;  %v26226_v28 = vpop.permute.xlu1 %22314  ;;  %v20300_v18 = vpack.c.bf16 %v11221_v44, %v11217_v23  ;;  %v11442_v23 = vsel %vm3827_vm12, %v22256_v4, %v22257_v30  ;;  %v11438_v30 = vsel %vm3827_vm12, %v22246_v22, %v22247_v19  ;;  %v19921_v22 = vld [vmem:[%s28187_s4 + $0xe8] sm:$0xff] }
 0x621   : > { %10953 = vmatprep.mubr.f32.mxu1 %v28269_v1  ;;  %v20304_v4 = vpack.c.bf16 %v11442_v23, %v11438_v30 }
 0x623   : > { %19906 = vmatmul.mubr.msk.f32.gmra.mrb[24].mxu0 %vm9251_vm0, %v19903_v14 }
 0x624   : > { %19909 = vmatmul.mubr.msk.f32.gmra.mrb[24].mxu1 %vm9251_vm0, %v19903_v14  ;;  %11081 = vmatprep.mubr.f32.mxu0 %v28269_v1  ;;  %v26244_v20 = vpop.permute.xlu0 %22329  ;;  %v26246_v53 = vpop.permute.xlu1 %22324  ;;  %v20302_v14 = vpack.c.bf16 %v11443_v5, %v11439_v39  ;;  %v22266_v39 = vunpack.i.l.bf16 %v26142_v35  ;;  %v11440_v35 = vsel %vm3827_vm12, %v22251_v17, %v22252_v6  ;;  %v19920_v17 = vld [vmem:[%s28187_s4 + $0xe0] sm:$0xff] }
 0x625   : > { %11164 = vmatprep.mubr.f32.mxu1 %v28269_v1 }
 0x626   : > { %v11661_v30 = vsel %vm4179_vm13, %v22266_v39, %v22267_v63 }
 0x627   : > { %19913 = vmatmul.mubr.msk.f32.vlgmr.msra.gmra.mrb[20].mxu0 %vm9251_vm0, %v19910_v46 }
 0x628   : > { %19916 = vmatmul.mubr.msk.f32.vlgmr.msra.gmra.mrb[20].mxu1 %vm9251_vm0, %v19910_v46  ;;  %20297 = vmatpush1.bf16.msra.mxu0 %v20296_v50  ;;  %v26259_v51 = vpop.permute.xlu0 %22339  ;;  %v26261_v62 = vpop.permute.xlu1 %22334  ;;  %v22276_v46 = vunpack.i.l.bf16 %v26163_v42  ;;  %v22272_v50 = vunpack.i.h.bf16 %v26140_v8  ;;  %v19919_v42 = vld [vmem:[%s28187_s4 + $0xd8] sm:$0xff] }
 0x629   : > { %20301 = vmatpush1.bf16.msra.mxu1 %v20300_v18  ;;  %20303 = vmatprep.subr.bf16.mxu0 %v20302_v14  ;;  %v11666_v18 = vsel %vm4179_vm13, %v22277_v29, %v22281_v9 }
 0x62a   : > { %20307 = vmatprep.subr.bf16.mxu1 %v20306_v27  ;;  %11087 = vmatprep.mubr.f32.mxu0 %v28269_v1  ;;  %v22282_v27 = vunpack.i.h.bf16 %v26161_v36  ;;  %v11444_v36 = vsel %vm3827_vm12, %v22261_v45, %v22262_v7  ;;  %v11662_v45 = vsel %vm4179_vm13, %v22267_v63, %v22271_v0  ;;  %v28308_v63 = vpack.c.bf16 %v25544_v26, %v25524_v12  ;;  %v19930_v12 = vld [vmem:[%s28187_s4 + $0x100] sm:$0xff]  ;;  %vm28320_vm12 = vmmov %vm28318_vm7 }
 0x62b   : > { %11170 = vmatprep.mubr.f32.mxu1 %v28269_v1  ;;  %19914 = vmatmul.mubr.msk.f32.gmra.mrb[22].mxu0 %vm9251_vm0, %v19911_v21  ;;  %v20308_v14 = vpack.c.bf16 %v11444_v36, %v11440_v35  ;;  %v11665_v36 = vsel %vm4179_vm13, %v22276_v46, %v22277_v29  ;;  %v22296_v26 = vunpack.i.l.bf16 %v26197_v15 }
 0x62c   : > { %19917 = vmatmul.mubr.msk.f32.gmra.mrb[22].mxu1 %vm9251_vm0, %v19911_v21  ;;  %11093 = vmatprep.mubr.f32.mxu0 %v28269_v1  ;;  %v26273_v44 = vpop.permute.xlu0 %22349  ;;  %v26278_v5 = vpop.permute.xlu1 %22344  ;;  %v11668_v8 = vsel %vm4179_vm13, %v22282_v27, %v22276_v46  ;;  %v20310_v21 = vpack.c.bf16 %v11666_v18, %v11662_v45  ;;  %v19928_v18 = vld [vmem:[%s28187_s4 + $0xf0] sm:$0xff]  ;;  %v20312_v29 = vpack.c.bf16 %v11665_v36, %v11661_v30  ;;  %v22291_v45 = vunpack.i.l.bf16 %v26175_v38 }
 0x62d   : > { %11176 = vmatprep.mubr.f32.mxu1 %v28269_v1  ;;  %v19938_v30 = vld [vmem:[%s28187_s4 + $0x110] sm:$0xff] }
 0x62f   : > { %19915 = vmatmul.mubr.msk.f32.gmra.mrb[24].mxu0 %vm9251_vm0, %v19912_v40 }
 0x630   : > { %19918 = vmatmul.mubr.msk.f32.gmra.mrb[24].mxu1 %vm9251_vm0, %v19912_v40  ;;  %11304 = vmatprep.mubr.f32.mxu0 %v28269_v1  ;;  %v26298_v7 = vpop.permute.xlu0 %22359  ;;  %v11664_v40 = vsel %vm4179_vm13, %v22272_v50, %v22266_v39  ;;  %v26302_v34 = vpop.permute.xlu1 %22354  ;;  %v22297_v39 = vunpack.i.h.bf16 %v26197_v15 }
 0x631   : > { %11387 = vmatprep.mubr.f32.mxu1 %v28269_v1  ;;  %v20314_v19 = vpack.c.bf16 %v11668_v8, %v11664_v40  ;;  %v11663_v8 = vsel %vm4179_vm13, %v22271_v0, %v22272_v50  ;;  %v28309_v0 = vpack.c.bf16 %v25547_v24, %v25527_v13  ;;  %v22301_v50 = vunpack.i.l.bf16 %v26195_v43 }
 0x632   : > { %v22302_v13 = vunpack.i.h.bf16 %v26195_v43  ;;  %v22286_v40 = vunpack.i.l.bf16 %v26177_v49  ;;  %v19937_v43 = vld [vmem:[%s28187_s4 + $0x108] sm:$0xff] }
 0x633   : > { %19922 = vmatmul.mubr.msk.f32.vlgmr.msra.gmra.mrb[20].mxu0 %vm9251_vm0, %v19919_v42  ;;  %v12080_v15 = vsel %vm28310_vm1, %v22297_v39, %v22301_v50 }
 0x634   : > { %19925 = vmatmul.mubr.msk.f32.vlgmr.msra.gmra.mrb[20].mxu1 %vm9251_vm0, %v19919_v42  ;;  %20305 = vmatpush1.bf16.msra.mxu0 %v20304_v4  ;;  %v26312_v6 = vpop.permute.xlu0 %22369  ;;  %v26318_v23 = vpop.permute.xlu1 %22364  ;;  %v11667_v42 = vsel %vm4179_vm13, %v22281_v9, %v22282_v27  ;;  %v19929_v27 = vld [vmem:[%s28187_s4 + $0xf8] sm:$0xff] }
 0x635   : > { %20309 = vmatpush1.bf16.msra.mxu1 %v20308_v14  ;;  %20311 = vmatprep.subr.bf16.mxu0 %v20310_v21  ;;  %v20316_v9 = vpack.c.bf16 %v11667_v42, %v11663_v8  ;;  %v22287_v14 = vunpack.i.h.bf16 %v26177_v49  ;;  %v22292_v21 = vunpack.i.h.bf16 %v26175_v38  ;;  %v28314_v42 = vpack.c.bf16 %v25538_v2, %v25518_v10 }
 0x636   : > { %20315 = vmatprep.subr.bf16.mxu1 %v20314_v19  ;;  %11310 = vmatprep.mubr.f32.mxu0 %v28269_v1  ;;  %v12082_v19 = vsel %vm28311_vm2, %v22302_v13, %v22296_v26  ;;  %v28315_v8 = vpack.c.bf16 %v25541_v25, %v25521_v11  ;;  %v22321_v10 = vunpack.i.l.bf16 %v26224_v37  ;;  %v22317_v2 = vunpack.i.h.bf16 %v26226_v28  ;;  %v19939_v11 = vld [vmem:[%s28187_s4 + $0x118] sm:$0xff]  ;;  %vm28321_vm2 = vmmov %vm28318_vm7 }
 0x637   : > { %11393 = vmatprep.mubr.f32.mxu1 %v28269_v1  ;;  %19923 = vmatmul.mubr.msk.f32.gmra.mrb[22].mxu0 %vm9251_vm0, %v19920_v17  ;;  %v12076_v38 = vsel %vm28312_vm3, %v22287_v14, %v22291_v45  ;;  %v12078_v36 = vsel %vm28313_vm4, %v22292_v21, %v22286_v40  ;;  %v22322_v25 = vunpack.i.h.bf16 %v26224_v37  ;;  %v12081_v37 = vsel %vm28317_vm6, %v22301_v50, %v22302_v13  ;;  %vm28322_vm3 = vmmov %vm28321_vm2 }
 0x638   : > { %19926 = vmatmul.mubr.msk.f32.gmra.mrb[22].mxu1 %vm9251_vm0, %v19920_v17  ;;  %11316 = vmatprep.mubr.f32.mxu0 %v28269_v1  ;;  %v26332_v35 = vpop.permute.xlu0 %22379  ;;  %v26334_v46 = vpop.permute.xlu1 %22374  ;;  %vm28323_vm4 = vmmov %vm28321_vm2 }
 0x639   : > { %11399 = vmatprep.mubr.f32.mxu1 %v28269_v1  ;;  %vm28325_vm6 = vmmov %vm28321_vm2 }
 0x63b   : > { %19924 = vmatmul.mubr.msk.f32.gmra.mrb[24].mxu0 %vm9251_vm0, %v19921_v22 }
 0x63c   : > { %19927 = vmatmul.mubr.msk.f32.gmra.mrb[24].mxu1 %vm9251_vm0, %v19921_v22  ;;  %11527 = vmatprep.mubr.f32.mxu0 %v28269_v1  ;;  %v20326_v22 = vpack.c.bf16 %v12080_v15, %v12076_v38  ;;  %v22306_v15 = vunpack.i.l.bf16 %v26212_v54 }
 0x63d   : > { %11610 = vmatprep.mubr.f32.mxu1 %v28269_v1  ;;  %v26352_v4 = vpop.permute.xlu0 %22389  ;;  %v26361_v24 = vpop.permute.xlu1 %22384 }
 0x63f   : > { %19931 = vmatmul.mubr.msk.f32.vlgmr.msra.gmra.mrb[20].mxu0 %vm9251_vm0, %v19928_v18 }
 0x640   : > { %19934 = vmatmul.mubr.msk.f32.vlgmr.msra.gmra.mrb[20].mxu1 %vm9251_vm0, %v19928_v18  ;;  %20313 = vmatpush1.bf16.msra.mxu0 %v20312_v29  ;;  %v20330_v18 = vpack.c.bf16 %v12082_v19, %v12078_v36  ;;  %v12303_v19 = vsel %vm28318_vm7, %v22317_v2, %v22321_v10  ;;  %vm28326_vm7 = vmmov %vm28321_vm2 }
 0x641   : > { %20317 = vmatpush1.bf16.msra.mxu1 %v20316_v9  ;;  %20319 = vmatprep.subr.bf16.mxu0 %v28308_v63  ;;  %v26377_v17 = vpop.permute.xlu0 %22399  ;;  %v26380_v49 = vpop.permute.xlu1 %22394  ;;  %v22316_v9 = vunpack.i.l.bf16 %v26226_v28  ;;  %v22311_v63 = vunpack.i.l.bf16 %v26210_v16  ;;  %v19946_v28 = vld [vmem:[%s28187_s4 + $0x120] sm:$0xff] }
 0x642   : > { %20323 = vmatprep.subr.bf16.mxu1 %v28309_v0  ;;  %11533 = vmatprep.mubr.f32.mxu0 %v28269_v1  ;;  %v22307_v0 = vunpack.i.h.bf16 %v26212_v54  ;;  %v12077_v54 = vsel %vm28310_vm1, %v22291_v45, %v22292_v21  ;;  %v26443_v21 = vsel %vm28326_vm7, %v22321_v10, %v22322_v25  ;;  %v22326_v10 = vunpack.i.l.bf16 %v26246_v53 }
 0x643   : > { %11616 = vmatprep.mubr.f32.mxu1 %v28269_v1  ;;  %19932 = vmatmul.mubr.msk.f32.gmra.mrb[22].mxu0 %vm9251_vm0, %v19929_v27  ;;  %v26429_v50 = vsel %vm28321_vm2, %v22316_v9, %v22317_v2  ;;  %v22331_v2 = vunpack.i.l.bf16 %v26244_v20 }
 0x644   : > { %19935 = vmatmul.mubr.msk.f32.gmra.mrb[22].mxu1 %vm9251_vm0, %v19929_v27  ;;  %11539 = vmatprep.mubr.f32.mxu0 %v28269_v1  ;;  %v12299_v38 = vsel %vm28322_vm3, %v22307_v0, %v22311_v63  ;;  %v12298_v45 = vsel %vm28325_vm6, %v22306_v15, %v22307_v0  ;;  %v22337_v0 = vunpack.i.h.bf16 %v26261_v62 }
 0x645   : > { %11622 = vmatprep.mubr.f32.mxu1 %v28269_v1  ;;  %v26399_v29 = vpop.permute.xlu0 %22409 }
 0x646   : > { %v26408_v27 = vpop.permute.xlu1 %22404 }
 0x647   : > { %19933 = vmatmul.mubr.msk.f32.gmra.mrb[24].mxu0 %vm9251_vm0, %v19930_v12 }
 0x648   : > { %19936 = vmatmul.mubr.msk.f32.gmra.mrb[24].mxu1 %vm9251_vm0, %v19930_v12  ;;  %11750 = vmatprep.mubr.f32.mxu0 %v28269_v1  ;;  %v12079_v12 = vsel %vm28316_vm5, %v22296_v26, %v22297_v39  ;;  %v12075_v39 = vsel %vm28319_vm11, %v22286_v40, %v22287_v14  ;;  %v20332_v14 = vpack.c.bf16 %v12081_v37, %v12077_v54  ;;  %vm28324_vm5 = vmmov %vm28321_vm2  ;;  %v19948_v54 = vld [vmem:[%s28187_s4 + $0x130] sm:$0xff]  ;;  %vm28327_vm11 = vcmask 900096  }
 0x649   : > { %11833 = vmatprep.mubr.f32.mxu1 %v28269_v1  ;;  %v26431_v13 = vpop.permute.xlu0 %22419  ;;  %v20328_v26 = vpack.c.bf16 %v12079_v12, %v12075_v39  ;;  %v20334_v40 = vpack.c.bf16 %v12303_v19, %v12299_v38  ;;  %vm28329_vm1 = vmmov %vm28327_vm11 }
 0x64a   : > { %v26437_v36 = vpop.permute.xlu1 %22414  ;;  %vm28330_vm2 = vmmov %vm28329_vm1 }
 0x64b   : > { %19940 = vmatmul.mubr.msk.f32.vlgmr.msra.gmra.mrb[20].mxu0 %vm9251_vm0, %v19937_v43  ;;  %vm28331_vm3 = vmmov %vm28329_vm1 }
 0x64c   : > { %19943 = vmatmul.mubr.msk.f32.vlgmr.msra.gmra.mrb[20].mxu1 %vm9251_vm0, %v19937_v43  ;;  %20321 = vmatpush1.bf16.msra.mxu0 %v28314_v42  ;;  %v22312_v43 = vunpack.i.h.bf16 %v26210_v16  ;;  %v12305_v16 = vsel %vm28320_vm12, %v22322_v25, %v22316_v9  ;;  %v20336_v9 = vpack.c.bf16 %v26429_v50, %v12298_v45  ;;  %v22342_v25 = vunpack.i.h.bf16 %v26259_v51  ;;  %vm28328_vm12 = vmmov %vm28327_vm11 }
 0x64d   : > { %20325 = vmatpush1.bf16.msra.mxu1 %v28315_v8  ;;  %20327 = vmatprep.subr.bf16.mxu0 %v20326_v22  ;;  %v22332_v8 = vunpack.i.h.bf16 %v26244_v20  ;;  %vm28334_vm6 = vmmov %vm28329_vm1  ;;  %v19965_v20 = vld [vmem:[%s28187_s4 + $0x158] sm:$0xff] }
 0x64e   : > { %20331 = vmatprep.subr.bf16.mxu1 %v20330_v18  ;;  %11756 = vmatprep.mubr.f32.mxu0 %v28269_v1  ;;  %v26435_v22 = vsel %vm28323_vm4, %v22311_v63, %v22312_v43  ;;  %v12301_v42 = vsel %vm28324_vm5, %v22312_v43, %v22306_v15  ;;  %v22341_v63 = vunpack.i.l.bf16 %v26259_v51  ;;  %v22336_v43 = vunpack.i.l.bf16 %v26261_v62  ;;  %vm28332_vm4 = vmmov %vm28329_vm1 }
 0x64f   : > { %11839 = vmatprep.mubr.f32.mxu1 %v28269_v1  ;;  %19941 = vmatmul.mubr.msk.f32.gmra.mrb[22].mxu0 %vm9251_vm0, %v19938_v30  ;;  %v20338_v18 = vpack.c.bf16 %v12305_v16, %v12301_v42  ;;  %vm28333_vm5 = vcmask 891904  }
 0x650   : > { %19944 = vmatmul.mubr.msk.f32.gmra.mrb[22].mxu1 %vm9251_vm0, %v19938_v30  ;;  %11762 = vmatprep.mubr.f32.mxu0 %v28269_v1  ;;  %v19947_v30 = vld [vmem:[%s28187_s4 + $0x128] sm:$0xff]  ;;  %vm28335_vm7 = vmmov %vm28333_vm5 }
 0x651   : > { %11845 = vmatprep.mubr.f32.mxu1 %v28269_v1 }
 0x653   : > { %19942 = vmatmul.mubr.msk.f32.gmra.mrb[24].mxu0 %vm9251_vm0, %v19939_v11 }
 0x654   : > { %19945 = vmatmul.mubr.msk.f32.gmra.mrb[24].mxu1 %vm9251_vm0, %v19939_v11  ;;  %11941 = vmatprep.mubr.f32.mxu0 %v28269_v1  ;;  %v22327_v11 = vunpack.i.h.bf16 %v26246_v53 }
 0x655   : > { %12024 = vmatprep.mubr.f32.mxu1 %v28269_v1 }
 0x656   : > { %v12522_v38 = vsel %vm28327_vm11, %v22327_v11, %v22331_v2  ;;  %vm28336_vm11 = vmmov %vm28329_vm1 }
 0x657   : > { %19949 = vmatmul.mubr.msk.f32.vlgmr.msra.gmra.mrb[20].mxu0 %vm9251_vm0, %v19946_v28 }
 0x658   : > { %19952 = vmatmul.mubr.msk.f32.vlgmr.msra.gmra.mrb[20].mxu1 %vm9251_vm0, %v19946_v28  ;;  %20329 = vmatpush1.bf16.msra.mxu0 %v20328_v26 }
 0x659   : > { %20333 = vmatpush1.bf16.msra.mxu1 %v20332_v14  ;;  %20335 = vmatprep.subr.bf16.mxu0 %v20334_v40  ;;  %v19955_v40 = vld [vmem:[%s28187_s4 + $0x138] sm:$0xff] }
 0x65a   : > { %20339 = vmatprep.subr.bf16.mxu1 %v20338_v18  ;;  %11947 = vmatprep.mubr.f32.mxu0 %v28269_v1  ;;  %v9133_v12 = vpop.permute.xlu0 %9132 }
 0x65b   : > { %12030 = vmatprep.mubr.f32.mxu1 %v28269_v1  ;;  %19950 = vmatmul.mubr.msk.f32.gmra.mrb[22].mxu0 %vm9251_vm0, %v19947_v30  ;;  %v9171_v15 = vadd.f32 %v9133_v12, %v25565_v52  ;;  %v9172_v37 = vadd.f32 %v9133_v12, %v25571_v58  ;;  %v9173_v28 = vadd.f32 %v9133_v12, %v25567_v55  ;;  %v9128_v19 = vpop.permute.xlu1 %9127 }
 0x65c   : > { %19953 = vmatmul.mubr.msk.f32.gmra.mrb[22].mxu1 %vm9251_vm0, %v19947_v30  ;;  %v9174_v51 = vadd.f32 %v9133_v12, %v25573_v59  ;;  %v9167_v39 = vadd.f32 %v9128_v19, %v25549_v3  ;;  %v9168_v16 = vadd.f32 %v9128_v19, %v25557_v47  ;;  %v9169_v62 = vadd.f32 %v9128_v19, %v25555_v41 }
 0x65d   : > { %v26473_v52 = vmul.f32 %v25509_v56, %v9171_v15  ;;  %v26476_v55 = vmul.f32 %v25513_v60, %v9172_v37  ;;  %v26479_v58 = vmul.f32 %v25511_v57, %v9173_v28  ;;  %v9170_v59 = vadd.f32 %v9128_v19, %v25559_v48  ;;  %11953 = vmatprep.mubr.f32.mxu0 %v28269_v1  ;;  %v19956_v37 = vld [vmem:[%s28187_s4 + $0x140] sm:$0xff] }
 0x65e   : > { %v26484_v3 = vmul.f32 %v25515_v61, %v9174_v51  ;;  %v26487_v41 = vmul.f32 %v25509_v56, %v9167_v39  ;;  %v26490_v47 = vmul.f32 %v25513_v60, %v9168_v16  ;;  %v26493_v50 = vmul.f32 %v25511_v57, %v9169_v62  ;;  %12036 = vmatprep.mubr.f32.mxu1 %v28269_v1 }
 0x65f   : > { %v26497_v26 = vmul.f32 %v25515_v61, %v9170_v59  ;;  %19951 = vmatmul.mubr.msk.f32.gmra.mrb[24].mxu0 %vm9251_vm0, %v19948_v54  ;;  %v20340_v48 = vpack.c.bf16 %v26443_v21, %v26435_v22  ;;  %v26509_v14 = vpack.i.bf16 %v26479_v58, %v26476_v55  ;;  %v12526_v22 = vsel %vm28328_vm12, %v22337_v0, %v22341_v63  ;;  %vm28337_vm12 = vmmov %vm28333_vm5 }
 0x660   : > { %19954 = vmatmul.mubr.msk.f32.gmra.mrb[24].mxu1 %vm9251_vm0, %v19948_v54  ;;  %12164 = vmatprep.mubr.f32.mxu0 %v28269_v1  ;;  %v26519_v42 = vpack.i.bf16 %v26493_v50, %v26490_v47  ;;  %v26523_v45 = vpack.i.bf16 %v26473_v52, %v26484_v3  ;;  %v12528_v21 = vsel %vm28329_vm1, %v22342_v25, %v22336_v43  ;;  %v22357_v16 = vunpack.i.h.bf16 %v26302_v34  ;;  %vm28338_vm1 = vmmov %vm28333_vm5 }
 0x661   : > { %12247 = vmatprep.mubr.f32.mxu1 %v28269_v1  ;;  %v26529_v18 = vpack.i.bf16 %v26487_v41, %v26497_v26  ;;  %v12524_v30 = vsel %vm28330_vm2, %v22332_v8, %v22326_v10  ;;  %v20342_v12 = vpack.c.bf16 %v12526_v22, %v12522_v38  ;;  %v12527_v28 = vsel %vm28331_vm3, %v22341_v63, %v22342_v25  ;;  %vm28339_vm2 = vmmov %vm28338_vm1 }
 0x662   : > { %22529 = vrot.lane.b32.xlu0 %v26519_v42, %s22865_s30  ;;  %v20346_v15 = vpack.c.bf16 %v12528_v21, %v12524_v30  ;;  %v26549_v19 = vpack.i.bf16 %v26497_v26, %v26493_v50  ;;  %v12525_v51 = vsel %vm28332_vm4, %v22336_v43, %v22337_v0  ;;  %v26557_v39 = vpack.i.bf16 %v26490_v47, %v26487_v41  ;;  %v19957_v0 = vld [vmem:[%s28187_s4 + $0x148] sm:$0xff]  ;;  %vm28340_vm3 = vmmov %vm28338_vm1 }
 0x663   : > { %19958 = vmatmul.mubr.msk.f32.vlgmr.msra.gmra.mrb[20].mxu0 %vm9251_vm0, %v19955_v40  ;;  %22524 = vrot.lane.b32.xlu1 %v26529_v18, %s22865_s30  ;;  %v26561_v25 = vpack.i.bf16 %v26484_v3, %v26479_v58  ;;  %v22361_v63 = vunpack.i.l.bf16 %v26298_v7  ;;  %v26573_v43 = vpack.i.bf16 %v26476_v55, %v26473_v52  ;;  %v22362_v62 = vunpack.i.h.bf16 %v26298_v7 }
 0x664   : > { %19961 = vmatmul.mubr.msk.f32.vlgmr.msra.gmra.mrb[20].mxu1 %vm9251_vm0, %v19955_v40  ;;  %20337 = vmatpush1.bf16.msra.mxu0 %v20336_v9  ;;  %v22351_v9 = vunpack.i.l.bf16 %v26273_v44  ;;  %v22356_v54 = vunpack.i.l.bf16 %v26302_v34  ;;  %v22347_v59 = vunpack.i.h.bf16 %v26278_v5  ;;  %v22346_v38 = vunpack.i.l.bf16 %v26278_v5  ;;  %v19964_v34 = vld [vmem:[%s28187_s4 + $0x150] sm:$0xff] }
 0x665   : > { %20341 = vmatpush1.bf16.msra.mxu1 %v20340_v48  ;;  %20343 = vmatprep.subr.bf16.mxu0 %v20342_v12  ;;  %v22352_v48 = vunpack.i.h.bf16 %v26273_v44  ;;  %v12749_v7 = vsel %vm28333_vm5, %v22357_v16, %v22361_v63  ;;  %v12521_v40 = vsel %vm28334_vm6, %v22326_v10, %v22327_v11  ;;  %v12523_v22 = vsel %vm28336_vm11, %v22331_v2, %v22332_v8  ;;  %vm28342_vm5 = vmmov %vm28338_vm1 }
 0x666   : > { %20347 = vmatprep.subr.bf16.mxu1 %v20346_v15  ;;  %12170 = vmatprep.mubr.f32.mxu0 %v28269_v1  ;;  %v12751_v5 = vsel %vm28335_vm7, %v22362_v62, %v22356_v54  ;;  %v20344_v21 = vpack.c.bf16 %v12525_v51, %v12521_v40  ;;  %v12745_v53 = vsel %vm28337_vm12, %v22347_v59, %v22351_v9  ;;  %v22381_v8 = vunpack.i.l.bf16 %v26332_v35  ;;  %v19966_v15 = vld [vmem:[%s28187_s4 + $0x160] sm:$0xff]  ;;  %vm28343_vm6 = vmmov %vm28338_vm1 }
 0x667   : > { %12253 = vmatprep.mubr.f32.mxu1 %v28269_v1  ;;  %19959 = vmatmul.mubr.msk.f32.gmra.mrb[22].mxu0 %vm9251_vm0, %v19956_v37  ;;  %v20348_v11 = vpack.c.bf16 %v12527_v28, %v12523_v22  ;;  %v20350_v10 = vpack.c.bf16 %v12749_v7, %v12745_v53  ;;  %v12747_v30 = vsel %vm28338_vm1, %v22352_v48, %v22346_v38  ;;  %v22377_v2 = vunpack.i.h.bf16 %v26334_v46 }
 0x668   : > { %19962 = vmatmul.mubr.msk.f32.gmra.mrb[22].mxu1 %vm9251_vm0, %v19956_v37  ;;  %22539 = vrot.lane.b32.xlu0 %v26509_v14, %s22865_s30  ;;  %v20354_v12 = vpack.c.bf16 %v12751_v5, %v12747_v30  ;;  %v22382_v37 = vunpack.i.h.bf16 %v26332_v35  ;;  %v22376_v28 = vunpack.i.l.bf16 %v26334_v46  ;;  %v22371_v51 = vunpack.i.l.bf16 %v26312_v6  ;;  %v19973_v5 = vld [vmem:[%s28187_s4 + $0x168] sm:$0xff] }
 0x669   : > { %22534 = vrot.lane.b32.xlu1 %v26523_v45, %s22865_s30  ;;  %12176 = vmatprep.mubr.f32.mxu0 %v28269_v1  ;;  %v22372_v7 = vunpack.i.h.bf16 %v26312_v6  ;;  %v22366_v40 = vunpack.i.l.bf16 %v26318_v23  ;;  %v12750_v46 = vsel %vm28340_vm3, %v22361_v63, %v22362_v62  ;;  %vm28341_vm4 = vcmask 883712  }
 0x66a   : > { %12259 = vmatprep.mubr.f32.mxu1 %v28269_v1  ;;  %v12744_v63 = vsel %vm28343_vm6, %v22346_v38, %v22347_v59  ;;  %vm28344_vm7 = vmmov %vm28341_vm4  ;;  %v20458_v44 = vpack.c.bf16 %v26484_v3, %v26497_v26  ;;  %v20460_v53 = vpack.c.bf16 %v26479_v58, %v26493_v50  ;;  %v22401_v30 = vunpack.i.l.bf16 %v26377_v17  ;;  %v20089_v58 = vld [vmem:[%s28189_s6 + $0x58] sm:$0xff] }
 0x66b   : > { %19960 = vmatmul.mubr.msk.f32.gmra.mrb[24].mxu0 %vm9251_vm0, %v19957_v0  ;;  %v12974_v62 = vsel %vm28344_vm7, %v22382_v37, %v22376_v28  ;;  %vm28345_vm11 = vmmov %vm28341_vm4  ;;  %vm28349_vm3 = vcmask 875520  }
 0x66c   : > { %19963 = vmatmul.mubr.msk.f32.gmra.mrb[24].mxu1 %vm9251_vm0, %v19957_v0  ;;  %22549 = vrot.lane.b32.xlu0 %v26519_v42, %s22864_s25  ;;  %v22367_v0 = vunpack.i.h.bf16 %v26318_v23  ;;  %v12746_v23 = vsel %vm28342_vm5, %v22351_v9, %v22352_v48  ;;  %v20456_v9 = vpack.c.bf16 %v26473_v52, %v26487_v41  ;;  %vm28346_vm12 = vmmov %vm28341_vm4 }
 0x66d   : > { %22544 = vrot.lane.b32.xlu1 %v26529_v18, %s22864_s25  ;;  %12387 = vmatprep.mubr.f32.mxu0 %v28269_v1  ;;  %v20356_v59 = vpack.c.bf16 %v12750_v46, %v12746_v23  ;;  %v12970_v38 = vsel %vm28346_vm12, %v22372_v7, %v22366_v40  ;;  %vm28347_vm1 = vmmov %vm28341_vm4  ;;  %v19984_v23 = vld [vmem:[%s28187_s4 + $0x190] sm:$0xff] }
 0x66e   : > { %12470 = vmatprep.mubr.f32.mxu1 %v28269_v1  ;;  %v12971_v46 = vsel %vm28347_vm1, %v22376_v28, %v22377_v2  ;;  %vm28351_vm5 = vmmov %vm28349_vm3 }
 0x66f   : > { %19967 = vmatmul.mubr.msk.f32.vlgmr.msra.gmra.mrb[20].mxu0 %vm9251_vm0, %v19964_v34  ;;  %vm28352_vm6 = vmmov %vm28347_vm1 }
 0x670   : > { %19970 = vmatmul.mubr.msk.f32.vlgmr.msra.gmra.mrb[20].mxu1 %vm9251_vm0, %v19964_v34  ;;  %20345 = vmatpush1.bf16.msra.mxu0 %v20344_v21  ;;  %v12748_v34 = vsel %vm28339_vm2, %v22356_v54, %v22357_v16  ;;  %v12972_v16 = vsel %vm28341_vm4, %v22377_v2, %v22381_v8  ;;  %v20454_v54 = vpack.c.bf16 %v26476_v55, %v26490_v47  ;;  %vm28348_vm2 = vmmov %vm28347_vm1  ;;  %v20080_v55 = vld [vmem:[%s28189_s6 + $0x40] sm:$0xff] }
 0x671   : > { %20349 = vmatpush1.bf16.msra.mxu1 %v20348_v11  ;;  %20351 = vmatprep.subr.bf16.mxu0 %v20350_v10  ;;  %v20352_v22 = vpack.c.bf16 %v12748_v34, %v12744_v63  ;;  %v12968_v21 = vsel %vm28345_vm11, %v22367_v0, %v22371_v51  ;;  %v20362_v11 = vpack.c.bf16 %v12974_v62, %v12970_v38  ;;  %v19974_v10 = vld [vmem:[%s28187_s4 + $0x170] sm:$0xff]  ;;  %v22387_v34 = vunpack.i.h.bf16 %v26361_v24  ;;  %vm28350_vm4 = vmmov %vm28347_vm1 }
 0x672   : > { %20355 = vmatprep.subr.bf16.mxu1 %v20354_v12  ;;  %22559 = vrot.lane.b32.xlu0 %v26509_v14, %s22864_s25  ;;  %v20358_v48 = vpack.c.bf16 %v12972_v16, %v12968_v21  ;;  %v22397_v12 = vunpack.i.h.bf16 %v26380_v49  ;;  %v12967_v2 = vsel %vm28350_vm4, %v22366_v40, %v22367_v0  ;;  %vm28353_vm7 = vmmov %vm28349_vm3  ;;  %v22417_v16 = vunpack.i.h.bf16 %v26437_v36 }
 0x673   : > { %22554 = vrot.lane.b32.xlu1 %v26523_v45, %s22864_s25  ;;  %12393 = vmatprep.mubr.f32.mxu0 %v28269_v1  ;;  %vm28354_vm11 = vmmov %vm28349_vm3  ;;  %v22422_v63 = vunpack.i.h.bf16 %v26431_v13  ;;  %v22416_v62 = vunpack.i.l.bf16 %v26437_v36  ;;  %v22407_v21 = vunpack.i.h.bf16 %v26408_v27  ;;  %v22406_v38 = vunpack.i.l.bf16 %v26408_v27 }
 0x674   : > { %12476 = vmatprep.mubr.f32.mxu1 %v28269_v1  ;;  %19968 = vmatmul.mubr.msk.f32.gmra.mrb[22].mxu0 %vm9251_vm0, %v19965_v20  ;;  %vm28355_vm12 = vmmov %vm28349_vm3 }
 0x675   : > { %19971 = vmatmul.mubr.msk.f32.gmra.mrb[22].mxu1 %vm9251_vm0, %v19965_v20  ;;  %12399 = vmatprep.mubr.f32.mxu0 %v28269_v1  ;;  %v22396_v20 = vunpack.i.l.bf16 %v26380_v49  ;;  %v12973_v49 = vsel %vm28348_vm2, %v22381_v8, %v22382_v37  ;;  %v20360_v8 = vpack.c.bf16 %v12971_v46, %v12967_v2  ;;  %vm28356_vm1 = vmmov %vm28349_vm3  ;;  %vm28357_vm2 = vcmask 867328  }
 0x676   : > { %22569 = vrot.lane.b32.xlu0 %v26519_v42, %s22866_s15  ;;  %12482 = vmatprep.mubr.f32.mxu1 %v28269_v1  ;;  %vm28359_vm4 = vmmov %vm28357_vm2 }
 0x677   : > { %22564 = vrot.lane.b32.xlu1 %v26529_v18, %s22866_s15 }
 0x678   : > { %19969 = vmatmul.mubr.msk.f32.gmra.mrb[24].mxu0 %vm9251_vm0, %v19966_v15 }
 0x679   : > { %19972 = vmatmul.mubr.msk.f32.gmra.mrb[24].mxu1 %vm9251_vm0, %v19966_v15  ;;  %12610 = vmatprep.mubr.f32.mxu0 %v28269_v1  ;;  %v22391_v15 = vunpack.i.l.bf16 %v26352_v4 }
 0x67a   : > { %22579 = vrot.lane.b32.xlu0 %v26509_v14, %s22866_s15  ;;  %12693 = vmatprep.mubr.f32.mxu1 %v28269_v1 }
 0x67b   : > { %22574 = vrot.lane.b32.xlu1 %v26523_v45, %s22866_s15  ;;  %v13191_v37 = vsel %vm28353_vm7, %v22387_v34, %v22391_v15  ;;  %vm28362_vm7 = vmmov %vm28357_vm2 }
 0x67c   : > { %19976 = vmatmul.mubr.msk.f32.vlgmr.msra.gmra.mrb[20].mxu0 %vm9251_vm0, %v19973_v5 }
 0x67d   : > { %19979 = vmatmul.mubr.msk.f32.vlgmr.msra.gmra.mrb[20].mxu1 %vm9251_vm0, %v19973_v5  ;;  %20353 = vmatpush1.bf16.msra.mxu0 %v20352_v22  ;;  %v22392_v5 = vunpack.i.h.bf16 %v26352_v4  ;;  %v22411_v22 = vunpack.i.l.bf16 %v26399_v29 }
 0x67e   : > { %20357 = vmatpush1.bf16.msra.mxu1 %v20356_v59  ;;  %20359 = vmatprep.subr.bf16.mxu0 %v20358_v48  ;;  %v13194_v59 = vsel %vm28355_vm12, %v22396_v20, %v22397_v12  ;;  %v22412_v48 = vunpack.i.h.bf16 %v26399_v29  ;;  %vm28364_vm12 = vmmov %vm28357_vm2 }
 0x67f   : > { %20363 = vmatprep.subr.bf16.mxu1 %v20362_v11  ;;  %22589 = vrot.lane.b32.xlu0 %v26519_v42, %s28263_s20  ;;  %v19975_v42 = vld [vmem:[%s28187_s4 + $0x178] sm:$0xff]  ;;  %v26762_v11 = vpop.permute.xlu0 %22429 }
 0x680   : > { %22584 = vrot.lane.b32.xlu1 %v26529_v18, %s28263_s20  ;;  %12616 = vmatprep.mubr.f32.mxu0 %v28269_v1  ;;  %v22402_v18 = vunpack.i.h.bf16 %v26377_v17  ;;  %v22386_v17 = vunpack.i.l.bf16 %v26361_v24  ;;  %v12969_v24 = vsel %vm28352_vm6, %v22371_v51, %v22372_v7  ;;  %v19983_v51 = vld [vmem:[%s28187_s4 + $0x188] sm:$0xff]  ;;  %v22421_v7 = vunpack.i.l.bf16 %v26431_v13  ;;  %vm28361_vm6 = vmmov %vm28357_vm2 }
 0x681   : > { %12699 = vmatprep.mubr.f32.mxu1 %v28269_v1  ;;  %19977 = vmatmul.mubr.msk.f32.gmra.mrb[22].mxu0 %vm9251_vm0, %v19974_v10  ;;  %v20364_v28 = vpack.c.bf16 %v12973_v49, %v12969_v24  ;;  %v13416_v4 = vsel %vm28362_vm7, %v22412_v48, %v22406_v38  ;;  %v19993_v24 = vld [vmem:[%s28187_s4 + $0x1a8] sm:$0xff] }
 0x682   : > { %19980 = vmatmul.mubr.msk.f32.gmra.mrb[22].mxu1 %vm9251_vm0, %v19974_v10  ;;  %12622 = vmatprep.mubr.f32.mxu0 %v28269_v1  ;;  %v13197_v35 = vsel %vm28351_vm5, %v22402_v18, %v22396_v20  ;;  %v13193_v40 = vsel %vm28354_vm11, %v22392_v5, %v22386_v17  ;;  %v13196_v36 = vsel %vm28356_vm1, %v22401_v30, %v22402_v18  ;;  %v26764_v10 = vpop.permute.xlu1 %22424  ;;  %vm28360_vm5 = vmmov %vm28356_vm1 }
 0x683   : > { %22599 = vrot.lane.b32.xlu0 %v26509_v14, %s28263_s20  ;;  %12705 = vmatprep.mubr.f32.mxu1 %v28269_v1  ;;  %v19982_v14 = vld [vmem:[%s28187_s4 + $0x180] sm:$0xff]  ;;  %v20370_v6 = vpack.c.bf16 %v13197_v35, %v13193_v40  ;;  %v13192_v18 = vsel %vm28360_vm5, %v22391_v15, %v22392_v5  ;;  %vm28363_vm11 = vmmov %vm28357_vm2 }
 0x684   : > { %22594 = vrot.lane.b32.xlu1 %v26523_v45, %s28263_s20  ;;  %v13195_v45 = vsel %vm28349_vm3, %v22397_v12, %v22401_v30  ;;  %v19991_v12 = vld [vmem:[%s28187_s4 + $0x198] sm:$0xff]  ;;  %vm28358_vm3 = vmmov %vm28356_vm1  ;;  %v13420_v30 = vsel %vm28359_vm4, %v22422_v63, %v22416_v62  ;;  %v19992_v5 = vld [vmem:[%s28187_s4 + $0x1a0] sm:$0xff]  ;;  %v13417_v40 = vsel %vm28363_vm11, %v22416_v62, %v22417_v16  ;;  %vm28365_vm1 = vcmask 736256  }
 0x685   : > { %19978 = vmatmul.mubr.msk.f32.gmra.mrb[24].mxu0 %vm9251_vm0, %v19975_v42  ;;  %v20366_v0 = vpack.c.bf16 %v13195_v45, %v13191_v37  ;;  %v13190_v20 = vsel %vm28358_vm3, %v22386_v17, %v22387_v34  ;;  %v13414_v34 = vsel %vm28361_vm6, %v22407_v21, %v22411_v22  ;;  %v20372_v17 = vpack.c.bf16 %v13196_v36, %v13192_v18  ;;  %vm28366_vm3 = vmmov %vm28365_vm1 }
 0x686   : > { %19981 = vmatmul.mubr.msk.f32.gmra.mrb[24].mxu1 %vm9251_vm0, %v19975_v42  ;;  %12833 = vmatprep.mubr.f32.mxu0 %v28269_v1  ;;  %v13418_v42 = vsel %vm28357_vm2, %v22417_v16, %v22421_v7  ;;  %v20368_v46 = vpack.c.bf16 %v13194_v59, %v13190_v20  ;;  %v20378_v15 = vpack.c.bf16 %v13420_v30, %v13416_v4  ;;  %v26799_v45 = vpop.permute.xlu1 %22434  ;;  %v20000_v16 = vld [vmem:[%s28187_s4 + $0x1b0] sm:$0xff]  ;;  %vm28367_vm4 = vmmov %vm28357_vm2  ;;  %v16727_v20 = vld [vmem:[%s28190_s7] sm:$0xff] }
 0x687   : > { %22609 = vrot.lane.b32.xlu0 %v26549_v19, %s28264_s21  ;;  %12916 = vmatprep.mubr.f32.mxu1 %v28269_v1  ;;  %v20374_v49 = vpack.c.bf16 %v13418_v42, %v13414_v34  ;;  %v22437_v35 = vunpack.i.h.bf16 %v26799_v45  ;;  %v22436_v37 = vunpack.i.l.bf16 %v26799_v45  ;;  %v13415_v62 = vsel %vm28367_vm4, %v22411_v22, %v22412_v48  ;;  %vm28368_vm5 = vmmov %vm28365_vm1  ;;  %v16728_v42 = vld [vmem:[%s28190_s7 + $0x8] sm:$0xff] }
 0x688   : > { %22604 = vrot.lane.b32.xlu1 %v26557_v39, %s28264_s21  ;;  %vm28369_vm6 = vmmov %vm28365_vm1 }
 0x689   : > { %19985 = vmatmul.mubr.msk.f32.vlgmr.msra.gmra.mrb[20].mxu0 %vm9251_vm0, %v19982_v14  ;;  %vm28370_vm7 = vmmov %vm28365_vm1 }
 0x68a   : > { %19988 = vmatmul.mubr.msk.f32.vlgmr.msra.gmra.mrb[20].mxu1 %vm9251_vm0, %v19982_v14  ;;  %20361 = vmatpush1.bf16.msra.mxu0 %v20360_v8  ;;  %v26797_v14 = vpop.permute.xlu0 %22439  ;;  %v26833_v36 = vpop.permute.xlu1 %22444  ;;  %vm28371_vm11 = vmmov %vm28365_vm1 }
 0x68b   : > { %20365 = vmatpush1.bf16.msra.mxu1 %v20364_v28  ;;  %20367 = vmatprep.subr.bf16.mxu0 %v20366_v0  ;;  %v22441_v2 = vunpack.i.l.bf16 %v26797_v14  ;;  %v22442_v8 = vunpack.i.h.bf16 %v26797_v14  ;;  %v22431_v28 = vunpack.i.l.bf16 %v26762_v11  ;;  %v22427_v0 = vunpack.i.h.bf16 %v26764_v10 }
 0x68c   : > { %20371 = vmatprep.subr.bf16.mxu1 %v20370_v6  ;;  %22619 = vrot.lane.b32.xlu0 %v26561_v25, %s28264_s21  ;;  %v22432_v6 = vunpack.i.h.bf16 %v26762_v11  ;;  %v20010_v11 = vld [vmem:[%s28187_s4 + $0x1d0] sm:$0xff] }
 0x68d   : > { %22614 = vrot.lane.b32.xlu1 %v26573_v43, %s28264_s21  ;;  %12839 = vmatprep.mubr.f32.mxu0 %v28269_v1  ;;  %v13641_v13 = vsel %vm28365_vm1, %v22437_v35, %v22441_v2  ;;  %v13642_v45 = vsel %vm28371_vm11, %v22441_v2, %v22442_v8  ;;  %vm28379_vm11 = vcmask 719872  }
 0x68e   : > { %12922 = vmatprep.mubr.f32.mxu1 %v28269_v1  ;;  %19986 = vmatmul.mubr.msk.f32.gmra.mrb[22].mxu0 %vm9251_vm0, %v19983_v51  ;;  %v26831_v59 = vpop.permute.xlu0 %22449 }
 0x68f   : > { %19989 = vmatmul.mubr.msk.f32.gmra.mrb[22].mxu1 %vm9251_vm0, %v19983_v51  ;;  %12845 = vmatprep.mubr.f32.mxu0 %v28269_v1  ;;  %v22426_v51 = vunpack.i.l.bf16 %v26764_v10  ;;  %v22451_v34 = vunpack.i.l.bf16 %v26831_v59  ;;  %v22452_v4 = vunpack.i.h.bf16 %v26831_v59 }
 0x690   : > { %22629 = vrot.lane.b32.xlu0 %v26549_v19, %s28267_s24  ;;  %12928 = vmatprep.mubr.f32.mxu1 %v28269_v1 }
 0x691   : > { %22624 = vrot.lane.b32.xlu1 %v26557_v39, %s28267_s24  ;;  %v13639_v29 = vsel %vm28369_vm6, %v22432_v6, %v22426_v51 }
 0x692   : > { %19987 = vmatmul.mubr.msk.f32.gmra.mrb[24].mxu0 %vm9251_vm0, %v19984_v23  ;;  %v26874_v48 = vpop.permute.xlu0 %22459 }
 0x693   : > { %19990 = vmatmul.mubr.msk.f32.gmra.mrb[24].mxu1 %vm9251_vm0, %v19984_v23  ;;  %13056 = vmatprep.mubr.f32.mxu0 %v28269_v1  ;;  %v13419_v23 = vsel %vm28364_vm12, %v22421_v7, %v22422_v63  ;;  %v13413_v7 = vsel %vm28357_vm2, %v22406_v38, %v22407_v21  ;;  %v13643_v63 = vsel %vm28366_vm3, %v22442_v8, %v22436_v37  ;;  %v22461_v30 = vunpack.i.l.bf16 %v26874_v48  ;;  %vm28374_vm3 = vmmov %vm28365_vm1 }
 0x694   : > { %22639 = vrot.lane.b32.xlu0 %v26561_v25, %s28267_s24  ;;  %13139 = vmatprep.mubr.f32.mxu1 %v28269_v1  ;;  %v20376_v27 = vpack.c.bf16 %v13417_v40, %v13413_v7  ;;  %v20380_v21 = vpack.c.bf16 %v13419_v23, %v13415_v62  ;;  %v20386_v22 = vpack.c.bf16 %v13643_v63, %v13639_v29  ;;  %v22462_v18 = vunpack.i.h.bf16 %v26874_v48  ;;  %v16729_v40 = vld [vmem:[%s28190_s7 + $0x10] sm:$0xff]  ;;  %v20011_v63 = vld [vmem:[%s28187_s4 + $0x1d8] sm:$0xff] }
 0x695   : > { %22634 = vrot.lane.b32.xlu1 %v26573_v43, %s28267_s24  ;;  %vm28372_vm12 = vcmask 728064   ;;  %v13636_v23 = vsel %vm28365_vm1, %v22426_v51, %v22427_v0  ;;  %v13638_v2 = vsel %vm28374_vm3, %v22431_v28, %v22432_v6  ;;  %vm28381_vm1 = vmmov %vm28379_vm11 }
 0x696   : > { %19994 = vmatmul.mubr.msk.f32.vlgmr.msra.gmra.mrb[20].mxu0 %vm9251_vm0, %v19991_v12  ;;  %vm28373_vm2 = vmmov %vm28372_vm12  ;;  %v20388_v10 = vpack.c.bf16 %v13642_v45, %v13638_v2  ;;  %v20020_v45 = vld [vmem:[%s28187_s4 + $0x1f0] sm:$0xff] }
 0x697   : > { %19997 = vmatmul.mubr.msk.f32.vlgmr.msra.gmra.mrb[20].mxu1 %vm9251_vm0, %v19991_v12  ;;  %20369 = vmatpush1.bf16.msra.mxu0 %v20368_v46  ;;  %v26876_v12 = vpop.permute.xlu1 %22454  ;;  %vm28375_vm4 = vmmov %vm28373_vm2  ;;  %v13861_v48 = vsel %vm28373_vm2, %v22451_v34, %v22452_v4 }
 0x698   : > { %20373 = vmatpush1.bf16.msra.mxu1 %v20372_v17  ;;  %20375 = vmatprep.subr.bf16.mxu0 %v20374_v49  ;;  %v22456_v46 = vunpack.i.l.bf16 %v26876_v12  ;;  %v22447_v17 = vunpack.i.h.bf16 %v26833_v36  ;;  %v13640_v49 = vsel %vm28370_vm7, %v22436_v37, %v22437_v35  ;;  %v20009_v35 = vld [vmem:[%s28187_s4 + $0x1c8] sm:$0xff]  ;;  %vm28377_vm6 = vmmov %vm28373_vm2 }
 0x699   : > { %20379 = vmatprep.subr.bf16.mxu1 %v20378_v15  ;;  %22649 = vrot.lane.b32.xlu0 %v26549_v19, %s28268_s27  ;;  %v22446_v15 = vunpack.i.l.bf16 %v26833_v36  ;;  %v20384_v8 = vpack.c.bf16 %v13640_v49, %v13636_v23  ;;  %vm28378_vm7 = vmmov %vm28373_vm2 }
 0x69a   : > { %22644 = vrot.lane.b32.xlu1 %v26557_v39, %s28268_s27  ;;  %13062 = vmatprep.mubr.f32.mxu0 %v28269_v1  ;;  %v13866_v14 = vsel %vm28373_vm2, %v22462_v18, %v22456_v46  ;;  %v13860_v36 = vsel %vm28375_vm4, %v22447_v17, %v22451_v34  ;;  %vm28382_vm3 = vmmov %vm28381_vm1 }
 0x69b   : > { %13145 = vmatprep.mubr.f32.mxu1 %v28269_v1  ;;  %19995 = vmatmul.mubr.msk.f32.gmra.mrb[22].mxu0 %vm9251_vm0, %v19992_v5  ;;  %vm28383_vm4 = vmmov %vm28381_vm1 }
 0x69c   : > { %19998 = vmatmul.mubr.msk.f32.gmra.mrb[22].mxu1 %vm9251_vm0, %v19992_v5  ;;  %13068 = vmatprep.mubr.f32.mxu0 %v28269_v1  ;;  %v26908_v5 = vpop.permute.xlu0 %22469 }
 0x69d   : > { %22659 = vrot.lane.b32.xlu0 %v26561_v25, %s28268_s27  ;;  %13151 = vmatprep.mubr.f32.mxu1 %v28269_v1  ;;  %v22472_v29 = vunpack.i.h.bf16 %v26908_v5 }
 0x69e   : > { %22654 = vrot.lane.b32.xlu1 %v26573_v43, %s28268_s27 }
 0x69f   : > { %19996 = vmatmul.mubr.msk.f32.gmra.mrb[24].mxu0 %vm9251_vm0, %v19993_v24 }
 0x6a0   : > { %19999 = vmatmul.mubr.msk.f32.gmra.mrb[24].mxu1 %vm9251_vm0, %v19993_v24  ;;  %13279 = vmatprep.mubr.f32.mxu0 %v28269_v1  ;;  %v26910_v24 = vpop.permute.xlu1 %22464 }
 0x6a1   : > { %22669 = vrot.lane.b32.xlu0 %v26549_v19, %s28270_s29  ;;  %13362 = vmatprep.mubr.f32.mxu1 %v28269_v1  ;;  %v13637_v19 = vsel %vm28368_vm5, %v22427_v0, %v22431_v28  ;;  %vm28376_vm5 = vmmov %vm28373_vm2  ;;  %v26948_v28 = vpop.permute.xlu0 %22479 }
 0x6a2   : > { %22664 = vrot.lane.b32.xlu1 %v26557_v39, %s28270_s29  ;;  %v20382_v38 = vpack.c.bf16 %v13641_v13, %v13637_v19  ;;  %v20001_v39 = vld [vmem:[%s28187_s4 + $0x1b8] sm:$0xff]  ;;  %v13862_v51 = vsel %vm28376_vm5, %v22452_v4, %v22446_v15  ;;  %v22481_v13 = vunpack.i.l.bf16 %v26948_v28  ;;  %v22482_v62 = vunpack.i.h.bf16 %v26948_v28  ;;  %vm28384_vm5 = vmmov %vm28381_vm1 }
 0x6a3   : > { %20003 = vmatmul.mubr.msk.f32.vlgmr.msra.gmra.mrb[20].mxu0 %vm9251_vm0, %v20000_v16  ;;  %v22471_v19 = vunpack.i.l.bf16 %v26908_v5 }
 0x6a4   : > { %20006 = vmatmul.mubr.msk.f32.vlgmr.msra.gmra.mrb[20].mxu1 %vm9251_vm0, %v20000_v16  ;;  %20377 = vmatpush1.bf16.msra.mxu0 %v20376_v27  ;;  %v20394_v16 = vpack.c.bf16 %v13866_v14, %v13862_v51  ;;  %v22475_v6 = vpop.permute.xlu1 %22474 }
 0x6a5   : > { %20381 = vmatpush1.bf16.msra.mxu1 %v20380_v21  ;;  %20383 = vmatprep.subr.bf16.mxu0 %v20382_v38  ;;  %v22477_v7 = vunpack.i.h.bf16 %v22475_v6  ;;  %v22476_v27 = vunpack.i.l.bf16 %v22475_v6  ;;  %v22467_v21 = vunpack.i.h.bf16 %v26910_v24 }
 0x6a6   : > { %20387 = vmatprep.subr.bf16.mxu1 %v20386_v22  ;;  %22679 = vrot.lane.b32.xlu0 %v26561_v25, %s28270_s29  ;;  %v22457_v25 = vunpack.i.h.bf16 %v26876_v12  ;;  %v22466_v22 = vunpack.i.l.bf16 %v26910_v24 }
 0x6a7   : > { %22674 = vrot.lane.b32.xlu1 %v26573_v43, %s28270_s29  ;;  %13285 = vmatprep.mubr.f32.mxu0 %v28269_v1  ;;  %v20002_v43 = vld [vmem:[%s28187_s4 + $0x1c0] sm:$0xff]  ;;  %v14086_v2 = vsel %vm28384_vm5, %v22476_v27, %v22477_v7 }
 0x6a8   : > { %13368 = vmatprep.mubr.f32.mxu1 %v28269_v1  ;;  %20004 = vmatmul.mubr.msk.f32.gmra.mrb[22].mxu0 %vm9251_vm0, %v20001_v39  ;;  %v13864_v37 = vsel %vm28372_vm12, %v22457_v25, %v22461_v30  ;;  %v13863_v38 = vsel %vm28377_vm6, %v22456_v46, %v22457_v25  ;;  %v26968_v12 = vpop.permute.xlu1 %22484  ;;  %v14087_v25 = vsel %vm28379_vm11, %v22477_v7, %v22481_v13  ;;  %vm28380_vm12 = vmmov %vm28373_vm2 }
 0x6a9   : > { %20007 = vmatmul.mubr.msk.f32.gmra.mrb[22].mxu1 %vm9251_vm0, %v20001_v39  ;;  %13291 = vmatprep.mubr.f32.mxu0 %v28269_v1  ;;  %v20390_v0 = vpack.c.bf16 %v13864_v37, %v13860_v36  ;;  %v26966_v39 = vpop.permute.xlu0 %22489  ;;  %v14089_v46 = vsel %vm28381_vm1, %v22482_v62, %v22476_v27  ;;  %v14085_v24 = vsel %vm28383_vm4, %v22472_v29, %v22466_v22  ;;  %v22487_v14 = vunpack.i.h.bf16 %v26968_v12  ;;  %vm28385_vm6 = vmmov %vm28381_vm1 }
 0x6aa   : > { %16737 = vperm.xlu0 %22041, %v16728_v42   ;;  %13374 = vmatprep.mubr.f32.mxu1 %v28269_v1  ;;  %v13865_v42 = vsel %vm28378_vm7, %v22461_v30, %v22462_v18  ;;  %v14083_v18 = vsel %vm28382_vm3, %v22467_v21, %v22471_v19  ;;  %v22491_v23 = vunpack.i.l.bf16 %v26966_v39  ;;  %v22486_v36 = vunpack.i.l.bf16 %v26968_v12  ;;  %vm28386_vm7 = vmmov %vm28381_vm1 }
 0x6ab   : > { %16732 = vperm.xlu1 %22042, %v16727_v20   ;;  %v20018_v20 = vld [vmem:[%s28187_s4 + $0x1e0] sm:$0xff]  ;;  %v20396_v49 = vpack.c.bf16 %v13865_v42, %v13861_v48  ;;  %v20398_v5 = vpack.c.bf16 %v14087_v25, %v14083_v18  ;;  %v14088_v51 = vsel %vm28385_vm6, %v22481_v13, %v22482_v62  ;;  %v14082_v28 = vsel %vm28386_vm7, %v22466_v22, %v22467_v21  ;;  %vm28387_vm11 = vmmov %vm28381_vm1  ;;  %v20029_v42 = vld [vmem:[%s28187_s4 + $0x208] sm:$0xff] }
 0x6ac   : > { %20005 = vmatmul.mubr.msk.f32.gmra.mrb[24].mxu0 %vm9251_vm0, %v20002_v43  ;;  %v22495_v34 = vpop.permute.xlu1 %22494  ;;  %v14084_v7 = vsel %vm28387_vm11, %v22471_v19, %v22472_v29  ;;  %v14306_v13 = vsel %vm8390_vm14, %v22487_v14, %v22491_v23  ;;  %v20028_v21 = vld [vmem:[%s28187_s4 + $0x200] sm:$0xff]  ;;  %vm28394_vm4 = vcmask 891904  }
 0x6ad   : > { %20008 = vmatmul.mubr.msk.f32.gmra.mrb[24].mxu1 %vm9251_vm0, %v20002_v43  ;;  %13502 = vmatprep.mubr.f32.mxu0 %v28269_v1  ;;  %v13859_v43 = vsel %vm28380_vm12, %v22446_v15, %v22447_v17  ;;  %v20402_v17 = vpack.c.bf16 %v14089_v46, %v14085_v24  ;;  %v20019_v15 = vld [vmem:[%s28187_s4 + $0x1e8] sm:$0xff]  ;;  %v26993_v59 = vpop.permute.xlu0 %22499  ;;  %v22496_v37 = vunpack.i.l.bf16 %v22495_v34  ;;  %v20404_v62 = vpack.c.bf16 %v14088_v51, %v14084_v7  ;;  %vm28396_vm6 = vmmov %vm28394_vm4 }
 0x6ae   : > { %13585 = vmatprep.mubr.f32.mxu1 %v28269_v1  ;;  %v20392_v30 = vpack.c.bf16 %v13863_v38, %v13859_v43  ;;  %v22501_v4 = vunpack.i.l.bf16 %v26993_v59  ;;  %vm28398_vm11 = vmmov %vm28394_vm4 }
 0x6af   : > { %16742 = vperm.xlu1 %22042, %v16729_v40   ;;  %v22497_v40 = vunpack.i.h.bf16 %v22495_v34 }
 0x6b0   : > { %20012 = vmatmul.mubr.msk.f32.vlgmr.msra.gmra.mrb[20].mxu0 %vm9251_vm0, %v20009_v35 }
 0x6b1   : > { %20015 = vmatmul.mubr.msk.f32.vlgmr.msra.gmra.mrb[20].mxu1 %vm9251_vm0, %v20009_v35  ;;  %20385 = vmatpush1.bf16.msra.mxu0 %v20384_v8  ;;  %v22502_v35 = vunpack.i.h.bf16 %v26993_v59  ;;  %v22492_v8 = vunpack.i.h.bf16 %v26966_v39  ;;  %v14309_v48 = vsel %vm8390_vm14, %v22496_v37, %v22497_v40 }
 0x6b2   : > { %20389 = vmatpush1.bf16.msra.mxu1 %v20388_v10  ;;  %20391 = vmatprep.subr.bf16.mxu0 %v20390_v0  ;;  %v27011_v10 = vpop.permute.xlu0 %22509  ;;  %v27013_v0 = vpop.permute.xlu1 %22504 }
 0x6b3   : > { %20395 = vmatprep.subr.bf16.mxu1 %v20394_v16  ;;  %13508 = vmatprep.mubr.f32.mxu0 %v28269_v1  ;;  %v20027_v16 = vld [vmem:[%s28187_s4 + $0x1f8] sm:$0xff]  ;;  %v14312_v6 = vsel %vm8390_vm14, %v22502_v35, %v22496_v37  ;;  %v14308_v38 = vsel %vm8390_vm14, %v22492_v8, %v22486_v36  ;;  %v22511_v43 = vunpack.i.l.bf16 %v27011_v10  ;;  %v22507_v46 = vunpack.i.h.bf16 %v27013_v0 }
 0x6b4   : > { %13591 = vmatprep.mubr.f32.mxu1 %v28269_v1  ;;  %20013 = vmatmul.mubr.msk.f32.gmra.mrb[22].mxu0 %vm9251_vm0, %v20010_v11  ;;  %v20410_v39 = vpack.c.bf16 %v14312_v6, %v14308_v38  ;;  %v22506_v18 = vunpack.i.l.bf16 %v27013_v0  ;;  %v14307_v59 = vsel %vm8390_vm14, %v22491_v23, %v22492_v8  ;;  %v20038_v8 = vld [vmem:[%s28187_s4 + $0x220] sm:$0xff] }
 0x6b5   : > { %20016 = vmatmul.mubr.msk.f32.gmra.mrb[22].mxu1 %vm9251_vm0, %v20010_v11  ;;  %13514 = vmatprep.mubr.f32.mxu0 %v28269_v1  ;;  %v14310_v11 = vsel %vm8390_vm14, %v22497_v40, %v22501_v4 }
 0x6b6   : > { %13597 = vmatprep.mubr.f32.mxu1 %v28269_v1  ;;  %v20406_v27 = vpack.c.bf16 %v14310_v11, %v14306_v13  ;;  %v27034_v22 = vpop.permute.xlu0 %22519  ;;  %v22515_v19 = vpop.permute.xlu1 %22514  ;;  %v14528_v38 = vsel %vm8742_vm15, %v22506_v18, %v22507_v46 }
 0x6b7   : > { %v22521_v29 = vunpack.i.l.bf16 %v27034_v22  ;;  %v22517_v12 = vunpack.i.h.bf16 %v22515_v19  ;;  %v22516_v25 = vunpack.i.l.bf16 %v22515_v19 }
 0x6b8   : > { %20014 = vmatmul.mubr.msk.f32.gmra.mrb[24].mxu0 %vm9251_vm0, %v20011_v63 }
 0x6b9   : > { %20017 = vmatmul.mubr.msk.f32.gmra.mrb[24].mxu1 %vm9251_vm0, %v20011_v63  ;;  %13725 = vmatprep.mubr.f32.mxu0 %v28269_v1  ;;  %v20400_v63 = vpack.c.bf16 %v14086_v2, %v14082_v28  ;;  %v14533_v24 = vsel %vm8742_vm15, %v22517_v12, %v22521_v29  ;;  %v20037_v2 = vld [vmem:[%s28187_s4 + $0x218] sm:$0xff]  ;;  %v14532_v7 = vsel %vm8742_vm15, %v22516_v25, %v22517_v12 }
 0x6ba   : > { %13808 = vmatprep.mubr.f32.mxu1 %v28269_v1  ;;  %v20416_v12 = vpack.c.bf16 %v14532_v7, %v14528_v38 }
 0x6bc   : > { %20021 = vmatmul.mubr.msk.f32.vlgmr.msra.gmra.mrb[20].mxu0 %vm9251_vm0, %v20018_v20 }
 0x6bd   : > { %20024 = vmatmul.mubr.msk.f32.vlgmr.msra.gmra.mrb[20].mxu1 %vm9251_vm0, %v20018_v20  ;;  %20393 = vmatpush1.bf16.msra.mxu0 %v20392_v30  ;;  %v22522_v20 = vunpack.i.h.bf16 %v27034_v22  ;;  %v22512_v30 = vunpack.i.h.bf16 %v27011_v10 }
 0x6be   : > { %20397 = vmatpush1.bf16.msra.mxu1 %v20396_v49  ;;  %20399 = vmatprep.subr.bf16.mxu0 %v20398_v5  ;;  %v14311_v49 = vsel %vm8390_vm14, %v22501_v4, %v22502_v35  ;;  %v20036_v5 = vld [vmem:[%s28187_s4 + $0x210] sm:$0xff]  ;;  %v14529_v4 = vsel %vm8742_vm15, %v22507_v46, %v22511_v43 }
 0x6bf   : > { %20403 = vmatprep.subr.bf16.mxu1 %v20402_v17  ;;  %13731 = vmatprep.mubr.f32.mxu0 %v28269_v1  ;;  %v14305_v17 = vsel %vm8390_vm14, %v22486_v36, %v22487_v14  ;;  %v20412_v40 = vpack.c.bf16 %v14311_v49, %v14307_v59  ;;  %v14531_v35 = vsel %vm8742_vm15, %v22512_v30, %v22506_v18  ;;  %v20046_v18 = vld [vmem:[%s28187_s4 + $0x230] sm:$0xff]  ;;  %vm28388_vm14 = vcmask 1039360  }
 0x6c0   : > { %13814 = vmatprep.mubr.f32.mxu1 %v28269_v1  ;;  %20022 = vmatmul.mubr.msk.f32.gmra.mrb[22].mxu0 %vm9251_vm0, %v20019_v15  ;;  %v20408_v34 = vpack.c.bf16 %v14309_v48, %v14305_v17  ;;  %vm28390_vm12 = vmmov %vm28388_vm14 }
 0x6c1   : > { %20025 = vmatmul.mubr.msk.f32.gmra.mrb[22].mxu1 %vm9251_vm0, %v20019_v15  ;;  %13737 = vmatprep.mubr.f32.mxu0 %v28269_v1  ;;  %v14535_v15 = vsel %vm8742_vm15, %v22522_v20, %v22516_v25  ;;  %vm28391_vm1 = vmmov %vm28390_vm12 }
 0x6c2   : > { %13820 = vmatprep.mubr.f32.mxu1 %v28269_v1  ;;  %v20418_v14 = vpack.c.bf16 %v14535_v15, %v14531_v35  ;;  %v20047_v15 = vld [vmem:[%s28187_s4 + $0x238] sm:$0xff]  ;;  %vm28392_vm2 = vmmov %vm28391_vm1 }
 0x6c3   : > { %vm28393_vm3 = vmmov %vm28391_vm1 }
 0x6c4   : > { %20023 = vmatmul.mubr.msk.f32.gmra.mrb[24].mxu0 %vm9251_vm0, %v20020_v45  ;;  %vm28395_vm5 = vmmov %vm28391_vm1 }
 0x6c5   : > { %20026 = vmatmul.mubr.msk.f32.gmra.mrb[24].mxu1 %vm9251_vm0, %v20020_v45  ;;  %13948 = vmatprep.mubr.f32.mxu0 %v28269_v1  ;;  %v20414_v45 = vpack.c.bf16 %v14533_v24, %v14529_v4  ;;  %vm28397_vm7 = vmmov %vm28391_vm1 }
 0x6c6   : > { %14031 = vmatprep.mubr.f32.mxu1 %v28269_v1 }
 0x6c8   : > { %20030 = vmatmul.mubr.msk.f32.vlgmr.msra.gmra.mrb[20].mxu0 %vm9251_vm0, %v20027_v16 }
 0x6c9   : > { %20033 = vmatmul.mubr.msk.f32.vlgmr.msra.gmra.mrb[20].mxu1 %vm9251_vm0, %v20027_v16  ;;  %20401 = vmatpush1.bf16.msra.mxu0 %v20400_v63 }
 0x6ca   : > { %20405 = vmatpush1.bf16.msra.mxu1 %v20404_v62  ;;  %20407 = vmatprep.subr.bf16.mxu0 %v20406_v27  ;;  %v14534_v62 = vsel %vm8742_vm15, %v22521_v29, %v22522_v20  ;;  %v20045_v27 = vld [vmem:[%s28187_s4 + $0x228] sm:$0xff]  ;;  %v14530_v29 = vsel %vm8742_vm15, %v22511_v43, %v22512_v30  ;;  %vm28389_vm15 = vmmov %vm28388_vm14 }
 0x6cb   : > { %20411 = vmatprep.subr.bf16.mxu1 %v20410_v39  ;;  %13954 = vmatprep.mubr.f32.mxu0 %v28269_v1  ;;  %v20420_v46 = vpack.c.bf16 %v14534_v62, %v14530_v29 }
 0x6cc   : > { %14037 = vmatprep.mubr.f32.mxu1 %v28269_v1  ;;  %20031 = vmatmul.mubr.msk.f32.gmra.mrb[22].mxu0 %vm9251_vm0, %v20028_v21 }
 0x6cd   : > { %20034 = vmatmul.mubr.msk.f32.gmra.mrb[22].mxu1 %vm9251_vm0, %v20028_v21  ;;  %13960 = vmatprep.mubr.f32.mxu0 %v28269_v1 }
 0x6ce   : > { %14043 = vmatprep.mubr.f32.mxu1 %v28269_v1 }
 0x6d0   : > { %20032 = vmatmul.mubr.msk.f32.gmra.mrb[24].mxu0 %vm9251_vm0, %v20029_v42 }
 0x6d1   : > { %20035 = vmatmul.mubr.msk.f32.gmra.mrb[24].mxu1 %vm9251_vm0, %v20029_v42  ;;  %14171 = vmatprep.mubr.f32.mxu0 %v28269_v1 }
 0x6d2   : > { %14254 = vmatprep.mubr.f32.mxu1 %v28269_v1 }
 0x6d4   : > { %20039 = vmatmul.mubr.msk.f32.vlgmr.msra.gmra.mrb[20].mxu0 %vm9251_vm0, %v20036_v5  ;;  %v27067_v37 = vpop.permute.xlu0 %22529 }
 0x6d5   : > { %20042 = vmatmul.mubr.msk.f32.vlgmr.msra.gmra.mrb[20].mxu1 %vm9251_vm0, %v20036_v5  ;;  %20409 = vmatpush1.bf16.msra.mxu0 %v20408_v34  ;;  %v27073_v23 = vpop.permute.xlu1 %22524  ;;  %v22531_v36 = vunpack.i.l.bf16 %v27067_v37  ;;  %v22532_v51 = vunpack.i.h.bf16 %v27067_v37 }
 0x6d6   : > { %20413 = vmatpush1.bf16.msra.mxu1 %v20412_v40  ;;  %20415 = vmatprep.subr.bf16.mxu0 %v20414_v45  ;;  %v22527_v10 = vunpack.i.h.bf16 %v27073_v23  ;;  %v22526_v16 = vunpack.i.l.bf16 %v27073_v23  ;;  %v20055_v23 = vld [vmem:[%s28187_s4 + $0x248] sm:$0xff] }
 0x6d7   : > { %20419 = vmatprep.subr.bf16.mxu1 %v20418_v14  ;;  %14177 = vmatprep.mubr.f32.mxu0 %v28269_v1 }
 0x6d8   : > { %14260 = vmatprep.mubr.f32.mxu1 %v28269_v1  ;;  %20040 = vmatmul.mubr.msk.f32.gmra.mrb[22].mxu0 %vm9251_vm0, %v20037_v2  ;;  %v14801_v21 = vsel %vm2771_vm9, %v22527_v10, %v22531_v36  ;;  %v14803_v25 = vsel %vm2771_vm9, %v22532_v51, %v22526_v16 }
 0x6d9   : > { %20043 = vmatmul.mubr.msk.f32.gmra.mrb[22].mxu1 %vm9251_vm0, %v20037_v2  ;;  %14183 = vmatprep.mubr.f32.mxu0 %v28269_v1 }
 0x6da   : > { %14266 = vmatprep.mubr.f32.mxu1 %v28269_v1  ;;  %v22540_v0 = vpop.permute.xlu0 %22539 }
 0x6db   : > { %v22542_v11 = vunpack.i.h.bf16 %v22540_v0  ;;  %v22541_v28 = vunpack.i.l.bf16 %v22540_v0  ;;  %v22535_v6 = vpop.permute.xlu1 %22534 }
 0x6dc   : > { %20041 = vmatmul.mubr.msk.f32.gmra.mrb[24].mxu0 %vm9251_vm0, %v20038_v8  ;;  %v22537_v63 = vunpack.i.h.bf16 %v22535_v6  ;;  %v22536_v13 = vunpack.i.l.bf16 %v22535_v6  ;;  %v20054_v6 = vld [vmem:[%s28187_s4 + $0x240] sm:$0xff] }
 0x6dd   : > { %20044 = vmatmul.mubr.msk.f32.gmra.mrb[24].mxu1 %vm9251_vm0, %v20038_v8  ;;  %14394 = vmatprep.mubr.f32.mxu0 %v28269_v1  ;;  %v14806_v8 = vsel %vm2771_vm9, %v22541_v28, %v22542_v11 }
 0x6de   : > { %14477 = vmatprep.mubr.f32.mxu1 %v28269_v1  ;;  %v27098_v39 = vpop.permute.xlu0 %22549  ;;  %v14805_v22 = vsel %vm2771_vm9, %v22537_v63, %v22541_v28  ;;  %v14807_v19 = vsel %vm2771_vm9, %v22542_v11, %v22536_v13  ;;  %v14804_v45 = vsel %vm2771_vm9, %v22536_v13, %v22537_v63  ;;  %v14800_v11 = vsel %vm2771_vm9, %v22526_v16, %v22527_v10 }
 0x6df   : > { %v27108_v42 = vpop.permute.xlu1 %22544  ;;  %v20422_v20 = vpack.c.bf16 %v14805_v22, %v14801_v21  ;;  %v20426_v48 = vpack.c.bf16 %v14807_v19, %v14803_v25  ;;  %v22551_v30 = vunpack.i.l.bf16 %v27098_v39  ;;  %v22552_v59 = vunpack.i.h.bf16 %v27098_v39 }
 0x6e0   : > { %20048 = vmatmul.mubr.msk.f32.vlgmr.msra.gmra.mrb[20].mxu0 %vm9251_vm0, %v20045_v27  ;;  %v22547_v49 = vunpack.i.h.bf16 %v27108_v42  ;;  %v22546_v34 = vunpack.i.l.bf16 %v27108_v42  ;;  %v14802_v13 = vsel %vm2771_vm9, %v22531_v36, %v22532_v51  ;;  %v20424_v62 = vpack.c.bf16 %v14804_v45, %v14800_v11  ;;  %v20056_v51 = vld [vmem:[%s28187_s4 + $0x250] sm:$0xff] }
 0x6e1   : > { %20051 = vmatmul.mubr.msk.f32.vlgmr.msra.gmra.mrb[20].mxu1 %vm9251_vm0, %v20045_v27  ;;  %20417 = vmatpush1.bf16.msra.mxu0 %v20416_v12  ;;  %v20428_v38 = vpack.c.bf16 %v14806_v8, %v14802_v13 }
 0x6e2   : > { %20421 = vmatpush1.bf16.msra.mxu1 %v20420_v46  ;;  %14400 = vmatprep.mubr.f32.mxu0 %v28269_v1  ;;  %v15008_v7 = vsel %vm2419_vm8, %v22547_v49, %v22551_v30  ;;  %v15010_v63 = vsel %vm2419_vm8, %v22552_v59, %v22546_v34 }
 0x6e3   : > { %14483 = vmatprep.mubr.f32.mxu1 %v28269_v1  ;;  %20423 = vmatprep.subr.bf16.mxu0 %v20422_v20 }
 0x6e4   : > { %20049 = vmatmul.mubr.msk.f32.gmra.mrb[22].mxu0 %vm9251_vm0, %v20046_v18  ;;  %20427 = vmatprep.subr.bf16.mxu1 %v20426_v48  ;;  %v27121_v43 = vpop.permute.xlu0 %22559 }
 0x6e5   : > { %20052 = vmatmul.mubr.msk.f32.gmra.mrb[22].mxu1 %vm9251_vm0, %v20046_v18  ;;  %14406 = vmatprep.mubr.f32.mxu0 %v28269_v1  ;;  %v22562_v5 = vunpack.i.h.bf16 %v27121_v43  ;;  %v22561_v24 = vunpack.i.l.bf16 %v27121_v43  ;;  %v22555_v17 = vpop.permute.xlu1 %22554  ;;  %v20063_v43 = vld [vmem:[%s28189_s6 + $0x18] sm:$0xff] }
 0x6e6   : > { %14489 = vmatprep.mubr.f32.mxu1 %v28269_v1  ;;  %v22557_v4 = vunpack.i.h.bf16 %v22555_v17  ;;  %v22556_v40 = vunpack.i.l.bf16 %v22555_v17 }
 0x6e7   : > { %v15013_v18 = vsel %vm2419_vm8, %v22561_v24, %v22562_v5 }
 0x6e8   : > { %20050 = vmatmul.mubr.msk.f32.gmra.mrb[24].mxu0 %vm9251_vm0, %v20047_v15  ;;  %v27137_v35 = vpop.permute.xlu0 %22569  ;;  %v15012_v14 = vsel %vm2419_vm8, %v22557_v4, %v22561_v24  ;;  %v15014_v2 = vsel %vm2419_vm8, %v22562_v5, %v22556_v40  ;;  %v15011_v12 = vsel %vm2419_vm8, %v22556_v40, %v22557_v4  ;;  %v15009_v5 = vsel %vm2419_vm8, %v22551_v30, %v22552_v59 }
 0x6e9   : > { %20053 = vmatmul.mubr.msk.f32.gmra.mrb[24].mxu1 %vm9251_vm0, %v20047_v15  ;;  %14617 = vmatprep.mubr.f32.mxu0 %v28269_v1  ;;  %v27144_v0 = vpop.permute.xlu1 %22564  ;;  %v20430_v28 = vpack.c.bf16 %v15012_v14, %v15008_v7  ;;  %v20434_v27 = vpack.c.bf16 %v15014_v2, %v15010_v63  ;;  %v22571_v19 = vunpack.i.l.bf16 %v27137_v35  ;;  %v22572_v20 = vunpack.i.h.bf16 %v27137_v35  ;;  %v20065_v2 = vld [vmem:[%s28189_s6 + $0x28] sm:$0xff] }
 0x6ea   : > { %14700 = vmatprep.mubr.f32.mxu1 %v28269_v1  ;;  %v22567_v29 = vunpack.i.h.bf16 %v27144_v0  ;;  %v22566_v25 = vunpack.i.l.bf16 %v27144_v0  ;;  %v15007_v15 = vsel %vm2419_vm8, %v22546_v34, %v22547_v49  ;;  %v20436_v45 = vpack.c.bf16 %v15013_v18, %v15009_v5  ;;  %v20064_v49 = vld [vmem:[%s28189_s6 + $0x20] sm:$0xff] }
 0x6eb   : > { %v20432_v24 = vpack.c.bf16 %v15011_v12, %v15007_v15 }
 0x6ec   : > { %20057 = vmatmul.mubr.msk.f32.vlgmr.msra.gmra.mrb[20].mxu0 %vm9251_vm0, %v20054_v6  ;;  %v27169_v10 = vpop.permute.xlu0 %22579  ;;  %v15219_v40 = vsel %vm3123_vm10, %v22567_v29, %v22571_v19  ;;  %v15221_v14 = vsel %vm3123_vm10, %v22572_v20, %v22566_v25 }
 0x6ed   : > { %20060 = vmatmul.mubr.msk.f32.vlgmr.msra.gmra.mrb[20].mxu1 %vm9251_vm0, %v20054_v6  ;;  %20425 = vmatpush1.bf16.msra.mxu0 %v20424_v62  ;;  %v22575_v16 = vpop.permute.xlu1 %22574  ;;  %v22581_v37 = vunpack.i.l.bf16 %v27169_v10  ;;  %v22582_v21 = vunpack.i.h.bf16 %v27169_v10  ;;  %v14769_v62 = vld [vmem:[%s28189_s6] sm:$0xff]  ;;  %v15220_v10 = vsel %vm3123_vm10, %v22571_v19, %v22572_v20  ;;  %v14771_v19 = vld [vmem:[%s28189_s6 + $0x10] sm:$0xff] }
 0x6ee   : > { %20429 = vmatpush1.bf16.msra.mxu1 %v20428_v38  ;;  %20431 = vmatprep.subr.bf16.mxu0 %v20430_v28  ;;  %v22577_v36 = vunpack.i.h.bf16 %v22575_v16  ;;  %v22576_v22 = vunpack.i.l.bf16 %v22575_v16  ;;  %v15218_v38 = vsel %vm3123_vm10, %v22566_v25, %v22567_v29  ;;  %v14770_v29 = vld [vmem:[%s28189_s6 + $0x8] sm:$0xff] }
 0x6ef   : > { %20435 = vmatprep.subr.bf16.mxu1 %v20434_v27  ;;  %14623 = vmatprep.mubr.f32.mxu0 %v28269_v1  ;;  %v15224_v13 = vsel %vm3123_vm10, %v22581_v37, %v22582_v21 }
 0x6f0   : > { %14706 = vmatprep.mubr.f32.mxu1 %v28269_v1  ;;  %20058 = vmatmul.mubr.msk.f32.gmra.mrb[22].mxu0 %vm9251_vm0, %v20055_v23  ;;  %v15223_v17 = vsel %vm3123_vm10, %v22577_v36, %v22581_v37  ;;  %v15225_v4 = vsel %vm3123_vm10, %v22582_v21, %v22576_v22  ;;  %v15222_v11 = vsel %vm3123_vm10, %v22576_v22, %v22577_v36 }
 0x6f1   : > { %20061 = vmatmul.mubr.msk.f32.gmra.mrb[22].mxu1 %vm9251_vm0, %v20055_v23  ;;  %14629 = vmatprep.mubr.f32.mxu0 %v28269_v1  ;;  %v27187_v46 = vpop.permute.xlu0 %22589  ;;  %v20438_v35 = vpack.c.bf16 %v15223_v17, %v15219_v40  ;;  %v20442_v42 = vpack.c.bf16 %v15225_v4, %v15221_v14  ;;  %v20440_v16 = vpack.c.bf16 %v15222_v11, %v15218_v38  ;;  %v20079_v4 = vld [vmem:[%s28189_s6 + $0x38] sm:$0xff] }
 0x6f2   : > { %14712 = vmatprep.mubr.f32.mxu1 %v28269_v1  ;;  %v27189_v48 = vpop.permute.xlu1 %22584  ;;  %v22591_v6 = vunpack.i.l.bf16 %v27187_v46  ;;  %v22592_v28 = vunpack.i.h.bf16 %v27187_v46  ;;  %v20444_v36 = vpack.c.bf16 %v15224_v13, %v15220_v10 }
 0x6f3   : > { %v22587_v7 = vunpack.i.h.bf16 %v27189_v48  ;;  %v22586_v63 = vunpack.i.l.bf16 %v27189_v48  ;;  %v20078_v48 = vld [vmem:[%s28189_s6 + $0x30] sm:$0xff] }
 0x6f4   : > { %20059 = vmatmul.mubr.msk.f32.gmra.mrb[24].mxu0 %vm9251_vm0, %v20056_v51 }
 0x6f5   : > { %20062 = vmatmul.mubr.msk.f32.gmra.mrb[24].mxu1 %vm9251_vm0, %v20056_v51  ;;  %14889 = vmatprep.mubr.f32.mxu0 %v28269_v1  ;;  %v22600_v39 = vpop.permute.xlu0 %22599  ;;  %v15442_v37 = vsel %vm4179_vm13, %v22587_v7, %v22591_v6  ;;  %v15444_v21 = vsel %vm4179_vm13, %v22592_v28, %v22586_v63  ;;  %v15441_v18 = vsel %vm4179_vm13, %v22586_v63, %v22587_v7 }
 0x6f6   : > { %14972 = vmatprep.mubr.f32.mxu1 %v28269_v1  ;;  %v22595_v34 = vpop.permute.xlu1 %22594  ;;  %v22601_v30 = vunpack.i.l.bf16 %v22600_v39  ;;  %v22602_v8 = vunpack.i.h.bf16 %v22600_v39 }
 0x6f7   : > { %v22597_v59 = vunpack.i.h.bf16 %v22595_v34  ;;  %v22596_v0 = vunpack.i.l.bf16 %v22595_v34 }
 0x6f8   : > { %20066 = vmatmul.mubr.msk.f32.vlgmr.msra.gmra.mrb[26].mxu0 %vm9251_vm0, %v20063_v43  ;;  %v15447_v46 = vsel %vm4179_vm13, %v22601_v30, %v22602_v8 }
 0x6f9   : > { %20069 = vmatmul.mubr.msk.f32.vlgmr.msra.gmra.mrb[26].mxu1 %vm9251_vm0, %v20063_v43  ;;  %20433 = vmatpush1.bf16.msra.mxu0 %v20432_v24  ;;  %v15446_v27 = vsel %vm4179_vm13, %v22597_v59, %v22601_v30  ;;  %v15448_v23 = vsel %vm4179_vm13, %v22602_v8, %v22596_v0  ;;  %v15445_v12 = vsel %vm4179_vm13, %v22596_v0, %v22597_v59  ;;  %v27257_v20 = vpop.permute.xlu0 %22609  ;;  %v20088_v0 = vld [vmem:[%s28189_s6 + $0x50] sm:$0xff] }
 0x6fa   : > { %20437 = vmatpush1.bf16.msra.mxu1 %v20436_v45  ;;  %20439 = vmatprep.subr.bf16.mxu0 %v20438_v35  ;;  %v20446_v51 = vpack.c.bf16 %v15446_v27, %v15442_v37  ;;  %v20450_v22 = vpack.c.bf16 %v15448_v23, %v15444_v21  ;;  %v27259_v25 = vpop.permute.xlu1 %22604  ;;  %v15443_v43 = vsel %vm4179_vm13, %v22591_v6, %v22592_v28  ;;  %v22611_v26 = vunpack.i.l.bf16 %v27257_v20  ;;  %v20096_v23 = vld [vmem:[%s28189_s6 + $0x60] sm:$0xff] }
 0x6fb   : > { %20443 = vmatprep.subr.bf16.mxu1 %v20442_v42  ;;  %14895 = vmatprep.mubr.f32.mxu0 %v28269_v1  ;;  %v20448_v17 = vpack.c.bf16 %v15445_v12, %v15441_v18  ;;  %v20452_v15 = vpack.c.bf16 %v15447_v46, %v15443_v43  ;;  %v22606_v35 = vunpack.i.l.bf16 %v27259_v25  ;;  %v20098_v43 = vld [vmem:[%s28189_s6 + $0x70] sm:$0xff] }
 0x6fc   : > { %14978 = vmatprep.mubr.f32.mxu1 %v28269_v1  ;;  %20067 = vmatmul.mubr.msk.f32.gmra.mrb[28].mxu0 %vm9251_vm0, %v20064_v49 }
 0x6fd   : > { %20070 = vmatmul.mubr.msk.f32.gmra.mrb[28].mxu1 %vm9251_vm0, %v20064_v49  ;;  %14901 = vmatprep.mubr.f32.mxu0 %v28269_v1  ;;  %v20087_v49 = vld [vmem:[%s28189_s6 + $0x48] sm:$0xff] }
 0x6fe   : > { %14984 = vmatprep.mubr.f32.mxu1 %v28269_v1  ;;  %v27276_v5 = vpop.permute.xlu0 %22619 }
 0x6ff   : > { %v22615_v24 = vpop.permute.xlu1 %22614  ;;  %v22621_v40 = vunpack.i.l.bf16 %v27276_v5  ;;  %v22622_v3 = vunpack.i.h.bf16 %v27276_v5 }
 0x700   : > { %20068 = vmatmul.mubr.msk.f32.gmra.mrb[30].mxu0 %vm9251_vm0, %v20065_v2  ;;  %v22617_v45 = vunpack.i.h.bf16 %v22615_v24  ;;  %v22616_v47 = vunpack.i.l.bf16 %v22615_v24 }
 0x701   : > { %20071 = vmatmul.mubr.msk.f32.gmra.mrb[30].mxu1 %vm9251_vm0, %v20065_v2  ;;  %15096 = vmatprep.mubr.f32.mxu0 %v28269_v1  ;;  %v15861_v38 = vsel %vm28393_vm3, %v22621_v40, %v22622_v3 }
 0x702   : > { %15179 = vmatprep.mubr.f32.mxu1 %v28269_v1  ;;  %v27299_v14 = vpop.permute.xlu0 %22629  ;;  %v15860_v39 = vsel %vm28388_vm14, %v22617_v45, %v22621_v40  ;;  %v15862_v34 = vsel %vm28389_vm15, %v22622_v3, %v22616_v47  ;;  %v15859_v28 = vsel %vm28392_vm2, %v22616_v47, %v22617_v45  ;;  %vm28399_vm14 = vmmov %vm28394_vm4 }
 0x703   : > { %v27301_v42 = vpop.permute.xlu1 %22624  ;;  %v22632_v63 = vunpack.i.h.bf16 %v27299_v14  ;;  %vm28400_vm15 = vmmov %vm28394_vm4 }
 0x704   : > { %20072 = vmatmul.mubr.msk.f32.vlgmr.msra.gmra.mrb[26].mxu0 %vm9251_vm0, %v14769_v62  ;;  %v22627_v11 = vunpack.i.h.bf16 %v27301_v42  ;;  %v22626_v13 = vunpack.i.l.bf16 %v27301_v42  ;;  %vm28403_vm2 = vmmov %vm28394_vm4 }
 0x705   : > { %20075 = vmatmul.mubr.msk.f32.vlgmr.msra.gmra.mrb[26].mxu1 %vm9251_vm0, %v14769_v62  ;;  %20441 = vmatpush1.bf16.msra.mxu0 %v20440_v16 }
 0x706   : > { %20445 = vmatpush1.bf16.msra.mxu1 %v20444_v36  ;;  %20447 = vmatprep.subr.bf16.mxu0 %v20446_v51  ;;  %v27322_v6 = vpop.permute.xlu0 %22639 }
 0x707   : > { %20451 = vmatprep.subr.bf16.mxu1 %v20450_v22  ;;  %15102 = vmatprep.mubr.f32.mxu0 %v28269_v1  ;;  %v22635_v7 = vpop.permute.xlu1 %22634  ;;  %v22641_v52 = vunpack.i.l.bf16 %v27322_v6  ;;  %v22642_v50 = vunpack.i.h.bf16 %v27322_v6 }
 0x708   : > { %15185 = vmatprep.mubr.f32.mxu1 %v28269_v1  ;;  %20073 = vmatmul.mubr.msk.f32.gmra.mrb[28].mxu0 %vm9251_vm0, %v14770_v29  ;;  %v22637_v41 = vunpack.i.h.bf16 %v22635_v7 }
 0x709   : > { %20076 = vmatmul.mubr.msk.f32.gmra.mrb[28].mxu1 %vm9251_vm0, %v14770_v29  ;;  %15108 = vmatprep.mubr.f32.mxu0 %v28269_v1 }
 0x70a   : > { %15191 = vmatprep.mubr.f32.mxu1 %v28269_v1  ;;  %v16083_v10 = vsel %vm28394_vm4, %v22637_v41, %v22641_v52 }
 0x70b   : > { %v27343_v62 = vpop.permute.xlu0 %22649 }
 0x70c   : > { %20074 = vmatmul.mubr.msk.f32.gmra.mrb[30].mxu0 %vm9251_vm0, %v14771_v19  ;;  %v27345_v27 = vpop.permute.xlu1 %22644  ;;  %v22652_v40 = vunpack.i.h.bf16 %v27343_v62 }
 0x70d   : > { %20077 = vmatmul.mubr.msk.f32.gmra.mrb[30].mxu1 %vm9251_vm0, %v14771_v19  ;;  %15307 = vmatprep.mubr.f32.mxu0 %v28269_v1  ;;  %v16081_v19 = vsel %vm28399_vm14, %v22632_v63, %v22626_v13  ;;  %v22647_v5 = vunpack.i.h.bf16 %v27345_v27  ;;  %v22646_v45 = vunpack.i.l.bf16 %v27345_v27  ;;  %vm28410_vm14 = vcmask 875520  }
 0x70e   : > { %15390 = vmatprep.mubr.f32.mxu1 %v28269_v1 }
 0x710   : > { %20081 = vmatmul.mubr.msk.f32.vlgmr.msra.gmra.mrb[26].mxu0 %vm9251_vm0, %v20078_v48  ;;  %v22655_v46 = vpop.permute.xlu1 %22654 }
 0x711   : > { %20084 = vmatmul.mubr.msk.f32.vlgmr.msra.gmra.mrb[26].mxu1 %vm9251_vm0, %v20078_v48  ;;  %20449 = vmatpush1.bf16.msra.mxu0 %v20448_v17  ;;  %v22657_v18 = vunpack.i.h.bf16 %v22655_v46 }
 0x712   : > { %20453 = vmatpush1.bf16.msra.mxu1 %v20452_v15  ;;  %20455 = vmatprep.subr.bf16.mxu0 %v20454_v54  ;;  %v22607_v54 = vunpack.i.h.bf16 %v27259_v25  ;;  %v27366_v25 = vpop.permute.xlu0 %22659  ;;  %v22656_v15 = vunpack.i.l.bf16 %v22655_v46 }
 0x713   : > { %20459 = vmatprep.subr.bf16.mxu1 %v20458_v44  ;;  %15313 = vmatprep.mubr.f32.mxu0 %v28269_v1  ;;  %v22612_v44 = vunpack.i.h.bf16 %v27257_v20  ;;  %v20097_v20 = vld [vmem:[%s28189_s6 + $0x68] sm:$0xff]  ;;  %v22661_v48 = vunpack.i.l.bf16 %v27366_v25  ;;  %v22662_v17 = vunpack.i.h.bf16 %v27366_v25 }
 0x714   : > { %15396 = vmatprep.mubr.f32.mxu1 %v28269_v1  ;;  %20082 = vmatmul.mubr.msk.f32.gmra.mrb[28].mxu0 %vm9251_vm0, %v20079_v4  ;;  %v15856_v30 = vsel %vm28390_vm12, %v22607_v54, %v22611_v26  ;;  %v15855_v16 = vsel %vm28395_vm5, %v22606_v35, %v22607_v54  ;;  %v27386_v3 = vpop.permute.xlu1 %22664  ;;  %vm28401_vm12 = vmmov %vm28394_vm4 }
 0x715   : > { %20085 = vmatmul.mubr.msk.f32.gmra.mrb[28].mxu1 %vm9251_vm0, %v20079_v4  ;;  %15319 = vmatprep.mubr.f32.mxu0 %v28269_v1  ;;  %v20462_v59 = vpack.c.bf16 %v15860_v39, %v15856_v30  ;;  %v15858_v2 = vsel %vm28391_vm1, %v22612_v44, %v22606_v35  ;;  %v15857_v36 = vsel %vm28397_vm7, %v22611_v26, %v22612_v44  ;;  %v22651_v4 = vunpack.i.l.bf16 %v27343_v62  ;;  %v20105_v26 = vld [vmem:[%s28189_s6 + $0x78] sm:$0xff]  ;;  %vm28405_vm4 = vmmov %vm28403_vm2 }
 0x716   : > { %15402 = vmatprep.mubr.f32.mxu1 %v28269_v1  ;;  %v20466_v8 = vpack.c.bf16 %v15862_v34, %v15858_v2  ;;  %v20464_v51 = vpack.c.bf16 %v15859_v28, %v15855_v16  ;;  %v20468_v22 = vpack.c.bf16 %v15861_v38, %v15857_v36  ;;  %v16084_v47 = vsel %vm28401_vm12, %v22641_v52, %v22642_v50  ;;  %v20106_v2 = vld [vmem:[%s28189_s6 + $0x80] sm:$0xff]  ;;  %v20107_v52 = vld [vmem:[%s28189_s6 + $0x88] sm:$0xff]  ;;  %vm28412_vm12 = vmmov %vm28410_vm14 }
 0x717   : > { %vm28402_vm1 = vcmask 883712   ;;  %v16078_v44 = vsel %vm28403_vm2, %v22626_v13, %v22627_v11  ;;  %v22666_v28 = vunpack.i.l.bf16 %v27386_v3  ;;  %v20114_v13 = vld [vmem:[%s28189_s6 + $0x90] sm:$0xff]  ;;  %vm28413_vm2 = vmmov %vm28412_vm12 }
 0x718   : > { %20083 = vmatmul.mubr.msk.f32.gmra.mrb[30].mxu0 %vm9251_vm0, %v20080_v55  ;;  %v16306_v54 = vsel %vm28402_vm1, %v22657_v18, %v22661_v48  ;;  %vm28404_vm3 = vmmov %vm28402_vm1 }
 0x719   : > { %20086 = vmatmul.mubr.msk.f32.gmra.mrb[30].mxu1 %vm9251_vm0, %v20080_v55  ;;  %15530 = vmatprep.mubr.f32.mxu0 %v28269_v1  ;;  %v27384_v55 = vpop.permute.xlu0 %22669  ;;  %v16308_v35 = vsel %vm28404_vm3, %v22662_v17, %v22656_v15  ;;  %vm28406_vm5 = vmmov %vm28402_vm1 }
 0x71a   : > { %15613 = vmatprep.mubr.f32.mxu1 %v28269_v1  ;;  %vm28408_vm7 = vmmov %vm28402_vm1 }
 0x71b   : > { %vm28414_vm3 = vmmov %vm28413_vm2 }
 0x71c   : > { %20090 = vmatmul.mubr.msk.f32.vlgmr.msra.gmra.mrb[26].mxu0 %vm9251_vm0, %v20087_v49 }
 0x71d   : > { %20093 = vmatmul.mubr.msk.f32.vlgmr.msra.gmra.mrb[26].mxu1 %vm9251_vm0, %v20087_v49  ;;  %20457 = vmatpush1.bf16.msra.mxu0 %v20456_v9  ;;  %v22636_v9 = vunpack.i.l.bf16 %v22635_v7  ;;  %v16302_v49 = vsel %vm28406_vm5, %v22647_v5, %v22651_v4  ;;  %vm28416_vm5 = vmmov %vm28413_vm2 }
 0x71e   : > { %20461 = vmatpush1.bf16.msra.mxu1 %v20460_v53  ;;  %20463 = vmatprep.subr.bf16.mxu0 %v20462_v59  ;;  %v22631_v53 = vunpack.i.l.bf16 %v27299_v14  ;;  %v20478_v34 = vpack.c.bf16 %v16306_v54, %v16302_v49 }
 0x71f   : > { %20467 = vmatprep.subr.bf16.mxu1 %v20466_v8  ;;  %15536 = vmatprep.mubr.f32.mxu0 %v28269_v1  ;;  %v16085_v37 = vsel %vm28396_vm6, %v22642_v50, %v22636_v9  ;;  %v16082_v24 = vsel %vm28400_vm15, %v22636_v9, %v22637_v41  ;;  %vm28407_vm6 = vmmov %vm28402_vm1  ;;  %v22680_v8 = vpop.permute.xlu0 %22679  ;;  %v22671_v50 = vunpack.i.l.bf16 %v27384_v55  ;;  %v22667_v9 = vunpack.i.h.bf16 %v27386_v3 }
 0x720   : > { %15619 = vmatprep.mubr.f32.mxu1 %v28269_v1  ;;  %20091 = vmatmul.mubr.msk.f32.gmra.mrb[28].mxu0 %vm9251_vm0, %v20088_v0  ;;  %v16079_v21 = vsel %vm28398_vm11, %v22627_v11, %v22631_v53  ;;  %v20474_v12 = vpack.c.bf16 %v16085_v37, %v16081_v19  ;;  %v16080_v14 = vsel %vm28405_vm4, %v22631_v53, %v22632_v63  ;;  %v22681_v6 = vunpack.i.l.bf16 %v22680_v8  ;;  %vm28409_vm11 = vmmov %vm28402_vm1 }
 0x721   : > { %20094 = vmatmul.mubr.msk.f32.gmra.mrb[28].mxu1 %vm9251_vm0, %v20088_v0  ;;  %15542 = vmatprep.mubr.f32.mxu0 %v28269_v1  ;;  %v20470_v29 = vpack.c.bf16 %v16083_v10, %v16079_v21  ;;  %v20472_v42 = vpack.c.bf16 %v16082_v24, %v16078_v44  ;;  %v20476_v39 = vpack.c.bf16 %v16084_v47, %v16080_v14  ;;  %v22675_v0 = vpop.permute.xlu1 %22674  ;;  %v22682_v41 = vunpack.i.h.bf16 %v22680_v8  ;;  %vm28411_vm15 = vmmov %vm28402_vm1 }
 0x722   : > { %15625 = vmatprep.mubr.f32.mxu1 %v28269_v1  ;;  %v16304_v30 = vsel %vm28407_vm6, %v22652_v40, %v22646_v45  ;;  %v22677_v7 = vunpack.i.h.bf16 %v22675_v0  ;;  %v16305_v53 = vsel %vm28408_vm7, %v22656_v15, %v22657_v18  ;;  %v22672_v11 = vunpack.i.h.bf16 %v27384_v55  ;;  %vm28415_vm4 = vmmov %vm28413_vm2  ;;  %v20132_v15 = vld [vmem:[%s28189_s6 + $0xc0] sm:$0xff] }
 0x723   : > { %v20482_v59 = vpack.c.bf16 %v16308_v35, %v16304_v30  ;;  %v16307_v63 = vsel %vm28409_vm11, %v22661_v48, %v22662_v17  ;;  %v16301_v27 = vsel %vm28411_vm15, %v22646_v45, %v22647_v5  ;;  %v16525_v16 = vsel %vm28413_vm2, %v22667_v9, %v22671_v50  ;;  %vm28417_vm6 = vmmov %vm28413_vm2  ;;  %v20125_v17 = vld [vmem:[%s28189_s6 + $0xb8] sm:$0xff]  ;;  %v20134_v5 = vld [vmem:[%s28189_s6 + $0xd0] sm:$0xff] }
 0x724   : > { %20092 = vmatmul.mubr.msk.f32.gmra.mrb[30].mxu0 %vm9251_vm0, %v20089_v58  ;;  %v16529_v62 = vsel %vm28410_vm14, %v22677_v7, %v22681_v6  ;;  %v20480_v10 = vpack.c.bf16 %v16305_v53, %v16301_v27  ;;  %v16524_v25 = vsel %vm28417_vm6, %v22666_v28, %v22667_v9  ;;  %vm28418_vm7 = vmmov %vm28413_vm2 }
 0x725   : > { %20095 = vmatmul.mubr.msk.f32.gmra.mrb[30].mxu1 %vm9251_vm0, %v20089_v58  ;;  %15721 = vmatprep.mubr.f32.mxu0 %v28269_v1  ;;  %v22676_v58 = vunpack.i.l.bf16 %v22675_v0  ;;  %v20486_v36 = vpack.c.bf16 %v16529_v62, %v16525_v16  ;;  %v16526_v46 = vsel %vm28418_vm7, %v22671_v50, %v22672_v11 }
 0x726   : > { %15804 = vmatprep.mubr.f32.mxu1 %v28269_v1 }
 0x727   : > { %v16531_v38 = vsel %vm28412_vm12, %v22682_v41, %v22676_v58  ;;  %v16528_v19 = vsel %vm28415_vm4, %v22676_v58, %v22677_v7 }
 0x728   : > { %20099 = vmatmul.mubr.msk.f32.vlgmr.msra.gmra.mrb[26].mxu0 %vm9251_vm0, %v20096_v23  ;;  %v20488_v48 = vpack.c.bf16 %v16528_v19, %v16524_v25 }
 0x729   : > { %20102 = vmatmul.mubr.msk.f32.vlgmr.msra.gmra.mrb[26].mxu1 %vm9251_vm0, %v20096_v23  ;;  %20465 = vmatpush1.bf16.msra.mxu0 %v20464_v51  ;;  %v16303_v23 = vsel %vm28402_vm1, %v22651_v4, %v22652_v40  ;;  %v16527_v51 = vsel %vm28414_vm3, %v22672_v11, %v22666_v28  ;;  %v20133_v4 = vld [vmem:[%s28189_s6 + $0xc8] sm:$0xff]  ;;  %vm28429_vm3 = vcmask 891904  }
 0x72a   : > { %20469 = vmatpush1.bf16.msra.mxu1 %v20468_v22  ;;  %20471 = vmatprep.subr.bf16.mxu0 %v20470_v29  ;;  %v20484_v37 = vpack.c.bf16 %v16307_v63, %v16303_v23  ;;  %v20490_v21 = vpack.c.bf16 %v16531_v38, %v16527_v51  ;;  %v20115_v22 = vld [vmem:[%s28189_s6 + $0x98] sm:$0xff]  ;;  %v20116_v29 = vld [vmem:[%s28189_s6 + $0xa0] sm:$0xff]  ;;  %v16733_v49 = vpop.permute.xlu1 %16732  ;;  %vm28430_vm4 = vmmov %vm28429_vm3 }
 0x72b   : > { %20475 = vmatprep.subr.bf16.mxu1 %v20474_v12  ;;  %15727 = vmatprep.mubr.f32.mxu0 %v28269_v1  ;;  %v16530_v12 = vsel %vm28416_vm5, %v22681_v6, %v22682_v41  ;;  %vm28431_vm5 = vmmov %vm28429_vm3 }
 0x72c   : > { %15810 = vmatprep.mubr.f32.mxu1 %v28269_v1  ;;  %20100 = vmatmul.mubr.msk.f32.gmra.mrb[28].mxu0 %vm9251_vm0, %v20097_v20  ;;  %v20492_v18 = vpack.c.bf16 %v16530_v12, %v16526_v46 }
 0x72d   : > { %20103 = vmatmul.mubr.msk.f32.gmra.mrb[28].mxu1 %vm9251_vm0, %v20097_v20  ;;  %15733 = vmatprep.mubr.f32.mxu0 %v28269_v1  ;;  %v20123_v20 = vld [vmem:[%s28189_s6 + $0xa8] sm:$0xff] }
 0x72e   : > { %15816 = vmatprep.mubr.f32.mxu1 %v28269_v1 }
 0x730   : > { %20101 = vmatmul.mubr.msk.f32.gmra.mrb[30].mxu0 %vm9251_vm0, %v20098_v43 }
 0x731   : > { %20104 = vmatmul.mubr.msk.f32.gmra.mrb[30].mxu1 %vm9251_vm0, %v20098_v43  ;;  %15944 = vmatprep.mubr.f32.mxu0 %v28269_v1  ;;  %v20124_v43 = vld [vmem:[%s28189_s6 + $0xb0] sm:$0xff] }
 0x732   : > { %16027 = vmatprep.mubr.f32.mxu1 %v28269_v1 }
 0x734   : > { %20108 = vmatmul.mubr.msk.f32.vlgmr.msra.gmra.mrb[26].mxu0 %vm9251_vm0, %v20105_v26 }
 0x735   : > { %20111 = vmatmul.mubr.msk.f32.vlgmr.msra.gmra.mrb[26].mxu1 %vm9251_vm0, %v20105_v26  ;;  %20473 = vmatpush1.bf16.msra.mxu0 %v20472_v42 }
 0x736   : > { %20477 = vmatpush1.bf16.msra.mxu1 %v20476_v39  ;;  %20479 = vmatprep.subr.bf16.mxu0 %v20478_v34 }
 0x737   : > { %20483 = vmatprep.subr.bf16.mxu1 %v20482_v59  ;;  %15950 = vmatprep.mubr.f32.mxu0 %v28269_v1 }
 0x738   : > { %16033 = vmatprep.mubr.f32.mxu1 %v28269_v1  ;;  %20109 = vmatmul.mubr.msk.f32.gmra.mrb[28].mxu0 %vm9251_vm0, %v20106_v2 }
 0x739   : > { %20112 = vmatmul.mubr.msk.f32.gmra.mrb[28].mxu1 %vm9251_vm0, %v20106_v2  ;;  %15956 = vmatprep.mubr.f32.mxu0 %v28269_v1 }
 0x73a   : > { %16039 = vmatprep.mubr.f32.mxu1 %v28269_v1 }
 0x73c   : > { %20110 = vmatmul.mubr.msk.f32.gmra.mrb[30].mxu0 %vm9251_vm0, %v20107_v52 }
 0x73d   : > { %20113 = vmatmul.mubr.msk.f32.gmra.mrb[30].mxu1 %vm9251_vm0, %v20107_v52  ;;  %16167 = vmatprep.mubr.f32.mxu0 %v28269_v1  ;;  %v16738_v52 = vpop.permute.xlu0 %16737 }
 0x73e   : > { %16250 = vmatprep.mubr.f32.mxu1 %v28269_v1 }
 0x740   : > { %20117 = vmatmul.mubr.msk.f32.vlgmr.msra.gmra.mrb[26].mxu0 %vm9251_vm0, %v20114_v13 }
 0x741   : > { %20120 = vmatmul.mubr.msk.f32.vlgmr.msra.gmra.mrb[26].mxu1 %vm9251_vm0, %v20114_v13  ;;  %20481 = vmatpush1.bf16.msra.mxu0 %v20480_v10 }
 0x742   : > { %20485 = vmatpush1.bf16.msra.mxu1 %v20484_v37  ;;  %20487 = vmatprep.subr.bf16.mxu0 %v20486_v36 }
 0x743   : > { %20491 = vmatprep.subr.bf16.mxu1 %v20490_v21  ;;  %16173 = vmatprep.mubr.f32.mxu0 %v28269_v1 }
 0x744   : > { %16256 = vmatprep.mubr.f32.mxu1 %v28269_v1  ;;  %20118 = vmatmul.mubr.msk.f32.gmra.mrb[28].mxu0 %vm9251_vm0, %v20115_v22 }
 0x745   : > { %20121 = vmatmul.mubr.msk.f32.gmra.mrb[28].mxu1 %vm9251_vm0, %v20115_v22  ;;  %16179 = vmatprep.mubr.f32.mxu0 %v28269_v1 }
 0x746   : > { %16262 = vmatprep.mubr.f32.mxu1 %v28269_v1 }
 0x748   : > { %20119 = vmatmul.mubr.msk.f32.gmra.mrb[30].mxu0 %vm9251_vm0, %v20116_v29 }
 0x749   : > { %20122 = vmatmul.mubr.msk.f32.gmra.mrb[30].mxu1 %vm9251_vm0, %v20116_v29  ;;  %16390 = vmatprep.mubr.f32.mxu0 %v28269_v1 }
 0x74a   : > { %16473 = vmatprep.mubr.f32.mxu1 %v28269_v1 }
 0x74c   : > { %20126 = vmatmul.mubr.msk.f32.vlgmr.msra.gmra.mrb[26].mxu0 %vm9251_vm0, %v20123_v20 }
 0x74d   : > { %20129 = vmatmul.mubr.msk.f32.vlgmr.msra.gmra.mrb[26].mxu1 %vm9251_vm0, %v20123_v20  ;;  %20489 = vmatpush1.bf16.msra.mxu0 %v20488_v48 }
 0x74e   : > { %20493 = vmatpush1.bf16.msra.mxu1 %v20492_v18  ;;  %16396 = vmatprep.mubr.f32.mxu0 %v28269_v1 }
 0x74f   : > { %16479 = vmatprep.mubr.f32.mxu1 %v28269_v1 }
 0x750   : > { %20127 = vmatmul.mubr.msk.f32.gmra.mrb[28].mxu0 %vm9251_vm0, %v20124_v43 }
 0x751   : > { %20130 = vmatmul.mubr.msk.f32.gmra.mrb[28].mxu1 %vm9251_vm0, %v20124_v43  ;;  %16402 = vmatprep.mubr.f32.mxu0 %v28269_v1 }
 0x752   : > { %16485 = vmatprep.mubr.f32.mxu1 %v28269_v1 }
 0x754   : > { %20128 = vmatmul.mubr.msk.f32.gmra.mrb[30].mxu0 %vm9251_vm0, %v20125_v17 }
 0x755   : > { %20131 = vmatmul.mubr.msk.f32.gmra.mrb[30].mxu1 %vm9251_vm0, %v20125_v17  ;;  %16613 = vmatprep.mubr.f32.mxu0 %v28269_v1 }
 0x756   : > { %16696 = vmatprep.mubr.f32.mxu1 %v28269_v1 }
 0x758   : > { %20135 = vmatmul.mubr.msk.f32.vlgmr.msra.gmra.mrb[26].mxu0 %vm9251_vm0, %v20132_v15 }
 0x759   : > { %20138 = vmatmul.mubr.msk.f32.vlgmr.msra.gmra.mrb[26].mxu1 %vm9251_vm0, %v20132_v15  ;;  %16619 = vmatprep.mubr.f32.mxu0 %v28269_v1 }
 0x75a   : > { %16702 = vmatprep.mubr.f32.mxu1 %v28269_v1 }
 0x75c   : > { %20136 = vmatmul.mubr.msk.f32.gmra.mrb[28].mxu0 %vm9251_vm0, %v20133_v4 }
 0x75d   : > { %20139 = vmatmul.mubr.msk.f32.gmra.mrb[28].mxu1 %vm9251_vm0, %v20133_v4  ;;  %16625 = vmatprep.mubr.f32.mxu0 %v28269_v1  ;;  %v16743_v4 = vpop.permute.xlu1 %16742 }
 0x75e   : > { %16708 = vmatprep.mubr.f32.mxu1 %v28269_v1 }
 0x760   : > { %20137 = vmatmul.mubr.msk.f32.gmra.mrb[30].mxu0 %vm9251_vm0, %v20134_v5 }
 0x761   : > { %20140 = vmatmul.mubr.msk.f32.gmra.mrb[30].mxu1 %vm9251_vm0, %v20134_v5  ;;  %16910 = vmatprep.mubr.f32.mxu0 %v28269_v1  ;;  %vm16836_vm0 = vcmask 195584  }
 0x762   : > { %16993 = vmatprep.mubr.f32.mxu1 %v28269_v1 }
 0x7bf   : > { %v27499_v24 = vpop.f32.mrb[20].mxu0 }
 0x7c0   : > { %v27501_v40 = vpop.f32.mrb[20].mxu1  ;;  %v27503_v45 = vpop.f32.mrb[21].mxu0 }
 0x7c1   : > { %v27505_v55 = vpop.f32.mrb[21].mxu1 }
 0x7c3   : > { %v27507_v3 = vpop.f32.mrb[22].mxu0 }
 0x7c4   : > { %v27509_v47 = vpop.f32.mrb[22].mxu1  ;;  %v27511_v26 = vpop.f32.mrb[23].mxu0 }
 0x7c5   : > { %v27513_v54 = vpop.f32.mrb[23].mxu1 }
 0x7c7   : > { %v27515_v44 = vpop.f32.mrb[24].mxu0 }
 0x7c8   : > { %v27517_v35 = vpop.f32.mrb[24].mxu1  ;;  %v27519_v14 = vpop.f32.mrb[25].mxu0 }
 0x7c9   : > { %v27521_v42 = vpop.f32.mrb[25].mxu1 }
 0x82b   : > { %v16615_v39 = vpop.f32.mrb[26].mxu0 }
 0x82c   : > { %v16745_v34 = vadd.f32 %v16733_v49, %v16615_v39  ;;  %v16698_v30 = vpop.f32.mrb[26].mxu1  ;;  %v16617_v59 = vpop.f32.mrb[27].mxu0 }
 0x82d   : > { %v16747_v2 = vadd.f32 %v16733_v49, %v16698_v30  ;;  %v16746_v8 = vadd.f32 %v16733_v49, %v16617_v59  ;;  %v16700_v0 = vpop.f32.mrb[27].mxu1 }
 0x82e   : > { %v27524_v6 = vmul.f32 %v16745_v34, %v25509_v56  ;;  %v16748_v7 = vadd.f32 %v16733_v49, %v16700_v0 }
 0x82f   : > { %v27527_v41 = vmul.f32 %v16747_v2, %v25511_v57  ;;  %v27530_v58 = vmul.f32 %v16746_v8, %v25513_v60  ;;  %v16621_v50 = vpop.f32.mrb[28].mxu0 }
 0x830   : > { %v27533_v9 = vmul.f32 %v16748_v7, %v25515_v61  ;;  %v16749_v53 = vadd.f32 %v16738_v52, %v16621_v50  ;;  %v16704_v11 = vpop.f32.mrb[28].mxu1  ;;  %v16623_v28 = vpop.f32.mrb[29].mxu0 }
 0x831   : > { %v16751_v63 = vadd.f32 %v16738_v52, %v16704_v11  ;;  %v16750_v13 = vadd.f32 %v16738_v52, %v16623_v28  ;;  %v16706_v62 = vpop.f32.mrb[29].mxu1  ;;  %v22688_v27 = vpack.i.bf16 %v27527_v41, %v27530_v58  ;;  %v27561_v20 = vpack.i.bf16 %v27530_v58, %v27524_v6  ;;  %v9076_v28 = vld [vmem:[%s28186_s3 + $0x8] sm:$0xff] }
 0x832   : > { %v27538_v38 = vmul.f32 %v16749_v53, %v25509_v56  ;;  %v16752_v23 = vadd.f32 %v16738_v52, %v16706_v62  ;;  %v22683_v10 = vpack.i.bf16 %v27524_v6, %v27533_v9  ;;  %v27565_v25 = vpack.i.bf16 %v27533_v9, %v27527_v41 }
 0x833   : > { %v27543_v16 = vmul.f32 %v16751_v63, %v25511_v57  ;;  %v27546_v37 = vmul.f32 %v16750_v13, %v25513_v60  ;;  %22689 = vrot.lane.b32.xlu1 %v22688_v27, %s22865_s30  ;;  %v16627_v36 = vpop.f32.mrb[30].mxu0  ;;  %v9075_v13 = vld [vmem:[%s28186_s3] sm:$0xff] }
 0x834   : > { %v27550_v51 = vmul.f32 %v16752_v23, %v25515_v61  ;;  %v16710_v21 = vpop.f32.mrb[30].mxu1  ;;  %22684 = vrot.lane.b32.xlu0 %v22683_v10, %s22865_s30  ;;  %v16629_v22 = vpop.f32.mrb[31].mxu0  ;;  %v20528_v15 = vpack.c.bf16 %v27538_v38, %v27524_v6  ;;  %v16753_v5 = vadd.f32 %v16743_v4, %v16627_v36 }
 0x835   : > { %v16712_v29 = vpop.f32.mrb[31].mxu1  ;;  %v22718_v19 = vpack.i.bf16 %v27543_v16, %v27546_v37  ;;  %v27573_v48 = vpack.i.bf16 %v27546_v37, %v27538_v38  ;;  %v20526_v43 = vpack.c.bf16 %v27546_v37, %v27530_v58  ;;  %v20532_v17 = vpack.c.bf16 %v27543_v16, %v27527_v41 }
 0x836   : > { %v22713_v12 = vpack.i.bf16 %v27538_v38, %v27550_v51  ;;  %v27569_v46 = vpack.i.bf16 %v27550_v51, %v27543_v16  ;;  %v20530_v18 = vpack.c.bf16 %v27550_v51, %v27533_v9  ;;  %v16756_v49 = vadd.f32 %v16743_v4, %v16712_v29  ;;  %v20166_v9 = vld [vmem:[%s28191_s8 + $0x50] sm:$0xff] }
 0x837   : > { %22699 = vrot.lane.b32.xlu1 %v22688_v27, %s22864_s25  ;;  %v16755_v39 = vadd.f32 %v16743_v4, %v16710_v21  ;;  %v27592_v34 = vmul.f32 %v16753_v5, %v25509_v56  ;;  %v16754_v30 = vadd.f32 %v16743_v4, %v16629_v22  ;;  %v9077_v4 = vld [vmem:[%s28186_s3 + $0x10] sm:$0xff] }
 0x838   : > { %22694 = vrot.lane.b32.xlu0 %v22683_v10, %s22864_s25  ;;  %v27595_v59 = vmul.f32 %v16756_v49, %v25515_v61 }
 0x839   : > { %v27602_v2 = vmul.f32 %v16755_v39, %v25511_v57  ;;  %v27605_v8 = vmul.f32 %v16754_v30, %v25513_v60 }
 0x83b   : > { %22709 = vrot.lane.b32.xlu1 %v22688_v27, %s22866_s15 }
 0x83c   : > { %22704 = vrot.lane.b32.xlu0 %v22683_v10, %s22866_s15 }
 0x83f   : > { %22719 = vrot.lane.b32.xlu1 %v22718_v19, %s22865_s30 }
 0x840   : > { %22714 = vrot.lane.b32.xlu0 %v22713_v12, %s22865_s30 }
 0x843   : > { %22729 = vrot.lane.b32.xlu1 %v22718_v19, %s22864_s25 }
 0x844   : > { %22724 = vrot.lane.b32.xlu0 %v22713_v12, %s22864_s25 }
 0x847   : > { %22739 = vrot.lane.b32.xlu1 %v22718_v19, %s22866_s15 }
 0x848   : > { %22734 = vrot.lane.b32.xlu0 %v22713_v12, %s22866_s15 }
 0x84b   : > { %16806 = vrot.lane.b32.xlu1 %v27592_v34, %s22865_s30 }
 0x84c   : > { %16804 = vrot.lane.b32.xlu0 %v27595_v59, %s22865_s30 }
 0x84f   : > { %16810 = vrot.lane.b32.xlu1 %v27602_v2, %s22865_s30 }
 0x850   : > { %16808 = vrot.lane.b32.xlu0 %v27605_v8, %s22865_s30 }
 0x853   : > { %17030 = vrot.lane.b32.xlu1 %v27592_v34, %s22864_s25 }
 0x854   : > { %22744 = vrot.lane.b32.xlu0 %v22683_v10, %s28263_s20 }
 0x857   : > { %17034 = vrot.lane.b32.xlu1 %v27602_v2, %s22864_s25 }
 0x858   : > { %17028 = vrot.lane.b32.xlu0 %v27595_v59, %s22864_s25 }
 0x85b   : > { %17257 = vrot.lane.b32.xlu1 %v27592_v34, %s22866_s15 }
 0x85c   : > { %17032 = vrot.lane.b32.xlu0 %v27605_v8, %s22864_s25 }
 0x85f   : > { %17261 = vrot.lane.b32.xlu1 %v27602_v2, %s22866_s15 }
 0x860   : > { %22754 = vrot.lane.b32.xlu0 %v22713_v12, %s28263_s20 }
 0x863   : > { %22749 = vrot.lane.b32.xlu1 %v22688_v27, %s28263_s20 }
 0x864   : > { %17255 = vrot.lane.b32.xlu0 %v27595_v59, %s22866_s15 }
 0x867   : > { %22759 = vrot.lane.b32.xlu1 %v22718_v19, %s28263_s20  ;;  %v9078_v19 = vld [vmem:[%s28186_s3 + $0x18] sm:$0xff] }
 0x868   : > { %17259 = vrot.lane.b32.xlu0 %v27605_v8, %s22866_s15 }
 0x86b   : > { %17496 = vrot.lane.b32.xlu1 %v27592_v34, %s28263_s20 }
 0x86c   : > { %22764 = vrot.lane.b32.xlu0 %v27561_v20, %s28264_s21 }
 0x86f   : > { %17500 = vrot.lane.b32.xlu1 %v27602_v2, %s28263_s20 }
 0x870   : > { %17494 = vrot.lane.b32.xlu0 %v27595_v59, %s28263_s20 }
 0x873   : > { %22769 = vrot.lane.b32.xlu1 %v27565_v25, %s28264_s21 }
 0x874   : > { %17498 = vrot.lane.b32.xlu0 %v27605_v8, %s28263_s20 }
 0x877   : > { %22779 = vrot.lane.b32.xlu1 %v27569_v46, %s28264_s21 }
 0x878   : > { %22774 = vrot.lane.b32.xlu0 %v27573_v48, %s28264_s21 }
 0x87b   : > { %22789 = vrot.lane.b32.xlu1 %v27565_v25, %s28267_s24 }
 0x87c   : > { %17924 = vrot.lane.b32.xlu0 %v27592_v34, %s28264_s21 }
 0x87f   : > { %22799 = vrot.lane.b32.xlu1 %v27569_v46, %s28267_s24 }
 0x880   : > { %17928 = vrot.lane.b32.xlu0 %v27602_v2, %s28264_s21 }
 0x883   : > { %22809 = vrot.lane.b32.xlu1 %v27565_v25, %s28268_s27 }
 0x884   : > { %22784 = vrot.lane.b32.xlu0 %v27561_v20, %s28267_s24 }
 0x887   : > { %17926 = vrot.lane.b32.xlu1 %v27605_v8, %s28264_s21 }
 0x888   : > { %22794 = vrot.lane.b32.xlu0 %v27573_v48, %s28267_s24 }
 0x88b   : > { %17930 = vrot.lane.b32.xlu1 %v27595_v59, %s28264_s21 }
 0x88c   : > { %18163 = vrot.lane.b32.xlu0 %v27592_v34, %s28267_s24 }
 0x88f   : > { %22819 = vrot.lane.b32.xlu1 %v27569_v46, %s28268_s27 }
 0x890   : > { %18167 = vrot.lane.b32.xlu0 %v27602_v2, %s28267_s24 }
 0x893   : > { %18165 = vrot.lane.b32.xlu1 %v27605_v8, %s28267_s24 }
 0x894   : > { %22804 = vrot.lane.b32.xlu0 %v27561_v20, %s28268_s27 }
 0x897   : > { %18169 = vrot.lane.b32.xlu1 %v27595_v59, %s28267_s24 }
 0x898   : > { %22814 = vrot.lane.b32.xlu0 %v27573_v48, %s28268_s27 }
 0x89b   : > { %22829 = vrot.lane.b32.xlu1 %v27565_v25, %s28270_s29 }
 0x89c   : > { %18402 = vrot.lane.b32.xlu0 %v27592_v34, %s28268_s27 }
 0x89f   : > { %18404 = vrot.lane.b32.xlu1 %v27605_v8, %s28268_s27 }
 0x8a0   : > { %18406 = vrot.lane.b32.xlu0 %v27602_v2, %s28268_s27 }
 0x8a3   : > { %18408 = vrot.lane.b32.xlu1 %v27595_v59, %s28268_s27  ;;  %s22006_s27 = smul.u32 384, %s28489_s14 }
 0x8a4   : > { %22824 = vrot.lane.b32.xlu0 %v27561_v20, %s28270_s29 }
 0x8a5   : > { %v22690_v56 = vpop.permute.xlu1 %22689  ;;  %s28094_s16 = scalar_lea.vmem %s28193_s10, %s22006_s27 }
 0x8a6   : > { %v22685_v57 = vpop.permute.xlu0 %22684  ;;  %v22692_v53 = vunpack.i.h.bf16 %v22690_v56  ;;  %v22691_v11 = vunpack.i.l.bf16 %v22690_v56 }
 0x8a7   : > { %22839 = vrot.lane.b32.xlu1 %v27569_v46, %s28270_s29  ;;  %v22687_v52 = vunpack.i.h.bf16 %v22685_v57  ;;  %v22686_v50 = vunpack.i.l.bf16 %v22685_v57 }
 0x8a8   : > { %22834 = vrot.lane.b32.xlu0 %v27573_v48, %s28270_s29  ;;  %v16814_v22 = vsel %vm2771_vm9, %v22691_v11, %v22692_v53 }
 0x8a9   : > { %v27695_v60 = vpop.permute.xlu1 %22699  ;;  %v16812_v21 = vsel %vm2771_vm9, %v22686_v50, %v22687_v52  ;;  %v16813_v25 = vsel %vm2771_vm9, %v22687_v52, %v22691_v11  ;;  %v16815_v56 = vsel %vm2771_vm9, %v22692_v53, %v22686_v50  ;;  %v9080_v52 = vld [vmem:[%s28186_s3 + $0x28] sm:$0xff] }
 0x8aa   : > { %v27697_v61 = vpop.permute.xlu0 %22694  ;;  %v14732_v50 = vld [vmem:[%s28188_s5 + $0x8] sm:$0xff]  ;;  %v22702_v53 = vunpack.i.h.bf16 %v27695_v60 }
 0x8ab   : > { %18643 = vrot.lane.b32.xlu1 %v27605_v8, %s28270_s29 }
 0x8ac   : > { %18641 = vrot.lane.b32.xlu0 %v27592_v34, %s28270_s29 }
 0x8ad   : > { %v27703_v0 = vpop.permute.xlu1 %22709 }
 0x8ae   : > { %v27705_v7 = vpop.permute.xlu0 %22704 }
 0x8af   : > { %18647 = vrot.lane.b32.xlu1 %v27595_v59, %s28270_s29 }
 0x8b0   : > { %18645 = vrot.lane.b32.xlu0 %v27602_v2, %s28270_s29 }
 0x8b1   : > { %v22720_v63 = vpop.permute.xlu1 %22719 }
 0x8b2   : > { %v22715_v62 = vpop.permute.xlu0 %22714  ;;  %v22722_v27 = vunpack.i.h.bf16 %v22720_v63  ;;  %v22721_v23 = vunpack.i.l.bf16 %v22720_v63 }
 0x8b3   : > { %v22717_v10 = vunpack.i.h.bf16 %v22715_v62  ;;  %v22716_v36 = vunpack.i.l.bf16 %v22715_v62  ;;  %9092 = vperm.xlu1 %22042, %v9076_v28   ;;  %v9079_v28 = vld [vmem:[%s28186_s3 + $0x20] sm:$0xff] }
 0x8b4   : > { %v16818_v29 = vsel %vm2771_vm9, %v22721_v23, %v22722_v27  ;;  %9087 = vperm.xlu0 %22041, %v9075_v13   ;;  %v22701_v13 = vunpack.i.l.bf16 %v27695_v60  ;;  %v18860_v60 = vld [vmem:[%s28192_s9] sm:$0xff] }
 0x8b5   : > { %v16816_v12 = vsel %vm2771_vm9, %v22716_v36, %v22717_v10  ;;  %v22730_v20 = vpop.permute.xlu1 %22729  ;;  %v16817_v46 = vsel %vm2771_vm9, %v22717_v10, %v22721_v23  ;;  %v16819_v48 = vsel %vm2771_vm9, %v22722_v27, %v22716_v36  ;;  %v20500_v49 = vpack.c.bf16 %v16818_v29, %v16814_v22  ;;  %v14731_v27 = vld [vmem:[%s28188_s5] sm:$0xff] }
 0x8b6   : > { %v20496_v5 = vpack.c.bf16 %v16816_v12, %v16812_v21  ;;  %v22725_v39 = vpop.permute.xlu0 %22724  ;;  %v20494_v30 = vpack.c.bf16 %v16817_v46, %v16813_v25  ;;  %v20498_v57 = vpack.c.bf16 %v16819_v48, %v16815_v56  ;;  %v22732_v36 = vunpack.i.h.bf16 %v22730_v20  ;;  %v14733_v46 = vld [vmem:[%s28188_s5 + $0x10] sm:$0xff]  ;;  %v20141_v56 = vld [vmem:[%s28191_s8 + $0x18] sm:$0xff] }
 0x8b7   : > { %9102 = vperm.xlu1 %22042, %v9078_v19   ;;  %v22727_v23 = vunpack.i.h.bf16 %v22725_v39  ;;  %v22726_v10 = vunpack.i.l.bf16 %v22725_v39  ;;  %v22731_v21 = vunpack.i.l.bf16 %v22730_v20  ;;  %v22697_v29 = vunpack.i.h.bf16 %v27697_v61 }
 0x8b8   : > { %20495 = vmatprep.subr.bf16.mxu0 %v20494_v30  ;;  %9097 = vperm.xlu0 %22041, %v9077_v4   ;;  %v22696_v19 = vunpack.i.l.bf16 %v27697_v61  ;;  %v17038_v12 = vsel %vm2419_vm8, %v22701_v13, %v22702_v53 }
 0x8b9   : > { %20499 = vmatprep.subr.bf16.mxu1 %v20498_v57  ;;  %20497 = vmatpush1.bf16.msra.mxu0 %v20496_v5  ;;  %v27734_v11 = vpop.permute.xlu1 %22739  ;;  %v17042_v20 = vsel %vm2419_vm8, %v22731_v21, %v22732_v36  ;;  %v17041_v5 = vsel %vm2419_vm8, %v22727_v23, %v22731_v21  ;;  %v17043_v61 = vsel %vm2419_vm8, %v22732_v36, %v22726_v10 }
 0x8ba   : > { %20501 = vmatpush1.bf16.msra.mxu1 %v20500_v49  ;;  %v27739_v63 = vpop.permute.xlu0 %22734  ;;  %v17040_v49 = vsel %vm2419_vm8, %v22726_v10, %v22727_v23  ;;  %v20508_v21 = vpack.c.bf16 %v17042_v20, %v17038_v12  ;;  %v22706_v12 = vunpack.i.l.bf16 %v27705_v7 }
 0x8bb   : > { %9112 = vperm.xlu1 %22042, %v9080_v52   ;;  %v17037_v52 = vsel %vm2419_vm8, %v22697_v29, %v22701_v13  ;;  %v18862_v13 = vld [vmem:[%s28192_s9 + $0x10] sm:$0xff] }
 0x8bc   : > { %9107 = vperm.xlu0 %22041, %v9079_v28   ;;  %v17039_v28 = vsel %vm2419_vm8, %v22702_v53, %v22696_v19  ;;  %v20502_v23 = vpack.c.bf16 %v17041_v5, %v17037_v52  ;;  %v18861_v53 = vld [vmem:[%s28192_s9 + $0x8] sm:$0xff]  ;;  %v22707_v5 = vunpack.i.h.bf16 %v27705_v7 }
 0x8bd   : > { %v16807_v62 = vpop.permute.xlu1 %16806  ;;  %v20506_v10 = vpack.c.bf16 %v17043_v61, %v17039_v28  ;;  %v22711_v61 = vunpack.i.l.bf16 %v27703_v0 }
 0x8be   : > { %v16805_v22 = vpop.permute.xlu0 %16804 }
 0x8bf   : > { %14741 = vperm.xlu1 %22042, %v14732_v50   ;;  %v16820_v57 = vsel %vm2771_vm9, %v16805_v22, %v16807_v62  ;;  %v17036_v50 = vsel %vm2419_vm8, %v22696_v19, %v22697_v29  ;;  %v22736_v29 = vunpack.i.l.bf16 %v27739_v63  ;;  %v22742_v19 = vunpack.i.h.bf16 %v27734_v11 }
 0x8c0   : > { %14736 = vperm.xlu0 %22041, %v14731_v27   ;;  %v20504_v36 = vpack.c.bf16 %v17040_v49, %v17036_v50 }
 0x8c1   : > { %v16811_v25 = vpop.permute.xlu1 %16810  ;;  %v17270_v49 = vsel %vm3123_vm10, %v22742_v19, %v22736_v29 }
 0x8c2   : > { %v16809_v48 = vpop.permute.xlu0 %16808  ;;  %v16823_v4 = vsel %vm2771_vm9, %v16811_v25, %v16805_v22  ;;  %v20142_v22 = vld [vmem:[%s28191_s8 + $0x20] sm:$0xff] }
 0x8c3   : > { %v16822_v39 = vsel %vm2771_vm9, %v16809_v48, %v16811_v25  ;;  %16933 = vmatprep.subr.mxu1 %v16823_v4  ;;  %18865 = vperm.xlu1 %22042, %v18860_v60   ;;  %v16821_v30 = vsel %vm2771_vm9, %v16807_v62, %v16809_v48  ;;  %v22712_v25 = vunpack.i.h.bf16 %v27703_v0  ;;  %v22737_v48 = vunpack.i.h.bf16 %v27739_v63 }
 0x8c4   : > { %14746 = vperm.xlu0 %22041, %v14733_v46   ;;  %16850 = vmatprep.subr.mxu0 %v16821_v30  ;;  %v22741_v46 = vunpack.i.l.bf16 %v27734_v11  ;;  %v20143_v11 = vld [vmem:[%s28191_s8 + $0x28] sm:$0xff] }
 0x8c5   : > { %16851 = vmatpush1.msra.mxu0 %v16820_v57  ;;  %16934 = vmatpush1.msra.mxu1 %v16822_v39  ;;  %v17031_v27 = vpop.permute.xlu1 %17030  ;;  %v17267_v52 = vsel %vm3123_vm10, %v22736_v29, %v22737_v48 }
 0x8c6   : > { %20144 = vmatmul.mubr.msk.f32.vlgmr.msra.gmra.mrb[32].mxu0 %vm16836_vm0, %v20141_v56  ;;  %20147 = vmatmul.mubr.msk.f32.vlgmr.msra.gmra.mrb[32].mxu1 %vm16836_vm0, %v20141_v56  ;;  %v27774_v62 = vpop.permute.xlu0 %22744  ;;  %v17269_v39 = vsel %vm3123_vm10, %v22741_v46, %v22742_v19  ;;  %v17266_v56 = vsel %vm3123_vm10, %v22712_v25, %v22706_v12  ;;  %v17268_v0 = vsel %vm3123_vm10, %v22737_v48, %v22741_v46  ;;  %v16770_v19 = vld [vmem:[%s28191_s8 + $0x8] sm:$0xff] }
 0x8c7   : > { %20503 = vmatprep.subr.bf16.mxu0 %v20502_v23  ;;  %20507 = vmatprep.subr.bf16.mxu1 %v20506_v10  ;;  %v20514_v50 = vpack.c.bf16 %v17270_v49, %v17266_v56  ;;  %v16769_v23 = vld [vmem:[%s28191_s8] sm:$0xff]  ;;  %v17265_v10 = vsel %vm3123_vm10, %v22711_v61, %v22712_v25 }
 0x8c8   : > { %20505 = vmatpush1.bf16.msra.mxu0 %v20504_v36  ;;  %20509 = vmatpush1.bf16.msra.mxu1 %v20508_v21  ;;  %v17264_v21 = vsel %vm3123_vm10, %v22707_v5, %v22711_v61  ;;  %v22746_v61 = vunpack.i.l.bf16 %v27774_v62 }
 0x8c9   : > { %18875 = vperm.xlu1 %22042, %v18862_v13   ;;  %18870 = vperm.xlu0 %22041, %v18861_v53   ;;  %v17035_v60 = vpop.permute.xlu1 %17034  ;;  %v17263_v13 = vsel %vm3123_vm10, %v22706_v12, %v22707_v5  ;;  %v20516_v53 = vpack.c.bf16 %v17269_v39, %v17265_v10  ;;  %v16771_v5 = vld [vmem:[%s28191_s8 + $0x10] sm:$0xff] }
 0x8ca   : > { %16916 = vmatprep.mubr.f32.mxu0 %v28269_v1  ;;  %16999 = vmatprep.mubr.f32.mxu1 %v28269_v1  ;;  %v17029_v20 = vpop.permute.xlu0 %17028  ;;  %v20512_v29 = vpack.c.bf16 %v17267_v52, %v17263_v13 }
 0x8cb   : > { %20145 = vmatmul.mubr.msk.f32.gmra.mrb[34].mxu0 %vm16836_vm0, %v20142_v22  ;;  %20148 = vmatmul.mubr.msk.f32.gmra.mrb[34].mxu1 %vm16836_vm0, %v20142_v22  ;;  %v17047_v4 = vsel %vm2419_vm8, %v17035_v60, %v17029_v20  ;;  %v17044_v28 = vsel %vm2419_vm8, %v17029_v20, %v17031_v27 }
 0x8cc   : > { %17156 = vmatprep.subr.mxu1 %v17047_v4  ;;  %16922 = vmatprep.mubr.f32.mxu0 %v28269_v1 }
 0x8cd   : > { %17005 = vmatprep.mubr.f32.mxu1 %v28269_v1  ;;  %v17258_v63 = vpop.permute.xlu1 %17257 }
 0x8ce   : > { %v17033_v30 = vpop.permute.xlu0 %17032 }
 0x8cf   : > { %20146 = vmatmul.mubr.msk.f32.gmra.mrb[36].mxu0 %vm16836_vm0, %v20143_v11  ;;  %20149 = vmatmul.mubr.msk.f32.gmra.mrb[36].mxu1 %vm16836_vm0, %v20143_v11  ;;  %v17046_v57 = vsel %vm2419_vm8, %v17033_v30, %v17035_v60  ;;  %v17045_v7 = vsel %vm2419_vm8, %v17031_v27, %v17033_v30  ;;  %v20510_v27 = vpack.c.bf16 %v17268_v0, %v17264_v21  ;;  %v22747_v11 = vunpack.i.h.bf16 %v27774_v62 }
 0x8d0   : > { %17073 = vmatprep.subr.mxu0 %v17045_v7  ;;  %17157 = vmatpush1.msra.mxu1 %v17046_v57  ;;  %vm28419_vm8 = vcmask 1039360  }
 0x8d1   : > { %17074 = vmatpush1.msra.mxu0 %v17044_v28  ;;  %17133 = vmatprep.mubr.f32.mxu0 %v28269_v1  ;;  %v17262_v36 = vpop.permute.xlu1 %17261  ;;  %vm28420_vm9 = vmmov %vm28419_vm8 }
 0x8d2   : > { %17216 = vmatprep.mubr.f32.mxu1 %v28269_v1  ;;  %20515 = vmatprep.subr.bf16.mxu1 %v20514_v50  ;;  %v22755_v22 = vpop.permute.xlu0 %22754  ;;  %vm28423_vm11 = vmmov %vm28419_vm8 }
 0x8d3   : > { %20150 = vmatmul.mubr.msk.f32.vlgmr.msra.gmra.mrb[32].mxu0 %vm16836_vm0, %v16769_v23  ;;  %20153 = vmatmul.mubr.msk.f32.vlgmr.msra.gmra.mrb[32].mxu1 %vm16836_vm0, %v16769_v23  ;;  %v22757_v60 = vunpack.i.h.bf16 %v22755_v22  ;;  %v22756_v25 = vunpack.i.l.bf16 %v22755_v22  ;;  %v20156_v23 = vld [vmem:[%s28191_s8 + $0x30] sm:$0xff]  ;;  %vm28424_vm14 = vmmov %vm28419_vm8 }
 0x8d4   : > { %20511 = vmatprep.subr.bf16.mxu0 %v20510_v27  ;;  %20517 = vmatpush1.bf16.msra.mxu1 %v20516_v53  ;;  %vm28425_vm15 = vmmov %vm28419_vm8 }
 0x8d5   : > { %20513 = vmatpush1.bf16.msra.mxu0 %v20512_v29  ;;  %17139 = vmatprep.mubr.f32.mxu0 %v28269_v1  ;;  %v22750_v12 = vpop.permute.xlu1 %22749  ;;  %v17506_v49 = vsel %vm4179_vm13, %v22756_v25, %v22757_v60  ;;  %v17502_v29 = vsel %vm4179_vm13, %v22746_v61, %v22747_v11  ;;  %vm28426_vm12 = vmmov %vm28419_vm8 }
 0x8d6   : > { %17222 = vmatprep.mubr.f32.mxu1 %v28269_v1  ;;  %v22751_v46 = vunpack.i.l.bf16 %v22750_v12  ;;  %v17256_v20 = vpop.permute.xlu0 %17255  ;;  %v22752_v48 = vunpack.i.h.bf16 %v22750_v12  ;;  %vm28427_vm1 = vmmov %vm28419_vm8 }
 0x8d7   : > { %20151 = vmatmul.mubr.msk.f32.gmra.mrb[34].mxu0 %vm16836_vm0, %v16770_v19  ;;  %20154 = vmatmul.mubr.msk.f32.gmra.mrb[34].mxu1 %vm16836_vm0, %v16770_v19  ;;  %v17274_v4 = vsel %vm3123_vm10, %v17262_v36, %v17256_v20  ;;  %v17271_v30 = vsel %vm3123_vm10, %v17256_v20, %v17258_v63  ;;  %v20520_v19 = vpack.c.bf16 %v17506_v49, %v17502_v29  ;;  %v20158_v20 = vld [vmem:[%s28191_s8 + $0x40] sm:$0xff]  ;;  %v20165_v49 = vld [vmem:[%s28191_s8 + $0x48] sm:$0xff]  ;;  %vm28428_vm2 = vmmov %vm28427_vm1 }
 0x8d8   : > { %17383 = vmatprep.subr.mxu1 %v17274_v4  ;;  %17145 = vmatprep.mubr.f32.mxu0 %v28269_v1  ;;  %v17503_v0 = vsel %vm4179_vm13, %v22747_v11, %v22751_v46  ;;  %v17505_v28 = vsel %vm4179_vm13, %v22752_v48, %v22746_v61  ;;  %v17504_v13 = vsel %vm4179_vm13, %v22751_v46, %v22752_v48  ;;  %vm28432_vm6 = vmmov %vm28427_vm1 }
 0x8d9   : > { %17228 = vmatprep.mubr.f32.mxu1 %v28269_v1  ;;  %v22760_v39 = vpop.permute.xlu1 %22759  ;;  %vm28433_vm7 = vmmov %vm28427_vm1 }
 0x8da   : > { %v22762_v56 = vunpack.i.h.bf16 %v22760_v39  ;;  %v22761_v57 = vunpack.i.l.bf16 %v22760_v39  ;;  %v17260_v7 = vpop.permute.xlu0 %17259 }
 0x8db   : > { %20152 = vmatmul.mubr.msk.f32.gmra.mrb[36].mxu0 %vm16836_vm0, %v16771_v5  ;;  %20155 = vmatmul.mubr.msk.f32.gmra.mrb[36].mxu1 %vm16836_vm0, %v16771_v5  ;;  %v17273_v52 = vsel %vm3123_vm10, %v17260_v7, %v17262_v36  ;;  %v17272_v62 = vsel %vm3123_vm10, %v17258_v63, %v17260_v7  ;;  %vm28421_vm10 = vmmov %vm28419_vm8 }
 0x8dc   : > { %v17508_v50 = vsel %vm4179_vm13, %v22761_v57, %v22762_v56  ;;  %17300 = vmatprep.subr.mxu0 %v17272_v62  ;;  %17384 = vmatpush1.msra.mxu1 %v17273_v52  ;;  %v17507_v10 = vsel %vm4179_vm13, %v22757_v60, %v22761_v57  ;;  %v17509_v21 = vsel %vm4179_vm13, %v22762_v56, %v22756_v25  ;;  %v20157_v60 = vld [vmem:[%s28191_s8 + $0x38] sm:$0xff] }
 0x8dd   : > { %17301 = vmatpush1.msra.mxu0 %v17271_v30  ;;  %17360 = vmatprep.mubr.f32.mxu0 %v28269_v1  ;;  %v17497_v63 = vpop.permute.xlu1 %17496  ;;  %v20518_v36 = vpack.c.bf16 %v17507_v10, %v17503_v0  ;;  %v20522_v53 = vpack.c.bf16 %v17509_v21, %v17505_v28  ;;  %v20524_v27 = vpack.c.bf16 %v17508_v50, %v17504_v13 }
 0x8de   : > { %17443 = vmatprep.mubr.f32.mxu1 %v28269_v1  ;;  %v27855_v22 = vpop.permute.xlu0 %22764 }
 0x8df   : > { %20159 = vmatmul.mubr.msk.f32.vlgmr.msra.gmra.mrb[32].mxu0 %vm16836_vm0, %v20156_v23  ;;  %20162 = vmatmul.mubr.msk.f32.vlgmr.msra.gmra.mrb[32].mxu1 %vm16836_vm0, %v20156_v23  ;;  %v22767_v56 = vunpack.i.h.bf16 %v27855_v22  ;;  %v22766_v51 = vunpack.i.l.bf16 %v27855_v22 }
 0x8e0   : > { %20519 = vmatprep.subr.bf16.mxu0 %v20518_v36  ;;  %20523 = vmatprep.subr.bf16.mxu1 %v20522_v53  ;;  %v20175_v36 = vld [vmem:[%s28191_s8 + $0x68] sm:$0xff] }
 0x8e1   : > { %17366 = vmatprep.mubr.f32.mxu0 %v28269_v1  ;;  %17449 = vmatprep.mubr.f32.mxu1 %v28269_v1  ;;  %v17501_v25 = vpop.permute.xlu1 %17500 }
 0x8e2   : > { %20521 = vmatpush1.bf16.msra.mxu0 %v20520_v19  ;;  %20525 = vmatpush1.bf16.msra.mxu1 %v20524_v27  ;;  %v17495_v12 = vpop.permute.xlu0 %17494 }
 0x8e3   : > { %20160 = vmatmul.mubr.msk.f32.gmra.mrb[34].mxu0 %vm16836_vm0, %v20157_v60  ;;  %20163 = vmatmul.mubr.msk.f32.gmra.mrb[34].mxu1 %vm16836_vm0, %v20157_v60  ;;  %v17513_v46 = vsel %vm4179_vm13, %v17501_v25, %v17495_v12  ;;  %v17510_v61 = vsel %vm4179_vm13, %v17495_v12, %v17497_v63 }
 0x8e4   : > { %17622 = vmatprep.subr.mxu1 %v17513_v46  ;;  %17372 = vmatprep.mubr.f32.mxu0 %v28269_v1 }
 0x8e5   : > { %17455 = vmatprep.mubr.f32.mxu1 %v28269_v1  ;;  %v27873_v48 = vpop.permute.xlu1 %22769 }
 0x8e6   : > { %v17499_v4 = vpop.permute.xlu0 %17498  ;;  %v22771_v39 = vunpack.i.l.bf16 %v27873_v48  ;;  %v22772_v0 = vunpack.i.h.bf16 %v27873_v48 }
 0x8e7   : > { %20161 = vmatmul.mubr.msk.f32.gmra.mrb[36].mxu0 %vm16836_vm0, %v20158_v20  ;;  %20164 = vmatmul.mubr.msk.f32.gmra.mrb[36].mxu1 %vm16836_vm0, %v20158_v20  ;;  %v17512_v11 = vsel %vm4179_vm13, %v17499_v4, %v17501_v25  ;;  %v17511_v5 = vsel %vm4179_vm13, %v17497_v63, %v17499_v4  ;;  %vm28422_vm13 = vmmov %vm28419_vm8  ;;  %v20176_v4 = vld [vmem:[%s28191_s8 + $0x70] sm:$0xff] }
 0x8e8   : > { %17539 = vmatprep.subr.mxu0 %v17511_v5  ;;  %17623 = vmatpush1.msra.mxu1 %v17512_v11  ;;  %v17933_v58 = vsel %vm28419_vm8, %v22767_v56, %v22771_v39  ;;  %v17935_v6 = vsel %vm28421_vm10, %v22772_v0, %v22766_v51  ;;  %v17934_v10 = vsel %vm28426_vm12, %v22771_v39, %v22772_v0  ;;  %vm28434_vm8 = vmmov %vm28429_vm3 }
 0x8e9   : > { %17540 = vmatpush1.msra.mxu0 %v17510_v61  ;;  %17599 = vmatprep.mubr.f32.mxu0 %v28269_v1  ;;  %v22780_v30 = vpop.permute.xlu1 %22779  ;;  %vm28436_vm10 = vmmov %vm28429_vm3 }
 0x8ea   : > { %17682 = vmatprep.mubr.f32.mxu1 %v28269_v1  ;;  %20531 = vmatprep.subr.bf16.mxu1 %v20530_v18  ;;  %v22781_v57 = vunpack.i.l.bf16 %v22780_v30  ;;  %v22775_v7 = vpop.permute.xlu0 %22774  ;;  %v22782_v52 = vunpack.i.h.bf16 %v22780_v30  ;;  %vm28441_vm12 = vmmov %vm28429_vm3 }
 0x8eb   : > { %v22777_v62 = vunpack.i.h.bf16 %v22775_v7  ;;  %v22776_v28 = vunpack.i.l.bf16 %v22775_v7  ;;  %20168 = vmatmul.mubr.msk.f32.vlgmr.msra.gmra.mrb[32].mxu0 %vm16836_vm0, %v20165_v49  ;;  %20171 = vmatmul.mubr.msk.f32.vlgmr.msra.gmra.mrb[32].mxu1 %vm16836_vm0, %v20165_v49 }
 0x8ec   : > { %20527 = vmatprep.subr.bf16.mxu0 %v20526_v43  ;;  %20533 = vmatpush1.bf16.msra.mxu1 %v20532_v17  ;;  %v20167_v17 = vld [vmem:[%s28191_s8 + $0x58] sm:$0xff]  ;;  %v17938_v50 = vsel %vm28424_vm14, %v22781_v57, %v22782_v52  ;;  %vm28439_vm14 = vmmov %vm28429_vm3 }
 0x8ed   : > { %20529 = vmatpush1.bf16.msra.mxu0 %v20528_v15  ;;  %17813 = vmatprep.subr.mxu1 %v27595_v59  ;;  %v27907_v18 = vpop.permute.xlu1 %22789  ;;  %v17937_v37 = vsel %vm28420_vm9, %v22777_v62, %v22781_v57  ;;  %v17939_v38 = vsel %vm28422_vm13, %v22782_v52, %v22776_v28  ;;  %v20540_v63 = vpack.c.bf16 %v17938_v50, %v17934_v10  ;;  %vm28435_vm9 = vmmov %vm28429_vm3  ;;  %v20185_v50 = vld [vmem:[%s28191_s8 + $0x88] sm:$0xff] }
 0x8ee   : > { %17730 = vmatprep.subr.mxu0 %v27605_v8  ;;  %17605 = vmatprep.mubr.f32.mxu0 %v28269_v1  ;;  %v27913_v41 = vpop.permute.xlu0 %17924  ;;  %v20534_v16 = vpack.c.bf16 %v17937_v37, %v17933_v58  ;;  %v20538_v43 = vpack.c.bf16 %v17939_v38, %v17935_v6  ;;  %v17936_v8 = vsel %vm28423_vm11, %v22776_v28, %v22777_v62  ;;  %v22791_v22 = vunpack.i.l.bf16 %v27907_v18  ;;  %v20183_v28 = vld [vmem:[%s28191_s8 + $0x78] sm:$0xff]  ;;  %vm28437_vm13 = vmmov %vm28429_vm3  ;;  %v20184_v6 = vld [vmem:[%s28191_s8 + $0x80] sm:$0xff] }
 0x8ef   : > { %17688 = vmatprep.mubr.f32.mxu1 %v28269_v1  ;;  %20169 = vmatmul.mubr.msk.f32.gmra.mrb[34].mxu0 %vm16836_vm0, %v20166_v9  ;;  %v22792_v11 = vunpack.i.h.bf16 %v27907_v18  ;;  %vm28438_vm11 = vmmov %vm28429_vm3 }
 0x8f0   : > { %20172 = vmatmul.mubr.msk.f32.gmra.mrb[34].mxu1 %vm16836_vm0, %v20166_v9  ;;  %17611 = vmatprep.mubr.f32.mxu0 %v28269_v1 }
 0x8f1   : > { %17814 = vmatpush1.msra.mxu1 %v27602_v2  ;;  %17731 = vmatpush1.msra.mxu0 %v27592_v34  ;;  %v22800_v15 = vpop.permute.xlu1 %22799  ;;  %v20174_v34 = vld [vmem:[%s28191_s8 + $0x60] sm:$0xff]  ;;  %v17932_v2 = vsel %vm28425_vm15, %v22766_v51, %v22767_v56  ;;  %v18173_v58 = vsel %vm28438_vm11, %v22791_v22, %v22792_v11  ;;  %vm28440_vm15 = vmmov %vm28429_vm3 }
 0x8f2   : > { %20535 = vmatprep.subr.bf16.mxu0 %v20534_v16  ;;  %20539 = vmatprep.subr.bf16.mxu1 %v20538_v43  ;;  %v17929_v59 = vpop.permute.xlu0 %17928  ;;  %v20536_v21 = vpack.c.bf16 %v17936_v8, %v17932_v2  ;;  %v22802_v29 = vunpack.i.h.bf16 %v22800_v15  ;;  %v22801_v12 = vunpack.i.l.bf16 %v22800_v15 }
 0x8f3   : > { %17694 = vmatprep.mubr.f32.mxu1 %v28269_v1  ;;  %20170 = vmatmul.mubr.msk.f32.gmra.mrb[36].mxu0 %vm16836_vm0, %v20167_v17 }
 0x8f4   : > { %20173 = vmatmul.mubr.msk.f32.gmra.mrb[36].mxu1 %vm16836_vm0, %v20167_v17  ;;  %17790 = vmatprep.mubr.f32.mxu0 %v28269_v1  ;;  %v18177_v62 = vsel %vm28436_vm10, %v22801_v12, %v22802_v29 }
 0x8f5   : > { %17873 = vmatprep.mubr.f32.mxu1 %v28269_v1  ;;  %v27937_v23 = vpop.permute.xlu1 %22809  ;;  %v20548_v16 = vpack.c.bf16 %v18177_v62, %v18173_v58 }
 0x8f6   : > { %v22785_v13 = vpop.permute.xlu0 %22784 }
 0x8f7   : > { %20177 = vmatmul.mubr.msk.f32.vlgmr.msra.gmra.mrb[32].mxu0 %vm16836_vm0, %v20174_v34  ;;  %v22787_v53 = vunpack.i.h.bf16 %v22785_v13  ;;  %v22786_v46 = vunpack.i.l.bf16 %v22785_v13 }
 0x8f8   : > { %20180 = vmatmul.mubr.msk.f32.vlgmr.msra.gmra.mrb[32].mxu1 %vm16836_vm0, %v20174_v34  ;;  %20537 = vmatpush1.bf16.msra.mxu0 %v20536_v21  ;;  %v22811_v34 = vunpack.i.l.bf16 %v27937_v23 }
 0x8f9   : > { %20541 = vmatpush1.bf16.msra.mxu1 %v20540_v63  ;;  %17796 = vmatprep.mubr.f32.mxu0 %v28269_v1  ;;  %v17927_v27 = vpop.permute.xlu1 %17926  ;;  %v18172_v61 = vsel %vm28429_vm3, %v22787_v53, %v22791_v22  ;;  %v18174_v52 = vsel %vm28435_vm9, %v22792_v11, %v22786_v46  ;;  %v18171_v51 = vsel %vm28437_vm13, %v22786_v46, %v22787_v53  ;;  %v22812_v22 = vunpack.i.h.bf16 %v27937_v23 }
 0x8fa   : > { %17879 = vmatprep.mubr.f32.mxu1 %v28269_v1  ;;  %v17940_v19 = vsel %vm28427_vm1, %v27913_v41, %v17927_v27  ;;  %v22795_v60 = vpop.permute.xlu0 %22794  ;;  %v17941_v25 = vsel %vm28428_vm2, %v17927_v27, %v17929_v59  ;;  %vm28442_vm1 = vmmov %vm28429_vm3  ;;  %vm28443_vm2 = vcmask 883712  }
 0x8fb   : > { %v22797_v20 = vunpack.i.h.bf16 %v22795_v60  ;;  %v22796_v48 = vunpack.i.l.bf16 %v22795_v60  ;;  %20178 = vmatmul.mubr.msk.f32.gmra.mrb[34].mxu0 %vm16836_vm0, %v20175_v36  ;;  %17969 = vmatprep.subr.mxu0 %v17941_v25  ;;  %vm28444_vm3 = vmmov %vm28443_vm2 }
 0x8fc   : > { %20181 = vmatmul.mubr.msk.f32.gmra.mrb[34].mxu1 %vm16836_vm0, %v20175_v36  ;;  %17802 = vmatprep.mubr.f32.mxu0 %v28269_v1  ;;  %vm28450_vm9 = vmmov %vm28443_vm2 }
 0x8fd   : > { %17885 = vmatprep.mubr.f32.mxu1 %v28269_v1  ;;  %17970 = vmatpush1.msra.mxu0 %v17940_v19  ;;  %v17931_v5 = vpop.permute.xlu1 %17930  ;;  %v18176_v49 = vsel %vm28430_vm4, %v22797_v20, %v22801_v12  ;;  %v18178_v39 = vsel %vm28431_vm5, %v22802_v29, %v22796_v48  ;;  %v18175_v0 = vsel %vm28434_vm8, %v22796_v48, %v22797_v20  ;;  %v20192_v19 = vld [vmem:[%s28191_s8 + $0x90] sm:$0xff]  ;;  %vm28445_vm4 = vmmov %vm28443_vm2 }
 0x8fe   : > { %v17942_v30 = vsel %vm28432_vm6, %v17929_v59, %v17931_v5  ;;  %v18164_v56 = vpop.permute.xlu0 %18163  ;;  %v17943_v57 = vsel %vm28433_vm7, %v17931_v5, %v27913_v41  ;;  %v20542_v7 = vpack.c.bf16 %v18176_v49, %v18172_v61  ;;  %v20546_v9 = vpack.c.bf16 %v18178_v39, %v18174_v52  ;;  %vm28446_vm5 = vmmov %vm28443_vm2  ;;  %v20193_v39 = vld [vmem:[%s28191_s8 + $0x98] sm:$0xff]  ;;  %v20194_v52 = vld [vmem:[%s28191_s8 + $0xa0] sm:$0xff] }
 0x8ff   : > { %20179 = vmatmul.mubr.msk.f32.gmra.mrb[36].mxu0 %vm16836_vm0, %v20176_v4  ;;  %18052 = vmatprep.subr.mxu1 %v17943_v57  ;;  %v20544_v37 = vpack.c.bf16 %v18175_v0, %v18171_v51  ;;  %vm28447_vm6 = vmmov %vm28443_vm2  ;;  %v18412_v49 = vsel %vm28450_vm9, %v22811_v34, %v22812_v22 }
 0x900   : > { %20182 = vmatmul.mubr.msk.f32.gmra.mrb[36].mxu1 %vm16836_vm0, %v20176_v4  ;;  %20543 = vmatprep.subr.bf16.mxu0 %v20542_v7  ;;  %vm28448_vm7 = vmmov %vm28443_vm2 }
 0x901   : > { %18029 = vmatprep.mubr.f32.mxu0 %v28269_v1  ;;  %18053 = vmatpush1.msra.mxu1 %v17942_v30  ;;  %v22820_v18 = vpop.permute.xlu1 %22819  ;;  %vm28449_vm8 = vmmov %vm28443_vm2 }
 0x902   : > { %18112 = vmatprep.mubr.f32.mxu1 %v28269_v1  ;;  %v18168_v41 = vpop.permute.xlu0 %18167  ;;  %20547 = vmatprep.subr.bf16.mxu1 %v20546_v9  ;;  %v22822_v10 = vunpack.i.h.bf16 %v22820_v18  ;;  %v22821_v21 = vunpack.i.l.bf16 %v22820_v18  ;;  %vm28451_vm10 = vmmov %vm28443_vm2 }
 0x903   : > { %20186 = vmatmul.mubr.msk.f32.vlgmr.msra.gmra.mrb[32].mxu0 %vm16836_vm0, %v20183_v28  ;;  %vm28452_vm13 = vmmov %vm28443_vm2 }
 0x904   : > { %20189 = vmatmul.mubr.msk.f32.vlgmr.msra.gmra.mrb[32].mxu1 %vm16836_vm0, %v20183_v28  ;;  %20545 = vmatpush1.bf16.msra.mxu0 %v20544_v37  ;;  %v18416_v20 = vsel %vm28448_vm7, %v22821_v21, %v22822_v10  ;;  %vm28453_vm11 = vmmov %vm28443_vm2  ;;  %v20201_v37 = vld [vmem:[%s28191_s8 + $0xa8] sm:$0xff] }
 0x905   : > { %20549 = vmatpush1.bf16.msra.mxu1 %v20548_v16  ;;  %18035 = vmatprep.mubr.f32.mxu0 %v28269_v1  ;;  %v18166_v38 = vpop.permute.xlu1 %18165  ;;  %v20556_v30 = vpack.c.bf16 %v18416_v20, %v18412_v49 }
 0x906   : > { %18118 = vmatprep.mubr.f32.mxu1 %v28269_v1  ;;  %v18179_v43 = vsel %vm28439_vm14, %v18164_v56, %v18166_v38  ;;  %v22805_v17 = vpop.permute.xlu0 %22804  ;;  %v18180_v15 = vsel %vm28440_vm15, %v18166_v38, %v18168_v41  ;;  %vm28454_vm14 = vmmov %vm28443_vm2  ;;  %vm28455_vm15 = vcmask 875520  }
 0x907   : > { %20187 = vmatmul.mubr.msk.f32.gmra.mrb[34].mxu0 %vm16836_vm0, %v20184_v6  ;;  %18208 = vmatprep.subr.mxu0 %v18180_v15  ;;  %v22807_v59 = vunpack.i.h.bf16 %v22805_v17  ;;  %v22806_v8 = vunpack.i.l.bf16 %v22805_v17 }
 0x908   : > { %20190 = vmatmul.mubr.msk.f32.gmra.mrb[34].mxu1 %vm16836_vm0, %v20184_v6  ;;  %18041 = vmatprep.mubr.f32.mxu0 %v28269_v1 }
 0x909   : > { %18124 = vmatprep.mubr.f32.mxu1 %v28269_v1  ;;  %18209 = vmatpush1.msra.mxu0 %v18179_v43  ;;  %v18170_v2 = vpop.permute.xlu1 %18169  ;;  %v18410_v29 = vsel %vm28443_vm2, %v22806_v8, %v22807_v59  ;;  %v18411_v60 = vsel %vm28444_vm3, %v22807_v59, %v22811_v34  ;;  %v18413_v5 = vsel %vm28449_vm8, %v22812_v22, %v22806_v8  ;;  %v20202_v34 = vld [vmem:[%s28191_s8 + $0xb0] sm:$0xff] }
 0x90a   : > { %v18181_v13 = vsel %vm28441_vm12, %v18168_v41, %v18170_v2  ;;  %v22815_v63 = vpop.permute.xlu0 %22814  ;;  %v18182_v36 = vsel %vm28442_vm1, %v18170_v2, %v18164_v56  ;;  %vm28456_vm12 = vmmov %vm28455_vm15 }
 0x90b   : > { %v22817_v53 = vunpack.i.h.bf16 %v22815_v63  ;;  %v22816_v27 = vunpack.i.l.bf16 %v22815_v63  ;;  %20188 = vmatmul.mubr.msk.f32.gmra.mrb[36].mxu0 %vm16836_vm0, %v20185_v50  ;;  %18291 = vmatprep.subr.mxu1 %v18182_v36  ;;  %vm28457_vm1 = vmmov %vm28456_vm12 }
 0x90c   : > { %20191 = vmatmul.mubr.msk.f32.gmra.mrb[36].mxu1 %vm16836_vm0, %v20185_v50  ;;  %18268 = vmatprep.mubr.f32.mxu0 %v28269_v1  ;;  %vm28458_vm2 = vmmov %vm28457_vm1 }
 0x90d   : > { %v18414_v25 = vsel %vm28445_vm4, %v22816_v27, %v22817_v53  ;;  %18292 = vmatpush1.msra.mxu1 %v18181_v13  ;;  %18351 = vmatprep.mubr.f32.mxu1 %v28269_v1  ;;  %v28007_v12 = vpop.permute.xlu1 %22829  ;;  %v18415_v23 = vsel %vm28446_vm5, %v22817_v53, %v22821_v21  ;;  %v18417_v46 = vsel %vm28447_vm6, %v22822_v10, %v22816_v27  ;;  %vm28459_vm3 = vmmov %vm28457_vm1 }
 0x90e   : > { %v20552_v48 = vpack.c.bf16 %v18414_v25, %v18410_v29  ;;  %v18403_v4 = vpop.permute.xlu0 %18402  ;;  %v20550_v11 = vpack.c.bf16 %v18415_v23, %v18411_v60  ;;  %v20554_v61 = vpack.c.bf16 %v18417_v46, %v18413_v5  ;;  %v22832_v16 = vunpack.i.h.bf16 %v28007_v12  ;;  %vm28460_vm4 = vmmov %vm28457_vm1  ;;  %v20203_v25 = vld [vmem:[%s28191_s8 + $0xb8] sm:$0xff]  ;;  %v20211_v5 = vld [vmem:[%s28191_s8 + $0xc8] sm:$0xff] }
 0x90f   : > { %20195 = vmatmul.mubr.msk.f32.vlgmr.msra.gmra.mrb[32].mxu0 %vm16836_vm0, %v20192_v19  ;;  %v22831_v6 = vunpack.i.l.bf16 %v28007_v12  ;;  %vm28461_vm5 = vmmov %vm28457_vm1 }
 0x910   : > { %20198 = vmatmul.mubr.msk.f32.vlgmr.msra.gmra.mrb[32].mxu1 %vm16836_vm0, %v20192_v19  ;;  %20551 = vmatprep.subr.bf16.mxu0 %v20550_v11  ;;  %vm28462_vm6 = vmmov %vm28457_vm1 }
 0x911   : > { %20555 = vmatprep.subr.bf16.mxu1 %v20554_v61  ;;  %18274 = vmatprep.mubr.f32.mxu0 %v28269_v1  ;;  %v18405_v56 = vpop.permute.xlu1 %18404  ;;  %v18651_v53 = vsel %vm28462_vm6, %v22831_v6, %v22832_v16  ;;  %vm28463_vm7 = vmmov %vm28457_vm1  ;;  %v20212_v61 = vld [vmem:[%s28191_s8 + $0xd0] sm:$0xff] }
 0x912   : > { %18357 = vmatprep.mubr.f32.mxu1 %v28269_v1  ;;  %20553 = vmatpush1.bf16.msra.mxu0 %v20552_v48  ;;  %v18407_v57 = vpop.permute.xlu0 %18406  ;;  %v18418_v7 = vsel %vm28451_vm10, %v18403_v4, %v18405_v56  ;;  %vm28464_vm8 = vmmov %vm28457_vm1 }
 0x913   : > { %20557 = vmatpush1.bf16.msra.mxu1 %v20556_v30  ;;  %20196 = vmatmul.mubr.msk.f32.gmra.mrb[34].mxu0 %vm16836_vm0, %v20193_v39  ;;  %v18419_v0 = vsel %vm28452_vm13, %v18405_v56, %v18407_v57  ;;  %vm28465_vm9 = vmmov %vm28457_vm1  ;;  %v28467_v56 = vld [vmem:[#allocation6_spill] sm:$0xff] }
 0x914   : > { %20199 = vmatmul.mubr.msk.f32.gmra.mrb[34].mxu1 %vm16836_vm0, %v20193_v39  ;;  %18447 = vmatprep.subr.mxu0 %v18419_v0  ;;  %vm28466_vm10 = vmmov %vm28457_vm1  ;;  %v28468_v0 = vld [vmem:[#allocation2_spill] sm:$0xff] }
 0x915   : > { %18280 = vmatprep.mubr.f32.mxu0 %v28269_v1  ;;  %18363 = vmatprep.mubr.f32.mxu1 %v28269_v1  ;;  %v18409_v62 = vpop.permute.xlu1 %18408 }
 0x916   : > { %18448 = vmatpush1.msra.mxu0 %v18418_v7  ;;  %v18420_v28 = vsel %vm28453_vm11, %v18407_v57, %v18409_v62  ;;  %v22825_v9 = vpop.permute.xlu0 %22824  ;;  %v18421_v51 = vsel %vm28454_vm14, %v18409_v62, %v18403_v4  ;;  %v20210_v4 = vld [vmem:[%s28191_s8 + $0xc0] sm:$0xff]  ;;  %v28469_v62 = vld [vmem:[#allocation4_spill] sm:$0xff] }
 0x917   : > { %20197 = vmatmul.mubr.msk.f32.gmra.mrb[36].mxu0 %vm16836_vm0, %v20194_v52  ;;  %18530 = vmatprep.subr.mxu1 %v18421_v51  ;;  %v22827_v18 = vunpack.i.h.bf16 %v22825_v9  ;;  %v22826_v58 = vunpack.i.l.bf16 %v22825_v9  ;;  %v28470_v9 = vld [vmem:[#allocation3_spill] sm:$0xff] }
 0x918   : > { %20200 = vmatmul.mubr.msk.f32.gmra.mrb[36].mxu1 %vm16836_vm0, %v20194_v52  ;;  %18507 = vmatprep.mubr.f32.mxu0 %v28269_v1 }
 0x919   : > { %18531 = vmatpush1.msra.mxu1 %v18420_v28  ;;  %18590 = vmatprep.mubr.f32.mxu1 %v28269_v1  ;;  %v22840_v41 = vpop.permute.xlu1 %22839  ;;  %v18649_v8 = vsel %vm28455_vm15, %v22826_v58, %v22827_v18  ;;  %v18650_v2 = vsel %vm28457_vm1, %v22827_v18, %v22831_v6  ;;  %v18652_v63 = vsel %vm28460_vm4, %v22832_v16, %v22826_v58  ;;  %v28471_v18 = vld [vmem:[#allocation5_spill] sm:$0xff]  ;;  %v28474_v16 = vld [vmem:[#allocation12_spill] sm:$0xff] }
 0x91a   : > { %v22842_v38 = vunpack.i.h.bf16 %v22840_v41  ;;  %v22841_v43 = vunpack.i.l.bf16 %v22840_v41  ;;  %v22835_v17 = vpop.permute.xlu0 %22834 }
 0x91b   : > { %v22837_v15 = vunpack.i.h.bf16 %v22835_v17  ;;  %v22836_v59 = vunpack.i.l.bf16 %v22835_v17  ;;  %20204 = vmatmul.mubr.msk.f32.vlgmr.msra.gmra.mrb[32].mxu0 %vm16836_vm0, %v20201_v37 }
 0x91c   : > { %v18655_v50 = vsel %vm28456_vm12, %v22841_v43, %v22842_v38  ;;  %20207 = vmatmul.mubr.msk.f32.vlgmr.msra.gmra.mrb[32].mxu1 %vm16836_vm0, %v20201_v37  ;;  %18513 = vmatprep.mubr.f32.mxu0 %v28269_v1  ;;  %v28473_v37 = vld [vmem:[#allocation13_spill] sm:$0xff] }
 0x91d   : > { %v18653_v10 = vsel %vm28458_vm2, %v22836_v59, %v22837_v15  ;;  %18596 = vmatprep.mubr.f32.mxu1 %v28269_v1  ;;  %v18644_v21 = vpop.permute.xlu1 %18643  ;;  %v18654_v13 = vsel %vm28459_vm3, %v22837_v15, %v22841_v43  ;;  %v18656_v36 = vsel %vm28461_vm5, %v22842_v38, %v22836_v59  ;;  %v20564_v60 = vpack.c.bf16 %v18655_v50, %v18651_v53  ;;  %v28475_v38 = vld [vmem:[#allocation14_spill] sm:$0xff]  ;;  %v28476_v15 = vld [vmem:[#allocation7_spill] sm:$0xff]  ;;  %v28481_v53 = vld [vmem:[#allocation21_spill] sm:$0xff] }
 0x91e   : > { %v20560_v27 = vpack.c.bf16 %v18653_v10, %v18649_v8  ;;  %v18642_v22 = vpop.permute.xlu0 %18641  ;;  %v20558_v29 = vpack.c.bf16 %v18654_v13, %v18650_v2  ;;  %v20562_v19 = vpack.c.bf16 %v18656_v36, %v18652_v63  ;;  %v28477_v8 = vld [vmem:[#allocation9_spill] sm:$0xff]  ;;  %v28479_v10 = vld [vmem:[#allocation10_spill] sm:$0xff]  ;;  %v28480_v63 = vld [vmem:[#allocation19_spill] sm:$0xff] }
 0x91f   : > { %20205 = vmatmul.mubr.msk.f32.gmra.mrb[34].mxu0 %vm16836_vm0, %v20202_v34  ;;  %v18657_v11 = vsel %vm28466_vm10, %v18642_v22, %v18644_v21 }
 0x920   : > { %20208 = vmatmul.mubr.msk.f32.gmra.mrb[34].mxu1 %vm16836_vm0, %v20202_v34  ;;  %20559 = vmatprep.subr.bf16.mxu0 %v20558_v29  ;;  %v28478_v34 = vld [vmem:[#allocation8_spill] sm:$0xff] }
 0x921   : > { %20563 = vmatprep.subr.bf16.mxu1 %v20562_v19  ;;  %18519 = vmatprep.mubr.f32.mxu0 %v28269_v1  ;;  %v18648_v12 = vpop.permute.xlu1 %18647  ;;  %v28483_v19 = vld [vmem:[#allocation22_spill] sm:$0xff] }
 0x922   : > { %18602 = vmatprep.mubr.f32.mxu1 %v28269_v1  ;;  %20561 = vmatpush1.bf16.msra.mxu0 %v20560_v27  ;;  %v18646_v23 = vpop.permute.xlu0 %18645  ;;  %v18660_v46 = vsel %vm28463_vm7, %v18648_v12, %v18642_v22  ;;  %v28482_v22 = vld [vmem:[#allocation20_spill] sm:$0xff] }
 0x923   : > { %20565 = vmatpush1.bf16.msra.mxu1 %v20564_v60  ;;  %20206 = vmatmul.mubr.msk.f32.gmra.mrb[36].mxu0 %vm16836_vm0, %v20203_v25  ;;  %v18658_v20 = vsel %vm28464_vm8, %v18644_v21, %v18646_v23  ;;  %v18659_v48 = vsel %vm28465_vm9, %v18646_v23, %v18648_v12  ;;  %v28484_v12 = vld [vmem:[#allocation15_spill] sm:$0xff] }
 0x924   : > { %20209 = vmatmul.mubr.msk.f32.gmra.mrb[36].mxu1 %vm16836_vm0, %v20203_v25  ;;  %18686 = vmatprep.subr.mxu0 %v18658_v20 }
 0x925   : > { %18769 = vmatprep.subr.mxu1 %v18660_v46  ;;  %18746 = vmatprep.mubr.f32.mxu0 %v28269_v1  ;;  %v28485_v46 = vld [vmem:[#allocation17_spill] sm:$0xff] }
 0x926   : > { %18687 = vmatpush1.msra.mxu0 %v18657_v11  ;;  %18829 = vmatprep.mubr.f32.mxu1 %v28269_v1  ;;  %v28487_v11 = vld [vmem:[#allocation18_spill] sm:$0xff] }
 0x927   : > { %18770 = vmatpush1.msra.mxu1 %v18659_v48  ;;  %20213 = vmatmul.mubr.msk.f32.vlgmr.msra.gmra.mrb[32].mxu0 %vm16836_vm0, %v20210_v4  ;;  %v28486_v48 = vld [vmem:[#allocation16_spill] sm:$0xff] }
 0x928   : > { %20216 = vmatmul.mubr.msk.f32.vlgmr.msra.gmra.mrb[32].mxu1 %vm16836_vm0, %v20210_v4  ;;  %18752 = vmatprep.mubr.f32.mxu0 %v28269_v1 }
 0x929   : > { %18835 = vmatprep.mubr.f32.mxu1 %v28269_v1 }
 0x92b   : > { %20214 = vmatmul.mubr.msk.f32.gmra.mrb[34].mxu0 %vm16836_vm0, %v20211_v5 }
 0x92c   : > { %20217 = vmatmul.mubr.msk.f32.gmra.mrb[34].mxu1 %vm16836_vm0, %v20211_v5  ;;  %18758 = vmatprep.mubr.f32.mxu0 %v28269_v1 }
 0x92d   : > { %18841 = vmatprep.mubr.f32.mxu1 %v28269_v1 }
 0x92f   : > { %20215 = vmatmul.mubr.msk.f32.gmra.mrb[36].mxu0 %vm16836_vm0, %v20212_v61 }
 0x930   : > { %20218 = vmatmul.mubr.msk.f32.gmra.mrb[36].mxu1 %vm16836_vm0, %v20212_v61 }
 0x932   : > { %v9093_v49 = vpop.permute.xlu1 %9092 }
 0x933   : > { %v9139_v1 = vadd.f32 %v9093_v49, %v25466_v31  ;;  %v9140_v39 = vadd.f32 %v9093_v49, %v25470_v33  ;;  %v9141_v30 = vadd.f32 %v9093_v49, %v25468_v32  ;;  %v9142_v57 = vadd.f32 %v9093_v49, %v28467_v56  ;;  %v9088_v7 = vpop.permute.xlu0 %9087  ;;  %v28472_v32 = vld [vmem:[#allocation11_spill] sm:$0xff] }
 0x934   : > { %v9135_v52 = vadd.f32 %v9088_v7, %v28468_v0  ;;  %v9136_v28 = vadd.f32 %v9088_v7, %v28469_v62  ;;  %v9137_v51 = vadd.f32 %v9088_v7, %v28470_v9  ;;  %v9138_v58 = vadd.f32 %v9088_v7, %v28471_v18 }
 0x935   : > { %18894 = vst [vmem:[%s28094_s16 + $0x20] sm:$0xff] %v9139_v1  ;;  %18895 = vst [vmem:[%s28094_s16 + $0x28] sm:$0xff] %v9140_v39 }
 0x936   : > { %18896 = vst [vmem:[%s28094_s16 + $0x30] sm:$0xff] %v9141_v30  ;;  %18897 = vst [vmem:[%s28094_s16 + $0x38] sm:$0xff] %v9142_v57  ;;  %v9103_v31 = vpop.permute.xlu1 %9102 }
 0x937   : > { %18890 = vst [vmem:[%s28094_s16] sm:$0xff] %v9135_v52  ;;  %18891 = vst [vmem:[%s28094_s16 + $0x8] sm:$0xff] %v9136_v28  ;;  %v9147_v33 = vadd.f32 %v9103_v31, %v28472_v32  ;;  %v9148_v41 = vadd.f32 %v9103_v31, %v28473_v37  ;;  %v9149_v6 = vadd.f32 %v9103_v31, %v28474_v16  ;;  %v9098_v17 = vpop.permute.xlu0 %9097 }
 0x938   : > { %18892 = vst [vmem:[%s28094_s16 + $0x10] sm:$0xff] %v9137_v51  ;;  %18893 = vst [vmem:[%s28094_s16 + $0x18] sm:$0xff] %v9138_v58  ;;  %v9150_v43 = vadd.f32 %v9103_v31, %v28475_v38  ;;  %v9143_v59 = vadd.f32 %v9098_v17, %v28476_v15  ;;  %v9144_v50 = vadd.f32 %v9098_v17, %v28477_v8 }
 0x939   : > { %v9145_v2 = vadd.f32 %v9098_v17, %v28478_v34  ;;  %v9146_v21 = vadd.f32 %v9098_v17, %v28479_v10  ;;  %18902 = vst [vmem:[%s28094_s16 + $0x60] sm:$0xff] %v9147_v33  ;;  %18903 = vst [vmem:[%s28094_s16 + $0x68] sm:$0xff] %v9148_v41 }
 0x93a   : > { %18904 = vst [vmem:[%s28094_s16 + $0x70] sm:$0xff] %v9149_v6  ;;  %18905 = vst [vmem:[%s28094_s16 + $0x78] sm:$0xff] %v9150_v43  ;;  %v9113_v13 = vpop.permute.xlu1 %9112 }
 0x93b   : > { %18898 = vst [vmem:[%s28094_s16 + $0x40] sm:$0xff] %v9143_v59  ;;  %18899 = vst [vmem:[%s28094_s16 + $0x48] sm:$0xff] %v9144_v50  ;;  %v9155_v36 = vadd.f32 %v9113_v13, %v28480_v63  ;;  %v9156_v27 = vadd.f32 %v9113_v13, %v28481_v53  ;;  %v9157_v29 = vadd.f32 %v9113_v13, %v28482_v22  ;;  %v9108_v25 = vpop.permute.xlu0 %9107 }
 0x93c   : > { %18900 = vst [vmem:[%s28094_s16 + $0x50] sm:$0xff] %v9145_v2  ;;  %18901 = vst [vmem:[%s28094_s16 + $0x58] sm:$0xff] %v9146_v21  ;;  %v9158_v60 = vadd.f32 %v9113_v13, %v28483_v19  ;;  %v9151_v23 = vadd.f32 %v9108_v25, %v28484_v12  ;;  %v9152_v20 = vadd.f32 %v9108_v25, %v28485_v46 }
 0x93d   : > { %v9153_v4 = vadd.f32 %v9108_v25, %v28486_v48  ;;  %v9154_v5 = vadd.f32 %v9108_v25, %v28487_v11  ;;  %18910 = vst [vmem:[%s28094_s16 + $0xa0] sm:$0xff] %v9155_v36  ;;  %18911 = vst [vmem:[%s28094_s16 + $0xa8] sm:$0xff] %v9156_v27 }
 0x93e   : > { %18912 = vst [vmem:[%s28094_s16 + $0xb0] sm:$0xff] %v9157_v29  ;;  %18913 = vst [vmem:[%s28094_s16 + $0xb8] sm:$0xff] %v9158_v60  ;;  %v14742_v61 = vpop.permute.xlu1 %14741 }
 0x93f   : > { %18906 = vst [vmem:[%s28094_s16 + $0x80] sm:$0xff] %v9151_v23  ;;  %18907 = vst [vmem:[%s28094_s16 + $0x88] sm:$0xff] %v9152_v20  ;;  %v14753_v49 = vadd.f32 %v14742_v61, %v27507_v3  ;;  %v14754_v1 = vadd.f32 %v14742_v61, %v27511_v26  ;;  %v14755_v39 = vadd.f32 %v14742_v61, %v27509_v47  ;;  %v14737_v56 = vpop.permute.xlu0 %14736 }
 0x940   : > { %18908 = vst [vmem:[%s28094_s16 + $0x90] sm:$0xff] %v9153_v4  ;;  %18909 = vst [vmem:[%s28094_s16 + $0x98] sm:$0xff] %v9154_v5  ;;  %v14756_v30 = vadd.f32 %v14742_v61, %v27513_v54  ;;  %v14749_v57 = vadd.f32 %v14737_v56, %v27499_v24  ;;  %v14750_v7 = vadd.f32 %v14737_v56, %v27503_v45 }
 0x941   : > { %v14751_v0 = vadd.f32 %v14737_v56, %v27501_v40  ;;  %v14752_v52 = vadd.f32 %v14737_v56, %v27505_v55  ;;  %18918 = vst [vmem:[%s28094_s16 + $0xe0] sm:$0xff] %v14753_v49  ;;  %18919 = vst [vmem:[%s28094_s16 + $0xe8] sm:$0xff] %v14754_v1 }
 0x942   : > { %18920 = vst [vmem:[%s28094_s16 + $0xf0] sm:$0xff] %v14755_v39  ;;  %18921 = vst [vmem:[%s28094_s16 + $0xf8] sm:$0xff] %v14756_v30  ;;  %v18866_v47 = vpop.permute.xlu1 %18865 }
 0x943   : > { %18914 = vst [vmem:[%s28094_s16 + $0xc0] sm:$0xff] %v14749_v57  ;;  %18915 = vst [vmem:[%s28094_s16 + $0xc8] sm:$0xff] %v14750_v7  ;;  %v14747_v3 = vpop.permute.xlu0 %14746 }
 0x944   : > { %18916 = vst [vmem:[%s28094_s16 + $0xd0] sm:$0xff] %v14751_v0  ;;  %18917 = vst [vmem:[%s28094_s16 + $0xd8] sm:$0xff] %v14752_v52  ;;  %v14757_v24 = vadd.f32 %v14747_v3, %v27515_v44  ;;  %v14758_v45 = vadd.f32 %v14747_v3, %v27519_v14  ;;  %v14759_v40 = vadd.f32 %v14747_v3, %v27517_v35 }
 0x945   : > { %v14760_v55 = vadd.f32 %v14747_v3, %v27521_v42 }
 0x946   : > { %18922 = vst [vmem:[%s28094_s16 + $0x100] sm:$0xff] %v14757_v24  ;;  %18923 = vst [vmem:[%s28094_s16 + $0x108] sm:$0xff] %v14758_v45 }
 0x947   : > { %18924 = vst [vmem:[%s28094_s16 + $0x110] sm:$0xff] %v14759_v40  ;;  %18925 = vst [vmem:[%s28094_s16 + $0x118] sm:$0xff] %v14760_v55 }
 0x948   : > { %v18871_v42 = vpop.permute.xlu0 %18870  ;;  %v18876_v16 = vpop.permute.xlu1 %18875 }
 0x9fa   : > { %v18748_v26 = vpop.f32.mrb[32].mxu0 }
 0x9fb   : > { %v18878_v54 = vadd.f32 %v18866_v47, %v18748_v26  ;;  %v18831_v62 = vpop.f32.mrb[32].mxu1  ;;  %v18750_v28 = vpop.f32.mrb[33].mxu0 }
 0x9fc   : > { %v18880_v44 = vadd.f32 %v18866_v47, %v18831_v62  ;;  %v18879_v9 = vadd.f32 %v18866_v47, %v18750_v28  ;;  %v18833_v14 = vpop.f32.mrb[33].mxu1 }
 0x9fd   : > { %18926 = vst [vmem:[%s28094_s16 + $0x120] sm:$0xff] %v18878_v54  ;;  %v18881_v35 = vadd.f32 %v18866_v47, %v18833_v14 }
 0x9fe   : > { %18928 = vst [vmem:[%s28094_s16 + $0x130] sm:$0xff] %v18880_v44  ;;  %18927 = vst [vmem:[%s28094_s16 + $0x128] sm:$0xff] %v18879_v9  ;;  %v18754_v51 = vpop.f32.mrb[34].mxu0 }
 0x9ff   : > { %18929 = vst [vmem:[%s28094_s16 + $0x138] sm:$0xff] %v18881_v35  ;;  %v18882_v18 = vadd.f32 %v18871_v42, %v18754_v51  ;;  %v18837_v58 = vpop.f32.mrb[34].mxu1  ;;  %v18756_v31 = vpop.f32.mrb[35].mxu0 }
 0xa00   : > { %v18884_v32 = vadd.f32 %v18871_v42, %v18837_v58  ;;  %v18883_v33 = vadd.f32 %v18871_v42, %v18756_v31  ;;  %v18839_v37 = vpop.f32.mrb[35].mxu1 }
 0xa01   : > { %18930 = vst [vmem:[%s28094_s16 + $0x140] sm:$0xff] %v18882_v18  ;;  %v18885_v41 = vadd.f32 %v18871_v42, %v18839_v37 }
 0xa02   : > { %18932 = vst [vmem:[%s28094_s16 + $0x150] sm:$0xff] %v18884_v32  ;;  %18931 = vst [vmem:[%s28094_s16 + $0x148] sm:$0xff] %v18883_v33  ;;  %v18760_v6 = vpop.f32.mrb[36].mxu0 }
 0xa03   : > { %18933 = vst [vmem:[%s28094_s16 + $0x158] sm:$0xff] %v18885_v41  ;;  %v18886_v38 = vadd.f32 %v18876_v16, %v18760_v6  ;;  %v18843_v43 = vpop.f32.mrb[36].mxu1  ;;  %v18762_v17 = vpop.f32.mrb[37].mxu0 }
 0xa04   : > { %v18888_v15 = vadd.f32 %v18876_v16, %v18843_v43  ;;  %v18887_v59 = vadd.f32 %v18876_v16, %v18762_v17  ;;  %v18845_v8 = vpop.f32.mrb[37].mxu1 }
 0xa05   : > { %18934 = vst [vmem:[%s28094_s16 + $0x160] sm:$0xff] %v18886_v38  ;;  %v18889_v50 = vadd.f32 %v18876_v16, %v18845_v8 }
 0xa06   : > { %18936 = vst [vmem:[%s28094_s16 + $0x170] sm:$0xff] %v18888_v15  ;;  %18935 = vst [vmem:[%s28094_s16 + $0x168] sm:$0xff] %v18887_v59 }
 0xa07   : > { %18937 = vst [vmem:[%s28094_s16 + $0x178] sm:$0xff] %v18889_v50 }
 0xa08 PF: > { %s20_s13 = sadd.s32 1, %s22855_s13  }
 0xa09   : > { %p17_p4 = scmp.ge.s32.totalorder %s20_s13, 4  }
 0xa0b   :  { %19 = sbr.rel (!%p17_p4) target bundleno = 1 (0x1), region = 154 }

</bundles_post_ra>
